<compile_context>
chip_gen: v6e
topology: v6e:2x2x1
jax: 0.10.0
libtpu: 0.0.40
codegen_flags: <defaults>
</compile_context>

<pallas_src>
import functools

import numpy as np
import jax
import jax.numpy as jnp
from jax.experimental import pallas as pl
from jax.experimental.pallas import tpu as pltpu


# 3x3 tap offsets (dy, dx) in the same (ky, kx) order used to flatten the PyTorch
# Conv2d weight tensor: tap index t = ky*3 + kx, with (dy, dx) = (ky-1, kx-1).
_TAPS = tuple((dy, dx) for dy in (-1, 0, 1) for dx in (-1, 0, 1))

# (cin, cout, followed_by_BN_and_ReLU) for each of the 8 Conv2d layers.
_LAYER_DEFS = (
    (1, 2, True), (2, 2, True), (2, 2, True), (2, 2, False),   # encoder
    (2, 2, True), (2, 2, True), (2, 2, True), (2, 1, False),   # decoder
)


def _make_tap_masks(H, W, TN):
    """masks[t, :, h*W + w] = 1.0 iff (h+dy, w+dx) lies inside the image for tap t.

    Pre-replicated to TN sublanes so the kernel never emits a broadcast for the mask.
    """
    hh, ww = np.meshgrid(np.arange(H), np.arange(W), indexing="ij")
    rows = []
    for dy, dx in _TAPS:
        valid = ((hh + dy >= 0) & (hh + dy < H) &
                 (ww + dx >= 0) & (ww + dx < W)).reshape(-1).astype(np.float32)
        rows.append(np.broadcast_to(valid, (TN, H * W)))
    return jnp.asarray(np.stack(rows, axis=0), dtype=jnp.float32)   # (9, TN, H*W)


def _fused_net_kernel(x_ref, w_ref, shift_ref, masks_ref, o_ref, *, layer_defs, W, TN):
    """All conv(+BN+ReLU) layers back-to-back on VMEM/vreg-resident data.

    x_ref     : (TN, H*W)           VMEM  flattened single-channel input tile
    w_ref     : (sum_l cout*cin*9,) SMEM  BN-folded conv weights, (co,ci,ky,kx) order
    shift_ref : (sum_l cout,)       SMEM  per-output-channel shift (bias / folded BN)
    masks_ref : (9, TN, H*W)        VMEM  per-tap validity masks (== zero padding)
    o_ref     : (TN, H*W)           VMEM  flattened single-channel output tile
    """
    P = x_ref.shape[-1]
    NUM_PARTS = 3   # independent partial accumulators per output channel (break add chains)

    # Hoisted: all 9 tap masks loaded once, already replicated to TN sublanes.
    masks = masks_ref[...]                                  # (9, TN, P)

    # Stacked activations: (cin*TN, P).  Layer 0 has cin=1.
    act = x_ref[...].astype(jnp.float32)

    w_off = 0
    s_off = 0
    for cin, cout, relu in layer_defs:                      # fully unrolled at trace time
        parts = [[None] * NUM_PARTS for _ in range(cout)]
        for t, (dy, dx) in enumerate(_TAPS):
            off = dy * W + dx
            if off == 0:
                # centre tap: always valid, no shift / mask needed
                taps = [act[ci * TN:(ci + 1) * TN, :] for ci in range(cin)]
            else:
                # One roll per (layer, tap), shared across all input channels.
                # pltpu.roll matches jnp.roll: rolled[i] = x[(i - s) % P]; we want
                # x[i + off] => s = (-off) % P.  Out-of-image neighbours (including
                # intra-row wraparound) are zeroed by the per-tap mask == 'same' padding.
                rolled = pltpu.roll(act, shift=(-off) % P, axis=1)
                mask_t = masks[t]                           # (TN, P), no broadcast needed
                taps = [rolled[ci * TN:(ci + 1) * TN, :] * mask_t for ci in range(cin)]
            for co in range(cout):
                contrib = None
                for ci in range(cin):
                    wv = w_ref[w_off + (co * cin + ci) * 9 + t]     # SMEM scalar
                    term = wv * taps[ci]
                    contrib = term if contrib is None else contrib + term
                p = t % NUM_PARTS
                parts[co][p] = contrib if parts[co][p] is None else parts[co][p] + contrib

        outs = []
        for co in range(cout):
            y = parts[co][0]
            for p in range(1, NUM_PARTS):
                if parts[co][p] is not None:
                    y = y + parts[co][p]
            y = y + shift_ref[s_off + co]
            if relu:
                y = jnp.maximum(y, 0.0)
            outs.append(y)
        act = outs[0] if cout == 1 else jnp.concatenate(outs, axis=0)   # (cout*TN, P)

        w_off += cout * cin * 9
        s_off += cout

    o_ref[...] = act.astype(o_ref.dtype)


def init_params(key):
    """Raw PyTorch-style parameters (conv weight/bias + eval-mode BN stats)."""
    params = []
    for cin, cout, has_bn_relu in _LAYER_DEFS:
        key, kw, kb, kg, kbe, km, kv = jax.random.split(key, 7)
        fan_in = cin * 9
        bound = 1.0 / np.sqrt(fan_in)
        w = jax.random.uniform(kw, (cout, cin, 3, 3), jnp.float32, -bound, bound)
        b = jax.random.uniform(kb, (cout,), jnp.float32, -bound, bound)
        if has_bn_relu:
            gamma = jax.random.uniform(kg, (cout,), jnp.float32, 0.5, 1.5)
            beta = jax.random.uniform(kbe, (cout,), jnp.float32, -0.5, 0.5)
            mean = jax.random.uniform(km, (cout,), jnp.float32, -0.5, 0.5)
            var = jax.random.uniform(kv, (cout,), jnp.float32, 0.5, 1.5)
            bn = (gamma, beta, mean, var)
        else:
            bn = None
        params.append((w, b, bn, has_bn_relu))
    return params, _LAYER_DEFS


def pack_params(params, eps=1e-5):
    """Fold eval-mode BN scale into the conv weights and flatten everything for SMEM."""
    w_chunks, s_chunks = [], []
    for w, b, bn, _relu in params:
        if bn is not None:
            gamma, beta, mean, var = bn
            scale = gamma / jnp.sqrt(var + eps)
            shift = scale * (b - mean) + beta
        else:
            scale = jnp.ones_like(b)
            shift = b
        w_chunks.append((w * scale[:, None, None, None]).reshape(-1))
        s_chunks.append(shift)
    return (jnp.concatenate(w_chunks).astype(jnp.float32),
            jnp.concatenate(s_chunks).astype(jnp.float32))


def reference_forward(x, params, eps=1e-5):
    """Pure-JAX reference: Conv2d(padding=1) -> (+bias) -> eval BN -> ReLU per layer."""
    y = x.astype(jnp.float32)
    for w, b, bn, relu in params:
        y = jax.lax.conv_general_dilated(
            y, w, window_strides=(1, 1), padding=((1, 1), (1, 1)),
            dimension_numbers=("NCHW", "OIHW", "NCHW"))
        y = y + b[None, :, None, None]
        if bn is not None:
            gamma, beta, mean, var = bn
            s = (gamma / jnp.sqrt(var + eps))[None, :, None, None]
            y = (y - mean[None, :, None, None]) * s + beta[None, :, None, None]
        if relu:
            y = jnp.maximum(y, 0.0)
    return y


def make_forward(layer_defs, H, W, TN=8):
    P = H * W
    kernel = functools.partial(_fused_net_kernel, layer_defs=layer_defs, W=W, TN=TN)
    masks = _make_tap_masks(H, W, TN)     # (9, TN, P)

    @jax.jit
    def forward(x, w_flat, shift_flat):
        N = x.shape[0]
        x_flat = x.reshape(N, P)          # contiguous NCHW (C=1) -> lane-dense bitcast
        n_pad = pl.cdiv(N, TN) * TN
        if n_pad != N:
            x_flat = jnp.pad(x_flat, ((0, n_pad - N), (0, 0)))
        out = pl.pallas_call(
            kernel,
            out_shape=jax.ShapeDtypeStruct((n_pad, P), jnp.float32),
            grid=(n_pad // TN,),
            in_specs=[
                pl.BlockSpec((TN, P), lambda i: (i, 0)),                  # x tile (VMEM)
                pl.BlockSpec(memory_space=pltpu.MemorySpace.SMEM),        # folded weights
                pl.BlockSpec(memory_space=pltpu.MemorySpace.SMEM),        # per-channel shifts
                pl.BlockSpec((9, TN, P), lambda i: (0, 0, 0)),            # tap masks (VMEM)
            ],
            out_specs=pl.BlockSpec((TN, P), lambda i: (i, 0)),
            compiler_params=pltpu.CompilerParams(
                dimension_semantics=("parallel",)),
        )(x_flat, w_flat, shift_flat, masks)
        return out[:N].reshape(N, 1, H, W)

    return forward


if __name__ == "__main__":
    key = jax.random.PRNGKey(0)
    key, k_x = jax.random.split(key)
    H = W = 16
    N = 16                                   # >= 8 rows per call to amortize launch overhead
    x = jax.random.normal(k_x, (N, 1, H, W), jnp.float32)

    params, layer_defs = init_params(key)
    w_flat, shift_flat = pack_params(params)
    forward = make_forward(layer_defs, H, W)

    out = jax.block_until_ready(forward(x, w_flat, shift_flat))

    assert out.shape == (N, 1, H, W), out.shape
    assert out.dtype == jnp.float32

    # Numerical check against an independent conv+BN reference (validates the roll/mask
    # zero-padding trick, the tap ordering and the BN fold).
    ref = jax.block_until_ready(reference_forward(x, params))
    np.testing.assert_allclose(np.asarray(out), np.asarray(ref), rtol=1e-3, atol=1e-3)

    print("KERNEL_OK")
</pallas_src>

<mosaic_0001>
module attributes {stable_mosaic.version = 11 : i64} {
  func.func @_fused_net_kernel(%arg0: i32, %arg1: memref<8x256xf32, #tpu.memory_space<vmem>>, %arg2: memref<252xf32, #tpu.memory_space<smem>>, %arg3: memref<15xf32, #tpu.memory_space<smem>>, %arg4: memref<9x8x256xf32, #tpu.memory_space<vmem>>, %arg5: memref<8x256xf32, #tpu.memory_space<vmem>>) attributes {dimension_semantics = [#tpu.dimension_semantics<parallel>], iteration_bounds = array<i64: 2>, scalar_prefetch = 0 : i64, scratch_operands = 0 : i64, tpu.core_type = #tpu.core_type<tc>, window_params = [{transform_indices = @transform_0, window_bounds = array<i64: 8, 256>}, {transform_indices = @transform_1, window_bounds = array<i64: 252>}, {transform_indices = @transform_2, window_bounds = array<i64: 15>}, {pipeline_mode = #tpu.pipeline_mode<synchronous>, transform_indices = @transform_3, window_bounds = array<i64: 9, 8, 256>}, {transform_indices = @transform_4, window_bounds = array<i64: 8, 256>}]} {
    %c0 = arith.constant 0 : index
    %c0_0 = arith.constant 0 : index
    %c0_1 = arith.constant 0 : index
    %0 = vector.load %arg4[%c0, %c0_0, %c0_1] : memref<9x8x256xf32, #tpu.memory_space<vmem>>, vector<9x8x256xf32>
    %c0_2 = arith.constant 0 : index
    %c0_3 = arith.constant 0 : index
    %1 = vector.load %arg1[%c0_2, %c0_3] : memref<8x256xf32, #tpu.memory_space<vmem>>, vector<8x256xf32>
    %c17_i32 = arith.constant 17 : i32
    %2 = tpu.dynamic_rotate %1 by %c17_i32 dim 1 : vector<8x256xf32>, i32 -> vector<8x256xf32>
    %3 = vector.extract_strided_slice %0 {offsets = [0, 0, 0], sizes = [1, 8, 256], strides = [1, 1, 1]} : vector<9x8x256xf32> to vector<1x8x256xf32>
    %4 = vector.shape_cast %3 : vector<1x8x256xf32> to vector<8x256xf32>
    %5 = arith.mulf %2, %4 : vector<8x256xf32>
    %c0_4 = arith.constant 0 : index
    %6 = memref.load %arg2[%c0_4] : memref<252xf32, #tpu.memory_space<smem>>
    %7 = vector.broadcast %6 : f32 to vector<8x256xf32>
    %8 = arith.mulf %7, %5 : vector<8x256xf32>
    %c9 = arith.constant 9 : index
    %9 = memref.load %arg2[%c9] : memref<252xf32, #tpu.memory_space<smem>>
    %10 = vector.broadcast %9 : f32 to vector<8x256xf32>
    %11 = arith.mulf %10, %5 : vector<8x256xf32>
    %c16_i32 = arith.constant 16 : i32
    %12 = tpu.dynamic_rotate %1 by %c16_i32 dim 1 : vector<8x256xf32>, i32 -> vector<8x256xf32>
    %13 = vector.extract_strided_slice %0 {offsets = [1, 0, 0], sizes = [1, 8, 256], strides = [1, 1, 1]} : vector<9x8x256xf32> to vector<1x8x256xf32>
    %14 = vector.shape_cast %13 : vector<1x8x256xf32> to vector<8x256xf32>
    %15 = arith.mulf %12, %14 : vector<8x256xf32>
    %c1 = arith.constant 1 : index
    %16 = memref.load %arg2[%c1] : memref<252xf32, #tpu.memory_space<smem>>
    %17 = vector.broadcast %16 : f32 to vector<8x256xf32>
    %18 = arith.mulf %17, %15 : vector<8x256xf32>
    %c10 = arith.constant 10 : index
    %19 = memref.load %arg2[%c10] : memref<252xf32, #tpu.memory_space<smem>>
    %20 = vector.broadcast %19 : f32 to vector<8x256xf32>
    %21 = arith.mulf %20, %15 : vector<8x256xf32>
    %c15_i32 = arith.constant 15 : i32
    %22 = tpu.dynamic_rotate %1 by %c15_i32 dim 1 : vector<8x256xf32>, i32 -> vector<8x256xf32>
    %23 = vector.extract_strided_slice %0 {offsets = [2, 0, 0], sizes = [1, 8, 256], strides = [1, 1, 1]} : vector<9x8x256xf32> to vector<1x8x256xf32>
    %24 = vector.shape_cast %23 : vector<1x8x256xf32> to vector<8x256xf32>
    %25 = arith.mulf %22, %24 : vector<8x256xf32>
    %c2 = arith.constant 2 : index
    %26 = memref.load %arg2[%c2] : memref<252xf32, #tpu.memory_space<smem>>
    %27 = vector.broadcast %26 : f32 to vector<8x256xf32>
    %28 = arith.mulf %27, %25 : vector<8x256xf32>
    %c11 = arith.constant 11 : index
    %29 = memref.load %arg2[%c11] : memref<252xf32, #tpu.memory_space<smem>>
    %30 = vector.broadcast %29 : f32 to vector<8x256xf32>
    %31 = arith.mulf %30, %25 : vector<8x256xf32>
    %c1_i32 = arith.constant 1 : i32
    %32 = tpu.dynamic_rotate %1 by %c1_i32 dim 1 : vector<8x256xf32>, i32 -> vector<8x256xf32>
    %33 = vector.extract_strided_slice %0 {offsets = [3, 0, 0], sizes = [1, 8, 256], strides = [1, 1, 1]} : vector<9x8x256xf32> to vector<1x8x256xf32>
    %34 = vector.shape_cast %33 : vector<1x8x256xf32> to vector<8x256xf32>
    %35 = arith.mulf %32, %34 : vector<8x256xf32>
    %c3 = arith.constant 3 : index
    %36 = memref.load %arg2[%c3] : memref<252xf32, #tpu.memory_space<smem>>
    %37 = vector.broadcast %36 : f32 to vector<8x256xf32>
    %38 = arith.mulf %37, %35 : vector<8x256xf32>
    %39 = arith.addf %8, %38 : vector<8x256xf32>
    %c12 = arith.constant 12 : index
    %40 = memref.load %arg2[%c12] : memref<252xf32, #tpu.memory_space<smem>>
    %41 = vector.broadcast %40 : f32 to vector<8x256xf32>
    %42 = arith.mulf %41, %35 : vector<8x256xf32>
    %43 = arith.addf %11, %42 : vector<8x256xf32>
    %c4 = arith.constant 4 : index
    %44 = memref.load %arg2[%c4] : memref<252xf32, #tpu.memory_space<smem>>
    %45 = vector.broadcast %44 : f32 to vector<8x256xf32>
    %46 = arith.mulf %45, %1 : vector<8x256xf32>
    %47 = arith.addf %18, %46 : vector<8x256xf32>
    %c13 = arith.constant 13 : index
    %48 = memref.load %arg2[%c13] : memref<252xf32, #tpu.memory_space<smem>>
    %49 = vector.broadcast %48 : f32 to vector<8x256xf32>
    %50 = arith.mulf %49, %1 : vector<8x256xf32>
    %51 = arith.addf %21, %50 : vector<8x256xf32>
    %c255_i32 = arith.constant 255 : i32
    %52 = tpu.dynamic_rotate %1 by %c255_i32 dim 1 : vector<8x256xf32>, i32 -> vector<8x256xf32>
    %53 = vector.extract_strided_slice %0 {offsets = [5, 0, 0], sizes = [1, 8, 256], strides = [1, 1, 1]} : vector<9x8x256xf32> to vector<1x8x256xf32>
    %54 = vector.shape_cast %53 : vector<1x8x256xf32> to vector<8x256xf32>
    %55 = arith.mulf %52, %54 : vector<8x256xf32>
    %c5 = arith.constant 5 : index
    %56 = memref.load %arg2[%c5] : memref<252xf32, #tpu.memory_space<smem>>
    %57 = vector.broadcast %56 : f32 to vector<8x256xf32>
    %58 = arith.mulf %57, %55 : vector<8x256xf32>
    %59 = arith.addf %28, %58 : vector<8x256xf32>
    %c14 = arith.constant 14 : index
    %60 = memref.load %arg2[%c14] : memref<252xf32, #tpu.memory_space<smem>>
    %61 = vector.broadcast %60 : f32 to vector<8x256xf32>
    %62 = arith.mulf %61, %55 : vector<8x256xf32>
    %63 = arith.addf %31, %62 : vector<8x256xf32>
    %c241_i32 = arith.constant 241 : i32
    %64 = tpu.dynamic_rotate %1 by %c241_i32 dim 1 : vector<8x256xf32>, i32 -> vector<8x256xf32>
    %65 = vector.extract_strided_slice %0 {offsets = [6, 0, 0], sizes = [1, 8, 256], strides = [1, 1, 1]} : vector<9x8x256xf32> to vector<1x8x256xf32>
    %66 = vector.shape_cast %65 : vector<1x8x256xf32> to vector<8x256xf32>
    %67 = arith.mulf %64, %66 : vector<8x256xf32>
    %c6 = arith.constant 6 : index
    %68 = memref.load %arg2[%c6] : memref<252xf32, #tpu.memory_space<smem>>
    %69 = vector.broadcast %68 : f32 to vector<8x256xf32>
    %70 = arith.mulf %69, %67 : vector<8x256xf32>
    %71 = arith.addf %39, %70 : vector<8x256xf32>
    %c15 = arith.constant 15 : index
    %72 = memref.load %arg2[%c15] : memref<252xf32, #tpu.memory_space<smem>>
    %73 = vector.broadcast %72 : f32 to vector<8x256xf32>
    %74 = arith.mulf %73, %67 : vector<8x256xf32>
    %75 = arith.addf %43, %74 : vector<8x256xf32>
    %c240_i32 = arith.constant 240 : i32
    %76 = tpu.dynamic_rotate %1 by %c240_i32 dim 1 : vector<8x256xf32>, i32 -> vector<8x256xf32>
    %77 = vector.extract_strided_slice %0 {offsets = [7, 0, 0], sizes = [1, 8, 256], strides = [1, 1, 1]} : vector<9x8x256xf32> to vector<1x8x256xf32>
    %78 = vector.shape_cast %77 : vector<1x8x256xf32> to vector<8x256xf32>
    %79 = arith.mulf %76, %78 : vector<8x256xf32>
    %c7 = arith.constant 7 : index
    %80 = memref.load %arg2[%c7] : memref<252xf32, #tpu.memory_space<smem>>
    %81 = vector.broadcast %80 : f32 to vector<8x256xf32>
    %82 = arith.mulf %81, %79 : vector<8x256xf32>
    %83 = arith.addf %47, %82 : vector<8x256xf32>
    %c16 = arith.constant 16 : index
    %84 = memref.load %arg2[%c16] : memref<252xf32, #tpu.memory_space<smem>>
    %85 = vector.broadcast %84 : f32 to vector<8x256xf32>
    %86 = arith.mulf %85, %79 : vector<8x256xf32>
    %87 = arith.addf %51, %86 : vector<8x256xf32>
    %c239_i32 = arith.constant 239 : i32
    %88 = tpu.dynamic_rotate %1 by %c239_i32 dim 1 : vector<8x256xf32>, i32 -> vector<8x256xf32>
    %89 = vector.extract_strided_slice %0 {offsets = [8, 0, 0], sizes = [1, 8, 256], strides = [1, 1, 1]} : vector<9x8x256xf32> to vector<1x8x256xf32>
    %90 = vector.shape_cast %89 : vector<1x8x256xf32> to vector<8x256xf32>
    %91 = arith.mulf %88, %90 : vector<8x256xf32>
    %c8 = arith.constant 8 : index
    %92 = memref.load %arg2[%c8] : memref<252xf32, #tpu.memory_space<smem>>
    %93 = vector.broadcast %92 : f32 to vector<8x256xf32>
    %94 = arith.mulf %93, %91 : vector<8x256xf32>
    %95 = arith.addf %59, %94 : vector<8x256xf32>
    %c17 = arith.constant 17 : index
    %96 = memref.load %arg2[%c17] : memref<252xf32, #tpu.memory_space<smem>>
    %97 = vector.broadcast %96 : f32 to vector<8x256xf32>
    %98 = arith.mulf %97, %91 : vector<8x256xf32>
    %99 = arith.addf %63, %98 : vector<8x256xf32>
    %100 = arith.addf %71, %83 : vector<8x256xf32>
    %101 = arith.addf %100, %95 : vector<8x256xf32>
    %c0_5 = arith.constant 0 : index
    %102 = memref.load %arg3[%c0_5] : memref<15xf32, #tpu.memory_space<smem>>
    %103 = vector.broadcast %102 : f32 to vector<8x256xf32>
    %104 = arith.addf %101, %103 : vector<8x256xf32>
    %cst = arith.constant 0.000000e+00 : f32
    %105 = vector.broadcast %cst : f32 to vector<8x256xf32>
    %106 = arith.maximumf %104, %105 : vector<8x256xf32>
    %107 = arith.addf %75, %87 : vector<8x256xf32>
    %108 = arith.addf %107, %99 : vector<8x256xf32>
    %c1_6 = arith.constant 1 : index
    %109 = memref.load %arg3[%c1_6] : memref<15xf32, #tpu.memory_space<smem>>
    %110 = vector.broadcast %109 : f32 to vector<8x256xf32>
    %111 = arith.addf %108, %110 : vector<8x256xf32>
    %cst_7 = arith.constant 0.000000e+00 : f32
    %112 = vector.broadcast %cst_7 : f32 to vector<8x256xf32>
    %113 = arith.maximumf %111, %112 : vector<8x256xf32>
    %114 = tpu.concatenate %106, %113 in 0 : vector<8x256xf32>, vector<8x256xf32> -> vector<16x256xf32>
    %c17_i32_8 = arith.constant 17 : i32
    %115 = tpu.dynamic_rotate %114 by %c17_i32_8 dim 1 : vector<16x256xf32>, i32 -> vector<16x256xf32>
    %116 = vector.extract_strided_slice %0 {offsets = [0, 0, 0], sizes = [1, 8, 256], strides = [1, 1, 1]} : vector<9x8x256xf32> to vector<1x8x256xf32>
    %117 = vector.shape_cast %116 : vector<1x8x256xf32> to vector<8x256xf32>
    %118 = vector.extract_strided_slice %115 {offsets = [0, 0], sizes = [8, 256], strides = [1, 1]} : vector<16x256xf32> to vector<8x256xf32>
    %119 = arith.mulf %118, %117 : vector<8x256xf32>
    %120 = vector.extract_strided_slice %115 {offsets = [8, 0], sizes = [8, 256], strides = [1, 1]} : vector<16x256xf32> to vector<8x256xf32>
    %121 = arith.mulf %120, %117 : vector<8x256xf32>
    %c18 = arith.constant 18 : index
    %122 = memref.load %arg2[%c18] : memref<252xf32, #tpu.memory_space<smem>>
    %123 = vector.broadcast %122 : f32 to vector<8x256xf32>
    %124 = arith.mulf %123, %119 : vector<8x256xf32>
    %c27 = arith.constant 27 : index
    %125 = memref.load %arg2[%c27] : memref<252xf32, #tpu.memory_space<smem>>
    %126 = vector.broadcast %125 : f32 to vector<8x256xf32>
    %127 = arith.mulf %126, %121 : vector<8x256xf32>
    %128 = arith.addf %124, %127 : vector<8x256xf32>
    %c36 = arith.constant 36 : index
    %129 = memref.load %arg2[%c36] : memref<252xf32, #tpu.memory_space<smem>>
    %130 = vector.broadcast %129 : f32 to vector<8x256xf32>
    %131 = arith.mulf %130, %119 : vector<8x256xf32>
    %c45 = arith.constant 45 : index
    %132 = memref.load %arg2[%c45] : memref<252xf32, #tpu.memory_space<smem>>
    %133 = vector.broadcast %132 : f32 to vector<8x256xf32>
    %134 = arith.mulf %133, %121 : vector<8x256xf32>
    %135 = arith.addf %131, %134 : vector<8x256xf32>
    %c16_i32_9 = arith.constant 16 : i32
    %136 = tpu.dynamic_rotate %114 by %c16_i32_9 dim 1 : vector<16x256xf32>, i32 -> vector<16x256xf32>
    %137 = vector.extract_strided_slice %0 {offsets = [1, 0, 0], sizes = [1, 8, 256], strides = [1, 1, 1]} : vector<9x8x256xf32> to vector<1x8x256xf32>
    %138 = vector.shape_cast %137 : vector<1x8x256xf32> to vector<8x256xf32>
    %139 = vector.extract_strided_slice %136 {offsets = [0, 0], sizes = [8, 256], strides = [1, 1]} : vector<16x256xf32> to vector<8x256xf32>
    %140 = arith.mulf %139, %138 : vector<8x256xf32>
    %141 = vector.extract_strided_slice %136 {offsets = [8, 0], sizes = [8, 256], strides = [1, 1]} : vector<16x256xf32> to vector<8x256xf32>
    %142 = arith.mulf %141, %138 : vector<8x256xf32>
    %c19 = arith.constant 19 : index
    %143 = memref.load %arg2[%c19] : memref<252xf32, #tpu.memory_space<smem>>
    %144 = vector.broadcast %143 : f32 to vector<8x256xf32>
    %145 = arith.mulf %144, %140 : vector<8x256xf32>
    %c28 = arith.constant 28 : index
    %146 = memref.load %arg2[%c28] : memref<252xf32, #tpu.memory_space<smem>>
    %147 = vector.broadcast %146 : f32 to vector<8x256xf32>
    %148 = arith.mulf %147, %142 : vector<8x256xf32>
    %149 = arith.addf %145, %148 : vector<8x256xf32>
    %c37 = arith.constant 37 : index
    %150 = memref.load %arg2[%c37] : memref<252xf32, #tpu.memory_space<smem>>
    %151 = vector.broadcast %150 : f32 to vector<8x256xf32>
    %152 = arith.mulf %151, %140 : vector<8x256xf32>
    %c46 = arith.constant 46 : index
    %153 = memref.load %arg2[%c46] : memref<252xf32, #tpu.memory_space<smem>>
    %154 = vector.broadcast %153 : f32 to vector<8x256xf32>
    %155 = arith.mulf %154, %142 : vector<8x256xf32>
    %156 = arith.addf %152, %155 : vector<8x256xf32>
    %c15_i32_10 = arith.constant 15 : i32
    %157 = tpu.dynamic_rotate %114 by %c15_i32_10 dim 1 : vector<16x256xf32>, i32 -> vector<16x256xf32>
    %158 = vector.extract_strided_slice %0 {offsets = [2, 0, 0], sizes = [1, 8, 256], strides = [1, 1, 1]} : vector<9x8x256xf32> to vector<1x8x256xf32>
    %159 = vector.shape_cast %158 : vector<1x8x256xf32> to vector<8x256xf32>
    %160 = vector.extract_strided_slice %157 {offsets = [0, 0], sizes = [8, 256], strides = [1, 1]} : vector<16x256xf32> to vector<8x256xf32>
    %161 = arith.mulf %160, %159 : vector<8x256xf32>
    %162 = vector.extract_strided_slice %157 {offsets = [8, 0], sizes = [8, 256], strides = [1, 1]} : vector<16x256xf32> to vector<8x256xf32>
    %163 = arith.mulf %162, %159 : vector<8x256xf32>
    %c20 = arith.constant 20 : index
    %164 = memref.load %arg2[%c20] : memref<252xf32, #tpu.memory_space<smem>>
    %165 = vector.broadcast %164 : f32 to vector<8x256xf32>
    %166 = arith.mulf %165, %161 : vector<8x256xf32>
    %c29 = arith.constant 29 : index
    %167 = memref.load %arg2[%c29] : memref<252xf32, #tpu.memory_space<smem>>
    %168 = vector.broadcast %167 : f32 to vector<8x256xf32>
    %169 = arith.mulf %168, %163 : vector<8x256xf32>
    %170 = arith.addf %166, %169 : vector<8x256xf32>
    %c38 = arith.constant 38 : index
    %171 = memref.load %arg2[%c38] : memref<252xf32, #tpu.memory_space<smem>>
    %172 = vector.broadcast %171 : f32 to vector<8x256xf32>
    %173 = arith.mulf %172, %161 : vector<8x256xf32>
    %c47 = arith.constant 47 : index
    %174 = memref.load %arg2[%c47] : memref<252xf32, #tpu.memory_space<smem>>
    %175 = vector.broadcast %174 : f32 to vector<8x256xf32>
    %176 = arith.mulf %175, %163 : vector<8x256xf32>
    %177 = arith.addf %173, %176 : vector<8x256xf32>
    %c1_i32_11 = arith.constant 1 : i32
    %178 = tpu.dynamic_rotate %114 by %c1_i32_11 dim 1 : vector<16x256xf32>, i32 -> vector<16x256xf32>
    %179 = vector.extract_strided_slice %0 {offsets = [3, 0, 0], sizes = [1, 8, 256], strides = [1, 1, 1]} : vector<9x8x256xf32> to vector<1x8x256xf32>
    %180 = vector.shape_cast %179 : vector<1x8x256xf32> to vector<8x256xf32>
    %181 = vector.extract_strided_slice %178 {offsets = [0, 0], sizes = [8, 256], strides = [1, 1]} : vector<16x256xf32> to vector<8x256xf32>
    %182 = arith.mulf %181, %180 : vector<8x256xf32>
    %183 = vector.extract_strided_slice %178 {offsets = [8, 0], sizes = [8, 256], strides = [1, 1]} : vector<16x256xf32> to vector<8x256xf32>
    %184 = arith.mulf %183, %180 : vector<8x256xf32>
    %c21 = arith.constant 21 : index
    %185 = memref.load %arg2[%c21] : memref<252xf32, #tpu.memory_space<smem>>
    %186 = vector.broadcast %185 : f32 to vector<8x256xf32>
    %187 = arith.mulf %186, %182 : vector<8x256xf32>
    %c30 = arith.constant 30 : index
    %188 = memref.load %arg2[%c30] : memref<252xf32, #tpu.memory_space<smem>>
    %189 = vector.broadcast %188 : f32 to vector<8x256xf32>
    %190 = arith.mulf %189, %184 : vector<8x256xf32>
    %191 = arith.addf %187, %190 : vector<8x256xf32>
    %192 = arith.addf %128, %191 : vector<8x256xf32>
    %c39 = arith.constant 39 : index
    %193 = memref.load %arg2[%c39] : memref<252xf32, #tpu.memory_space<smem>>
    %194 = vector.broadcast %193 : f32 to vector<8x256xf32>
    %195 = arith.mulf %194, %182 : vector<8x256xf32>
    %c48 = arith.constant 48 : index
    %196 = memref.load %arg2[%c48] : memref<252xf32, #tpu.memory_space<smem>>
    %197 = vector.broadcast %196 : f32 to vector<8x256xf32>
    %198 = arith.mulf %197, %184 : vector<8x256xf32>
    %199 = arith.addf %195, %198 : vector<8x256xf32>
    %200 = arith.addf %135, %199 : vector<8x256xf32>
    %201 = vector.extract_strided_slice %114 {offsets = [0, 0], sizes = [8, 256], strides = [1, 1]} : vector<16x256xf32> to vector<8x256xf32>
    %202 = vector.extract_strided_slice %114 {offsets = [8, 0], sizes = [8, 256], strides = [1, 1]} : vector<16x256xf32> to vector<8x256xf32>
    %c22 = arith.constant 22 : index
    %203 = memref.load %arg2[%c22] : memref<252xf32, #tpu.memory_space<smem>>
    %204 = vector.broadcast %203 : f32 to vector<8x256xf32>
    %205 = arith.mulf %204, %201 : vector<8x256xf32>
    %c31 = arith.constant 31 : index
    %206 = memref.load %arg2[%c31] : memref<252xf32, #tpu.memory_space<smem>>
    %207 = vector.broadcast %206 : f32 to vector<8x256xf32>
    %208 = arith.mulf %207, %202 : vector<8x256xf32>
    %209 = arith.addf %205, %208 : vector<8x256xf32>
    %210 = arith.addf %149, %209 : vector<8x256xf32>
    %c40 = arith.constant 40 : index
    %211 = memref.load %arg2[%c40] : memref<252xf32, #tpu.memory_space<smem>>
    %212 = vector.broadcast %211 : f32 to vector<8x256xf32>
    %213 = arith.mulf %212, %201 : vector<8x256xf32>
    %c49 = arith.constant 49 : index
    %214 = memref.load %arg2[%c49] : memref<252xf32, #tpu.memory_space<smem>>
    %215 = vector.broadcast %214 : f32 to vector<8x256xf32>
    %216 = arith.mulf %215, %202 : vector<8x256xf32>
    %217 = arith.addf %213, %216 : vector<8x256xf32>
    %218 = arith.addf %156, %217 : vector<8x256xf32>
    %c255_i32_12 = arith.constant 255 : i32
    %219 = tpu.dynamic_rotate %114 by %c255_i32_12 dim 1 : vector<16x256xf32>, i32 -> vector<16x256xf32>
    %220 = vector.extract_strided_slice %0 {offsets = [5, 0, 0], sizes = [1, 8, 256], strides = [1, 1, 1]} : vector<9x8x256xf32> to vector<1x8x256xf32>
    %221 = vector.shape_cast %220 : vector<1x8x256xf32> to vector<8x256xf32>
    %222 = vector.extract_strided_slice %219 {offsets = [0, 0], sizes = [8, 256], strides = [1, 1]} : vector<16x256xf32> to vector<8x256xf32>
    %223 = arith.mulf %222, %221 : vector<8x256xf32>
    %224 = vector.extract_strided_slice %219 {offsets = [8, 0], sizes = [8, 256], strides = [1, 1]} : vector<16x256xf32> to vector<8x256xf32>
    %225 = arith.mulf %224, %221 : vector<8x256xf32>
    %c23 = arith.constant 23 : index
    %226 = memref.load %arg2[%c23] : memref<252xf32, #tpu.memory_space<smem>>
    %227 = vector.broadcast %226 : f32 to vector<8x256xf32>
    %228 = arith.mulf %227, %223 : vector<8x256xf32>
    %c32 = arith.constant 32 : index
    %229 = memref.load %arg2[%c32] : memref<252xf32, #tpu.memory_space<smem>>
    %230 = vector.broadcast %229 : f32 to vector<8x256xf32>
    %231 = arith.mulf %230, %225 : vector<8x256xf32>
    %232 = arith.addf %228, %231 : vector<8x256xf32>
    %233 = arith.addf %170, %232 : vector<8x256xf32>
    %c41 = arith.constant 41 : index
    %234 = memref.load %arg2[%c41] : memref<252xf32, #tpu.memory_space<smem>>
    %235 = vector.broadcast %234 : f32 to vector<8x256xf32>
    %236 = arith.mulf %235, %223 : vector<8x256xf32>
    %c50 = arith.constant 50 : index
    %237 = memref.load %arg2[%c50] : memref<252xf32, #tpu.memory_space<smem>>
    %238 = vector.broadcast %237 : f32 to vector<8x256xf32>
    %239 = arith.mulf %238, %225 : vector<8x256xf32>
    %240 = arith.addf %236, %239 : vector<8x256xf32>
    %241 = arith.addf %177, %240 : vector<8x256xf32>
    %c241_i32_13 = arith.constant 241 : i32
    %242 = tpu.dynamic_rotate %114 by %c241_i32_13 dim 1 : vector<16x256xf32>, i32 -> vector<16x256xf32>
    %243 = vector.extract_strided_slice %0 {offsets = [6, 0, 0], sizes = [1, 8, 256], strides = [1, 1, 1]} : vector<9x8x256xf32> to vector<1x8x256xf32>
    %244 = vector.shape_cast %243 : vector<1x8x256xf32> to vector<8x256xf32>
    %245 = vector.extract_strided_slice %242 {offsets = [0, 0], sizes = [8, 256], strides = [1, 1]} : vector<16x256xf32> to vector<8x256xf32>
    %246 = arith.mulf %245, %244 : vector<8x256xf32>
    %247 = vector.extract_strided_slice %242 {offsets = [8, 0], sizes = [8, 256], strides = [1, 1]} : vector<16x256xf32> to vector<8x256xf32>
    %248 = arith.mulf %247, %244 : vector<8x256xf32>
    %c24 = arith.constant 24 : index
    %249 = memref.load %arg2[%c24] : memref<252xf32, #tpu.memory_space<smem>>
    %250 = vector.broadcast %249 : f32 to vector<8x256xf32>
    %251 = arith.mulf %250, %246 : vector<8x256xf32>
    %c33 = arith.constant 33 : index
    %252 = memref.load %arg2[%c33] : memref<252xf32, #tpu.memory_space<smem>>
    %253 = vector.broadcast %252 : f32 to vector<8x256xf32>
    %254 = arith.mulf %253, %248 : vector<8x256xf32>
    %255 = arith.addf %251, %254 : vector<8x256xf32>
    %256 = arith.addf %192, %255 : vector<8x256xf32>
    %c42 = arith.constant 42 : index
    %257 = memref.load %arg2[%c42] : memref<252xf32, #tpu.memory_space<smem>>
    %258 = vector.broadcast %257 : f32 to vector<8x256xf32>
    %259 = arith.mulf %258, %246 : vector<8x256xf32>
    %c51 = arith.constant 51 : index
    %260 = memref.load %arg2[%c51] : memref<252xf32, #tpu.memory_space<smem>>
    %261 = vector.broadcast %260 : f32 to vector<8x256xf32>
    %262 = arith.mulf %261, %248 : vector<8x256xf32>
    %263 = arith.addf %259, %262 : vector<8x256xf32>
    %264 = arith.addf %200, %263 : vector<8x256xf32>
    %c240_i32_14 = arith.constant 240 : i32
    %265 = tpu.dynamic_rotate %114 by %c240_i32_14 dim 1 : vector<16x256xf32>, i32 -> vector<16x256xf32>
    %266 = vector.extract_strided_slice %0 {offsets = [7, 0, 0], sizes = [1, 8, 256], strides = [1, 1, 1]} : vector<9x8x256xf32> to vector<1x8x256xf32>
    %267 = vector.shape_cast %266 : vector<1x8x256xf32> to vector<8x256xf32>
    %268 = vector.extract_strided_slice %265 {offsets = [0, 0], sizes = [8, 256], strides = [1, 1]} : vector<16x256xf32> to vector<8x256xf32>
    %269 = arith.mulf %268, %267 : vector<8x256xf32>
    %270 = vector.extract_strided_slice %265 {offsets = [8, 0], sizes = [8, 256], strides = [1, 1]} : vector<16x256xf32> to vector<8x256xf32>
    %271 = arith.mulf %270, %267 : vector<8x256xf32>
    %c25 = arith.constant 25 : index
    %272 = memref.load %arg2[%c25] : memref<252xf32, #tpu.memory_space<smem>>
    %273 = vector.broadcast %272 : f32 to vector<8x256xf32>
    %274 = arith.mulf %273, %269 : vector<8x256xf32>
    %c34 = arith.constant 34 : index
    %275 = memref.load %arg2[%c34] : memref<252xf32, #tpu.memory_space<smem>>
    %276 = vector.broadcast %275 : f32 to vector<8x256xf32>
    %277 = arith.mulf %276, %271 : vector<8x256xf32>
    %278 = arith.addf %274, %277 : vector<8x256xf32>
    %279 = arith.addf %210, %278 : vector<8x256xf32>
    %c43 = arith.constant 43 : index
    %280 = memref.load %arg2[%c43] : memref<252xf32, #tpu.memory_space<smem>>
    %281 = vector.broadcast %280 : f32 to vector<8x256xf32>
    %282 = arith.mulf %281, %269 : vector<8x256xf32>
    %c52 = arith.constant 52 : index
    %283 = memref.load %arg2[%c52] : memref<252xf32, #tpu.memory_space<smem>>
    %284 = vector.broadcast %283 : f32 to vector<8x256xf32>
    %285 = arith.mulf %284, %271 : vector<8x256xf32>
    %286 = arith.addf %282, %285 : vector<8x256xf32>
    %287 = arith.addf %218, %286 : vector<8x256xf32>
    %c239_i32_15 = arith.constant 239 : i32
    %288 = tpu.dynamic_rotate %114 by %c239_i32_15 dim 1 : vector<16x256xf32>, i32 -> vector<16x256xf32>
    %289 = vector.extract_strided_slice %0 {offsets = [8, 0, 0], sizes = [1, 8, 256], strides = [1, 1, 1]} : vector<9x8x256xf32> to vector<1x8x256xf32>
    %290 = vector.shape_cast %289 : vector<1x8x256xf32> to vector<8x256xf32>
    %291 = vector.extract_strided_slice %288 {offsets = [0, 0], sizes = [8, 256], strides = [1, 1]} : vector<16x256xf32> to vector<8x256xf32>
    %292 = arith.mulf %291, %290 : vector<8x256xf32>
    %293 = vector.extract_strided_slice %288 {offsets = [8, 0], sizes = [8, 256], strides = [1, 1]} : vector<16x256xf32> to vector<8x256xf32>
    %294 = arith.mulf %293, %290 : vector<8x256xf32>
    %c26 = arith.constant 26 : index
    %295 = memref.load %arg2[%c26] : memref<252xf32, #tpu.memory_space<smem>>
    %296 = vector.broadcast %295 : f32 to vector<8x256xf32>
    %297 = arith.mulf %296, %292 : vector<8x256xf32>
    %c35 = arith.constant 35 : index
    %298 = memref.load %arg2[%c35] : memref<252xf32, #tpu.memory_space<smem>>
    %299 = vector.broadcast %298 : f32 to vector<8x256xf32>
    %300 = arith.mulf %299, %294 : vector<8x256xf32>
    %301 = arith.addf %297, %300 : vector<8x256xf32>
    %302 = arith.addf %233, %301 : vector<8x256xf32>
    %c44 = arith.constant 44 : index
    %303 = memref.load %arg2[%c44] : memref<252xf32, #tpu.memory_space<smem>>
    %304 = vector.broadcast %303 : f32 to vector<8x256xf32>
    %305 = arith.mulf %304, %292 : vector<8x256xf32>
    %c53 = arith.constant 53 : index
    %306 = memref.load %arg2[%c53] : memref<252xf32, #tpu.memory_space<smem>>
    %307 = vector.broadcast %306 : f32 to vector<8x256xf32>
    %308 = arith.mulf %307, %294 : vector<8x256xf32>
    %309 = arith.addf %305, %308 : vector<8x256xf32>
    %310 = arith.addf %241, %309 : vector<8x256xf32>
    %311 = arith.addf %256, %279 : vector<8x256xf32>
    %312 = arith.addf %311, %302 : vector<8x256xf32>
    %c2_16 = arith.constant 2 : index
    %313 = memref.load %arg3[%c2_16] : memref<15xf32, #tpu.memory_space<smem>>
    %314 = vector.broadcast %313 : f32 to vector<8x256xf32>
    %315 = arith.addf %312, %314 : vector<8x256xf32>
    %cst_17 = arith.constant 0.000000e+00 : f32
    %316 = vector.broadcast %cst_17 : f32 to vector<8x256xf32>
    %317 = arith.maximumf %315, %316 : vector<8x256xf32>
    %318 = arith.addf %264, %287 : vector<8x256xf32>
    %319 = arith.addf %318, %310 : vector<8x256xf32>
    %c3_18 = arith.constant 3 : index
    %320 = memref.load %arg3[%c3_18] : memref<15xf32, #tpu.memory_space<smem>>
    %321 = vector.broadcast %320 : f32 to vector<8x256xf32>
    %322 = arith.addf %319, %321 : vector<8x256xf32>
    %cst_19 = arith.constant 0.000000e+00 : f32
    %323 = vector.broadcast %cst_19 : f32 to vector<8x256xf32>
    %324 = arith.maximumf %322, %323 : vector<8x256xf32>
    %325 = tpu.concatenate %317, %324 in 0 : vector<8x256xf32>, vector<8x256xf32> -> vector<16x256xf32>
    %c17_i32_20 = arith.constant 17 : i32
    %326 = tpu.dynamic_rotate %325 by %c17_i32_20 dim 1 : vector<16x256xf32>, i32 -> vector<16x256xf32>
    %327 = vector.extract_strided_slice %0 {offsets = [0, 0, 0], sizes = [1, 8, 256], strides = [1, 1, 1]} : vector<9x8x256xf32> to vector<1x8x256xf32>
    %328 = vector.shape_cast %327 : vector<1x8x256xf32> to vector<8x256xf32>
    %329 = vector.extract_strided_slice %326 {offsets = [0, 0], sizes = [8, 256], strides = [1, 1]} : vector<16x256xf32> to vector<8x256xf32>
    %330 = arith.mulf %329, %328 : vector<8x256xf32>
    %331 = vector.extract_strided_slice %326 {offsets = [8, 0], sizes = [8, 256], strides = [1, 1]} : vector<16x256xf32> to vector<8x256xf32>
    %332 = arith.mulf %331, %328 : vector<8x256xf32>
    %c54 = arith.constant 54 : index
    %333 = memref.load %arg2[%c54] : memref<252xf32, #tpu.memory_space<smem>>
    %334 = vector.broadcast %333 : f32 to vector<8x256xf32>
    %335 = arith.mulf %334, %330 : vector<8x256xf32>
    %c63 = arith.constant 63 : index
    %336 = memref.load %arg2[%c63] : memref<252xf32, #tpu.memory_space<smem>>
    %337 = vector.broadcast %336 : f32 to vector<8x256xf32>
    %338 = arith.mulf %337, %332 : vector<8x256xf32>
    %339 = arith.addf %335, %338 : vector<8x256xf32>
    %c72 = arith.constant 72 : index
    %340 = memref.load %arg2[%c72] : memref<252xf32, #tpu.memory_space<smem>>
    %341 = vector.broadcast %340 : f32 to vector<8x256xf32>
    %342 = arith.mulf %341, %330 : vector<8x256xf32>
    %c81 = arith.constant 81 : index
    %343 = memref.load %arg2[%c81] : memref<252xf32, #tpu.memory_space<smem>>
    %344 = vector.broadcast %343 : f32 to vector<8x256xf32>
    %345 = arith.mulf %344, %332 : vector<8x256xf32>
    %346 = arith.addf %342, %345 : vector<8x256xf32>
    %c16_i32_21 = arith.constant 16 : i32
    %347 = tpu.dynamic_rotate %325 by %c16_i32_21 dim 1 : vector<16x256xf32>, i32 -> vector<16x256xf32>
    %348 = vector.extract_strided_slice %0 {offsets = [1, 0, 0], sizes = [1, 8, 256], strides = [1, 1, 1]} : vector<9x8x256xf32> to vector<1x8x256xf32>
    %349 = vector.shape_cast %348 : vector<1x8x256xf32> to vector<8x256xf32>
    %350 = vector.extract_strided_slice %347 {offsets = [0, 0], sizes = [8, 256], strides = [1, 1]} : vector<16x256xf32> to vector<8x256xf32>
    %351 = arith.mulf %350, %349 : vector<8x256xf32>
    %352 = vector.extract_strided_slice %347 {offsets = [8, 0], sizes = [8, 256], strides = [1, 1]} : vector<16x256xf32> to vector<8x256xf32>
    %353 = arith.mulf %352, %349 : vector<8x256xf32>
    %c55 = arith.constant 55 : index
    %354 = memref.load %arg2[%c55] : memref<252xf32, #tpu.memory_space<smem>>
    %355 = vector.broadcast %354 : f32 to vector<8x256xf32>
    %356 = arith.mulf %355, %351 : vector<8x256xf32>
    %c64 = arith.constant 64 : index
    %357 = memref.load %arg2[%c64] : memref<252xf32, #tpu.memory_space<smem>>
    %358 = vector.broadcast %357 : f32 to vector<8x256xf32>
    %359 = arith.mulf %358, %353 : vector<8x256xf32>
    %360 = arith.addf %356, %359 : vector<8x256xf32>
    %c73 = arith.constant 73 : index
    %361 = memref.load %arg2[%c73] : memref<252xf32, #tpu.memory_space<smem>>
    %362 = vector.broadcast %361 : f32 to vector<8x256xf32>
    %363 = arith.mulf %362, %351 : vector<8x256xf32>
    %c82 = arith.constant 82 : index
    %364 = memref.load %arg2[%c82] : memref<252xf32, #tpu.memory_space<smem>>
    %365 = vector.broadcast %364 : f32 to vector<8x256xf32>
    %366 = arith.mulf %365, %353 : vector<8x256xf32>
    %367 = arith.addf %363, %366 : vector<8x256xf32>
    %c15_i32_22 = arith.constant 15 : i32
    %368 = tpu.dynamic_rotate %325 by %c15_i32_22 dim 1 : vector<16x256xf32>, i32 -> vector<16x256xf32>
    %369 = vector.extract_strided_slice %0 {offsets = [2, 0, 0], sizes = [1, 8, 256], strides = [1, 1, 1]} : vector<9x8x256xf32> to vector<1x8x256xf32>
    %370 = vector.shape_cast %369 : vector<1x8x256xf32> to vector<8x256xf32>
    %371 = vector.extract_strided_slice %368 {offsets = [0, 0], sizes = [8, 256], strides = [1, 1]} : vector<16x256xf32> to vector<8x256xf32>
    %372 = arith.mulf %371, %370 : vector<8x256xf32>
    %373 = vector.extract_strided_slice %368 {offsets = [8, 0], sizes = [8, 256], strides = [1, 1]} : vector<16x256xf32> to vector<8x256xf32>
    %374 = arith.mulf %373, %370 : vector<8x256xf32>
    %c56 = arith.constant 56 : index
    %375 = memref.load %arg2[%c56] : memref<252xf32, #tpu.memory_space<smem>>
    %376 = vector.broadcast %375 : f32 to vector<8x256xf32>
    %377 = arith.mulf %376, %372 : vector<8x256xf32>
    %c65 = arith.constant 65 : index
    %378 = memref.load %arg2[%c65] : memref<252xf32, #tpu.memory_space<smem>>
    %379 = vector.broadcast %378 : f32 to vector<8x256xf32>
    %380 = arith.mulf %379, %374 : vector<8x256xf32>
    %381 = arith.addf %377, %380 : vector<8x256xf32>
    %c74 = arith.constant 74 : index
    %382 = memref.load %arg2[%c74] : memref<252xf32, #tpu.memory_space<smem>>
    %383 = vector.broadcast %382 : f32 to vector<8x256xf32>
    %384 = arith.mulf %383, %372 : vector<8x256xf32>
    %c83 = arith.constant 83 : index
    %385 = memref.load %arg2[%c83] : memref<252xf32, #tpu.memory_space<smem>>
    %386 = vector.broadcast %385 : f32 to vector<8x256xf32>
    %387 = arith.mulf %386, %374 : vector<8x256xf32>
    %388 = arith.addf %384, %387 : vector<8x256xf32>
    %c1_i32_23 = arith.constant 1 : i32
    %389 = tpu.dynamic_rotate %325 by %c1_i32_23 dim 1 : vector<16x256xf32>, i32 -> vector<16x256xf32>
    %390 = vector.extract_strided_slice %0 {offsets = [3, 0, 0], sizes = [1, 8, 256], strides = [1, 1, 1]} : vector<9x8x256xf32> to vector<1x8x256xf32>
    %391 = vector.shape_cast %390 : vector<1x8x256xf32> to vector<8x256xf32>
    %392 = vector.extract_strided_slice %389 {offsets = [0, 0], sizes = [8, 256], strides = [1, 1]} : vector<16x256xf32> to vector<8x256xf32>
    %393 = arith.mulf %392, %391 : vector<8x256xf32>
    %394 = vector.extract_strided_slice %389 {offsets = [8, 0], sizes = [8, 256], strides = [1, 1]} : vector<16x256xf32> to vector<8x256xf32>
    %395 = arith.mulf %394, %391 : vector<8x256xf32>
    %c57 = arith.constant 57 : index
    %396 = memref.load %arg2[%c57] : memref<252xf32, #tpu.memory_space<smem>>
    %397 = vector.broadcast %396 : f32 to vector<8x256xf32>
    %398 = arith.mulf %397, %393 : vector<8x256xf32>
    %c66 = arith.constant 66 : index
    %399 = memref.load %arg2[%c66] : memref<252xf32, #tpu.memory_space<smem>>
    %400 = vector.broadcast %399 : f32 to vector<8x256xf32>
    %401 = arith.mulf %400, %395 : vector<8x256xf32>
    %402 = arith.addf %398, %401 : vector<8x256xf32>
    %403 = arith.addf %339, %402 : vector<8x256xf32>
    %c75 = arith.constant 75 : index
    %404 = memref.load %arg2[%c75] : memref<252xf32, #tpu.memory_space<smem>>
    %405 = vector.broadcast %404 : f32 to vector<8x256xf32>
    %406 = arith.mulf %405, %393 : vector<8x256xf32>
    %c84 = arith.constant 84 : index
    %407 = memref.load %arg2[%c84] : memref<252xf32, #tpu.memory_space<smem>>
    %408 = vector.broadcast %407 : f32 to vector<8x256xf32>
    %409 = arith.mulf %408, %395 : vector<8x256xf32>
    %410 = arith.addf %406, %409 : vector<8x256xf32>
    %411 = arith.addf %346, %410 : vector<8x256xf32>
    %412 = vector.extract_strided_slice %325 {offsets = [0, 0], sizes = [8, 256], strides = [1, 1]} : vector<16x256xf32> to vector<8x256xf32>
    %413 = vector.extract_strided_slice %325 {offsets = [8, 0], sizes = [8, 256], strides = [1, 1]} : vector<16x256xf32> to vector<8x256xf32>
    %c58 = arith.constant 58 : index
    %414 = memref.load %arg2[%c58] : memref<252xf32, #tpu.memory_space<smem>>
    %415 = vector.broadcast %414 : f32 to vector<8x256xf32>
    %416 = arith.mulf %415, %412 : vector<8x256xf32>
    %c67 = arith.constant 67 : index
    %417 = memref.load %arg2[%c67] : memref<252xf32, #tpu.memory_space<smem>>
    %418 = vector.broadcast %417 : f32 to vector<8x256xf32>
    %419 = arith.mulf %418, %413 : vector<8x256xf32>
    %420 = arith.addf %416, %419 : vector<8x256xf32>
    %421 = arith.addf %360, %420 : vector<8x256xf32>
    %c76 = arith.constant 76 : index
    %422 = memref.load %arg2[%c76] : memref<252xf32, #tpu.memory_space<smem>>
    %423 = vector.broadcast %422 : f32 to vector<8x256xf32>
    %424 = arith.mulf %423, %412 : vector<8x256xf32>
    %c85 = arith.constant 85 : index
    %425 = memref.load %arg2[%c85] : memref<252xf32, #tpu.memory_space<smem>>
    %426 = vector.broadcast %425 : f32 to vector<8x256xf32>
    %427 = arith.mulf %426, %413 : vector<8x256xf32>
    %428 = arith.addf %424, %427 : vector<8x256xf32>
    %429 = arith.addf %367, %428 : vector<8x256xf32>
    %c255_i32_24 = arith.constant 255 : i32
    %430 = tpu.dynamic_rotate %325 by %c255_i32_24 dim 1 : vector<16x256xf32>, i32 -> vector<16x256xf32>
    %431 = vector.extract_strided_slice %0 {offsets = [5, 0, 0], sizes = [1, 8, 256], strides = [1, 1, 1]} : vector<9x8x256xf32> to vector<1x8x256xf32>
    %432 = vector.shape_cast %431 : vector<1x8x256xf32> to vector<8x256xf32>
    %433 = vector.extract_strided_slice %430 {offsets = [0, 0], sizes = [8, 256], strides = [1, 1]} : vector<16x256xf32> to vector<8x256xf32>
    %434 = arith.mulf %433, %432 : vector<8x256xf32>
    %435 = vector.extract_strided_slice %430 {offsets = [8, 0], sizes = [8, 256], strides = [1, 1]} : vector<16x256xf32> to vector<8x256xf32>
    %436 = arith.mulf %435, %432 : vector<8x256xf32>
    %c59 = arith.constant 59 : index
    %437 = memref.load %arg2[%c59] : memref<252xf32, #tpu.memory_space<smem>>
    %438 = vector.broadcast %437 : f32 to vector<8x256xf32>
    %439 = arith.mulf %438, %434 : vector<8x256xf32>
    %c68 = arith.constant 68 : index
    %440 = memref.load %arg2[%c68] : memref<252xf32, #tpu.memory_space<smem>>
    %441 = vector.broadcast %440 : f32 to vector<8x256xf32>
    %442 = arith.mulf %441, %436 : vector<8x256xf32>
    %443 = arith.addf %439, %442 : vector<8x256xf32>
    %444 = arith.addf %381, %443 : vector<8x256xf32>
    %c77 = arith.constant 77 : index
    %445 = memref.load %arg2[%c77] : memref<252xf32, #tpu.memory_space<smem>>
    %446 = vector.broadcast %445 : f32 to vector<8x256xf32>
    %447 = arith.mulf %446, %434 : vector<8x256xf32>
    %c86 = arith.constant 86 : index
    %448 = memref.load %arg2[%c86] : memref<252xf32, #tpu.memory_space<smem>>
    %449 = vector.broadcast %448 : f32 to vector<8x256xf32>
    %450 = arith.mulf %449, %436 : vector<8x256xf32>
    %451 = arith.addf %447, %450 : vector<8x256xf32>
    %452 = arith.addf %388, %451 : vector<8x256xf32>
    %c241_i32_25 = arith.constant 241 : i32
    %453 = tpu.dynamic_rotate %325 by %c241_i32_25 dim 1 : vector<16x256xf32>, i32 -> vector<16x256xf32>
    %454 = vector.extract_strided_slice %0 {offsets = [6, 0, 0], sizes = [1, 8, 256], strides = [1, 1, 1]} : vector<9x8x256xf32> to vector<1x8x256xf32>
    %455 = vector.shape_cast %454 : vector<1x8x256xf32> to vector<8x256xf32>
    %456 = vector.extract_strided_slice %453 {offsets = [0, 0], sizes = [8, 256], strides = [1, 1]} : vector<16x256xf32> to vector<8x256xf32>
    %457 = arith.mulf %456, %455 : vector<8x256xf32>
    %458 = vector.extract_strided_slice %453 {offsets = [8, 0], sizes = [8, 256], strides = [1, 1]} : vector<16x256xf32> to vector<8x256xf32>
    %459 = arith.mulf %458, %455 : vector<8x256xf32>
    %c60 = arith.constant 60 : index
    %460 = memref.load %arg2[%c60] : memref<252xf32, #tpu.memory_space<smem>>
    %461 = vector.broadcast %460 : f32 to vector<8x256xf32>
    %462 = arith.mulf %461, %457 : vector<8x256xf32>
    %c69 = arith.constant 69 : index
    %463 = memref.load %arg2[%c69] : memref<252xf32, #tpu.memory_space<smem>>
    %464 = vector.broadcast %463 : f32 to vector<8x256xf32>
    %465 = arith.mulf %464, %459 : vector<8x256xf32>
    %466 = arith.addf %462, %465 : vector<8x256xf32>
    %467 = arith.addf %403, %466 : vector<8x256xf32>
    %c78 = arith.constant 78 : index
    %468 = memref.load %arg2[%c78] : memref<252xf32, #tpu.memory_space<smem>>
    %469 = vector.broadcast %468 : f32 to vector<8x256xf32>
    %470 = arith.mulf %469, %457 : vector<8x256xf32>
    %c87 = arith.constant 87 : index
    %471 = memref.load %arg2[%c87] : memref<252xf32, #tpu.memory_space<smem>>
    %472 = vector.broadcast %471 : f32 to vector<8x256xf32>
    %473 = arith.mulf %472, %459 : vector<8x256xf32>
    %474 = arith.addf %470, %473 : vector<8x256xf32>
    %475 = arith.addf %411, %474 : vector<8x256xf32>
    %c240_i32_26 = arith.constant 240 : i32
    %476 = tpu.dynamic_rotate %325 by %c240_i32_26 dim 1 : vector<16x256xf32>, i32 -> vector<16x256xf32>
    %477 = vector.extract_strided_slice %0 {offsets = [7, 0, 0], sizes = [1, 8, 256], strides = [1, 1, 1]} : vector<9x8x256xf32> to vector<1x8x256xf32>
    %478 = vector.shape_cast %477 : vector<1x8x256xf32> to vector<8x256xf32>
    %479 = vector.extract_strided_slice %476 {offsets = [0, 0], sizes = [8, 256], strides = [1, 1]} : vector<16x256xf32> to vector<8x256xf32>
    %480 = arith.mulf %479, %478 : vector<8x256xf32>
    %481 = vector.extract_strided_slice %476 {offsets = [8, 0], sizes = [8, 256], strides = [1, 1]} : vector<16x256xf32> to vector<8x256xf32>
    %482 = arith.mulf %481, %478 : vector<8x256xf32>
    %c61 = arith.constant 61 : index
    %483 = memref.load %arg2[%c61] : memref<252xf32, #tpu.memory_space<smem>>
    %484 = vector.broadcast %483 : f32 to vector<8x256xf32>
    %485 = arith.mulf %484, %480 : vector<8x256xf32>
    %c70 = arith.constant 70 : index
    %486 = memref.load %arg2[%c70] : memref<252xf32, #tpu.memory_space<smem>>
    %487 = vector.broadcast %486 : f32 to vector<8x256xf32>
    %488 = arith.mulf %487, %482 : vector<8x256xf32>
    %489 = arith.addf %485, %488 : vector<8x256xf32>
    %490 = arith.addf %421, %489 : vector<8x256xf32>
    %c79 = arith.constant 79 : index
    %491 = memref.load %arg2[%c79] : memref<252xf32, #tpu.memory_space<smem>>
    %492 = vector.broadcast %491 : f32 to vector<8x256xf32>
    %493 = arith.mulf %492, %480 : vector<8x256xf32>
    %c88 = arith.constant 88 : index
    %494 = memref.load %arg2[%c88] : memref<252xf32, #tpu.memory_space<smem>>
    %495 = vector.broadcast %494 : f32 to vector<8x256xf32>
    %496 = arith.mulf %495, %482 : vector<8x256xf32>
    %497 = arith.addf %493, %496 : vector<8x256xf32>
    %498 = arith.addf %429, %497 : vector<8x256xf32>
    %c239_i32_27 = arith.constant 239 : i32
    %499 = tpu.dynamic_rotate %325 by %c239_i32_27 dim 1 : vector<16x256xf32>, i32 -> vector<16x256xf32>
    %500 = vector.extract_strided_slice %0 {offsets = [8, 0, 0], sizes = [1, 8, 256], strides = [1, 1, 1]} : vector<9x8x256xf32> to vector<1x8x256xf32>
    %501 = vector.shape_cast %500 : vector<1x8x256xf32> to vector<8x256xf32>
    %502 = vector.extract_strided_slice %499 {offsets = [0, 0], sizes = [8, 256], strides = [1, 1]} : vector<16x256xf32> to vector<8x256xf32>
    %503 = arith.mulf %502, %501 : vector<8x256xf32>
    %504 = vector.extract_strided_slice %499 {offsets = [8, 0], sizes = [8, 256], strides = [1, 1]} : vector<16x256xf32> to vector<8x256xf32>
    %505 = arith.mulf %504, %501 : vector<8x256xf32>
    %c62 = arith.constant 62 : index
    %506 = memref.load %arg2[%c62] : memref<252xf32, #tpu.memory_space<smem>>
    %507 = vector.broadcast %506 : f32 to vector<8x256xf32>
    %508 = arith.mulf %507, %503 : vector<8x256xf32>
    %c71 = arith.constant 71 : index
    %509 = memref.load %arg2[%c71] : memref<252xf32, #tpu.memory_space<smem>>
    %510 = vector.broadcast %509 : f32 to vector<8x256xf32>
    %511 = arith.mulf %510, %505 : vector<8x256xf32>
    %512 = arith.addf %508, %511 : vector<8x256xf32>
    %513 = arith.addf %444, %512 : vector<8x256xf32>
    %c80 = arith.constant 80 : index
    %514 = memref.load %arg2[%c80] : memref<252xf32, #tpu.memory_space<smem>>
    %515 = vector.broadcast %514 : f32 to vector<8x256xf32>
    %516 = arith.mulf %515, %503 : vector<8x256xf32>
    %c89 = arith.constant 89 : index
    %517 = memref.load %arg2[%c89] : memref<252xf32, #tpu.memory_space<smem>>
    %518 = vector.broadcast %517 : f32 to vector<8x256xf32>
    %519 = arith.mulf %518, %505 : vector<8x256xf32>
    %520 = arith.addf %516, %519 : vector<8x256xf32>
    %521 = arith.addf %452, %520 : vector<8x256xf32>
    %522 = arith.addf %467, %490 : vector<8x256xf32>
    %523 = arith.addf %522, %513 : vector<8x256xf32>
    %c4_28 = arith.constant 4 : index
    %524 = memref.load %arg3[%c4_28] : memref<15xf32, #tpu.memory_space<smem>>
    %525 = vector.broadcast %524 : f32 to vector<8x256xf32>
    %526 = arith.addf %523, %525 : vector<8x256xf32>
    %cst_29 = arith.constant 0.000000e+00 : f32
    %527 = vector.broadcast %cst_29 : f32 to vector<8x256xf32>
    %528 = arith.maximumf %526, %527 : vector<8x256xf32>
    %529 = arith.addf %475, %498 : vector<8x256xf32>
    %530 = arith.addf %529, %521 : vector<8x256xf32>
    %c5_30 = arith.constant 5 : index
    %531 = memref.load %arg3[%c5_30] : memref<15xf32, #tpu.memory_space<smem>>
    %532 = vector.broadcast %531 : f32 to vector<8x256xf32>
    %533 = arith.addf %530, %532 : vector<8x256xf32>
    %cst_31 = arith.constant 0.000000e+00 : f32
    %534 = vector.broadcast %cst_31 : f32 to vector<8x256xf32>
    %535 = arith.maximumf %533, %534 : vector<8x256xf32>
    %536 = tpu.concatenate %528, %535 in 0 : vector<8x256xf32>, vector<8x256xf32> -> vector<16x256xf32>
    %c17_i32_32 = arith.constant 17 : i32
    %537 = tpu.dynamic_rotate %536 by %c17_i32_32 dim 1 : vector<16x256xf32>, i32 -> vector<16x256xf32>
    %538 = vector.extract_strided_slice %0 {offsets = [0, 0, 0], sizes = [1, 8, 256], strides = [1, 1, 1]} : vector<9x8x256xf32> to vector<1x8x256xf32>
    %539 = vector.shape_cast %538 : vector<1x8x256xf32> to vector<8x256xf32>
    %540 = vector.extract_strided_slice %537 {offsets = [0, 0], sizes = [8, 256], strides = [1, 1]} : vector<16x256xf32> to vector<8x256xf32>
    %541 = arith.mulf %540, %539 : vector<8x256xf32>
    %542 = vector.extract_strided_slice %537 {offsets = [8, 0], sizes = [8, 256], strides = [1, 1]} : vector<16x256xf32> to vector<8x256xf32>
    %543 = arith.mulf %542, %539 : vector<8x256xf32>
    %c90 = arith.constant 90 : index
    %544 = memref.load %arg2[%c90] : memref<252xf32, #tpu.memory_space<smem>>
    %545 = vector.broadcast %544 : f32 to vector<8x256xf32>
    %546 = arith.mulf %545, %541 : vector<8x256xf32>
    %c99 = arith.constant 99 : index
    %547 = memref.load %arg2[%c99] : memref<252xf32, #tpu.memory_space<smem>>
    %548 = vector.broadcast %547 : f32 to vector<8x256xf32>
    %549 = arith.mulf %548, %543 : vector<8x256xf32>
    %550 = arith.addf %546, %549 : vector<8x256xf32>
    %c108 = arith.constant 108 : index
    %551 = memref.load %arg2[%c108] : memref<252xf32, #tpu.memory_space<smem>>
    %552 = vector.broadcast %551 : f32 to vector<8x256xf32>
    %553 = arith.mulf %552, %541 : vector<8x256xf32>
    %c117 = arith.constant 117 : index
    %554 = memref.load %arg2[%c117] : memref<252xf32, #tpu.memory_space<smem>>
    %555 = vector.broadcast %554 : f32 to vector<8x256xf32>
    %556 = arith.mulf %555, %543 : vector<8x256xf32>
    %557 = arith.addf %553, %556 : vector<8x256xf32>
    %c16_i32_33 = arith.constant 16 : i32
    %558 = tpu.dynamic_rotate %536 by %c16_i32_33 dim 1 : vector<16x256xf32>, i32 -> vector<16x256xf32>
    %559 = vector.extract_strided_slice %0 {offsets = [1, 0, 0], sizes = [1, 8, 256], strides = [1, 1, 1]} : vector<9x8x256xf32> to vector<1x8x256xf32>
    %560 = vector.shape_cast %559 : vector<1x8x256xf32> to vector<8x256xf32>
    %561 = vector.extract_strided_slice %558 {offsets = [0, 0], sizes = [8, 256], strides = [1, 1]} : vector<16x256xf32> to vector<8x256xf32>
    %562 = arith.mulf %561, %560 : vector<8x256xf32>
    %563 = vector.extract_strided_slice %558 {offsets = [8, 0], sizes = [8, 256], strides = [1, 1]} : vector<16x256xf32> to vector<8x256xf32>
    %564 = arith.mulf %563, %560 : vector<8x256xf32>
    %c91 = arith.constant 91 : index
    %565 = memref.load %arg2[%c91] : memref<252xf32, #tpu.memory_space<smem>>
    %566 = vector.broadcast %565 : f32 to vector<8x256xf32>
    %567 = arith.mulf %566, %562 : vector<8x256xf32>
    %c100 = arith.constant 100 : index
    %568 = memref.load %arg2[%c100] : memref<252xf32, #tpu.memory_space<smem>>
    %569 = vector.broadcast %568 : f32 to vector<8x256xf32>
    %570 = arith.mulf %569, %564 : vector<8x256xf32>
    %571 = arith.addf %567, %570 : vector<8x256xf32>
    %c109 = arith.constant 109 : index
    %572 = memref.load %arg2[%c109] : memref<252xf32, #tpu.memory_space<smem>>
    %573 = vector.broadcast %572 : f32 to vector<8x256xf32>
    %574 = arith.mulf %573, %562 : vector<8x256xf32>
    %c118 = arith.constant 118 : index
    %575 = memref.load %arg2[%c118] : memref<252xf32, #tpu.memory_space<smem>>
    %576 = vector.broadcast %575 : f32 to vector<8x256xf32>
    %577 = arith.mulf %576, %564 : vector<8x256xf32>
    %578 = arith.addf %574, %577 : vector<8x256xf32>
    %c15_i32_34 = arith.constant 15 : i32
    %579 = tpu.dynamic_rotate %536 by %c15_i32_34 dim 1 : vector<16x256xf32>, i32 -> vector<16x256xf32>
    %580 = vector.extract_strided_slice %0 {offsets = [2, 0, 0], sizes = [1, 8, 256], strides = [1, 1, 1]} : vector<9x8x256xf32> to vector<1x8x256xf32>
    %581 = vector.shape_cast %580 : vector<1x8x256xf32> to vector<8x256xf32>
    %582 = vector.extract_strided_slice %579 {offsets = [0, 0], sizes = [8, 256], strides = [1, 1]} : vector<16x256xf32> to vector<8x256xf32>
    %583 = arith.mulf %582, %581 : vector<8x256xf32>
    %584 = vector.extract_strided_slice %579 {offsets = [8, 0], sizes = [8, 256], strides = [1, 1]} : vector<16x256xf32> to vector<8x256xf32>
    %585 = arith.mulf %584, %581 : vector<8x256xf32>
    %c92 = arith.constant 92 : index
    %586 = memref.load %arg2[%c92] : memref<252xf32, #tpu.memory_space<smem>>
    %587 = vector.broadcast %586 : f32 to vector<8x256xf32>
    %588 = arith.mulf %587, %583 : vector<8x256xf32>
    %c101 = arith.constant 101 : index
    %589 = memref.load %arg2[%c101] : memref<252xf32, #tpu.memory_space<smem>>
    %590 = vector.broadcast %589 : f32 to vector<8x256xf32>
    %591 = arith.mulf %590, %585 : vector<8x256xf32>
    %592 = arith.addf %588, %591 : vector<8x256xf32>
    %c110 = arith.constant 110 : index
    %593 = memref.load %arg2[%c110] : memref<252xf32, #tpu.memory_space<smem>>
    %594 = vector.broadcast %593 : f32 to vector<8x256xf32>
    %595 = arith.mulf %594, %583 : vector<8x256xf32>
    %c119 = arith.constant 119 : index
    %596 = memref.load %arg2[%c119] : memref<252xf32, #tpu.memory_space<smem>>
    %597 = vector.broadcast %596 : f32 to vector<8x256xf32>
    %598 = arith.mulf %597, %585 : vector<8x256xf32>
    %599 = arith.addf %595, %598 : vector<8x256xf32>
    %c1_i32_35 = arith.constant 1 : i32
    %600 = tpu.dynamic_rotate %536 by %c1_i32_35 dim 1 : vector<16x256xf32>, i32 -> vector<16x256xf32>
    %601 = vector.extract_strided_slice %0 {offsets = [3, 0, 0], sizes = [1, 8, 256], strides = [1, 1, 1]} : vector<9x8x256xf32> to vector<1x8x256xf32>
    %602 = vector.shape_cast %601 : vector<1x8x256xf32> to vector<8x256xf32>
    %603 = vector.extract_strided_slice %600 {offsets = [0, 0], sizes = [8, 256], strides = [1, 1]} : vector<16x256xf32> to vector<8x256xf32>
    %604 = arith.mulf %603, %602 : vector<8x256xf32>
    %605 = vector.extract_strided_slice %600 {offsets = [8, 0], sizes = [8, 256], strides = [1, 1]} : vector<16x256xf32> to vector<8x256xf32>
    %606 = arith.mulf %605, %602 : vector<8x256xf32>
    %c93 = arith.constant 93 : index
    %607 = memref.load %arg2[%c93] : memref<252xf32, #tpu.memory_space<smem>>
    %608 = vector.broadcast %607 : f32 to vector<8x256xf32>
    %609 = arith.mulf %608, %604 : vector<8x256xf32>
    %c102 = arith.constant 102 : index
    %610 = memref.load %arg2[%c102] : memref<252xf32, #tpu.memory_space<smem>>
    %611 = vector.broadcast %610 : f32 to vector<8x256xf32>
    %612 = arith.mulf %611, %606 : vector<8x256xf32>
    %613 = arith.addf %609, %612 : vector<8x256xf32>
    %614 = arith.addf %550, %613 : vector<8x256xf32>
    %c111 = arith.constant 111 : index
    %615 = memref.load %arg2[%c111] : memref<252xf32, #tpu.memory_space<smem>>
    %616 = vector.broadcast %615 : f32 to vector<8x256xf32>
    %617 = arith.mulf %616, %604 : vector<8x256xf32>
    %c120 = arith.constant 120 : index
    %618 = memref.load %arg2[%c120] : memref<252xf32, #tpu.memory_space<smem>>
    %619 = vector.broadcast %618 : f32 to vector<8x256xf32>
    %620 = arith.mulf %619, %606 : vector<8x256xf32>
    %621 = arith.addf %617, %620 : vector<8x256xf32>
    %622 = arith.addf %557, %621 : vector<8x256xf32>
    %623 = vector.extract_strided_slice %536 {offsets = [0, 0], sizes = [8, 256], strides = [1, 1]} : vector<16x256xf32> to vector<8x256xf32>
    %624 = vector.extract_strided_slice %536 {offsets = [8, 0], sizes = [8, 256], strides = [1, 1]} : vector<16x256xf32> to vector<8x256xf32>
    %c94 = arith.constant 94 : index
    %625 = memref.load %arg2[%c94] : memref<252xf32, #tpu.memory_space<smem>>
    %626 = vector.broadcast %625 : f32 to vector<8x256xf32>
    %627 = arith.mulf %626, %623 : vector<8x256xf32>
    %c103 = arith.constant 103 : index
    %628 = memref.load %arg2[%c103] : memref<252xf32, #tpu.memory_space<smem>>
    %629 = vector.broadcast %628 : f32 to vector<8x256xf32>
    %630 = arith.mulf %629, %624 : vector<8x256xf32>
    %631 = arith.addf %627, %630 : vector<8x256xf32>
    %632 = arith.addf %571, %631 : vector<8x256xf32>
    %c112 = arith.constant 112 : index
    %633 = memref.load %arg2[%c112] : memref<252xf32, #tpu.memory_space<smem>>
    %634 = vector.broadcast %633 : f32 to vector<8x256xf32>
    %635 = arith.mulf %634, %623 : vector<8x256xf32>
    %c121 = arith.constant 121 : index
    %636 = memref.load %arg2[%c121] : memref<252xf32, #tpu.memory_space<smem>>
    %637 = vector.broadcast %636 : f32 to vector<8x256xf32>
    %638 = arith.mulf %637, %624 : vector<8x256xf32>
    %639 = arith.addf %635, %638 : vector<8x256xf32>
    %640 = arith.addf %578, %639 : vector<8x256xf32>
    %c255_i32_36 = arith.constant 255 : i32
    %641 = tpu.dynamic_rotate %536 by %c255_i32_36 dim 1 : vector<16x256xf32>, i32 -> vector<16x256xf32>
    %642 = vector.extract_strided_slice %0 {offsets = [5, 0, 0], sizes = [1, 8, 256], strides = [1, 1, 1]} : vector<9x8x256xf32> to vector<1x8x256xf32>
    %643 = vector.shape_cast %642 : vector<1x8x256xf32> to vector<8x256xf32>
    %644 = vector.extract_strided_slice %641 {offsets = [0, 0], sizes = [8, 256], strides = [1, 1]} : vector<16x256xf32> to vector<8x256xf32>
    %645 = arith.mulf %644, %643 : vector<8x256xf32>
    %646 = vector.extract_strided_slice %641 {offsets = [8, 0], sizes = [8, 256], strides = [1, 1]} : vector<16x256xf32> to vector<8x256xf32>
    %647 = arith.mulf %646, %643 : vector<8x256xf32>
    %c95 = arith.constant 95 : index
    %648 = memref.load %arg2[%c95] : memref<252xf32, #tpu.memory_space<smem>>
    %649 = vector.broadcast %648 : f32 to vector<8x256xf32>
    %650 = arith.mulf %649, %645 : vector<8x256xf32>
    %c104 = arith.constant 104 : index
    %651 = memref.load %arg2[%c104] : memref<252xf32, #tpu.memory_space<smem>>
    %652 = vector.broadcast %651 : f32 to vector<8x256xf32>
    %653 = arith.mulf %652, %647 : vector<8x256xf32>
    %654 = arith.addf %650, %653 : vector<8x256xf32>
    %655 = arith.addf %592, %654 : vector<8x256xf32>
    %c113 = arith.constant 113 : index
    %656 = memref.load %arg2[%c113] : memref<252xf32, #tpu.memory_space<smem>>
    %657 = vector.broadcast %656 : f32 to vector<8x256xf32>
    %658 = arith.mulf %657, %645 : vector<8x256xf32>
    %c122 = arith.constant 122 : index
    %659 = memref.load %arg2[%c122] : memref<252xf32, #tpu.memory_space<smem>>
    %660 = vector.broadcast %659 : f32 to vector<8x256xf32>
    %661 = arith.mulf %660, %647 : vector<8x256xf32>
    %662 = arith.addf %658, %661 : vector<8x256xf32>
    %663 = arith.addf %599, %662 : vector<8x256xf32>
    %c241_i32_37 = arith.constant 241 : i32
    %664 = tpu.dynamic_rotate %536 by %c241_i32_37 dim 1 : vector<16x256xf32>, i32 -> vector<16x256xf32>
    %665 = vector.extract_strided_slice %0 {offsets = [6, 0, 0], sizes = [1, 8, 256], strides = [1, 1, 1]} : vector<9x8x256xf32> to vector<1x8x256xf32>
    %666 = vector.shape_cast %665 : vector<1x8x256xf32> to vector<8x256xf32>
    %667 = vector.extract_strided_slice %664 {offsets = [0, 0], sizes = [8, 256], strides = [1, 1]} : vector<16x256xf32> to vector<8x256xf32>
    %668 = arith.mulf %667, %666 : vector<8x256xf32>
    %669 = vector.extract_strided_slice %664 {offsets = [8, 0], sizes = [8, 256], strides = [1, 1]} : vector<16x256xf32> to vector<8x256xf32>
    %670 = arith.mulf %669, %666 : vector<8x256xf32>
    %c96 = arith.constant 96 : index
    %671 = memref.load %arg2[%c96] : memref<252xf32, #tpu.memory_space<smem>>
    %672 = vector.broadcast %671 : f32 to vector<8x256xf32>
    %673 = arith.mulf %672, %668 : vector<8x256xf32>
    %c105 = arith.constant 105 : index
    %674 = memref.load %arg2[%c105] : memref<252xf32, #tpu.memory_space<smem>>
    %675 = vector.broadcast %674 : f32 to vector<8x256xf32>
    %676 = arith.mulf %675, %670 : vector<8x256xf32>
    %677 = arith.addf %673, %676 : vector<8x256xf32>
    %678 = arith.addf %614, %677 : vector<8x256xf32>
    %c114 = arith.constant 114 : index
    %679 = memref.load %arg2[%c114] : memref<252xf32, #tpu.memory_space<smem>>
    %680 = vector.broadcast %679 : f32 to vector<8x256xf32>
    %681 = arith.mulf %680, %668 : vector<8x256xf32>
    %c123 = arith.constant 123 : index
    %682 = memref.load %arg2[%c123] : memref<252xf32, #tpu.memory_space<smem>>
    %683 = vector.broadcast %682 : f32 to vector<8x256xf32>
    %684 = arith.mulf %683, %670 : vector<8x256xf32>
    %685 = arith.addf %681, %684 : vector<8x256xf32>
    %686 = arith.addf %622, %685 : vector<8x256xf32>
    %c240_i32_38 = arith.constant 240 : i32
    %687 = tpu.dynamic_rotate %536 by %c240_i32_38 dim 1 : vector<16x256xf32>, i32 -> vector<16x256xf32>
    %688 = vector.extract_strided_slice %0 {offsets = [7, 0, 0], sizes = [1, 8, 256], strides = [1, 1, 1]} : vector<9x8x256xf32> to vector<1x8x256xf32>
    %689 = vector.shape_cast %688 : vector<1x8x256xf32> to vector<8x256xf32>
    %690 = vector.extract_strided_slice %687 {offsets = [0, 0], sizes = [8, 256], strides = [1, 1]} : vector<16x256xf32> to vector<8x256xf32>
    %691 = arith.mulf %690, %689 : vector<8x256xf32>
    %692 = vector.extract_strided_slice %687 {offsets = [8, 0], sizes = [8, 256], strides = [1, 1]} : vector<16x256xf32> to vector<8x256xf32>
    %693 = arith.mulf %692, %689 : vector<8x256xf32>
    %c97 = arith.constant 97 : index
    %694 = memref.load %arg2[%c97] : memref<252xf32, #tpu.memory_space<smem>>
    %695 = vector.broadcast %694 : f32 to vector<8x256xf32>
    %696 = arith.mulf %695, %691 : vector<8x256xf32>
    %c106 = arith.constant 106 : index
    %697 = memref.load %arg2[%c106] : memref<252xf32, #tpu.memory_space<smem>>
    %698 = vector.broadcast %697 : f32 to vector<8x256xf32>
    %699 = arith.mulf %698, %693 : vector<8x256xf32>
    %700 = arith.addf %696, %699 : vector<8x256xf32>
    %701 = arith.addf %632, %700 : vector<8x256xf32>
    %c115 = arith.constant 115 : index
    %702 = memref.load %arg2[%c115] : memref<252xf32, #tpu.memory_space<smem>>
    %703 = vector.broadcast %702 : f32 to vector<8x256xf32>
    %704 = arith.mulf %703, %691 : vector<8x256xf32>
    %c124 = arith.constant 124 : index
    %705 = memref.load %arg2[%c124] : memref<252xf32, #tpu.memory_space<smem>>
    %706 = vector.broadcast %705 : f32 to vector<8x256xf32>
    %707 = arith.mulf %706, %693 : vector<8x256xf32>
    %708 = arith.addf %704, %707 : vector<8x256xf32>
    %709 = arith.addf %640, %708 : vector<8x256xf32>
    %c239_i32_39 = arith.constant 239 : i32
    %710 = tpu.dynamic_rotate %536 by %c239_i32_39 dim 1 : vector<16x256xf32>, i32 -> vector<16x256xf32>
    %711 = vector.extract_strided_slice %0 {offsets = [8, 0, 0], sizes = [1, 8, 256], strides = [1, 1, 1]} : vector<9x8x256xf32> to vector<1x8x256xf32>
    %712 = vector.shape_cast %711 : vector<1x8x256xf32> to vector<8x256xf32>
    %713 = vector.extract_strided_slice %710 {offsets = [0, 0], sizes = [8, 256], strides = [1, 1]} : vector<16x256xf32> to vector<8x256xf32>
    %714 = arith.mulf %713, %712 : vector<8x256xf32>
    %715 = vector.extract_strided_slice %710 {offsets = [8, 0], sizes = [8, 256], strides = [1, 1]} : vector<16x256xf32> to vector<8x256xf32>
    %716 = arith.mulf %715, %712 : vector<8x256xf32>
    %c98 = arith.constant 98 : index
    %717 = memref.load %arg2[%c98] : memref<252xf32, #tpu.memory_space<smem>>
    %718 = vector.broadcast %717 : f32 to vector<8x256xf32>
    %719 = arith.mulf %718, %714 : vector<8x256xf32>
    %c107 = arith.constant 107 : index
    %720 = memref.load %arg2[%c107] : memref<252xf32, #tpu.memory_space<smem>>
    %721 = vector.broadcast %720 : f32 to vector<8x256xf32>
    %722 = arith.mulf %721, %716 : vector<8x256xf32>
    %723 = arith.addf %719, %722 : vector<8x256xf32>
    %724 = arith.addf %655, %723 : vector<8x256xf32>
    %c116 = arith.constant 116 : index
    %725 = memref.load %arg2[%c116] : memref<252xf32, #tpu.memory_space<smem>>
    %726 = vector.broadcast %725 : f32 to vector<8x256xf32>
    %727 = arith.mulf %726, %714 : vector<8x256xf32>
    %c125 = arith.constant 125 : index
    %728 = memref.load %arg2[%c125] : memref<252xf32, #tpu.memory_space<smem>>
    %729 = vector.broadcast %728 : f32 to vector<8x256xf32>
    %730 = arith.mulf %729, %716 : vector<8x256xf32>
    %731 = arith.addf %727, %730 : vector<8x256xf32>
    %732 = arith.addf %663, %731 : vector<8x256xf32>
    %733 = arith.addf %678, %701 : vector<8x256xf32>
    %734 = arith.addf %733, %724 : vector<8x256xf32>
    %c6_40 = arith.constant 6 : index
    %735 = memref.load %arg3[%c6_40] : memref<15xf32, #tpu.memory_space<smem>>
    %736 = vector.broadcast %735 : f32 to vector<8x256xf32>
    %737 = arith.addf %734, %736 : vector<8x256xf32>
    %738 = arith.addf %686, %709 : vector<8x256xf32>
    %739 = arith.addf %738, %732 : vector<8x256xf32>
    %c7_41 = arith.constant 7 : index
    %740 = memref.load %arg3[%c7_41] : memref<15xf32, #tpu.memory_space<smem>>
    %741 = vector.broadcast %740 : f32 to vector<8x256xf32>
    %742 = arith.addf %739, %741 : vector<8x256xf32>
    %743 = tpu.concatenate %737, %742 in 0 : vector<8x256xf32>, vector<8x256xf32> -> vector<16x256xf32>
    %c17_i32_42 = arith.constant 17 : i32
    %744 = tpu.dynamic_rotate %743 by %c17_i32_42 dim 1 : vector<16x256xf32>, i32 -> vector<16x256xf32>
    %745 = vector.extract_strided_slice %0 {offsets = [0, 0, 0], sizes = [1, 8, 256], strides = [1, 1, 1]} : vector<9x8x256xf32> to vector<1x8x256xf32>
    %746 = vector.shape_cast %745 : vector<1x8x256xf32> to vector<8x256xf32>
    %747 = vector.extract_strided_slice %744 {offsets = [0, 0], sizes = [8, 256], strides = [1, 1]} : vector<16x256xf32> to vector<8x256xf32>
    %748 = arith.mulf %747, %746 : vector<8x256xf32>
    %749 = vector.extract_strided_slice %744 {offsets = [8, 0], sizes = [8, 256], strides = [1, 1]} : vector<16x256xf32> to vector<8x256xf32>
    %750 = arith.mulf %749, %746 : vector<8x256xf32>
    %c126 = arith.constant 126 : index
    %751 = memref.load %arg2[%c126] : memref<252xf32, #tpu.memory_space<smem>>
    %752 = vector.broadcast %751 : f32 to vector<8x256xf32>
    %753 = arith.mulf %752, %748 : vector<8x256xf32>
    %c135 = arith.constant 135 : index
    %754 = memref.load %arg2[%c135] : memref<252xf32, #tpu.memory_space<smem>>
    %755 = vector.broadcast %754 : f32 to vector<8x256xf32>
    %756 = arith.mulf %755, %750 : vector<8x256xf32>
    %757 = arith.addf %753, %756 : vector<8x256xf32>
    %c144 = arith.constant 144 : index
    %758 = memref.load %arg2[%c144] : memref<252xf32, #tpu.memory_space<smem>>
    %759 = vector.broadcast %758 : f32 to vector<8x256xf32>
    %760 = arith.mulf %759, %748 : vector<8x256xf32>
    %c153 = arith.constant 153 : index
    %761 = memref.load %arg2[%c153] : memref<252xf32, #tpu.memory_space<smem>>
    %762 = vector.broadcast %761 : f32 to vector<8x256xf32>
    %763 = arith.mulf %762, %750 : vector<8x256xf32>
    %764 = arith.addf %760, %763 : vector<8x256xf32>
    %c16_i32_43 = arith.constant 16 : i32
    %765 = tpu.dynamic_rotate %743 by %c16_i32_43 dim 1 : vector<16x256xf32>, i32 -> vector<16x256xf32>
    %766 = vector.extract_strided_slice %0 {offsets = [1, 0, 0], sizes = [1, 8, 256], strides = [1, 1, 1]} : vector<9x8x256xf32> to vector<1x8x256xf32>
    %767 = vector.shape_cast %766 : vector<1x8x256xf32> to vector<8x256xf32>
    %768 = vector.extract_strided_slice %765 {offsets = [0, 0], sizes = [8, 256], strides = [1, 1]} : vector<16x256xf32> to vector<8x256xf32>
    %769 = arith.mulf %768, %767 : vector<8x256xf32>
    %770 = vector.extract_strided_slice %765 {offsets = [8, 0], sizes = [8, 256], strides = [1, 1]} : vector<16x256xf32> to vector<8x256xf32>
    %771 = arith.mulf %770, %767 : vector<8x256xf32>
    %c127 = arith.constant 127 : index
    %772 = memref.load %arg2[%c127] : memref<252xf32, #tpu.memory_space<smem>>
    %773 = vector.broadcast %772 : f32 to vector<8x256xf32>
    %774 = arith.mulf %773, %769 : vector<8x256xf32>
    %c136 = arith.constant 136 : index
    %775 = memref.load %arg2[%c136] : memref<252xf32, #tpu.memory_space<smem>>
    %776 = vector.broadcast %775 : f32 to vector<8x256xf32>
    %777 = arith.mulf %776, %771 : vector<8x256xf32>
    %778 = arith.addf %774, %777 : vector<8x256xf32>
    %c145 = arith.constant 145 : index
    %779 = memref.load %arg2[%c145] : memref<252xf32, #tpu.memory_space<smem>>
    %780 = vector.broadcast %779 : f32 to vector<8x256xf32>
    %781 = arith.mulf %780, %769 : vector<8x256xf32>
    %c154 = arith.constant 154 : index
    %782 = memref.load %arg2[%c154] : memref<252xf32, #tpu.memory_space<smem>>
    %783 = vector.broadcast %782 : f32 to vector<8x256xf32>
    %784 = arith.mulf %783, %771 : vector<8x256xf32>
    %785 = arith.addf %781, %784 : vector<8x256xf32>
    %c15_i32_44 = arith.constant 15 : i32
    %786 = tpu.dynamic_rotate %743 by %c15_i32_44 dim 1 : vector<16x256xf32>, i32 -> vector<16x256xf32>
    %787 = vector.extract_strided_slice %0 {offsets = [2, 0, 0], sizes = [1, 8, 256], strides = [1, 1, 1]} : vector<9x8x256xf32> to vector<1x8x256xf32>
    %788 = vector.shape_cast %787 : vector<1x8x256xf32> to vector<8x256xf32>
    %789 = vector.extract_strided_slice %786 {offsets = [0, 0], sizes = [8, 256], strides = [1, 1]} : vector<16x256xf32> to vector<8x256xf32>
    %790 = arith.mulf %789, %788 : vector<8x256xf32>
    %791 = vector.extract_strided_slice %786 {offsets = [8, 0], sizes = [8, 256], strides = [1, 1]} : vector<16x256xf32> to vector<8x256xf32>
    %792 = arith.mulf %791, %788 : vector<8x256xf32>
    %c128 = arith.constant 128 : index
    %793 = memref.load %arg2[%c128] : memref<252xf32, #tpu.memory_space<smem>>
    %794 = vector.broadcast %793 : f32 to vector<8x256xf32>
    %795 = arith.mulf %794, %790 : vector<8x256xf32>
    %c137 = arith.constant 137 : index
    %796 = memref.load %arg2[%c137] : memref<252xf32, #tpu.memory_space<smem>>
    %797 = vector.broadcast %796 : f32 to vector<8x256xf32>
    %798 = arith.mulf %797, %792 : vector<8x256xf32>
    %799 = arith.addf %795, %798 : vector<8x256xf32>
    %c146 = arith.constant 146 : index
    %800 = memref.load %arg2[%c146] : memref<252xf32, #tpu.memory_space<smem>>
    %801 = vector.broadcast %800 : f32 to vector<8x256xf32>
    %802 = arith.mulf %801, %790 : vector<8x256xf32>
    %c155 = arith.constant 155 : index
    %803 = memref.load %arg2[%c155] : memref<252xf32, #tpu.memory_space<smem>>
    %804 = vector.broadcast %803 : f32 to vector<8x256xf32>
    %805 = arith.mulf %804, %792 : vector<8x256xf32>
    %806 = arith.addf %802, %805 : vector<8x256xf32>
    %c1_i32_45 = arith.constant 1 : i32
    %807 = tpu.dynamic_rotate %743 by %c1_i32_45 dim 1 : vector<16x256xf32>, i32 -> vector<16x256xf32>
    %808 = vector.extract_strided_slice %0 {offsets = [3, 0, 0], sizes = [1, 8, 256], strides = [1, 1, 1]} : vector<9x8x256xf32> to vector<1x8x256xf32>
    %809 = vector.shape_cast %808 : vector<1x8x256xf32> to vector<8x256xf32>
    %810 = vector.extract_strided_slice %807 {offsets = [0, 0], sizes = [8, 256], strides = [1, 1]} : vector<16x256xf32> to vector<8x256xf32>
    %811 = arith.mulf %810, %809 : vector<8x256xf32>
    %812 = vector.extract_strided_slice %807 {offsets = [8, 0], sizes = [8, 256], strides = [1, 1]} : vector<16x256xf32> to vector<8x256xf32>
    %813 = arith.mulf %812, %809 : vector<8x256xf32>
    %c129 = arith.constant 129 : index
    %814 = memref.load %arg2[%c129] : memref<252xf32, #tpu.memory_space<smem>>
    %815 = vector.broadcast %814 : f32 to vector<8x256xf32>
    %816 = arith.mulf %815, %811 : vector<8x256xf32>
    %c138 = arith.constant 138 : index
    %817 = memref.load %arg2[%c138] : memref<252xf32, #tpu.memory_space<smem>>
    %818 = vector.broadcast %817 : f32 to vector<8x256xf32>
    %819 = arith.mulf %818, %813 : vector<8x256xf32>
    %820 = arith.addf %816, %819 : vector<8x256xf32>
    %821 = arith.addf %757, %820 : vector<8x256xf32>
    %c147 = arith.constant 147 : index
    %822 = memref.load %arg2[%c147] : memref<252xf32, #tpu.memory_space<smem>>
    %823 = vector.broadcast %822 : f32 to vector<8x256xf32>
    %824 = arith.mulf %823, %811 : vector<8x256xf32>
    %c156 = arith.constant 156 : index
    %825 = memref.load %arg2[%c156] : memref<252xf32, #tpu.memory_space<smem>>
    %826 = vector.broadcast %825 : f32 to vector<8x256xf32>
    %827 = arith.mulf %826, %813 : vector<8x256xf32>
    %828 = arith.addf %824, %827 : vector<8x256xf32>
    %829 = arith.addf %764, %828 : vector<8x256xf32>
    %830 = vector.extract_strided_slice %743 {offsets = [0, 0], sizes = [8, 256], strides = [1, 1]} : vector<16x256xf32> to vector<8x256xf32>
    %831 = vector.extract_strided_slice %743 {offsets = [8, 0], sizes = [8, 256], strides = [1, 1]} : vector<16x256xf32> to vector<8x256xf32>
    %c130 = arith.constant 130 : index
    %832 = memref.load %arg2[%c130] : memref<252xf32, #tpu.memory_space<smem>>
    %833 = vector.broadcast %832 : f32 to vector<8x256xf32>
    %834 = arith.mulf %833, %830 : vector<8x256xf32>
    %c139 = arith.constant 139 : index
    %835 = memref.load %arg2[%c139] : memref<252xf32, #tpu.memory_space<smem>>
    %836 = vector.broadcast %835 : f32 to vector<8x256xf32>
    %837 = arith.mulf %836, %831 : vector<8x256xf32>
    %838 = arith.addf %834, %837 : vector<8x256xf32>
    %839 = arith.addf %778, %838 : vector<8x256xf32>
    %c148 = arith.constant 148 : index
    %840 = memref.load %arg2[%c148] : memref<252xf32, #tpu.memory_space<smem>>
    %841 = vector.broadcast %840 : f32 to vector<8x256xf32>
    %842 = arith.mulf %841, %830 : vector<8x256xf32>
    %c157 = arith.constant 157 : index
    %843 = memref.load %arg2[%c157] : memref<252xf32, #tpu.memory_space<smem>>
    %844 = vector.broadcast %843 : f32 to vector<8x256xf32>
    %845 = arith.mulf %844, %831 : vector<8x256xf32>
    %846 = arith.addf %842, %845 : vector<8x256xf32>
    %847 = arith.addf %785, %846 : vector<8x256xf32>
    %c255_i32_46 = arith.constant 255 : i32
    %848 = tpu.dynamic_rotate %743 by %c255_i32_46 dim 1 : vector<16x256xf32>, i32 -> vector<16x256xf32>
    %849 = vector.extract_strided_slice %0 {offsets = [5, 0, 0], sizes = [1, 8, 256], strides = [1, 1, 1]} : vector<9x8x256xf32> to vector<1x8x256xf32>
    %850 = vector.shape_cast %849 : vector<1x8x256xf32> to vector<8x256xf32>
    %851 = vector.extract_strided_slice %848 {offsets = [0, 0], sizes = [8, 256], strides = [1, 1]} : vector<16x256xf32> to vector<8x256xf32>
    %852 = arith.mulf %851, %850 : vector<8x256xf32>
    %853 = vector.extract_strided_slice %848 {offsets = [8, 0], sizes = [8, 256], strides = [1, 1]} : vector<16x256xf32> to vector<8x256xf32>
    %854 = arith.mulf %853, %850 : vector<8x256xf32>
    %c131 = arith.constant 131 : index
    %855 = memref.load %arg2[%c131] : memref<252xf32, #tpu.memory_space<smem>>
    %856 = vector.broadcast %855 : f32 to vector<8x256xf32>
    %857 = arith.mulf %856, %852 : vector<8x256xf32>
    %c140 = arith.constant 140 : index
    %858 = memref.load %arg2[%c140] : memref<252xf32, #tpu.memory_space<smem>>
    %859 = vector.broadcast %858 : f32 to vector<8x256xf32>
    %860 = arith.mulf %859, %854 : vector<8x256xf32>
    %861 = arith.addf %857, %860 : vector<8x256xf32>
    %862 = arith.addf %799, %861 : vector<8x256xf32>
    %c149 = arith.constant 149 : index
    %863 = memref.load %arg2[%c149] : memref<252xf32, #tpu.memory_space<smem>>
    %864 = vector.broadcast %863 : f32 to vector<8x256xf32>
    %865 = arith.mulf %864, %852 : vector<8x256xf32>
    %c158 = arith.constant 158 : index
    %866 = memref.load %arg2[%c158] : memref<252xf32, #tpu.memory_space<smem>>
    %867 = vector.broadcast %866 : f32 to vector<8x256xf32>
    %868 = arith.mulf %867, %854 : vector<8x256xf32>
    %869 = arith.addf %865, %868 : vector<8x256xf32>
    %870 = arith.addf %806, %869 : vector<8x256xf32>
    %c241_i32_47 = arith.constant 241 : i32
    %871 = tpu.dynamic_rotate %743 by %c241_i32_47 dim 1 : vector<16x256xf32>, i32 -> vector<16x256xf32>
    %872 = vector.extract_strided_slice %0 {offsets = [6, 0, 0], sizes = [1, 8, 256], strides = [1, 1, 1]} : vector<9x8x256xf32> to vector<1x8x256xf32>
    %873 = vector.shape_cast %872 : vector<1x8x256xf32> to vector<8x256xf32>
    %874 = vector.extract_strided_slice %871 {offsets = [0, 0], sizes = [8, 256], strides = [1, 1]} : vector<16x256xf32> to vector<8x256xf32>
    %875 = arith.mulf %874, %873 : vector<8x256xf32>
    %876 = vector.extract_strided_slice %871 {offsets = [8, 0], sizes = [8, 256], strides = [1, 1]} : vector<16x256xf32> to vector<8x256xf32>
    %877 = arith.mulf %876, %873 : vector<8x256xf32>
    %c132 = arith.constant 132 : index
    %878 = memref.load %arg2[%c132] : memref<252xf32, #tpu.memory_space<smem>>
    %879 = vector.broadcast %878 : f32 to vector<8x256xf32>
    %880 = arith.mulf %879, %875 : vector<8x256xf32>
    %c141 = arith.constant 141 : index
    %881 = memref.load %arg2[%c141] : memref<252xf32, #tpu.memory_space<smem>>
    %882 = vector.broadcast %881 : f32 to vector<8x256xf32>
    %883 = arith.mulf %882, %877 : vector<8x256xf32>
    %884 = arith.addf %880, %883 : vector<8x256xf32>
    %885 = arith.addf %821, %884 : vector<8x256xf32>
    %c150 = arith.constant 150 : index
    %886 = memref.load %arg2[%c150] : memref<252xf32, #tpu.memory_space<smem>>
    %887 = vector.broadcast %886 : f32 to vector<8x256xf32>
    %888 = arith.mulf %887, %875 : vector<8x256xf32>
    %c159 = arith.constant 159 : index
    %889 = memref.load %arg2[%c159] : memref<252xf32, #tpu.memory_space<smem>>
    %890 = vector.broadcast %889 : f32 to vector<8x256xf32>
    %891 = arith.mulf %890, %877 : vector<8x256xf32>
    %892 = arith.addf %888, %891 : vector<8x256xf32>
    %893 = arith.addf %829, %892 : vector<8x256xf32>
    %c240_i32_48 = arith.constant 240 : i32
    %894 = tpu.dynamic_rotate %743 by %c240_i32_48 dim 1 : vector<16x256xf32>, i32 -> vector<16x256xf32>
    %895 = vector.extract_strided_slice %0 {offsets = [7, 0, 0], sizes = [1, 8, 256], strides = [1, 1, 1]} : vector<9x8x256xf32> to vector<1x8x256xf32>
    %896 = vector.shape_cast %895 : vector<1x8x256xf32> to vector<8x256xf32>
    %897 = vector.extract_strided_slice %894 {offsets = [0, 0], sizes = [8, 256], strides = [1, 1]} : vector<16x256xf32> to vector<8x256xf32>
    %898 = arith.mulf %897, %896 : vector<8x256xf32>
    %899 = vector.extract_strided_slice %894 {offsets = [8, 0], sizes = [8, 256], strides = [1, 1]} : vector<16x256xf32> to vector<8x256xf32>
    %900 = arith.mulf %899, %896 : vector<8x256xf32>
    %c133 = arith.constant 133 : index
    %901 = memref.load %arg2[%c133] : memref<252xf32, #tpu.memory_space<smem>>
    %902 = vector.broadcast %901 : f32 to vector<8x256xf32>
    %903 = arith.mulf %902, %898 : vector<8x256xf32>
    %c142 = arith.constant 142 : index
    %904 = memref.load %arg2[%c142] : memref<252xf32, #tpu.memory_space<smem>>
    %905 = vector.broadcast %904 : f32 to vector<8x256xf32>
    %906 = arith.mulf %905, %900 : vector<8x256xf32>
    %907 = arith.addf %903, %906 : vector<8x256xf32>
    %908 = arith.addf %839, %907 : vector<8x256xf32>
    %c151 = arith.constant 151 : index
    %909 = memref.load %arg2[%c151] : memref<252xf32, #tpu.memory_space<smem>>
    %910 = vector.broadcast %909 : f32 to vector<8x256xf32>
    %911 = arith.mulf %910, %898 : vector<8x256xf32>
    %c160 = arith.constant 160 : index
    %912 = memref.load %arg2[%c160] : memref<252xf32, #tpu.memory_space<smem>>
    %913 = vector.broadcast %912 : f32 to vector<8x256xf32>
    %914 = arith.mulf %913, %900 : vector<8x256xf32>
    %915 = arith.addf %911, %914 : vector<8x256xf32>
    %916 = arith.addf %847, %915 : vector<8x256xf32>
    %c239_i32_49 = arith.constant 239 : i32
    %917 = tpu.dynamic_rotate %743 by %c239_i32_49 dim 1 : vector<16x256xf32>, i32 -> vector<16x256xf32>
    %918 = vector.extract_strided_slice %0 {offsets = [8, 0, 0], sizes = [1, 8, 256], strides = [1, 1, 1]} : vector<9x8x256xf32> to vector<1x8x256xf32>
    %919 = vector.shape_cast %918 : vector<1x8x256xf32> to vector<8x256xf32>
    %920 = vector.extract_strided_slice %917 {offsets = [0, 0], sizes = [8, 256], strides = [1, 1]} : vector<16x256xf32> to vector<8x256xf32>
    %921 = arith.mulf %920, %919 : vector<8x256xf32>
    %922 = vector.extract_strided_slice %917 {offsets = [8, 0], sizes = [8, 256], strides = [1, 1]} : vector<16x256xf32> to vector<8x256xf32>
    %923 = arith.mulf %922, %919 : vector<8x256xf32>
    %c134 = arith.constant 134 : index
    %924 = memref.load %arg2[%c134] : memref<252xf32, #tpu.memory_space<smem>>
    %925 = vector.broadcast %924 : f32 to vector<8x256xf32>
    %926 = arith.mulf %925, %921 : vector<8x256xf32>
    %c143 = arith.constant 143 : index
    %927 = memref.load %arg2[%c143] : memref<252xf32, #tpu.memory_space<smem>>
    %928 = vector.broadcast %927 : f32 to vector<8x256xf32>
    %929 = arith.mulf %928, %923 : vector<8x256xf32>
    %930 = arith.addf %926, %929 : vector<8x256xf32>
    %931 = arith.addf %862, %930 : vector<8x256xf32>
    %c152 = arith.constant 152 : index
    %932 = memref.load %arg2[%c152] : memref<252xf32, #tpu.memory_space<smem>>
    %933 = vector.broadcast %932 : f32 to vector<8x256xf32>
    %934 = arith.mulf %933, %921 : vector<8x256xf32>
    %c161 = arith.constant 161 : index
    %935 = memref.load %arg2[%c161] : memref<252xf32, #tpu.memory_space<smem>>
    %936 = vector.broadcast %935 : f32 to vector<8x256xf32>
    %937 = arith.mulf %936, %923 : vector<8x256xf32>
    %938 = arith.addf %934, %937 : vector<8x256xf32>
    %939 = arith.addf %870, %938 : vector<8x256xf32>
    %940 = arith.addf %885, %908 : vector<8x256xf32>
    %941 = arith.addf %940, %931 : vector<8x256xf32>
    %c8_50 = arith.constant 8 : index
    %942 = memref.load %arg3[%c8_50] : memref<15xf32, #tpu.memory_space<smem>>
    %943 = vector.broadcast %942 : f32 to vector<8x256xf32>
    %944 = arith.addf %941, %943 : vector<8x256xf32>
    %cst_51 = arith.constant 0.000000e+00 : f32
    %945 = vector.broadcast %cst_51 : f32 to vector<8x256xf32>
    %946 = arith.maximumf %944, %945 : vector<8x256xf32>
    %947 = arith.addf %893, %916 : vector<8x256xf32>
    %948 = arith.addf %947, %939 : vector<8x256xf32>
    %c9_52 = arith.constant 9 : index
    %949 = memref.load %arg3[%c9_52] : memref<15xf32, #tpu.memory_space<smem>>
    %950 = vector.broadcast %949 : f32 to vector<8x256xf32>
    %951 = arith.addf %948, %950 : vector<8x256xf32>
    %cst_53 = arith.constant 0.000000e+00 : f32
    %952 = vector.broadcast %cst_53 : f32 to vector<8x256xf32>
    %953 = arith.maximumf %951, %952 : vector<8x256xf32>
    %954 = tpu.concatenate %946, %953 in 0 : vector<8x256xf32>, vector<8x256xf32> -> vector<16x256xf32>
    %c17_i32_54 = arith.constant 17 : i32
    %955 = tpu.dynamic_rotate %954 by %c17_i32_54 dim 1 : vector<16x256xf32>, i32 -> vector<16x256xf32>
    %956 = vector.extract_strided_slice %0 {offsets = [0, 0, 0], sizes = [1, 8, 256], strides = [1, 1, 1]} : vector<9x8x256xf32> to vector<1x8x256xf32>
    %957 = vector.shape_cast %956 : vector<1x8x256xf32> to vector<8x256xf32>
    %958 = vector.extract_strided_slice %955 {offsets = [0, 0], sizes = [8, 256], strides = [1, 1]} : vector<16x256xf32> to vector<8x256xf32>
    %959 = arith.mulf %958, %957 : vector<8x256xf32>
    %960 = vector.extract_strided_slice %955 {offsets = [8, 0], sizes = [8, 256], strides = [1, 1]} : vector<16x256xf32> to vector<8x256xf32>
    %961 = arith.mulf %960, %957 : vector<8x256xf32>
    %c162 = arith.constant 162 : index
    %962 = memref.load %arg2[%c162] : memref<252xf32, #tpu.memory_space<smem>>
    %963 = vector.broadcast %962 : f32 to vector<8x256xf32>
    %964 = arith.mulf %963, %959 : vector<8x256xf32>
    %c171 = arith.constant 171 : index
    %965 = memref.load %arg2[%c171] : memref<252xf32, #tpu.memory_space<smem>>
    %966 = vector.broadcast %965 : f32 to vector<8x256xf32>
    %967 = arith.mulf %966, %961 : vector<8x256xf32>
    %968 = arith.addf %964, %967 : vector<8x256xf32>
    %c180 = arith.constant 180 : index
    %969 = memref.load %arg2[%c180] : memref<252xf32, #tpu.memory_space<smem>>
    %970 = vector.broadcast %969 : f32 to vector<8x256xf32>
    %971 = arith.mulf %970, %959 : vector<8x256xf32>
    %c189 = arith.constant 189 : index
    %972 = memref.load %arg2[%c189] : memref<252xf32, #tpu.memory_space<smem>>
    %973 = vector.broadcast %972 : f32 to vector<8x256xf32>
    %974 = arith.mulf %973, %961 : vector<8x256xf32>
    %975 = arith.addf %971, %974 : vector<8x256xf32>
    %c16_i32_55 = arith.constant 16 : i32
    %976 = tpu.dynamic_rotate %954 by %c16_i32_55 dim 1 : vector<16x256xf32>, i32 -> vector<16x256xf32>
    %977 = vector.extract_strided_slice %0 {offsets = [1, 0, 0], sizes = [1, 8, 256], strides = [1, 1, 1]} : vector<9x8x256xf32> to vector<1x8x256xf32>
    %978 = vector.shape_cast %977 : vector<1x8x256xf32> to vector<8x256xf32>
    %979 = vector.extract_strided_slice %976 {offsets = [0, 0], sizes = [8, 256], strides = [1, 1]} : vector<16x256xf32> to vector<8x256xf32>
    %980 = arith.mulf %979, %978 : vector<8x256xf32>
    %981 = vector.extract_strided_slice %976 {offsets = [8, 0], sizes = [8, 256], strides = [1, 1]} : vector<16x256xf32> to vector<8x256xf32>
    %982 = arith.mulf %981, %978 : vector<8x256xf32>
    %c163 = arith.constant 163 : index
    %983 = memref.load %arg2[%c163] : memref<252xf32, #tpu.memory_space<smem>>
    %984 = vector.broadcast %983 : f32 to vector<8x256xf32>
    %985 = arith.mulf %984, %980 : vector<8x256xf32>
    %c172 = arith.constant 172 : index
    %986 = memref.load %arg2[%c172] : memref<252xf32, #tpu.memory_space<smem>>
    %987 = vector.broadcast %986 : f32 to vector<8x256xf32>
    %988 = arith.mulf %987, %982 : vector<8x256xf32>
    %989 = arith.addf %985, %988 : vector<8x256xf32>
    %c181 = arith.constant 181 : index
    %990 = memref.load %arg2[%c181] : memref<252xf32, #tpu.memory_space<smem>>
    %991 = vector.broadcast %990 : f32 to vector<8x256xf32>
    %992 = arith.mulf %991, %980 : vector<8x256xf32>
    %c190 = arith.constant 190 : index
    %993 = memref.load %arg2[%c190] : memref<252xf32, #tpu.memory_space<smem>>
    %994 = vector.broadcast %993 : f32 to vector<8x256xf32>
    %995 = arith.mulf %994, %982 : vector<8x256xf32>
    %996 = arith.addf %992, %995 : vector<8x256xf32>
    %c15_i32_56 = arith.constant 15 : i32
    %997 = tpu.dynamic_rotate %954 by %c15_i32_56 dim 1 : vector<16x256xf32>, i32 -> vector<16x256xf32>
    %998 = vector.extract_strided_slice %0 {offsets = [2, 0, 0], sizes = [1, 8, 256], strides = [1, 1, 1]} : vector<9x8x256xf32> to vector<1x8x256xf32>
    %999 = vector.shape_cast %998 : vector<1x8x256xf32> to vector<8x256xf32>
    %1000 = vector.extract_strided_slice %997 {offsets = [0, 0], sizes = [8, 256], strides = [1, 1]} : vector<16x256xf32> to vector<8x256xf32>
    %1001 = arith.mulf %1000, %999 : vector<8x256xf32>
    %1002 = vector.extract_strided_slice %997 {offsets = [8, 0], sizes = [8, 256], strides = [1, 1]} : vector<16x256xf32> to vector<8x256xf32>
    %1003 = arith.mulf %1002, %999 : vector<8x256xf32>
    %c164 = arith.constant 164 : index
    %1004 = memref.load %arg2[%c164] : memref<252xf32, #tpu.memory_space<smem>>
    %1005 = vector.broadcast %1004 : f32 to vector<8x256xf32>
    %1006 = arith.mulf %1005, %1001 : vector<8x256xf32>
    %c173 = arith.constant 173 : index
    %1007 = memref.load %arg2[%c173] : memref<252xf32, #tpu.memory_space<smem>>
    %1008 = vector.broadcast %1007 : f32 to vector<8x256xf32>
    %1009 = arith.mulf %1008, %1003 : vector<8x256xf32>
    %1010 = arith.addf %1006, %1009 : vector<8x256xf32>
    %c182 = arith.constant 182 : index
    %1011 = memref.load %arg2[%c182] : memref<252xf32, #tpu.memory_space<smem>>
    %1012 = vector.broadcast %1011 : f32 to vector<8x256xf32>
    %1013 = arith.mulf %1012, %1001 : vector<8x256xf32>
    %c191 = arith.constant 191 : index
    %1014 = memref.load %arg2[%c191] : memref<252xf32, #tpu.memory_space<smem>>
    %1015 = vector.broadcast %1014 : f32 to vector<8x256xf32>
    %1016 = arith.mulf %1015, %1003 : vector<8x256xf32>
    %1017 = arith.addf %1013, %1016 : vector<8x256xf32>
    %c1_i32_57 = arith.constant 1 : i32
    %1018 = tpu.dynamic_rotate %954 by %c1_i32_57 dim 1 : vector<16x256xf32>, i32 -> vector<16x256xf32>
    %1019 = vector.extract_strided_slice %0 {offsets = [3, 0, 0], sizes = [1, 8, 256], strides = [1, 1, 1]} : vector<9x8x256xf32> to vector<1x8x256xf32>
    %1020 = vector.shape_cast %1019 : vector<1x8x256xf32> to vector<8x256xf32>
    %1021 = vector.extract_strided_slice %1018 {offsets = [0, 0], sizes = [8, 256], strides = [1, 1]} : vector<16x256xf32> to vector<8x256xf32>
    %1022 = arith.mulf %1021, %1020 : vector<8x256xf32>
    %1023 = vector.extract_strided_slice %1018 {offsets = [8, 0], sizes = [8, 256], strides = [1, 1]} : vector<16x256xf32> to vector<8x256xf32>
    %1024 = arith.mulf %1023, %1020 : vector<8x256xf32>
    %c165 = arith.constant 165 : index
    %1025 = memref.load %arg2[%c165] : memref<252xf32, #tpu.memory_space<smem>>
    %1026 = vector.broadcast %1025 : f32 to vector<8x256xf32>
    %1027 = arith.mulf %1026, %1022 : vector<8x256xf32>
    %c174 = arith.constant 174 : index
    %1028 = memref.load %arg2[%c174] : memref<252xf32, #tpu.memory_space<smem>>
    %1029 = vector.broadcast %1028 : f32 to vector<8x256xf32>
    %1030 = arith.mulf %1029, %1024 : vector<8x256xf32>
    %1031 = arith.addf %1027, %1030 : vector<8x256xf32>
    %1032 = arith.addf %968, %1031 : vector<8x256xf32>
    %c183 = arith.constant 183 : index
    %1033 = memref.load %arg2[%c183] : memref<252xf32, #tpu.memory_space<smem>>
    %1034 = vector.broadcast %1033 : f32 to vector<8x256xf32>
    %1035 = arith.mulf %1034, %1022 : vector<8x256xf32>
    %c192 = arith.constant 192 : index
    %1036 = memref.load %arg2[%c192] : memref<252xf32, #tpu.memory_space<smem>>
    %1037 = vector.broadcast %1036 : f32 to vector<8x256xf32>
    %1038 = arith.mulf %1037, %1024 : vector<8x256xf32>
    %1039 = arith.addf %1035, %1038 : vector<8x256xf32>
    %1040 = arith.addf %975, %1039 : vector<8x256xf32>
    %1041 = vector.extract_strided_slice %954 {offsets = [0, 0], sizes = [8, 256], strides = [1, 1]} : vector<16x256xf32> to vector<8x256xf32>
    %1042 = vector.extract_strided_slice %954 {offsets = [8, 0], sizes = [8, 256], strides = [1, 1]} : vector<16x256xf32> to vector<8x256xf32>
    %c166 = arith.constant 166 : index
    %1043 = memref.load %arg2[%c166] : memref<252xf32, #tpu.memory_space<smem>>
    %1044 = vector.broadcast %1043 : f32 to vector<8x256xf32>
    %1045 = arith.mulf %1044, %1041 : vector<8x256xf32>
    %c175 = arith.constant 175 : index
    %1046 = memref.load %arg2[%c175] : memref<252xf32, #tpu.memory_space<smem>>
    %1047 = vector.broadcast %1046 : f32 to vector<8x256xf32>
    %1048 = arith.mulf %1047, %1042 : vector<8x256xf32>
    %1049 = arith.addf %1045, %1048 : vector<8x256xf32>
    %1050 = arith.addf %989, %1049 : vector<8x256xf32>
    %c184 = arith.constant 184 : index
    %1051 = memref.load %arg2[%c184] : memref<252xf32, #tpu.memory_space<smem>>
    %1052 = vector.broadcast %1051 : f32 to vector<8x256xf32>
    %1053 = arith.mulf %1052, %1041 : vector<8x256xf32>
    %c193 = arith.constant 193 : index
    %1054 = memref.load %arg2[%c193] : memref<252xf32, #tpu.memory_space<smem>>
    %1055 = vector.broadcast %1054 : f32 to vector<8x256xf32>
    %1056 = arith.mulf %1055, %1042 : vector<8x256xf32>
    %1057 = arith.addf %1053, %1056 : vector<8x256xf32>
    %1058 = arith.addf %996, %1057 : vector<8x256xf32>
    %c255_i32_58 = arith.constant 255 : i32
    %1059 = tpu.dynamic_rotate %954 by %c255_i32_58 dim 1 : vector<16x256xf32>, i32 -> vector<16x256xf32>
    %1060 = vector.extract_strided_slice %0 {offsets = [5, 0, 0], sizes = [1, 8, 256], strides = [1, 1, 1]} : vector<9x8x256xf32> to vector<1x8x256xf32>
    %1061 = vector.shape_cast %1060 : vector<1x8x256xf32> to vector<8x256xf32>
    %1062 = vector.extract_strided_slice %1059 {offsets = [0, 0], sizes = [8, 256], strides = [1, 1]} : vector<16x256xf32> to vector<8x256xf32>
    %1063 = arith.mulf %1062, %1061 : vector<8x256xf32>
    %1064 = vector.extract_strided_slice %1059 {offsets = [8, 0], sizes = [8, 256], strides = [1, 1]} : vector<16x256xf32> to vector<8x256xf32>
    %1065 = arith.mulf %1064, %1061 : vector<8x256xf32>
    %c167 = arith.constant 167 : index
    %1066 = memref.load %arg2[%c167] : memref<252xf32, #tpu.memory_space<smem>>
    %1067 = vector.broadcast %1066 : f32 to vector<8x256xf32>
    %1068 = arith.mulf %1067, %1063 : vector<8x256xf32>
    %c176 = arith.constant 176 : index
    %1069 = memref.load %arg2[%c176] : memref<252xf32, #tpu.memory_space<smem>>
    %1070 = vector.broadcast %1069 : f32 to vector<8x256xf32>
    %1071 = arith.mulf %1070, %1065 : vector<8x256xf32>
    %1072 = arith.addf %1068, %1071 : vector<8x256xf32>
    %1073 = arith.addf %1010, %1072 : vector<8x256xf32>
    %c185 = arith.constant 185 : index
    %1074 = memref.load %arg2[%c185] : memref<252xf32, #tpu.memory_space<smem>>
    %1075 = vector.broadcast %1074 : f32 to vector<8x256xf32>
    %1076 = arith.mulf %1075, %1063 : vector<8x256xf32>
    %c194 = arith.constant 194 : index
    %1077 = memref.load %arg2[%c194] : memref<252xf32, #tpu.memory_space<smem>>
    %1078 = vector.broadcast %1077 : f32 to vector<8x256xf32>
    %1079 = arith.mulf %1078, %1065 : vector<8x256xf32>
    %1080 = arith.addf %1076, %1079 : vector<8x256xf32>
    %1081 = arith.addf %1017, %1080 : vector<8x256xf32>
    %c241_i32_59 = arith.constant 241 : i32
    %1082 = tpu.dynamic_rotate %954 by %c241_i32_59 dim 1 : vector<16x256xf32>, i32 -> vector<16x256xf32>
    %1083 = vector.extract_strided_slice %0 {offsets = [6, 0, 0], sizes = [1, 8, 256], strides = [1, 1, 1]} : vector<9x8x256xf32> to vector<1x8x256xf32>
    %1084 = vector.shape_cast %1083 : vector<1x8x256xf32> to vector<8x256xf32>
    %1085 = vector.extract_strided_slice %1082 {offsets = [0, 0], sizes = [8, 256], strides = [1, 1]} : vector<16x256xf32> to vector<8x256xf32>
    %1086 = arith.mulf %1085, %1084 : vector<8x256xf32>
    %1087 = vector.extract_strided_slice %1082 {offsets = [8, 0], sizes = [8, 256], strides = [1, 1]} : vector<16x256xf32> to vector<8x256xf32>
    %1088 = arith.mulf %1087, %1084 : vector<8x256xf32>
    %c168 = arith.constant 168 : index
    %1089 = memref.load %arg2[%c168] : memref<252xf32, #tpu.memory_space<smem>>
    %1090 = vector.broadcast %1089 : f32 to vector<8x256xf32>
    %1091 = arith.mulf %1090, %1086 : vector<8x256xf32>
    %c177 = arith.constant 177 : index
    %1092 = memref.load %arg2[%c177] : memref<252xf32, #tpu.memory_space<smem>>
    %1093 = vector.broadcast %1092 : f32 to vector<8x256xf32>
    %1094 = arith.mulf %1093, %1088 : vector<8x256xf32>
    %1095 = arith.addf %1091, %1094 : vector<8x256xf32>
    %1096 = arith.addf %1032, %1095 : vector<8x256xf32>
    %c186 = arith.constant 186 : index
    %1097 = memref.load %arg2[%c186] : memref<252xf32, #tpu.memory_space<smem>>
    %1098 = vector.broadcast %1097 : f32 to vector<8x256xf32>
    %1099 = arith.mulf %1098, %1086 : vector<8x256xf32>
    %c195 = arith.constant 195 : index
    %1100 = memref.load %arg2[%c195] : memref<252xf32, #tpu.memory_space<smem>>
    %1101 = vector.broadcast %1100 : f32 to vector<8x256xf32>
    %1102 = arith.mulf %1101, %1088 : vector<8x256xf32>
    %1103 = arith.addf %1099, %1102 : vector<8x256xf32>
    %1104 = arith.addf %1040, %1103 : vector<8x256xf32>
    %c240_i32_60 = arith.constant 240 : i32
    %1105 = tpu.dynamic_rotate %954 by %c240_i32_60 dim 1 : vector<16x256xf32>, i32 -> vector<16x256xf32>
    %1106 = vector.extract_strided_slice %0 {offsets = [7, 0, 0], sizes = [1, 8, 256], strides = [1, 1, 1]} : vector<9x8x256xf32> to vector<1x8x256xf32>
    %1107 = vector.shape_cast %1106 : vector<1x8x256xf32> to vector<8x256xf32>
    %1108 = vector.extract_strided_slice %1105 {offsets = [0, 0], sizes = [8, 256], strides = [1, 1]} : vector<16x256xf32> to vector<8x256xf32>
    %1109 = arith.mulf %1108, %1107 : vector<8x256xf32>
    %1110 = vector.extract_strided_slice %1105 {offsets = [8, 0], sizes = [8, 256], strides = [1, 1]} : vector<16x256xf32> to vector<8x256xf32>
    %1111 = arith.mulf %1110, %1107 : vector<8x256xf32>
    %c169 = arith.constant 169 : index
    %1112 = memref.load %arg2[%c169] : memref<252xf32, #tpu.memory_space<smem>>
    %1113 = vector.broadcast %1112 : f32 to vector<8x256xf32>
    %1114 = arith.mulf %1113, %1109 : vector<8x256xf32>
    %c178 = arith.constant 178 : index
    %1115 = memref.load %arg2[%c178] : memref<252xf32, #tpu.memory_space<smem>>
    %1116 = vector.broadcast %1115 : f32 to vector<8x256xf32>
    %1117 = arith.mulf %1116, %1111 : vector<8x256xf32>
    %1118 = arith.addf %1114, %1117 : vector<8x256xf32>
    %1119 = arith.addf %1050, %1118 : vector<8x256xf32>
    %c187 = arith.constant 187 : index
    %1120 = memref.load %arg2[%c187] : memref<252xf32, #tpu.memory_space<smem>>
    %1121 = vector.broadcast %1120 : f32 to vector<8x256xf32>
    %1122 = arith.mulf %1121, %1109 : vector<8x256xf32>
    %c196 = arith.constant 196 : index
    %1123 = memref.load %arg2[%c196] : memref<252xf32, #tpu.memory_space<smem>>
    %1124 = vector.broadcast %1123 : f32 to vector<8x256xf32>
    %1125 = arith.mulf %1124, %1111 : vector<8x256xf32>
    %1126 = arith.addf %1122, %1125 : vector<8x256xf32>
    %1127 = arith.addf %1058, %1126 : vector<8x256xf32>
    %c239_i32_61 = arith.constant 239 : i32
    %1128 = tpu.dynamic_rotate %954 by %c239_i32_61 dim 1 : vector<16x256xf32>, i32 -> vector<16x256xf32>
    %1129 = vector.extract_strided_slice %0 {offsets = [8, 0, 0], sizes = [1, 8, 256], strides = [1, 1, 1]} : vector<9x8x256xf32> to vector<1x8x256xf32>
    %1130 = vector.shape_cast %1129 : vector<1x8x256xf32> to vector<8x256xf32>
    %1131 = vector.extract_strided_slice %1128 {offsets = [0, 0], sizes = [8, 256], strides = [1, 1]} : vector<16x256xf32> to vector<8x256xf32>
    %1132 = arith.mulf %1131, %1130 : vector<8x256xf32>
    %1133 = vector.extract_strided_slice %1128 {offsets = [8, 0], sizes = [8, 256], strides = [1, 1]} : vector<16x256xf32> to vector<8x256xf32>
    %1134 = arith.mulf %1133, %1130 : vector<8x256xf32>
    %c170 = arith.constant 170 : index
    %1135 = memref.load %arg2[%c170] : memref<252xf32, #tpu.memory_space<smem>>
    %1136 = vector.broadcast %1135 : f32 to vector<8x256xf32>
    %1137 = arith.mulf %1136, %1132 : vector<8x256xf32>
    %c179 = arith.constant 179 : index
    %1138 = memref.load %arg2[%c179] : memref<252xf32, #tpu.memory_space<smem>>
    %1139 = vector.broadcast %1138 : f32 to vector<8x256xf32>
    %1140 = arith.mulf %1139, %1134 : vector<8x256xf32>
    %1141 = arith.addf %1137, %1140 : vector<8x256xf32>
    %1142 = arith.addf %1073, %1141 : vector<8x256xf32>
    %c188 = arith.constant 188 : index
    %1143 = memref.load %arg2[%c188] : memref<252xf32, #tpu.memory_space<smem>>
    %1144 = vector.broadcast %1143 : f32 to vector<8x256xf32>
    %1145 = arith.mulf %1144, %1132 : vector<8x256xf32>
    %c197 = arith.constant 197 : index
    %1146 = memref.load %arg2[%c197] : memref<252xf32, #tpu.memory_space<smem>>
    %1147 = vector.broadcast %1146 : f32 to vector<8x256xf32>
    %1148 = arith.mulf %1147, %1134 : vector<8x256xf32>
    %1149 = arith.addf %1145, %1148 : vector<8x256xf32>
    %1150 = arith.addf %1081, %1149 : vector<8x256xf32>
    %1151 = arith.addf %1096, %1119 : vector<8x256xf32>
    %1152 = arith.addf %1151, %1142 : vector<8x256xf32>
    %c10_62 = arith.constant 10 : index
    %1153 = memref.load %arg3[%c10_62] : memref<15xf32, #tpu.memory_space<smem>>
    %1154 = vector.broadcast %1153 : f32 to vector<8x256xf32>
    %1155 = arith.addf %1152, %1154 : vector<8x256xf32>
    %cst_63 = arith.constant 0.000000e+00 : f32
    %1156 = vector.broadcast %cst_63 : f32 to vector<8x256xf32>
    %1157 = arith.maximumf %1155, %1156 : vector<8x256xf32>
    %1158 = arith.addf %1104, %1127 : vector<8x256xf32>
    %1159 = arith.addf %1158, %1150 : vector<8x256xf32>
    %c11_64 = arith.constant 11 : index
    %1160 = memref.load %arg3[%c11_64] : memref<15xf32, #tpu.memory_space<smem>>
    %1161 = vector.broadcast %1160 : f32 to vector<8x256xf32>
    %1162 = arith.addf %1159, %1161 : vector<8x256xf32>
    %cst_65 = arith.constant 0.000000e+00 : f32
    %1163 = vector.broadcast %cst_65 : f32 to vector<8x256xf32>
    %1164 = arith.maximumf %1162, %1163 : vector<8x256xf32>
    %1165 = tpu.concatenate %1157, %1164 in 0 : vector<8x256xf32>, vector<8x256xf32> -> vector<16x256xf32>
    %c17_i32_66 = arith.constant 17 : i32
    %1166 = tpu.dynamic_rotate %1165 by %c17_i32_66 dim 1 : vector<16x256xf32>, i32 -> vector<16x256xf32>
    %1167 = vector.extract_strided_slice %0 {offsets = [0, 0, 0], sizes = [1, 8, 256], strides = [1, 1, 1]} : vector<9x8x256xf32> to vector<1x8x256xf32>
    %1168 = vector.shape_cast %1167 : vector<1x8x256xf32> to vector<8x256xf32>
    %1169 = vector.extract_strided_slice %1166 {offsets = [0, 0], sizes = [8, 256], strides = [1, 1]} : vector<16x256xf32> to vector<8x256xf32>
    %1170 = arith.mulf %1169, %1168 : vector<8x256xf32>
    %1171 = vector.extract_strided_slice %1166 {offsets = [8, 0], sizes = [8, 256], strides = [1, 1]} : vector<16x256xf32> to vector<8x256xf32>
    %1172 = arith.mulf %1171, %1168 : vector<8x256xf32>
    %c198 = arith.constant 198 : index
    %1173 = memref.load %arg2[%c198] : memref<252xf32, #tpu.memory_space<smem>>
    %1174 = vector.broadcast %1173 : f32 to vector<8x256xf32>
    %1175 = arith.mulf %1174, %1170 : vector<8x256xf32>
    %c207 = arith.constant 207 : index
    %1176 = memref.load %arg2[%c207] : memref<252xf32, #tpu.memory_space<smem>>
    %1177 = vector.broadcast %1176 : f32 to vector<8x256xf32>
    %1178 = arith.mulf %1177, %1172 : vector<8x256xf32>
    %1179 = arith.addf %1175, %1178 : vector<8x256xf32>
    %c216 = arith.constant 216 : index
    %1180 = memref.load %arg2[%c216] : memref<252xf32, #tpu.memory_space<smem>>
    %1181 = vector.broadcast %1180 : f32 to vector<8x256xf32>
    %1182 = arith.mulf %1181, %1170 : vector<8x256xf32>
    %c225 = arith.constant 225 : index
    %1183 = memref.load %arg2[%c225] : memref<252xf32, #tpu.memory_space<smem>>
    %1184 = vector.broadcast %1183 : f32 to vector<8x256xf32>
    %1185 = arith.mulf %1184, %1172 : vector<8x256xf32>
    %1186 = arith.addf %1182, %1185 : vector<8x256xf32>
    %c16_i32_67 = arith.constant 16 : i32
    %1187 = tpu.dynamic_rotate %1165 by %c16_i32_67 dim 1 : vector<16x256xf32>, i32 -> vector<16x256xf32>
    %1188 = vector.extract_strided_slice %0 {offsets = [1, 0, 0], sizes = [1, 8, 256], strides = [1, 1, 1]} : vector<9x8x256xf32> to vector<1x8x256xf32>
    %1189 = vector.shape_cast %1188 : vector<1x8x256xf32> to vector<8x256xf32>
    %1190 = vector.extract_strided_slice %1187 {offsets = [0, 0], sizes = [8, 256], strides = [1, 1]} : vector<16x256xf32> to vector<8x256xf32>
    %1191 = arith.mulf %1190, %1189 : vector<8x256xf32>
    %1192 = vector.extract_strided_slice %1187 {offsets = [8, 0], sizes = [8, 256], strides = [1, 1]} : vector<16x256xf32> to vector<8x256xf32>
    %1193 = arith.mulf %1192, %1189 : vector<8x256xf32>
    %c199 = arith.constant 199 : index
    %1194 = memref.load %arg2[%c199] : memref<252xf32, #tpu.memory_space<smem>>
    %1195 = vector.broadcast %1194 : f32 to vector<8x256xf32>
    %1196 = arith.mulf %1195, %1191 : vector<8x256xf32>
    %c208 = arith.constant 208 : index
    %1197 = memref.load %arg2[%c208] : memref<252xf32, #tpu.memory_space<smem>>
    %1198 = vector.broadcast %1197 : f32 to vector<8x256xf32>
    %1199 = arith.mulf %1198, %1193 : vector<8x256xf32>
    %1200 = arith.addf %1196, %1199 : vector<8x256xf32>
    %c217 = arith.constant 217 : index
    %1201 = memref.load %arg2[%c217] : memref<252xf32, #tpu.memory_space<smem>>
    %1202 = vector.broadcast %1201 : f32 to vector<8x256xf32>
    %1203 = arith.mulf %1202, %1191 : vector<8x256xf32>
    %c226 = arith.constant 226 : index
    %1204 = memref.load %arg2[%c226] : memref<252xf32, #tpu.memory_space<smem>>
    %1205 = vector.broadcast %1204 : f32 to vector<8x256xf32>
    %1206 = arith.mulf %1205, %1193 : vector<8x256xf32>
    %1207 = arith.addf %1203, %1206 : vector<8x256xf32>
    %c15_i32_68 = arith.constant 15 : i32
    %1208 = tpu.dynamic_rotate %1165 by %c15_i32_68 dim 1 : vector<16x256xf32>, i32 -> vector<16x256xf32>
    %1209 = vector.extract_strided_slice %0 {offsets = [2, 0, 0], sizes = [1, 8, 256], strides = [1, 1, 1]} : vector<9x8x256xf32> to vector<1x8x256xf32>
    %1210 = vector.shape_cast %1209 : vector<1x8x256xf32> to vector<8x256xf32>
    %1211 = vector.extract_strided_slice %1208 {offsets = [0, 0], sizes = [8, 256], strides = [1, 1]} : vector<16x256xf32> to vector<8x256xf32>
    %1212 = arith.mulf %1211, %1210 : vector<8x256xf32>
    %1213 = vector.extract_strided_slice %1208 {offsets = [8, 0], sizes = [8, 256], strides = [1, 1]} : vector<16x256xf32> to vector<8x256xf32>
    %1214 = arith.mulf %1213, %1210 : vector<8x256xf32>
    %c200 = arith.constant 200 : index
    %1215 = memref.load %arg2[%c200] : memref<252xf32, #tpu.memory_space<smem>>
    %1216 = vector.broadcast %1215 : f32 to vector<8x256xf32>
    %1217 = arith.mulf %1216, %1212 : vector<8x256xf32>
    %c209 = arith.constant 209 : index
    %1218 = memref.load %arg2[%c209] : memref<252xf32, #tpu.memory_space<smem>>
    %1219 = vector.broadcast %1218 : f32 to vector<8x256xf32>
    %1220 = arith.mulf %1219, %1214 : vector<8x256xf32>
    %1221 = arith.addf %1217, %1220 : vector<8x256xf32>
    %c218 = arith.constant 218 : index
    %1222 = memref.load %arg2[%c218] : memref<252xf32, #tpu.memory_space<smem>>
    %1223 = vector.broadcast %1222 : f32 to vector<8x256xf32>
    %1224 = arith.mulf %1223, %1212 : vector<8x256xf32>
    %c227 = arith.constant 227 : index
    %1225 = memref.load %arg2[%c227] : memref<252xf32, #tpu.memory_space<smem>>
    %1226 = vector.broadcast %1225 : f32 to vector<8x256xf32>
    %1227 = arith.mulf %1226, %1214 : vector<8x256xf32>
    %1228 = arith.addf %1224, %1227 : vector<8x256xf32>
    %c1_i32_69 = arith.constant 1 : i32
    %1229 = tpu.dynamic_rotate %1165 by %c1_i32_69 dim 1 : vector<16x256xf32>, i32 -> vector<16x256xf32>
    %1230 = vector.extract_strided_slice %0 {offsets = [3, 0, 0], sizes = [1, 8, 256], strides = [1, 1, 1]} : vector<9x8x256xf32> to vector<1x8x256xf32>
    %1231 = vector.shape_cast %1230 : vector<1x8x256xf32> to vector<8x256xf32>
    %1232 = vector.extract_strided_slice %1229 {offsets = [0, 0], sizes = [8, 256], strides = [1, 1]} : vector<16x256xf32> to vector<8x256xf32>
    %1233 = arith.mulf %1232, %1231 : vector<8x256xf32>
    %1234 = vector.extract_strided_slice %1229 {offsets = [8, 0], sizes = [8, 256], strides = [1, 1]} : vector<16x256xf32> to vector<8x256xf32>
    %1235 = arith.mulf %1234, %1231 : vector<8x256xf32>
    %c201 = arith.constant 201 : index
    %1236 = memref.load %arg2[%c201] : memref<252xf32, #tpu.memory_space<smem>>
    %1237 = vector.broadcast %1236 : f32 to vector<8x256xf32>
    %1238 = arith.mulf %1237, %1233 : vector<8x256xf32>
    %c210 = arith.constant 210 : index
    %1239 = memref.load %arg2[%c210] : memref<252xf32, #tpu.memory_space<smem>>
    %1240 = vector.broadcast %1239 : f32 to vector<8x256xf32>
    %1241 = arith.mulf %1240, %1235 : vector<8x256xf32>
    %1242 = arith.addf %1238, %1241 : vector<8x256xf32>
    %1243 = arith.addf %1179, %1242 : vector<8x256xf32>
    %c219 = arith.constant 219 : index
    %1244 = memref.load %arg2[%c219] : memref<252xf32, #tpu.memory_space<smem>>
    %1245 = vector.broadcast %1244 : f32 to vector<8x256xf32>
    %1246 = arith.mulf %1245, %1233 : vector<8x256xf32>
    %c228 = arith.constant 228 : index
    %1247 = memref.load %arg2[%c228] : memref<252xf32, #tpu.memory_space<smem>>
    %1248 = vector.broadcast %1247 : f32 to vector<8x256xf32>
    %1249 = arith.mulf %1248, %1235 : vector<8x256xf32>
    %1250 = arith.addf %1246, %1249 : vector<8x256xf32>
    %1251 = arith.addf %1186, %1250 : vector<8x256xf32>
    %1252 = vector.extract_strided_slice %1165 {offsets = [0, 0], sizes = [8, 256], strides = [1, 1]} : vector<16x256xf32> to vector<8x256xf32>
    %1253 = vector.extract_strided_slice %1165 {offsets = [8, 0], sizes = [8, 256], strides = [1, 1]} : vector<16x256xf32> to vector<8x256xf32>
    %c202 = arith.constant 202 : index
    %1254 = memref.load %arg2[%c202] : memref<252xf32, #tpu.memory_space<smem>>
    %1255 = vector.broadcast %1254 : f32 to vector<8x256xf32>
    %1256 = arith.mulf %1255, %1252 : vector<8x256xf32>
    %c211 = arith.constant 211 : index
    %1257 = memref.load %arg2[%c211] : memref<252xf32, #tpu.memory_space<smem>>
    %1258 = vector.broadcast %1257 : f32 to vector<8x256xf32>
    %1259 = arith.mulf %1258, %1253 : vector<8x256xf32>
    %1260 = arith.addf %1256, %1259 : vector<8x256xf32>
    %1261 = arith.addf %1200, %1260 : vector<8x256xf32>
    %c220 = arith.constant 220 : index
    %1262 = memref.load %arg2[%c220] : memref<252xf32, #tpu.memory_space<smem>>
    %1263 = vector.broadcast %1262 : f32 to vector<8x256xf32>
    %1264 = arith.mulf %1263, %1252 : vector<8x256xf32>
    %c229 = arith.constant 229 : index
    %1265 = memref.load %arg2[%c229] : memref<252xf32, #tpu.memory_space<smem>>
    %1266 = vector.broadcast %1265 : f32 to vector<8x256xf32>
    %1267 = arith.mulf %1266, %1253 : vector<8x256xf32>
    %1268 = arith.addf %1264, %1267 : vector<8x256xf32>
    %1269 = arith.addf %1207, %1268 : vector<8x256xf32>
    %c255_i32_70 = arith.constant 255 : i32
    %1270 = tpu.dynamic_rotate %1165 by %c255_i32_70 dim 1 : vector<16x256xf32>, i32 -> vector<16x256xf32>
    %1271 = vector.extract_strided_slice %0 {offsets = [5, 0, 0], sizes = [1, 8, 256], strides = [1, 1, 1]} : vector<9x8x256xf32> to vector<1x8x256xf32>
    %1272 = vector.shape_cast %1271 : vector<1x8x256xf32> to vector<8x256xf32>
    %1273 = vector.extract_strided_slice %1270 {offsets = [0, 0], sizes = [8, 256], strides = [1, 1]} : vector<16x256xf32> to vector<8x256xf32>
    %1274 = arith.mulf %1273, %1272 : vector<8x256xf32>
    %1275 = vector.extract_strided_slice %1270 {offsets = [8, 0], sizes = [8, 256], strides = [1, 1]} : vector<16x256xf32> to vector<8x256xf32>
    %1276 = arith.mulf %1275, %1272 : vector<8x256xf32>
    %c203 = arith.constant 203 : index
    %1277 = memref.load %arg2[%c203] : memref<252xf32, #tpu.memory_space<smem>>
    %1278 = vector.broadcast %1277 : f32 to vector<8x256xf32>
    %1279 = arith.mulf %1278, %1274 : vector<8x256xf32>
    %c212 = arith.constant 212 : index
    %1280 = memref.load %arg2[%c212] : memref<252xf32, #tpu.memory_space<smem>>
    %1281 = vector.broadcast %1280 : f32 to vector<8x256xf32>
    %1282 = arith.mulf %1281, %1276 : vector<8x256xf32>
    %1283 = arith.addf %1279, %1282 : vector<8x256xf32>
    %1284 = arith.addf %1221, %1283 : vector<8x256xf32>
    %c221 = arith.constant 221 : index
    %1285 = memref.load %arg2[%c221] : memref<252xf32, #tpu.memory_space<smem>>
    %1286 = vector.broadcast %1285 : f32 to vector<8x256xf32>
    %1287 = arith.mulf %1286, %1274 : vector<8x256xf32>
    %c230 = arith.constant 230 : index
    %1288 = memref.load %arg2[%c230] : memref<252xf32, #tpu.memory_space<smem>>
    %1289 = vector.broadcast %1288 : f32 to vector<8x256xf32>
    %1290 = arith.mulf %1289, %1276 : vector<8x256xf32>
    %1291 = arith.addf %1287, %1290 : vector<8x256xf32>
    %1292 = arith.addf %1228, %1291 : vector<8x256xf32>
    %c241_i32_71 = arith.constant 241 : i32
    %1293 = tpu.dynamic_rotate %1165 by %c241_i32_71 dim 1 : vector<16x256xf32>, i32 -> vector<16x256xf32>
    %1294 = vector.extract_strided_slice %0 {offsets = [6, 0, 0], sizes = [1, 8, 256], strides = [1, 1, 1]} : vector<9x8x256xf32> to vector<1x8x256xf32>
    %1295 = vector.shape_cast %1294 : vector<1x8x256xf32> to vector<8x256xf32>
    %1296 = vector.extract_strided_slice %1293 {offsets = [0, 0], sizes = [8, 256], strides = [1, 1]} : vector<16x256xf32> to vector<8x256xf32>
    %1297 = arith.mulf %1296, %1295 : vector<8x256xf32>
    %1298 = vector.extract_strided_slice %1293 {offsets = [8, 0], sizes = [8, 256], strides = [1, 1]} : vector<16x256xf32> to vector<8x256xf32>
    %1299 = arith.mulf %1298, %1295 : vector<8x256xf32>
    %c204 = arith.constant 204 : index
    %1300 = memref.load %arg2[%c204] : memref<252xf32, #tpu.memory_space<smem>>
    %1301 = vector.broadcast %1300 : f32 to vector<8x256xf32>
    %1302 = arith.mulf %1301, %1297 : vector<8x256xf32>
    %c213 = arith.constant 213 : index
    %1303 = memref.load %arg2[%c213] : memref<252xf32, #tpu.memory_space<smem>>
    %1304 = vector.broadcast %1303 : f32 to vector<8x256xf32>
    %1305 = arith.mulf %1304, %1299 : vector<8x256xf32>
    %1306 = arith.addf %1302, %1305 : vector<8x256xf32>
    %1307 = arith.addf %1243, %1306 : vector<8x256xf32>
    %c222 = arith.constant 222 : index
    %1308 = memref.load %arg2[%c222] : memref<252xf32, #tpu.memory_space<smem>>
    %1309 = vector.broadcast %1308 : f32 to vector<8x256xf32>
    %1310 = arith.mulf %1309, %1297 : vector<8x256xf32>
    %c231 = arith.constant 231 : index
    %1311 = memref.load %arg2[%c231] : memref<252xf32, #tpu.memory_space<smem>>
    %1312 = vector.broadcast %1311 : f32 to vector<8x256xf32>
    %1313 = arith.mulf %1312, %1299 : vector<8x256xf32>
    %1314 = arith.addf %1310, %1313 : vector<8x256xf32>
    %1315 = arith.addf %1251, %1314 : vector<8x256xf32>
    %c240_i32_72 = arith.constant 240 : i32
    %1316 = tpu.dynamic_rotate %1165 by %c240_i32_72 dim 1 : vector<16x256xf32>, i32 -> vector<16x256xf32>
    %1317 = vector.extract_strided_slice %0 {offsets = [7, 0, 0], sizes = [1, 8, 256], strides = [1, 1, 1]} : vector<9x8x256xf32> to vector<1x8x256xf32>
    %1318 = vector.shape_cast %1317 : vector<1x8x256xf32> to vector<8x256xf32>
    %1319 = vector.extract_strided_slice %1316 {offsets = [0, 0], sizes = [8, 256], strides = [1, 1]} : vector<16x256xf32> to vector<8x256xf32>
    %1320 = arith.mulf %1319, %1318 : vector<8x256xf32>
    %1321 = vector.extract_strided_slice %1316 {offsets = [8, 0], sizes = [8, 256], strides = [1, 1]} : vector<16x256xf32> to vector<8x256xf32>
    %1322 = arith.mulf %1321, %1318 : vector<8x256xf32>
    %c205 = arith.constant 205 : index
    %1323 = memref.load %arg2[%c205] : memref<252xf32, #tpu.memory_space<smem>>
    %1324 = vector.broadcast %1323 : f32 to vector<8x256xf32>
    %1325 = arith.mulf %1324, %1320 : vector<8x256xf32>
    %c214 = arith.constant 214 : index
    %1326 = memref.load %arg2[%c214] : memref<252xf32, #tpu.memory_space<smem>>
    %1327 = vector.broadcast %1326 : f32 to vector<8x256xf32>
    %1328 = arith.mulf %1327, %1322 : vector<8x256xf32>
    %1329 = arith.addf %1325, %1328 : vector<8x256xf32>
    %1330 = arith.addf %1261, %1329 : vector<8x256xf32>
    %c223 = arith.constant 223 : index
    %1331 = memref.load %arg2[%c223] : memref<252xf32, #tpu.memory_space<smem>>
    %1332 = vector.broadcast %1331 : f32 to vector<8x256xf32>
    %1333 = arith.mulf %1332, %1320 : vector<8x256xf32>
    %c232 = arith.constant 232 : index
    %1334 = memref.load %arg2[%c232] : memref<252xf32, #tpu.memory_space<smem>>
    %1335 = vector.broadcast %1334 : f32 to vector<8x256xf32>
    %1336 = arith.mulf %1335, %1322 : vector<8x256xf32>
    %1337 = arith.addf %1333, %1336 : vector<8x256xf32>
    %1338 = arith.addf %1269, %1337 : vector<8x256xf32>
    %c239_i32_73 = arith.constant 239 : i32
    %1339 = tpu.dynamic_rotate %1165 by %c239_i32_73 dim 1 : vector<16x256xf32>, i32 -> vector<16x256xf32>
    %1340 = vector.extract_strided_slice %0 {offsets = [8, 0, 0], sizes = [1, 8, 256], strides = [1, 1, 1]} : vector<9x8x256xf32> to vector<1x8x256xf32>
    %1341 = vector.shape_cast %1340 : vector<1x8x256xf32> to vector<8x256xf32>
    %1342 = vector.extract_strided_slice %1339 {offsets = [0, 0], sizes = [8, 256], strides = [1, 1]} : vector<16x256xf32> to vector<8x256xf32>
    %1343 = arith.mulf %1342, %1341 : vector<8x256xf32>
    %1344 = vector.extract_strided_slice %1339 {offsets = [8, 0], sizes = [8, 256], strides = [1, 1]} : vector<16x256xf32> to vector<8x256xf32>
    %1345 = arith.mulf %1344, %1341 : vector<8x256xf32>
    %c206 = arith.constant 206 : index
    %1346 = memref.load %arg2[%c206] : memref<252xf32, #tpu.memory_space<smem>>
    %1347 = vector.broadcast %1346 : f32 to vector<8x256xf32>
    %1348 = arith.mulf %1347, %1343 : vector<8x256xf32>
    %c215 = arith.constant 215 : index
    %1349 = memref.load %arg2[%c215] : memref<252xf32, #tpu.memory_space<smem>>
    %1350 = vector.broadcast %1349 : f32 to vector<8x256xf32>
    %1351 = arith.mulf %1350, %1345 : vector<8x256xf32>
    %1352 = arith.addf %1348, %1351 : vector<8x256xf32>
    %1353 = arith.addf %1284, %1352 : vector<8x256xf32>
    %c224 = arith.constant 224 : index
    %1354 = memref.load %arg2[%c224] : memref<252xf32, #tpu.memory_space<smem>>
    %1355 = vector.broadcast %1354 : f32 to vector<8x256xf32>
    %1356 = arith.mulf %1355, %1343 : vector<8x256xf32>
    %c233 = arith.constant 233 : index
    %1357 = memref.load %arg2[%c233] : memref<252xf32, #tpu.memory_space<smem>>
    %1358 = vector.broadcast %1357 : f32 to vector<8x256xf32>
    %1359 = arith.mulf %1358, %1345 : vector<8x256xf32>
    %1360 = arith.addf %1356, %1359 : vector<8x256xf32>
    %1361 = arith.addf %1292, %1360 : vector<8x256xf32>
    %1362 = arith.addf %1307, %1330 : vector<8x256xf32>
    %1363 = arith.addf %1362, %1353 : vector<8x256xf32>
    %c12_74 = arith.constant 12 : index
    %1364 = memref.load %arg3[%c12_74] : memref<15xf32, #tpu.memory_space<smem>>
    %1365 = vector.broadcast %1364 : f32 to vector<8x256xf32>
    %1366 = arith.addf %1363, %1365 : vector<8x256xf32>
    %cst_75 = arith.constant 0.000000e+00 : f32
    %1367 = vector.broadcast %cst_75 : f32 to vector<8x256xf32>
    %1368 = arith.maximumf %1366, %1367 : vector<8x256xf32>
    %1369 = arith.addf %1315, %1338 : vector<8x256xf32>
    %1370 = arith.addf %1369, %1361 : vector<8x256xf32>
    %c13_76 = arith.constant 13 : index
    %1371 = memref.load %arg3[%c13_76] : memref<15xf32, #tpu.memory_space<smem>>
    %1372 = vector.broadcast %1371 : f32 to vector<8x256xf32>
    %1373 = arith.addf %1370, %1372 : vector<8x256xf32>
    %cst_77 = arith.constant 0.000000e+00 : f32
    %1374 = vector.broadcast %cst_77 : f32 to vector<8x256xf32>
    %1375 = arith.maximumf %1373, %1374 : vector<8x256xf32>
    %1376 = tpu.concatenate %1368, %1375 in 0 : vector<8x256xf32>, vector<8x256xf32> -> vector<16x256xf32>
    %c17_i32_78 = arith.constant 17 : i32
    %1377 = tpu.dynamic_rotate %1376 by %c17_i32_78 dim 1 : vector<16x256xf32>, i32 -> vector<16x256xf32>
    %1378 = vector.extract_strided_slice %0 {offsets = [0, 0, 0], sizes = [1, 8, 256], strides = [1, 1, 1]} : vector<9x8x256xf32> to vector<1x8x256xf32>
    %1379 = vector.shape_cast %1378 : vector<1x8x256xf32> to vector<8x256xf32>
    %1380 = vector.extract_strided_slice %1377 {offsets = [0, 0], sizes = [8, 256], strides = [1, 1]} : vector<16x256xf32> to vector<8x256xf32>
    %1381 = arith.mulf %1380, %1379 : vector<8x256xf32>
    %1382 = vector.extract_strided_slice %1377 {offsets = [8, 0], sizes = [8, 256], strides = [1, 1]} : vector<16x256xf32> to vector<8x256xf32>
    %1383 = arith.mulf %1382, %1379 : vector<8x256xf32>
    %c234 = arith.constant 234 : index
    %1384 = memref.load %arg2[%c234] : memref<252xf32, #tpu.memory_space<smem>>
    %1385 = vector.broadcast %1384 : f32 to vector<8x256xf32>
    %1386 = arith.mulf %1385, %1381 : vector<8x256xf32>
    %c243 = arith.constant 243 : index
    %1387 = memref.load %arg2[%c243] : memref<252xf32, #tpu.memory_space<smem>>
    %1388 = vector.broadcast %1387 : f32 to vector<8x256xf32>
    %1389 = arith.mulf %1388, %1383 : vector<8x256xf32>
    %1390 = arith.addf %1386, %1389 : vector<8x256xf32>
    %c16_i32_79 = arith.constant 16 : i32
    %1391 = tpu.dynamic_rotate %1376 by %c16_i32_79 dim 1 : vector<16x256xf32>, i32 -> vector<16x256xf32>
    %1392 = vector.extract_strided_slice %0 {offsets = [1, 0, 0], sizes = [1, 8, 256], strides = [1, 1, 1]} : vector<9x8x256xf32> to vector<1x8x256xf32>
    %1393 = vector.shape_cast %1392 : vector<1x8x256xf32> to vector<8x256xf32>
    %1394 = vector.extract_strided_slice %1391 {offsets = [0, 0], sizes = [8, 256], strides = [1, 1]} : vector<16x256xf32> to vector<8x256xf32>
    %1395 = arith.mulf %1394, %1393 : vector<8x256xf32>
    %1396 = vector.extract_strided_slice %1391 {offsets = [8, 0], sizes = [8, 256], strides = [1, 1]} : vector<16x256xf32> to vector<8x256xf32>
    %1397 = arith.mulf %1396, %1393 : vector<8x256xf32>
    %c235 = arith.constant 235 : index
    %1398 = memref.load %arg2[%c235] : memref<252xf32, #tpu.memory_space<smem>>
    %1399 = vector.broadcast %1398 : f32 to vector<8x256xf32>
    %1400 = arith.mulf %1399, %1395 : vector<8x256xf32>
    %c244 = arith.constant 244 : index
    %1401 = memref.load %arg2[%c244] : memref<252xf32, #tpu.memory_space<smem>>
    %1402 = vector.broadcast %1401 : f32 to vector<8x256xf32>
    %1403 = arith.mulf %1402, %1397 : vector<8x256xf32>
    %1404 = arith.addf %1400, %1403 : vector<8x256xf32>
    %c15_i32_80 = arith.constant 15 : i32
    %1405 = tpu.dynamic_rotate %1376 by %c15_i32_80 dim 1 : vector<16x256xf32>, i32 -> vector<16x256xf32>
    %1406 = vector.extract_strided_slice %0 {offsets = [2, 0, 0], sizes = [1, 8, 256], strides = [1, 1, 1]} : vector<9x8x256xf32> to vector<1x8x256xf32>
    %1407 = vector.shape_cast %1406 : vector<1x8x256xf32> to vector<8x256xf32>
    %1408 = vector.extract_strided_slice %1405 {offsets = [0, 0], sizes = [8, 256], strides = [1, 1]} : vector<16x256xf32> to vector<8x256xf32>
    %1409 = arith.mulf %1408, %1407 : vector<8x256xf32>
    %1410 = vector.extract_strided_slice %1405 {offsets = [8, 0], sizes = [8, 256], strides = [1, 1]} : vector<16x256xf32> to vector<8x256xf32>
    %1411 = arith.mulf %1410, %1407 : vector<8x256xf32>
    %c236 = arith.constant 236 : index
    %1412 = memref.load %arg2[%c236] : memref<252xf32, #tpu.memory_space<smem>>
    %1413 = vector.broadcast %1412 : f32 to vector<8x256xf32>
    %1414 = arith.mulf %1413, %1409 : vector<8x256xf32>
    %c245 = arith.constant 245 : index
    %1415 = memref.load %arg2[%c245] : memref<252xf32, #tpu.memory_space<smem>>
    %1416 = vector.broadcast %1415 : f32 to vector<8x256xf32>
    %1417 = arith.mulf %1416, %1411 : vector<8x256xf32>
    %1418 = arith.addf %1414, %1417 : vector<8x256xf32>
    %c1_i32_81 = arith.constant 1 : i32
    %1419 = tpu.dynamic_rotate %1376 by %c1_i32_81 dim 1 : vector<16x256xf32>, i32 -> vector<16x256xf32>
    %1420 = vector.extract_strided_slice %0 {offsets = [3, 0, 0], sizes = [1, 8, 256], strides = [1, 1, 1]} : vector<9x8x256xf32> to vector<1x8x256xf32>
    %1421 = vector.shape_cast %1420 : vector<1x8x256xf32> to vector<8x256xf32>
    %1422 = vector.extract_strided_slice %1419 {offsets = [0, 0], sizes = [8, 256], strides = [1, 1]} : vector<16x256xf32> to vector<8x256xf32>
    %1423 = arith.mulf %1422, %1421 : vector<8x256xf32>
    %1424 = vector.extract_strided_slice %1419 {offsets = [8, 0], sizes = [8, 256], strides = [1, 1]} : vector<16x256xf32> to vector<8x256xf32>
    %1425 = arith.mulf %1424, %1421 : vector<8x256xf32>
    %c237 = arith.constant 237 : index
    %1426 = memref.load %arg2[%c237] : memref<252xf32, #tpu.memory_space<smem>>
    %1427 = vector.broadcast %1426 : f32 to vector<8x256xf32>
    %1428 = arith.mulf %1427, %1423 : vector<8x256xf32>
    %c246 = arith.constant 246 : index
    %1429 = memref.load %arg2[%c246] : memref<252xf32, #tpu.memory_space<smem>>
    %1430 = vector.broadcast %1429 : f32 to vector<8x256xf32>
    %1431 = arith.mulf %1430, %1425 : vector<8x256xf32>
    %1432 = arith.addf %1428, %1431 : vector<8x256xf32>
    %1433 = arith.addf %1390, %1432 : vector<8x256xf32>
    %1434 = vector.extract_strided_slice %1376 {offsets = [0, 0], sizes = [8, 256], strides = [1, 1]} : vector<16x256xf32> to vector<8x256xf32>
    %1435 = vector.extract_strided_slice %1376 {offsets = [8, 0], sizes = [8, 256], strides = [1, 1]} : vector<16x256xf32> to vector<8x256xf32>
    %c238 = arith.constant 238 : index
    %1436 = memref.load %arg2[%c238] : memref<252xf32, #tpu.memory_space<smem>>
    %1437 = vector.broadcast %1436 : f32 to vector<8x256xf32>
    %1438 = arith.mulf %1437, %1434 : vector<8x256xf32>
    %c247 = arith.constant 247 : index
    %1439 = memref.load %arg2[%c247] : memref<252xf32, #tpu.memory_space<smem>>
    %1440 = vector.broadcast %1439 : f32 to vector<8x256xf32>
    %1441 = arith.mulf %1440, %1435 : vector<8x256xf32>
    %1442 = arith.addf %1438, %1441 : vector<8x256xf32>
    %1443 = arith.addf %1404, %1442 : vector<8x256xf32>
    %c255_i32_82 = arith.constant 255 : i32
    %1444 = tpu.dynamic_rotate %1376 by %c255_i32_82 dim 1 : vector<16x256xf32>, i32 -> vector<16x256xf32>
    %1445 = vector.extract_strided_slice %0 {offsets = [5, 0, 0], sizes = [1, 8, 256], strides = [1, 1, 1]} : vector<9x8x256xf32> to vector<1x8x256xf32>
    %1446 = vector.shape_cast %1445 : vector<1x8x256xf32> to vector<8x256xf32>
    %1447 = vector.extract_strided_slice %1444 {offsets = [0, 0], sizes = [8, 256], strides = [1, 1]} : vector<16x256xf32> to vector<8x256xf32>
    %1448 = arith.mulf %1447, %1446 : vector<8x256xf32>
    %1449 = vector.extract_strided_slice %1444 {offsets = [8, 0], sizes = [8, 256], strides = [1, 1]} : vector<16x256xf32> to vector<8x256xf32>
    %1450 = arith.mulf %1449, %1446 : vector<8x256xf32>
    %c239 = arith.constant 239 : index
    %1451 = memref.load %arg2[%c239] : memref<252xf32, #tpu.memory_space<smem>>
    %1452 = vector.broadcast %1451 : f32 to vector<8x256xf32>
    %1453 = arith.mulf %1452, %1448 : vector<8x256xf32>
    %c248 = arith.constant 248 : index
    %1454 = memref.load %arg2[%c248] : memref<252xf32, #tpu.memory_space<smem>>
    %1455 = vector.broadcast %1454 : f32 to vector<8x256xf32>
    %1456 = arith.mulf %1455, %1450 : vector<8x256xf32>
    %1457 = arith.addf %1453, %1456 : vector<8x256xf32>
    %1458 = arith.addf %1418, %1457 : vector<8x256xf32>
    %c241_i32_83 = arith.constant 241 : i32
    %1459 = tpu.dynamic_rotate %1376 by %c241_i32_83 dim 1 : vector<16x256xf32>, i32 -> vector<16x256xf32>
    %1460 = vector.extract_strided_slice %0 {offsets = [6, 0, 0], sizes = [1, 8, 256], strides = [1, 1, 1]} : vector<9x8x256xf32> to vector<1x8x256xf32>
    %1461 = vector.shape_cast %1460 : vector<1x8x256xf32> to vector<8x256xf32>
    %1462 = vector.extract_strided_slice %1459 {offsets = [0, 0], sizes = [8, 256], strides = [1, 1]} : vector<16x256xf32> to vector<8x256xf32>
    %1463 = arith.mulf %1462, %1461 : vector<8x256xf32>
    %1464 = vector.extract_strided_slice %1459 {offsets = [8, 0], sizes = [8, 256], strides = [1, 1]} : vector<16x256xf32> to vector<8x256xf32>
    %1465 = arith.mulf %1464, %1461 : vector<8x256xf32>
    %c240 = arith.constant 240 : index
    %1466 = memref.load %arg2[%c240] : memref<252xf32, #tpu.memory_space<smem>>
    %1467 = vector.broadcast %1466 : f32 to vector<8x256xf32>
    %1468 = arith.mulf %1467, %1463 : vector<8x256xf32>
    %c249 = arith.constant 249 : index
    %1469 = memref.load %arg2[%c249] : memref<252xf32, #tpu.memory_space<smem>>
    %1470 = vector.broadcast %1469 : f32 to vector<8x256xf32>
    %1471 = arith.mulf %1470, %1465 : vector<8x256xf32>
    %1472 = arith.addf %1468, %1471 : vector<8x256xf32>
    %1473 = arith.addf %1433, %1472 : vector<8x256xf32>
    %c240_i32_84 = arith.constant 240 : i32
    %1474 = tpu.dynamic_rotate %1376 by %c240_i32_84 dim 1 : vector<16x256xf32>, i32 -> vector<16x256xf32>
    %1475 = vector.extract_strided_slice %0 {offsets = [7, 0, 0], sizes = [1, 8, 256], strides = [1, 1, 1]} : vector<9x8x256xf32> to vector<1x8x256xf32>
    %1476 = vector.shape_cast %1475 : vector<1x8x256xf32> to vector<8x256xf32>
    %1477 = vector.extract_strided_slice %1474 {offsets = [0, 0], sizes = [8, 256], strides = [1, 1]} : vector<16x256xf32> to vector<8x256xf32>
    %1478 = arith.mulf %1477, %1476 : vector<8x256xf32>
    %1479 = vector.extract_strided_slice %1474 {offsets = [8, 0], sizes = [8, 256], strides = [1, 1]} : vector<16x256xf32> to vector<8x256xf32>
    %1480 = arith.mulf %1479, %1476 : vector<8x256xf32>
    %c241 = arith.constant 241 : index
    %1481 = memref.load %arg2[%c241] : memref<252xf32, #tpu.memory_space<smem>>
    %1482 = vector.broadcast %1481 : f32 to vector<8x256xf32>
    %1483 = arith.mulf %1482, %1478 : vector<8x256xf32>
    %c250 = arith.constant 250 : index
    %1484 = memref.load %arg2[%c250] : memref<252xf32, #tpu.memory_space<smem>>
    %1485 = vector.broadcast %1484 : f32 to vector<8x256xf32>
    %1486 = arith.mulf %1485, %1480 : vector<8x256xf32>
    %1487 = arith.addf %1483, %1486 : vector<8x256xf32>
    %1488 = arith.addf %1443, %1487 : vector<8x256xf32>
    %c239_i32_85 = arith.constant 239 : i32
    %1489 = tpu.dynamic_rotate %1376 by %c239_i32_85 dim 1 : vector<16x256xf32>, i32 -> vector<16x256xf32>
    %1490 = vector.extract_strided_slice %0 {offsets = [8, 0, 0], sizes = [1, 8, 256], strides = [1, 1, 1]} : vector<9x8x256xf32> to vector<1x8x256xf32>
    %1491 = vector.shape_cast %1490 : vector<1x8x256xf32> to vector<8x256xf32>
    %1492 = vector.extract_strided_slice %1489 {offsets = [0, 0], sizes = [8, 256], strides = [1, 1]} : vector<16x256xf32> to vector<8x256xf32>
    %1493 = arith.mulf %1492, %1491 : vector<8x256xf32>
    %1494 = vector.extract_strided_slice %1489 {offsets = [8, 0], sizes = [8, 256], strides = [1, 1]} : vector<16x256xf32> to vector<8x256xf32>
    %1495 = arith.mulf %1494, %1491 : vector<8x256xf32>
    %c242 = arith.constant 242 : index
    %1496 = memref.load %arg2[%c242] : memref<252xf32, #tpu.memory_space<smem>>
    %1497 = vector.broadcast %1496 : f32 to vector<8x256xf32>
    %1498 = arith.mulf %1497, %1493 : vector<8x256xf32>
    %c251 = arith.constant 251 : index
    %1499 = memref.load %arg2[%c251] : memref<252xf32, #tpu.memory_space<smem>>
    %1500 = vector.broadcast %1499 : f32 to vector<8x256xf32>
    %1501 = arith.mulf %1500, %1495 : vector<8x256xf32>
    %1502 = arith.addf %1498, %1501 : vector<8x256xf32>
    %1503 = arith.addf %1458, %1502 : vector<8x256xf32>
    %1504 = arith.addf %1473, %1488 : vector<8x256xf32>
    %1505 = arith.addf %1504, %1503 : vector<8x256xf32>
    %c14_86 = arith.constant 14 : index
    %1506 = memref.load %arg3[%c14_86] : memref<15xf32, #tpu.memory_space<smem>>
    %1507 = vector.broadcast %1506 : f32 to vector<8x256xf32>
    %1508 = arith.addf %1505, %1507 : vector<8x256xf32>
    %c0_87 = arith.constant 0 : index
    %c0_88 = arith.constant 0 : index
    %1509 = vector.load %arg5[%c0_87, %c0_88] : memref<8x256xf32, #tpu.memory_space<vmem>>, vector<8x256xf32>
    tpu.vector_store %arg5[%c0_87, %c0_88], %1508 {strides = array<i32>} : memref<8x256xf32, #tpu.memory_space<vmem>>, vector<8x256xf32>,
    return
  }
  func.func @transform_0(%arg0: i32) -> (i32, i32) {
    %c0_i32 = arith.constant 0 : i32
    %c0_i32_0 = arith.constant 0 : i32
    return %arg0, %c0_i32 : i32, i32
  }
  func.func @transform_1(%arg0: i32) -> i32 {
    %c0_i32 = arith.constant 0 : i32
    %c0_i32_0 = arith.constant 0 : i32
    return %c0_i32 : i32
  }
  func.func @transform_2(%arg0: i32) -> i32 {
    %c0_i32 = arith.constant 0 : i32
    %c0_i32_0 = arith.constant 0 : i32
    return %c0_i32 : i32
  }
  func.func @transform_3(%arg0: i32) -> (i32, i32, i32) {
    %c0_i32 = arith.constant 0 : i32
    %c0_i32_0 = arith.constant 0 : i32
    %c0_i32_1 = arith.constant 0 : i32
    %c0_i32_2 = arith.constant 0 : i32
    return %c0_i32, %c0_i32_0, %c0_i32_1 : i32, i32, i32
  }
  func.func @transform_4(%arg0: i32) -> (i32, i32) {
    %c0_i32 = arith.constant 0 : i32
    %c0_i32_0 = arith.constant 0 : i32
    return %arg0, %c0_i32 : i32, i32
  }
}

</mosaic_0001>

<bundles_post_ra>
// kernel: forward.1
= control target key start
LH: loop header
LB: loop body
LE: loop exit
PB: predicated region body
PF: predicated region fallthrough
CT: control target
= control target key end

     0   :  { %s6621_s0 = inlined_call_operand.vmem [shape: f32[16,256], index: 0, kind: input, shape index: {}]   ;;  %s6622_s1 = inlined_call_operand.vmem [shape: f32[252], index: 1, kind: input, shape index: {}]   ;;  %s6623_s2 = inlined_call_operand.vmem [shape: f32[15], index: 2, kind: input, shape index: {}]   ;;  %s6624_s3 = inlined_call_operand.vmem [shape: f32[9,8,256], index: 3, kind: input, shape index: {}]   ;;  %s6625_s4 = inlined_call_operand.vmem [shape: f32[16,256], index: 4, kind: output, shape index: {}]  }
   0x1   :  { %6739 = sst [smem:[#allocation18_spill]] %s6621_s0 }
   0x2   :  { %6740 = sst [smem:[#allocation19_spill]] %s6622_s1 }
   0x3   :  { %6741 = sst [smem:[#allocation20_spill]] %s6623_s2 }
   0x4   :  { %6742 = sst [smem:[#allocation21_spill]] %s6624_s3 }
   0x5   :  { %6743 = sst [smem:[#allocation22_spill]] %s6625_s4 }
   0x6   :  { %9 = vsyncpa [#allocation3], 0 }
   0x7   :  { %10 = vsyncpa [#allocation5], 0  ;;  %s3306_s15 = smov 0  }
   0x8 LB: > { %6744 = sst [smem:[#allocation8_spill]] %s3269_s15  ;;  %s3312_s16 = sadd.s32 4294967295, %s3269_s15   ;;  %s3269_s15 = sphi %s3306_s15, %s16_s15  }
   0x9   : > { %p2860_p0 = scmp.ge.s32.totalorder %s3269_s15, 1  ;;  %p136_p1 = scmp.lt.s32.totalorder %s3269_s15, 3 }
   0xa   : > { %s6745_s1 = sld [smem:[#allocation19_spill]]  ;;  %p6626_p3 = scmp.eq.s32.totalorder %s3312_s16, 0 }
   0xb   : > { %p3319_p2 = pnand %p2860_p0, %p136_p1  ;;  %s6747_s2 = sld [smem:[#allocation20_spill]] }
   0xd   : > { %s6746_s20 = scalar_select %p3319_p2, 1, 0 }
   0xe   : > { %p3148_p4 = pneg %p3319_p2 }
  0x10   : > { %s149_s19 = sshll.u32 %s6745_s1, 4  ;;  %p3331_p5 = pnand %p6626_p3, %p3148_p4  ;;  %s150_s19 = int_to_ptr.vmem [resolvable:$true] %s149_s19 }
  0x11   : > { %s160_s23 = sshll.u32 %s6747_s2, 4  ;;  %s3225_s25 = scalar_lea.vmem %s150_s19, 32  ;;  %s161_s23 = int_to_ptr.vmem [resolvable:$true] %s160_s23 }
  0x12   : > { %p3226_p6 = scmp.ne.s32.totalorder %s150_s19, %s3225_s25  ;;  %p3227_p7 = pneg %p3331_p5 }
  0x13   : > { %p3233_p10 = scmp.lt.s32.totalorder %s150_s19, %s150_s19  ;;  %p3234_p11 = scmp.lt.s32.totalorder %s3225_s25, %s3225_s25 }
  0x14   : > { %p3228_p8 = pnand %p3227_p7, %p3226_p6 }
  0x15   : > { %p3235_p12 = por %p3234_p11, %p3233_p10 }
  0x16   : > { %p3229_p9 = pneg %p3228_p8 }
  0x18   : > { %p3236_p13 = pnand %p3235_p12, %p3229_p9 }
  0x1a   : > { %3239 = shalt.err (!%p3236_p13)
}
  0x1b   : > { %s3271_s26 = smov [#allocation2]   ;;  %s3240_s27 = scalar_lea.vmem %s161_s23, 16 }
  0x1c   : > { %3151 = dma.vmem_to_smem (!%p3331_p5), %s150_s19, 32, %s3271_s26, [#allocation3]  }
  0x1d   : > { %p3241_p0 = scmp.ne.s32.totalorder %s161_s23, %s3240_s27  ;;  %p3248_p3 = scmp.lt.s32.totalorder %s161_s23, %s161_s23 }
  0x1e   : > { %p3249_p2 = scmp.lt.s32.totalorder %s3240_s27, %s3240_s27 }
  0x1f   : > { %p3243_p1 = pnand %p3241_p0, %p3227_p7 }
  0x20   : > { %p3250_p6 = por %p3249_p2, %p3248_p3 }
  0x21   : > { %p3244_p4 = pneg %p3243_p1 }
  0x23   : > { %p3251_p8 = pnand %p3250_p6, %p3244_p4 }
  0x25   : > { %3254 = shalt.err (!%p3251_p8)
}
  0x26   : > { %s3272_s28 = smov [#allocation4]   ;;  %p6749_p9 = scmp.ne.s32.totalorder %s6746_s20, 0 }
  0x27   : > { %3154 = dma.vmem_to_smem (!%p3331_p5), %s161_s23, 16, %s3272_s28, [#allocation5]  }
  0x28   : > { %184 = sbr.rel (%p6749_p9) target bundleno = 1554 (0x612), region = 36 }
  0x2d   : > { %p6750_p10 = scmp.eq.s32.totalorder %s3312_s16, 0 }
  0x2f   : > { %3260 = dma.done.wait (%p6750_p10), [#allocation3], 32   ;;  %p6751_p11 = pmov %p6750_p10 }
  0x30   : > { %p6752_p7 = pmov %p6750_p10 }
  0x31   : > { %3262 = vsyncadd (%p6751_p11), [#allocation3], 4294967264 }
  0x32   : > { %3264 = dma.done.wait (%p6752_p7), [#allocation5], 16   ;;  %p6753_p2 = pmov %p6752_p7 }
  0x34   : > { %3266 = vsyncadd (%p6753_p2), [#allocation5], 4294967280 }
  0x35   : > { %194 = sfence }
  0x36   : > { %p215_p3 = scmp.lt.s32.totalorder %s3312_s16, 1  ;;  %s6755_s0 = sld [smem:[#allocation18_spill]]  ;;  %v247_v2 = vlaneseq }
  0x37   : > { %s6641_s7 = smov 16   ;;  %s6643_s8 = smov 17  }
  0x38   : > { %s6978_s16 = smov (!%p215_p3, %s3312_s16), 1  ;;  %s6639_s9 = smov 1   ;;  %v3411_v5 = vand.u32 127, %v247_v2 }
  0x39   : > { %6754 = sst [smem:[#allocation9_spill]] %s6978_s16  ;;  %s6628_s29 = sshll.u32 %s6978_s16, 4 }
  0x3a   : > { %s6637_s10 = smov 15   ;;  %s6635_s11 = smov 127   ;;  %vm266_vm0 = vcmp.lt.s32.totalorder %v3411_v5, 16  ;;  %vm249_vm1 = vcmp.lt.s32.totalorder %v3411_v5, 17  ;;  %vm300_vm2 = vcmp.lt.s32.totalorder %v3411_v5, 1  ;;  %vm283_vm3 = vcmp.lt.s32.totalorder %v3411_v5, 15 }
  0x3b   : > { %s6633_s12 = smov 113   ;;  %s6631_s13 = smov 112   ;;  %vm333_vm4 = vcmp.lt.s32.totalorder %v3411_v5, 127  ;;  %vm354_vm5 = vcmp.lt.s32.totalorder %v3411_v5, 113  ;;  %vm375_vm6 = vcmp.lt.s32.totalorder %v3411_v5, 112  ;;  %vm396_vm7 = vcmp.lt.s32.totalorder %v3411_v5, 111 }
  0x3c   : > { %s219_s6 = scalar_lea.vmem %s6755_s0, %s6628_s29  ;;  %s6629_s14 = smov 111  }
  0x3d   : > { %v3361_v0 = vld [vmem:[%s219_s6] sm:$0xff]  ;;  %v242_v1 = vld [vmem:[%s219_s6 + $0x8] sm:$0xff]  ;;  %s3387_s17 = sld [smem:[#allocation2 + $0x1]] }
  0x3e   : > { %262 = vrot.lane.b32.xlu1 %v3361_v0, %s6641_s7  ;;  %243 = vrot.lane.b32.xlu0 %v3361_v0, %s6643_s8  ;;  %s3389_s18 = sld [smem:[#allocation2 + $0xa]] }
  0x3f   : > { %s3391_s19 = sld [smem:[#allocation2 + $0x4]] }
  0x40   : > { %s3393_s20 = sld [smem:[#allocation2 + $0xd]] }
  0x41   : > { %s3395_s21 = sld [smem:[#allocation2]] }
  0x42   : > { %264 = vrot.lane.b32.xlu1 %v242_v1, %s6641_s7  ;;  %245 = vrot.lane.b32.xlu0 %v242_v1, %s6643_s8  ;;  %s3397_s22 = sld [smem:[#allocation2 + $0x9]] }
  0x43   : > { %s3399_s23 = sld [smem:[#allocation2 + $0x3]]  ;;  %v272_v12 = vstv %s3387_s17  ;;  %s6760_s17 = smov 111  }
  0x44   : > { %s3401_s24 = sld [smem:[#allocation2 + $0xc]]  ;;  %v276_v13 = vstv %s3389_s18 }
  0x45   : > { %s3403_s25 = sld [smem:[#allocation2 + $0x2]]  ;;  %v318_v8 = vstv %s3391_s19 }
  0x46   : > { %298 = vrot.lane.b32.xlu1 %v242_v1, %s6639_s9  ;;  %296 = vrot.lane.b32.xlu0 %v3361_v0, %s6639_s9  ;;  %s3405_s26 = sld [smem:[#allocation2 + $0xb]]  ;;  %v324_v9 = vstv %s3393_s20  ;;  %v3434_v14 = vmul.f32 %v318_v8, %v242_v1  ;;  %v3437_v15 = vmul.f32 %v318_v8, %v3361_v0 }
  0x47   : > { %s3407_s27 = sld [smem:[#allocation2 + $0x5]]  ;;  %v3449_v18 = vmul.f32 %v324_v9, %v242_v1  ;;  %v3456_v21 = vmul.f32 %v324_v9, %v3361_v0  ;;  %v255_v24 = vstv %s3395_s21 }
  0x48   : > { %s3409_s28 = sld [smem:[#allocation2 + $0xe]]  ;;  %v259_v25 = vstv %s3397_s22 }
  0x49   : > { %s3413_s30 = sld [smem:[#allocation2 + $0x6]]  ;;  %v306_v30 = vstv %s3399_s23 }
  0x4a   : > { %281 = vrot.lane.b32.xlu1 %v242_v1, %s6637_s10  ;;  %279 = vrot.lane.b32.xlu0 %v3361_v0, %s6637_s10  ;;  %s3415_s5 = sld [smem:[#allocation2 + $0xf]]  ;;  %v312_v31 = vstv %s3401_s24 }
  0x4b   : > { %s3417_s6 = sld [smem:[#allocation2 + $0x7]]  ;;  %v289_v38 = vstv %s3403_s25 }
  0x4c   : > { %s3420_s29 = sld [smem:[#allocation2 + $0x10]]  ;;  %v293_v39 = vstv %s3405_s26 }
  0x4d   : > { %s3430_s19 = sld [smem:[#allocation2 + $0x11]]  ;;  %v339_v42 = vstv %s3407_s27 }
  0x4e   : > { %331 = vrot.lane.b32.xlu1 %v242_v1, %s6635_s11  ;;  %329 = vrot.lane.b32.xlu0 %v3361_v0, %s6635_s11  ;;  %s6756_s3 = sld [smem:[#allocation21_spill]]  ;;  %v345_v43 = vstv %s3409_s28 }
  0x4f   : > { %v360_v46 = vstv %s3413_s30  ;;  %s3601_s25 = sld [smem:[#allocation4]] }
  0x50   : > { %v366_v47 = vstv %s3415_s5  ;;  %s3621_s5 = sld [smem:[#allocation4 + $0x1]] }
  0x51   : > { %v381_v50 = vstv %s3417_s6  ;;  %s3629_s6 = sld [smem:[#allocation2 + $0x1f]] }
  0x52   : > { %352 = vrot.lane.b32.xlu1 %v242_v1, %s6633_s12  ;;  %350 = vrot.lane.b32.xlu0 %v3361_v0, %s6633_s12  ;;  %v387_v51 = vstv %s3420_s29  ;;  %s3627_s29 = sld [smem:[#allocation2 + $0x16]] }
  0x53   : > { %v408_v53 = vstv %s3430_s19  ;;  %s3633_s18 = sld [smem:[#allocation2 + $0x28]]  ;;  %s6758_s19 = smov 113  }
  0x54   : > { %v3442_v16 = vld [vmem:[%s6756_s3 + $0x10] sm:$0xff]  ;;  %v3447_v17 = vld [vmem:[%s6756_s3 + $0x18] sm:$0xff]  ;;  %v3461_v22 = vld [vmem:[%s6756_s3] sm:$0xff]  ;;  %s3635_s20 = sld [smem:[#allocation2 + $0x31]] }
  0x55   : > { %v3466_v23 = vld [vmem:[%s6756_s3 + $0x8] sm:$0xff]  ;;  %v3478_v28 = vld [vmem:[%s6756_s3 + $0x30] sm:$0xff]  ;;  %v3483_v29 = vld [vmem:[%s6756_s3 + $0x38] sm:$0xff]  ;;  %s3691_s21 = sld [smem:[#allocation2 + $0x1b]] }
  0x56   : > { %373 = vrot.lane.b32.xlu1 %v242_v1, %s6631_s13  ;;  %371 = vrot.lane.b32.xlu0 %v3361_v0, %s6631_s13  ;;  %v3511_v60 = vld [vmem:[%s6756_s3 + $0x20] sm:$0xff]  ;;  %v3516_v61 = vld [vmem:[%s6756_s3 + $0x28] sm:$0xff]  ;;  %s6759_s13 = smov 112   ;;  %s3693_s22 = sld [smem:[#allocation2 + $0x2d]] }
  0x57   : > { %v3525_v2 = vld [vmem:[%s6756_s3 + $0x50] sm:$0xff]  ;;  %s3695_s23 = sld [smem:[#allocation2 + $0x12]] }
  0x58   : > { %s3697_s24 = sld [smem:[#allocation2 + $0x24]] }
  0x59   : > { %s3699_s11 = sld [smem:[#allocation2 + $0x1c]] }
  0x5a   : > { %394 = vrot.lane.b32.xlu1 %v242_v1, %s6629_s14  ;;  %392 = vrot.lane.b32.xlu0 %v3361_v0, %s6629_s14  ;;  %s3424_s14 = sld [smem:[#allocation2 + $0x8]] }
  0x5b   : > { %s3701_s12 = sld [smem:[#allocation2 + $0x2e]] }
  0x5c   : > { %s3705_s26 = sld [smem:[#allocation2 + $0x25]] }
  0x5d   : > { %s3707_s27 = sld [smem:[#allocation2 + $0x1e]] }
  0x5e   : > { %s3709_s28 = sld [smem:[#allocation2 + $0x30]] }
  0x5f   : > { %s3711_s30 = sld [smem:[#allocation2 + $0x15]] }
  0x60   : > { %v402_v52 = vstv %s3424_s14  ;;  %s6757_s14 = smov 127   ;;  %s3731_s0 = sld [smem:[#allocation2 + $0x21]] }
  0x61   : > { %s3733_s1 = sld [smem:[#allocation2 + $0x33]] }
  0x62   : > { %s3735_s2 = sld [smem:[#allocation2 + $0x18]] }
  0x63   : > { %s3737_s15 = sld [smem:[#allocation2 + $0x2a]] }
  0x64   : > { %s3739_s4 = sld [smem:[#allocation2 + $0x22]] }
  0x65   : > { %s3741_s16 = sld [smem:[#allocation2 + $0x34]] }
  0xb0   : > { %v263_v3 = vpop.permute.xlu1 %262  ;;  %v244_v4 = vpop.permute.xlu0 %243 }
  0xb4   : > { %v265_v6 = vpop.permute.xlu1 %264  ;;  %v246_v7 = vpop.permute.xlu0 %245 }
  0xb5   : > { %v267_v19 = vsel %vm266_vm0, %v263_v3, %v265_v6  ;;  %v268_v20 = vsel %vm266_vm0, %v265_v6, %v263_v3  ;;  %v250_v26 = vsel %vm249_vm1, %v244_v4, %v246_v7  ;;  %v251_v27 = vsel %vm249_vm1, %v246_v7, %v244_v4  ;;  %v3530_v3 = vld [vmem:[%s6756_s3 + $0x58] sm:$0xff] }
  0xb6   : > { %v269_v36 = vmul.f32 %v268_v20, %v3442_v16  ;;  %v270_v37 = vmul.f32 %v267_v19, %v3447_v17  ;;  %v252_v40 = vmul.f32 %v251_v27, %v3461_v22  ;;  %v253_v41 = vmul.f32 %v250_v26, %v3466_v23  ;;  %v3544_v26 = vld [vmem:[%s6756_s3 + $0x60] sm:$0xff] }
  0xb8   : > { %v299_v10 = vpop.permute.xlu1 %298  ;;  %v297_v11 = vpop.permute.xlu0 %296  ;;  %v273_v54 = vmul.f32 %v272_v12, %v269_v36  ;;  %v274_v55 = vmul.f32 %v272_v12, %v270_v37  ;;  %v277_v56 = vmul.f32 %v276_v13, %v269_v36  ;;  %v278_v57 = vmul.f32 %v276_v13, %v270_v37 }
  0xb9   : > { %v301_v32 = vsel %vm300_vm2, %v297_v11, %v299_v10  ;;  %v302_v33 = vsel %vm300_vm2, %v299_v10, %v297_v11  ;;  %v256_v58 = vmul.f32 %v255_v24, %v252_v40  ;;  %v257_v59 = vmul.f32 %v255_v24, %v253_v41 }
  0xba   : > { %v303_v44 = vmul.f32 %v302_v33, %v3478_v28  ;;  %v304_v45 = vmul.f32 %v301_v32, %v3483_v29  ;;  %v260_v7 = vmul.f32 %v259_v25, %v252_v40  ;;  %v261_v8 = vmul.f32 %v259_v25, %v253_v41  ;;  %v3549_v25 = vld [vmem:[%s6756_s3 + $0x68] sm:$0xff] }
  0xbb   : > { %v321_v13 = vadd.f32 %v3437_v15, %v273_v54  ;;  %v322_v19 = vadd.f32 %v3434_v14, %v274_v55  ;;  %v328_v32 = vadd.f32 %v3449_v18, %v278_v57  ;;  %v3569_v18 = vld [vmem:[%s6756_s3 + $0x78] sm:$0xff] }
  0xbc   : > { %v282_v34 = vpop.permute.xlu1 %281  ;;  %v280_v35 = vpop.permute.xlu0 %279  ;;  %v307_v0 = vmul.f32 %v306_v30, %v303_v44  ;;  %v308_v1 = vmul.f32 %v306_v30, %v304_v45  ;;  %v313_v9 = vmul.f32 %v312_v31, %v303_v44  ;;  %v314_v10 = vmul.f32 %v312_v31, %v304_v45 }
  0xbd   : > { %v284_v62 = vsel %vm283_vm3, %v280_v35, %v282_v34  ;;  %v285_v63 = vsel %vm283_vm3, %v282_v34, %v280_v35  ;;  %v327_v31 = vadd.f32 %v3456_v21, %v277_v56  ;;  %v3564_v21 = vld [vmem:[%s6756_s3 + $0x70] sm:$0xff] }
  0xbe   : > { %v286_v20 = vmul.f32 %v285_v63, %v3511_v60  ;;  %v287_v24 = vmul.f32 %v284_v62, %v3516_v61  ;;  %v309_v33 = vadd.f32 %v307_v0, %v256_v58  ;;  %v310_v34 = vadd.f32 %v308_v1, %v257_v59 }
  0xbf   : > { %v315_v35 = vadd.f32 %v313_v9, %v260_v7  ;;  %v316_v36 = vadd.f32 %v314_v10, %v261_v8 }
  0xc0   : > { %v332_v48 = vpop.permute.xlu1 %331  ;;  %v330_v49 = vpop.permute.xlu0 %329  ;;  %v290_v45 = vmul.f32 %v289_v38, %v286_v20  ;;  %v294_v55 = vmul.f32 %v293_v39, %v286_v20  ;;  %v295_v56 = vmul.f32 %v293_v39, %v287_v24 }
  0xc1   : > { %v334_v4 = vsel %vm333_vm4, %v330_v49, %v332_v48  ;;  %v335_v6 = vsel %vm333_vm4, %v332_v48, %v330_v49  ;;  %v291_v48 = vmul.f32 %v289_v38, %v287_v24 }
  0xc2   : > { %v336_v27 = vmul.f32 %v334_v4, %v3525_v2  ;;  %v337_v15 = vmul.f32 %v335_v6, %v3530_v3 }
  0xc4   : > { %v353_v11 = vpop.permute.xlu1 %352  ;;  %v351_v12 = vpop.permute.xlu0 %350  ;;  %v340_v57 = vmul.f32 %v339_v42, %v336_v27  ;;  %v341_v58 = vmul.f32 %v339_v42, %v337_v15  ;;  %v346_v38 = vmul.f32 %v345_v43, %v336_v27  ;;  %v347_v59 = vmul.f32 %v345_v43, %v337_v15 }
  0xc5   : > { %v355_v14 = vsel %vm354_vm5, %v351_v12, %v353_v11  ;;  %v356_v30 = vsel %vm354_vm5, %v353_v11, %v351_v12 }
  0xc6   : > { %v357_v37 = vmul.f32 %v355_v14, %v3544_v26  ;;  %v358_v40 = vmul.f32 %v356_v30, %v3549_v25  ;;  %v342_v10 = vadd.f32 %v340_v57, %v290_v45  ;;  %v343_v11 = vadd.f32 %v341_v58, %v291_v48 }
  0xc7   : > { %v348_v15 = vadd.f32 %v346_v38, %v294_v55  ;;  %v349_v14 = vadd.f32 %v347_v59, %v295_v56  ;;  %v418_v56 = vstv %s3601_s25  ;;  %v428_v57 = vstv %s3621_s5  ;;  %s3703_s25 = sld [smem:[#allocation2 + $0x13]] }
  0xc8   : > { %v374_v41 = vpop.permute.xlu1 %373  ;;  %v372_v44 = vpop.permute.xlu0 %371  ;;  %v361_v0 = vmul.f32 %v360_v46, %v357_v37  ;;  %v362_v1 = vmul.f32 %v360_v46, %v358_v40  ;;  %v367_v39 = vmul.f32 %v366_v47, %v357_v37  ;;  %v368_v4 = vmul.f32 %v366_v47, %v358_v40  ;;  %v3614_v46 = vld [vmem:[%s6756_s3 + $0x80] sm:$0xff]  ;;  %v3619_v47 = vld [vmem:[%s6756_s3 + $0x88] sm:$0xff]  ;;  %s3713_s5 = sld [smem:[#allocation2 + $0x27]] }
  0xc9   : > { %v376_v49 = vsel %vm375_vm6, %v372_v44, %v374_v41  ;;  %v377_v54 = vsel %vm375_vm6, %v374_v41, %v372_v44  ;;  %s3747_s3 = sld [smem:[#allocation2 + $0x19]] }
  0xca   : > { %v378_v62 = vmul.f32 %v376_v49, %v3564_v21  ;;  %v379_v63 = vmul.f32 %v377_v54, %v3569_v18  ;;  %v363_v40 = vadd.f32 %v361_v0, %v309_v33  ;;  %v364_v41 = vadd.f32 %v362_v1, %v310_v34 }
  0xcb   : > { %v582_v1 = vstv %s3627_s29  ;;  %s3715_s29 = sld [smem:[#allocation2 + $0x1d]] }
  0xcc   : > { %v395_v6 = vpop.permute.xlu1 %394  ;;  %v393_v42 = vpop.permute.xlu0 %392  ;;  %v382_v7 = vmul.f32 %v381_v50, %v378_v62  ;;  %v383_v43 = vmul.f32 %v381_v50, %v379_v63  ;;  %v388_v8 = vmul.f32 %v387_v51, %v378_v62  ;;  %v389_v9 = vmul.f32 %v387_v51, %v379_v63 }
  0xcd   : > { %v397_v50 = vsel %vm396_vm7, %v393_v42, %v395_v6  ;;  %v398_v51 = vsel %vm396_vm7, %v395_v6, %v393_v42  ;;  %v598_v6 = vstv %s3635_s20  ;;  %s3721_s20 = sld [smem:[#allocation2 + $0x26]] }
  0xce   : > { %v384_v12 = vadd.f32 %v382_v7, %v321_v13  ;;  %v385_v20 = vadd.f32 %v383_v43, %v322_v19  ;;  %v390_v24 = vadd.f32 %v388_v8, %v327_v31  ;;  %v391_v27 = vadd.f32 %v389_v9, %v328_v32 }
  0xcf   : > { %v399_v30 = vmul.f32 %v397_v50, %v3614_v46  ;;  %v400_v37 = vmul.f32 %v398_v51, %v3619_v47  ;;  %v369_v13 = vadd.f32 %v367_v39, %v315_v35  ;;  %v370_v19 = vadd.f32 %v368_v4, %v316_v36 }
  0xd0   : > { %v413_v48 = vadd.f32 %v384_v12, %v363_v40  ;;  %v414_v49 = vadd.f32 %v385_v20, %v364_v41  ;;  %v586_v39 = vstv %s3629_s6  ;;  %v594_v4 = vstv %s3633_s18  ;;  %s3717_s6 = sld [smem:[#allocation2 + $0x2f]] }
  0xd1   : > { %v403_v31 = vmul.f32 %v402_v52, %v399_v30  ;;  %v404_v32 = vmul.f32 %v402_v52, %v400_v37  ;;  %v409_v44 = vmul.f32 %v408_v53, %v399_v30  ;;  %v410_v45 = vmul.f32 %v408_v53, %v400_v37  ;;  %s3719_s18 = sld [smem:[#allocation2 + $0x14]] }
  0xd2   : > { %v423_v54 = vadd.f32 %v390_v24, %v369_v13  ;;  %v424_v33 = vadd.f32 %v391_v27, %v370_v19 }
  0xd3   : > { %v405_v34 = vadd.f32 %v403_v31, %v342_v10  ;;  %v406_v35 = vadd.f32 %v404_v32, %v343_v11  ;;  %v411_v36 = vadd.f32 %v409_v44, %v348_v15  ;;  %v412_v55 = vadd.f32 %v410_v45, %v349_v14 }
  0xd4   : > { %v454_v45 = vstv %s3691_s21  ;;  %s3779_s21 = sld [smem:[#allocation2 + $0x23]] }
  0xd5   : > { %v415_v58 = vadd.f32 %v413_v48, %v405_v34  ;;  %v416_v52 = vadd.f32 %v414_v49, %v406_v35  ;;  %v425_v38 = vadd.f32 %v423_v54, %v411_v36  ;;  %v426_v59 = vadd.f32 %v424_v33, %v412_v55 }
  0xd6   : > { %v464_v48 = vstv %s3693_s22  ;;  %v450_v49 = vstv %s3695_s23  ;;  %v460_v54 = vstv %s3697_s24  ;;  %v490_v35 = vstv %s3699_s11  ;;  %s3787_s22 = sld [smem:[#allocation2 + $0x35]] }
  0xd7   : > { %v419_v62 = vadd.f32 %v418_v56, %v415_v58  ;;  %v420_v53 = vadd.f32 %v418_v56, %v416_v52  ;;  %v429_v63 = vadd.f32 %v428_v57, %v425_v38  ;;  %v430_v0 = vadd.f32 %v428_v57, %v426_v59  ;;  %s4105_s23 = sld [smem:[#allocation2 + $0x51]] }
  0xd8   : > { %v500_v36 = vstv %s3701_s12  ;;  %v486_v55 = vstv %s3703_s25  ;;  %v496_v56 = vstv %s3705_s26  ;;  %v562_v57 = vstv %s3707_s27  ;;  %s4107_s24 = sld [smem:[#allocation2 + $0x36]] }
  0xd9   : > { %v421_v42 = vmax.f32 %v419_v62, 0.0  ;;  %v422_v7 = vmax.f32 %v420_v53, 0.0  ;;  %v431_v43 = vmax.f32 %v429_v63, 0.0  ;;  %v432_v8 = vmax.f32 %v430_v0, 0.0  ;;  %s4109_s11 = sld [smem:[#allocation2 + $0x48]] }
  0xda   : > { %v574_v58 = vstv %s3709_s28  ;;  %v558_v52 = vstv %s3711_s30  ;;  %v570_v38 = vstv %s3713_s5  ;;  %v526_v53 = vstv %s3715_s29  ;;  %s4111_s12 = sld [smem:[#allocation2 + $0x40]] }
  0xdb   : > { %435 = vrot.lane.b32.xlu1 %v431_v43, %s6643_s8  ;;  %433 = vrot.lane.b32.xlu0 %v421_v42, %s6643_s8  ;;  %v584_v9 = vmul.f32 %v582_v1, %v422_v7  ;;  %v587_v10 = vmul.f32 %v586_v39, %v431_v43  ;;  %v588_v11 = vmul.f32 %v586_v39, %v432_v8  ;;  %v536_v63 = vstv %s3717_s6  ;;  %s4113_s25 = sld [smem:[#allocation2 + $0x52]] }
  0xdc   : > { %v596_v50 = vmul.f32 %v594_v4, %v422_v7  ;;  %v599_v51 = vmul.f32 %v598_v6, %v431_v43  ;;  %v600_v12 = vmul.f32 %v598_v6, %v432_v8  ;;  %v583_v20 = vmul.f32 %v582_v1, %v421_v42  ;;  %s4115_s26 = sld [smem:[#allocation2 + $0x37]] }
  0xdd   : > { %v3653_v24 = vadd.f32 %v588_v11, %v584_v9  ;;  %v595_v27 = vmul.f32 %v594_v4, %v421_v42  ;;  %v522_v39 = vstv %s3719_s18  ;;  %v532_v4 = vstv %s3721_s20  ;;  %s4117_s27 = sld [smem:[#allocation2 + $0x49]] }
  0xde   : > { %v3655_v15 = vadd.f32 %v600_v12, %v596_v50  ;;  %v3657_v14 = vadd.f32 %v587_v10, %v583_v20  ;;  %s4119_s28 = sld [smem:[#allocation2 + $0x42]] }
  0xdf   : > { %439 = vrot.lane.b32.xlu1 %v432_v8, %s6643_s8  ;;  %437 = vrot.lane.b32.xlu0 %v422_v7, %s6643_s8  ;;  %v3661_v30 = vadd.f32 %v599_v51, %v595_v27  ;;  %s3729_s8 = sld [smem:[#allocation2 + $0x29]] }
  0xe0   : > { %s4121_s30 = sld [smem:[#allocation2 + $0x54]] }
  0xe1   : > { %s4123_s5 = sld [smem:[#allocation2 + $0x39]] }
  0xe2   : > { %s4125_s29 = sld [smem:[#allocation2 + $0x4b]] }
  0xe3   : > { %471 = vrot.lane.b32.xlu1 %v431_v43, %s6641_s7  ;;  %469 = vrot.lane.b32.xlu0 %v421_v42, %s6641_s7  ;;  %s4127_s6 = sld [smem:[#allocation2 + $0x41]] }
  0xe4   : > { %s4129_s18 = sld [smem:[#allocation2 + $0x53]] }
  0xe5   : > { %s4131_s20 = sld [smem:[#allocation2 + $0x38]] }
  0xe7   : > { %475 = vrot.lane.b32.xlu1 %v432_v8, %s6641_s7  ;;  %473 = vrot.lane.b32.xlu0 %v422_v7, %s6641_s7  ;;  %s3727_s7 = sld [smem:[#allocation2 + $0x17]] }
  0xeb   : > { %543 = vrot.lane.b32.xlu1 %v431_v43, %s6639_s9  ;;  %541 = vrot.lane.b32.xlu0 %v421_v42, %s6639_s9 }
  0xef   : > { %547 = vrot.lane.b32.xlu1 %v432_v8, %s6639_s9  ;;  %545 = vrot.lane.b32.xlu0 %v422_v7, %s6639_s9  ;;  %s3725_s9 = sld [smem:[#allocation2 + $0x32]] }
  0xf3   : > { %507 = vrot.lane.b32.xlu1 %v431_v43, %s6637_s10  ;;  %505 = vrot.lane.b32.xlu0 %v421_v42, %s6637_s10 }
  0xf7   : > { %511 = vrot.lane.b32.xlu1 %v432_v8, %s6637_s10  ;;  %509 = vrot.lane.b32.xlu0 %v422_v7, %s6637_s10  ;;  %s3723_s10 = sld [smem:[#allocation2 + $0x20]] }
  0xfb   : > { %607 = vrot.lane.b32.xlu1 %v431_v43, %s6757_s14  ;;  %605 = vrot.lane.b32.xlu0 %v421_v42, %s6757_s14 }
  0xfd   : > { %v626_v6 = vstv %s3723_s10  ;;  %s6791_s10 = smov 113  }
  0xff   : > { %611 = vrot.lane.b32.xlu1 %v432_v8, %s6757_s14  ;;  %609 = vrot.lane.b32.xlu0 %v422_v7, %s6757_s14 }
 0x103   : > { %647 = vrot.lane.b32.xlu1 %v431_v43, %s6758_s19  ;;  %645 = vrot.lane.b32.xlu0 %v421_v42, %s6758_s19 }
 0x107   : > { %651 = vrot.lane.b32.xlu1 %v432_v8, %s6758_s19  ;;  %649 = vrot.lane.b32.xlu0 %v422_v7, %s6758_s19  ;;  %s3805_s19 = sld [smem:[#allocation2 + $0x2c]] }
 0x10b   : > { %687 = vrot.lane.b32.xlu1 %v431_v43, %s6759_s13  ;;  %685 = vrot.lane.b32.xlu0 %v421_v42, %s6759_s13 }
 0x10f   : > { %691 = vrot.lane.b32.xlu1 %v432_v8, %s6759_s13  ;;  %689 = vrot.lane.b32.xlu0 %v422_v7, %s6759_s13  ;;  %s3799_s13 = sld [smem:[#allocation2 + $0x1a]] }
 0x113   : > { %727 = vrot.lane.b32.xlu1 %v431_v43, %s6760_s17  ;;  %725 = vrot.lane.b32.xlu0 %v421_v42, %s6760_s17  ;;  %v638_v42 = vstv %s3725_s9  ;;  %s6790_s9 = smov 15  }
 0x117   : > { %731 = vrot.lane.b32.xlu1 %v432_v8, %s6760_s17  ;;  %729 = vrot.lane.b32.xlu0 %v422_v7, %s6760_s17  ;;  %s3753_s17 = sld [smem:[#allocation2 + $0x2b]]  ;;  %v622_v7 = vstv %s3727_s7  ;;  %s6788_s7 = smov 16  }
 0x14d   : > { %v436_v37 = vpop.permute.xlu1 %435  ;;  %v434_v40 = vpop.permute.xlu0 %433 }
 0x151   : > { %v440_v41 = vpop.permute.xlu1 %439  ;;  %v438_v13 = vpop.permute.xlu0 %437 }
 0x152   : > { %v442_v59 = vsel %vm249_vm1, %v436_v37, %v440_v41  ;;  %v444_v62 = vsel %vm249_vm1, %v440_v41, %v436_v37  ;;  %v441_v50 = vsel %vm249_vm1, %v434_v40, %v438_v13  ;;  %v443_v51 = vsel %vm249_vm1, %v438_v13, %v434_v40 }
 0x153   : > { %v447_v10 = vmul.f32 %v444_v62, %v3461_v22  ;;  %v448_v11 = vmul.f32 %v442_v59, %v3466_v23 }
 0x155   : > { %v472_v19 = vpop.permute.xlu1 %471  ;;  %v470_v31 = vpop.permute.xlu0 %469  ;;  %v455_v8 = vmul.f32 %v454_v45, %v447_v10  ;;  %v465_v62 = vmul.f32 %v464_v48, %v447_v10 }
 0x159   : > { %v476_v32 = vpop.permute.xlu1 %475  ;;  %v474_v44 = vpop.permute.xlu0 %473 }
 0x15a   : > { %v478_v12 = vsel %vm266_vm0, %v472_v19, %v476_v32  ;;  %v480_v20 = vsel %vm266_vm0, %v476_v32, %v472_v19  ;;  %v477_v41 = vsel %vm266_vm0, %v470_v31, %v474_v44  ;;  %v479_v40 = vsel %vm266_vm0, %v474_v44, %v470_v31 }
 0x15b   : > { %v445_v19 = vmul.f32 %v443_v51, %v3461_v22  ;;  %v446_v32 = vmul.f32 %v441_v50, %v3466_v23  ;;  %v456_v31 = vmul.f32 %v454_v45, %v448_v11  ;;  %v483_v44 = vmul.f32 %v480_v20, %v3442_v16 }
 0x15c   : > { %v484_v9 = vmul.f32 %v478_v12, %v3447_v17  ;;  %v466_v22 = vmul.f32 %v464_v48, %v448_v11  ;;  %v481_v23 = vmul.f32 %v479_v40, %v3442_v16  ;;  %v482_v50 = vmul.f32 %v477_v41, %v3447_v17 }
 0x15d   : > { %v544_v33 = vpop.permute.xlu1 %543  ;;  %v542_v34 = vpop.permute.xlu0 %541  ;;  %v451_v16 = vmul.f32 %v450_v49, %v445_v19  ;;  %v452_v17 = vmul.f32 %v450_v49, %v446_v32  ;;  %v461_v12 = vmul.f32 %v460_v54, %v445_v19 }
 0x15e   : > { %v502_v41 = vmul.f32 %v500_v36, %v484_v9 }
 0x161   : > { %v548_v0 = vpop.permute.xlu1 %547  ;;  %v546_v1 = vpop.permute.xlu0 %545 }
 0x162   : > { %v550_v51 = vsel %vm300_vm2, %v544_v33, %v548_v0  ;;  %v552_v45 = vsel %vm300_vm2, %v548_v0, %v544_v33  ;;  %v549_v20 = vsel %vm300_vm2, %v542_v34, %v546_v1  ;;  %v551_v10 = vsel %vm300_vm2, %v546_v1, %v542_v34 }
 0x163   : > { %v462_v33 = vmul.f32 %v460_v54, %v446_v32  ;;  %v491_v0 = vmul.f32 %v490_v35, %v483_v44  ;;  %v492_v34 = vmul.f32 %v490_v35, %v484_v9  ;;  %v501_v1 = vmul.f32 %v500_v36, %v483_v44 }
 0x164   : > { %v555_v40 = vmul.f32 %v552_v45, %v3478_v28  ;;  %v556_v49 = vmul.f32 %v550_v51, %v3483_v29  ;;  %v553_v19 = vmul.f32 %v551_v10, %v3478_v28  ;;  %v554_v54 = vmul.f32 %v549_v20, %v3483_v29 }
 0x165   : > { %v3793_v13 = vpop.permute.xlu1 %507  ;;  %v3795_v59 = vpop.permute.xlu0 %505  ;;  %v487_v32 = vmul.f32 %v486_v55, %v481_v23  ;;  %v488_v35 = vmul.f32 %v486_v55, %v482_v50  ;;  %v497_v44 = vmul.f32 %v496_v56, %v481_v23  ;;  %v498_v36 = vmul.f32 %v496_v56, %v482_v50 }
 0x166   : > { %v457_v29 = vadd.f32 %v455_v8, %v451_v16  ;;  %v458_v20 = vadd.f32 %v456_v31, %v452_v17  ;;  %v3851_v10 = vadd.f32 %v465_v62, %v461_v12  ;;  %v3853_v43 = vadd.f32 %v466_v22, %v462_v33 }
 0x167   : > { %v563_v55 = vmul.f32 %v562_v57, %v555_v40  ;;  %v564_v56 = vmul.f32 %v562_v57, %v556_v49  ;;  %v559_v23 = vmul.f32 %v558_v52, %v553_v19  ;;  %v560_v50 = vmul.f32 %v558_v52, %v554_v54 }
 0x168   : > { %v493_v37 = vadd.f32 %v491_v0, %v487_v32  ;;  %v494_v51 = vadd.f32 %v492_v34, %v488_v35  ;;  %v503_v28 = vadd.f32 %v501_v1, %v497_v44  ;;  %v504_v27 = vadd.f32 %v502_v41, %v498_v36 }
 0x169   : > { %v512_v48 = vpop.permute.xlu1 %511  ;;  %v510_v11 = vpop.permute.xlu0 %509  ;;  %v575_v62 = vmul.f32 %v574_v58, %v555_v40  ;;  %v576_v22 = vmul.f32 %v574_v58, %v556_v49  ;;  %v571_v52 = vmul.f32 %v570_v38, %v553_v19  ;;  %v572_v17 = vmul.f32 %v570_v38, %v554_v54 }
 0x16a   : > { %v514_v16 = vsel %vm283_vm3, %v3793_v13, %v512_v48  ;;  %v516_v57 = vsel %vm283_vm3, %v512_v48, %v3793_v13  ;;  %v513_v12 = vsel %vm283_vm3, %v3795_v59, %v510_v11  ;;  %v515_v58 = vsel %vm283_vm3, %v510_v11, %v3795_v59 }
 0x16b   : > { %v565_v33 = vadd.f32 %v563_v55, %v559_v23  ;;  %v566_v0 = vadd.f32 %v564_v56, %v560_v50  ;;  %v519_v48 = vmul.f32 %v516_v57, %v3511_v60  ;;  %v520_v38 = vmul.f32 %v514_v16, %v3516_v61 }
 0x16c   : > { %v3894_v11 = vadd.f32 %v3657_v14, %v493_v37  ;;  %v3897_v49 = vadd.f32 %v3653_v24, %v494_v51  ;;  %v517_v19 = vmul.f32 %v515_v58, %v3511_v60  ;;  %v518_v54 = vmul.f32 %v513_v12, %v3516_v61 }
 0x16d   : > { %v608_v9 = vpop.permute.xlu1 %607  ;;  %v606_v45 = vpop.permute.xlu0 %605  ;;  %v3902_v32 = vadd.f32 %v3661_v30, %v503_v28  ;;  %v3905_v35 = vadd.f32 %v3655_v15, %v504_v27  ;;  %v577_v37 = vadd.f32 %v575_v62, %v571_v52  ;;  %v578_v60 = vadd.f32 %v576_v22, %v572_v17 }
 0x16e   : > { %v3911_v44 = vadd.f32 %v565_v33, %v457_v29  ;;  %v3913_v15 = vadd.f32 %v566_v0, %v458_v20  ;;  %v527_v27 = vmul.f32 %v526_v53, %v519_v48  ;;  %v528_v36 = vmul.f32 %v526_v53, %v520_v38 }
 0x16f   : > { %v538_v51 = vmul.f32 %v536_v63, %v520_v38  ;;  %v524_v28 = vmul.f32 %v522_v39, %v518_v54  ;;  %v533_v29 = vmul.f32 %v532_v4, %v517_v19  ;;  %v534_v20 = vmul.f32 %v532_v4, %v518_v54 }
 0x170   : > { %v3952_v57 = vadd.f32 %v577_v37, %v3851_v10 }
 0x171   : > { %v612_v8 = vpop.permute.xlu1 %611  ;;  %v610_v31 = vpop.permute.xlu0 %609  ;;  %v540_v10 = vadd.f32 %v538_v51, %v534_v20  ;;  %v6767_v51 = vstv %s3735_s2  ;;  %v6769_v20 = vstv %s3737_s15  ;;  %s4029_s2 = sld [smem:[#allocation2 + $0x3a]] }
 0x172   : > { %v614_v34 = vsel %vm333_vm4, %v608_v9, %v612_v8  ;;  %v616_v13 = vsel %vm333_vm4, %v612_v8, %v608_v9  ;;  %v613_v1 = vsel %vm333_vm4, %v606_v45, %v610_v31  ;;  %v615_v41 = vsel %vm333_vm4, %v610_v31, %v606_v45  ;;  %s4055_s15 = sld [smem:[#allocation2 + $0x55]] }
 0x173   : > { %v619_v14 = vmul.f32 %v614_v34, %v3525_v2  ;;  %v620_v24 = vmul.f32 %v616_v13, %v3530_v3  ;;  %v617_v61 = vmul.f32 %v613_v1, %v3525_v2  ;;  %v618_v30 = vmul.f32 %v615_v41, %v3530_v3 }
 0x174   : > { %v537_v2 = vmul.f32 %v536_v63, %v519_v48  ;;  %v523_v3 = vmul.f32 %v522_v39, %v517_v19  ;;  %v6761_v31 = vstv %s3729_s8  ;;  %s6789_s8 = smov 1  }
 0x175   : > { %v648_v40 = vpop.permute.xlu1 %647  ;;  %v646_v59 = vpop.permute.xlu0 %645  ;;  %v627_v55 = vmul.f32 %v626_v6, %v619_v14  ;;  %v628_v53 = vmul.f32 %v626_v6, %v620_v24  ;;  %v623_v56 = vmul.f32 %v622_v7, %v617_v61  ;;  %v624_v23 = vmul.f32 %v622_v7, %v618_v30 }
 0x176   : > { %v639_v39 = vmul.f32 %v638_v42, %v619_v14  ;;  %v640_v8 = vmul.f32 %v638_v42, %v620_v24  ;;  %v635_v4 = vmul.f32 %v6761_v31, %v617_v61  ;;  %v6762_v62 = vmov %v6761_v31 }
 0x177   : > { %v636_v22 = vmul.f32 %v6762_v62, %v618_v30  ;;  %v3955_v7 = vadd.f32 %v578_v60, %v3853_v43  ;;  %v529_v12 = vadd.f32 %v527_v27, %v523_v3  ;;  %v530_v42 = vadd.f32 %v528_v36, %v524_v28 }
 0x178   : > { %v539_v0 = vadd.f32 %v537_v2, %v533_v29  ;;  %v629_v43 = vadd.f32 %v627_v55, %v623_v56  ;;  %v630_v34 = vadd.f32 %v628_v53, %v624_v23  ;;  %v641_v13 = vadd.f32 %v639_v39, %v635_v4 }
 0x179   : > { %v652_v9 = vpop.permute.xlu1 %651  ;;  %v650_v45 = vpop.permute.xlu0 %649  ;;  %v642_v48 = vadd.f32 %v640_v8, %v636_v22  ;;  %v6763_v14 = vstv %s3731_s0  ;;  %v6765_v60 = vstv %s3733_s1  ;;  %v6768_v28 = vmov %v6767_v51  ;;  %s4017_s0 = sld [smem:[#allocation4 + $0x2]] }
 0x17a   : > { %v654_v50 = vsel %vm354_vm5, %v648_v40, %v652_v9  ;;  %v656_v63 = vsel %vm354_vm5, %v652_v9, %v648_v40  ;;  %v653_v52 = vsel %vm354_vm5, %v646_v59, %v650_v45  ;;  %v655_v17 = vsel %vm354_vm5, %v650_v45, %v646_v59  ;;  %s4021_s1 = sld [smem:[#allocation4 + $0x3]] }
 0x17b   : > { %v659_v58 = vmul.f32 %v654_v50, %v3544_v26  ;;  %v660_v33 = vmul.f32 %v656_v63, %v3549_v25  ;;  %v657_v38 = vmul.f32 %v653_v52, %v3544_v26  ;;  %v658_v1 = vmul.f32 %v655_v17, %v3549_v25 }
 0x17c   : > { %v6764_v24 = vmov %v6763_v14  ;;  %v6766_v30 = vmov %v6765_v60  ;;  %v6770_v53 = vmov %v6769_v20  ;;  %v6771_v63 = vstv %s3739_s4  ;;  %s4049_s4 = sld [smem:[#allocation2 + $0x4c]] }
 0x17d   : > { %v688_v16 = vpop.permute.xlu1 %687  ;;  %v686_v6 = vpop.permute.xlu0 %685  ;;  %v667_v25 = vmul.f32 %v6763_v14, %v659_v58  ;;  %v668_v37 = vmul.f32 %v6764_v24, %v660_v33  ;;  %v679_v61 = vmul.f32 %v6765_v60, %v659_v58  ;;  %v680_v27 = vmul.f32 %v6766_v30, %v660_v33 }
 0x17e   : > { %v663_v3 = vmul.f32 %v6767_v51, %v657_v38  ;;  %v664_v29 = vmul.f32 %v6768_v28, %v658_v1  ;;  %v675_v55 = vmul.f32 %v6769_v20, %v657_v38  ;;  %v676_v56 = vmul.f32 %v6770_v53, %v658_v1 }
 0x17f   : > { %v6772_v8 = vmov %v6771_v63  ;;  %v6773_v4 = vstv %s3741_s16  ;;  %v6777_v17 = vstv %s3753_s17  ;;  %v632_v1 = vadd.f32 %v630_v34, %v530_v42  ;;  %s6787_s16 = smov 17   ;;  %s4103_s17 = sld [smem:[#allocation2 + $0x3f]] }
 0x180   : > { %v6774_v22 = vmov %v6773_v4  ;;  %v6778_v33 = vmov %v6777_v17  ;;  %v669_v42 = vadd.f32 %v667_v25, %v663_v3 }
 0x181   : > { %v692_v41 = vpop.permute.xlu1 %691  ;;  %v690_v40 = vpop.permute.xlu0 %689 }
 0x182   : > { %v694_v59 = vsel %vm375_vm6, %v688_v16, %v692_v41  ;;  %v696_v19 = vsel %vm375_vm6, %v692_v41, %v688_v16  ;;  %v693_v54 = vsel %vm375_vm6, %v686_v6, %v690_v40  ;;  %v695_v26 = vsel %vm375_vm6, %v690_v40, %v686_v6 }
 0x183   : > { %v699_v36 = vmul.f32 %v694_v59, %v3564_v21  ;;  %v700_v9 = vmul.f32 %v696_v19, %v3569_v18  ;;  %v697_v45 = vmul.f32 %v693_v54, %v3564_v21  ;;  %v698_v2 = vmul.f32 %v695_v26, %v3569_v18 }
 0x184   : > { %v6775_v16 = vstv %s3747_s3  ;;  %v631_v41 = vadd.f32 %v629_v43, %v529_v12  ;;  %v643_v40 = vadd.f32 %v641_v13, %v539_v0  ;;  %v644_v59 = vadd.f32 %v642_v48, %v540_v10  ;;  %s4039_s3 = sld [smem:[#allocation2 + $0x43]] }
 0x185   : > { %v728_v23 = vpop.permute.xlu1 %727  ;;  %v726_v50 = vpop.permute.xlu0 %725  ;;  %v707_v39 = vmul.f32 %v6771_v63, %v699_v36  ;;  %v708_v31 = vmul.f32 %v6772_v8, %v700_v9  ;;  %v719_v62 = vmul.f32 %v6773_v4, %v699_v36  ;;  %v720_v21 = vmul.f32 %v6774_v22, %v700_v9 }
 0x186   : > { %v703_v18 = vmul.f32 %v6775_v16, %v697_v45  ;;  %v6776_v6 = vmov %v6775_v16  ;;  %v715_v58 = vmul.f32 %v6777_v17, %v697_v45  ;;  %v716_v38 = vmul.f32 %v6778_v33, %v698_v2 }
 0x187   : > { %v704_v52 = vmul.f32 %v6776_v6, %v698_v2  ;;  %v670_v0 = vadd.f32 %v668_v37, %v664_v29  ;;  %v681_v10 = vadd.f32 %v679_v61, %v675_v55  ;;  %v682_v43 = vadd.f32 %v680_v27, %v676_v56 }
 0x188   : > { %v709_v19 = vadd.f32 %v707_v39, %v703_v18  ;;  %v721_v26 = vadd.f32 %v719_v62, %v715_v58  ;;  %v722_v14 = vadd.f32 %v720_v21, %v716_v38  ;;  %v6779_v2 = vstv %s3779_s21  ;;  %s4133_s21 = sld [smem:[#allocation2 + $0x4a]] }
 0x189   : > { %v710_v54 = vadd.f32 %v708_v31, %v704_v52  ;;  %v732_v24 = vpop.permute.xlu1 %731  ;;  %v730_v60 = vpop.permute.xlu0 %729  ;;  %v6780_v3 = vmov %v6779_v2  ;;  %v6781_v29 = vstv %s3787_s22  ;;  %v6785_v56 = vstv %s3805_s19  ;;  %s6792_s19 = smov 112   ;;  %s4135_s22 = sld [smem:[#allocation2 + $0x44]] }
 0x18a   : > { %v734_v30 = vsel %vm396_vm7, %v728_v23, %v732_v24  ;;  %v736_v36 = vsel %vm396_vm7, %v732_v24, %v728_v23  ;;  %v733_v9 = vsel %vm396_vm7, %v726_v50, %v730_v60  ;;  %v735_v12 = vsel %vm396_vm7, %v730_v60, %v726_v50 }
 0x18b   : > { %v739_v34 = vmul.f32 %v734_v30, %v3614_v46  ;;  %v740_v13 = vmul.f32 %v736_v36, %v3619_v47  ;;  %v737_v48 = vmul.f32 %v733_v9, %v3614_v46  ;;  %v738_v25 = vmul.f32 %v735_v12, %v3619_v47 }
 0x18c   : > { %v711_v37 = vadd.f32 %v709_v19, %v3894_v11  ;;  %v712_v61 = vadd.f32 %v710_v54, %v3897_v49  ;;  %v723_v27 = vadd.f32 %v721_v26, %v3902_v32  ;;  %v724_v45 = vadd.f32 %v722_v14, %v3905_v35 }
 0x18d   : > { %v747_v51 = vmul.f32 %v6779_v2, %v739_v34  ;;  %v748_v28 = vmul.f32 %v6780_v3, %v740_v13  ;;  %v759_v20 = vmul.f32 %v6781_v29, %v739_v34  ;;  %v6782_v55 = vmov %v6781_v29 }
 0x18e   : > { %v760_v46 = vmul.f32 %v6782_v55, %v740_v13  ;;  %v6783_v47 = vstv %s3799_s13  ;;  %v755_v32 = vmul.f32 %v6785_v56, %v737_v48  ;;  %v6786_v23 = vmov %v6785_v56  ;;  %s6793_s13 = smov 111  }
 0x18f   : > { %v743_v11 = vmul.f32 %v6783_v47, %v737_v48  ;;  %v6784_v53 = vmov %v6783_v47  ;;  %v756_v35 = vmul.f32 %v6786_v23, %v738_v25  ;;  %v671_v50 = vadd.f32 %v669_v42, %v3911_v44 }
 0x190   : > { %v744_v49 = vmul.f32 %v6784_v53, %v738_v25  ;;  %v672_v63 = vadd.f32 %v670_v0, %v3913_v15  ;;  %v683_v39 = vadd.f32 %v681_v10, %v3952_v57  ;;  %v684_v8 = vadd.f32 %v682_v43, %v3955_v7 }
 0x191   : > { %v749_v31 = vadd.f32 %v747_v51, %v743_v11  ;;  %v761_v62 = vadd.f32 %v759_v20, %v755_v32  ;;  %v762_v22 = vadd.f32 %v760_v46, %v756_v35  ;;  %v765_v21 = vadd.f32 %v711_v37, %v671_v50 }
 0x192   : > { %v750_v4 = vadd.f32 %v748_v28, %v744_v49  ;;  %v766_v16 = vadd.f32 %v712_v61, %v672_v63  ;;  %v775_v18 = vadd.f32 %v723_v27, %v683_v39  ;;  %v776_v6 = vadd.f32 %v724_v45, %v684_v8 }
 0x193   : > { %v751_v44 = vadd.f32 %v749_v31, %v631_v41  ;;  %v763_v57 = vadd.f32 %v761_v62, %v643_v40  ;;  %v764_v52 = vadd.f32 %v762_v22, %v644_v59  ;;  %v770_v17 = vstv %s4017_s0  ;;  %s4137_s0 = sld [smem:[#allocation2 + $0x56]] }
 0x194   : > { %v752_v15 = vadd.f32 %v750_v4, %v632_v1  ;;  %v780_v7 = vstv %s4021_s1  ;;  %v934_v60 = vstv %s4029_s2  ;;  %v938_v30 = vstv %s4039_s3  ;;  %s4139_s1 = sld [smem:[#allocation2 + $0x3b]] }
 0x195   : > { %v767_v58 = vadd.f32 %v765_v21, %v751_v44  ;;  %v777_v38 = vadd.f32 %v775_v18, %v763_v57  ;;  %v778_v19 = vadd.f32 %v776_v6, %v764_v52  ;;  %v946_v36 = vstv %s4049_s4  ;;  %s4141_s2 = sld [smem:[#allocation2 + $0x4d]] }
 0x196   : > { %v768_v33 = vadd.f32 %v766_v16, %v752_v15  ;;  %v950_v9 = vstv %s4055_s15  ;;  %s4143_s3 = sld [smem:[#allocation2 + $0x45]]  ;;  %v806_v46 = vstv %s4103_s17  ;;  %v816_v47 = vstv %s4105_s23 }
 0x197   : > { %v771_v54 = vadd.f32 %v770_v17, %v767_v58  ;;  %v781_v14 = vadd.f32 %v780_v7, %v777_v38  ;;  %v782_v24 = vadd.f32 %v780_v7, %v778_v19  ;;  %s4145_s4 = sld [smem:[#allocation2 + $0x57]]  ;;  %v802_v11 = vstv %s4107_s24 }
 0x198   : > { %v772_v26 = vadd.f32 %v770_v17, %v768_v33  ;;  %s4147_s15 = sld [smem:[#allocation2 + $0x3c]]  ;;  %v812_v53 = vstv %s4109_s11  ;;  %v842_v32 = vstv %s4111_s12  ;;  %v852_v23 = vstv %s4113_s25 }
 0x199   : > { %v773_v41 = vmax.f32 %v771_v54, 0.0  ;;  %v783_v1 = vmax.f32 %v781_v14, 0.0  ;;  %v784_v42 = vmax.f32 %v782_v24, 0.0  ;;  %v838_v35 = vstv %s4115_s26  ;;  %s4167_s17 = sld [smem:[#allocation2 + $0x4f]]  ;;  %s6828_s26 = smov 15  }
 0x19a   : > { %v774_v12 = vmax.f32 %v772_v26, 0.0  ;;  %v848_v50 = vstv %s4117_s27  ;;  %v914_v63 = vstv %s4119_s28  ;;  %v926_v39 = vstv %s4121_s30  ;;  %s4229_s23 = sld [smem:[#allocation2 + $0x50]]  ;;  %s6829_s27 = smov 127  }
 0x19b   : > { %787 = vrot.lane.b32.xlu1 %v783_v1, %s6787_s16  ;;  %785 = vrot.lane.b32.xlu0 %v773_v41, %s6787_s16  ;;  %v939_v59 = vmul.f32 %v938_v30, %v783_v1  ;;  %v940_v0 = vmul.f32 %v938_v30, %v784_v42  ;;  %v951_v43 = vmul.f32 %v950_v9, %v783_v1  ;;  %v910_v8 = vstv %s4123_s5  ;;  %s4517_s24 = sld [smem:[#allocation4 + $0x5]]  ;;  %s6830_s28 = smov 113  }
 0x19c   : > { %v936_v40 = vmul.f32 %v934_v60, %v774_v12  ;;  %v948_v10 = vmul.f32 %v946_v36, %v774_v12  ;;  %v952_v34 = vmul.f32 %v950_v9, %v784_v42  ;;  %v935_v13 = vmul.f32 %v934_v60, %v773_v41  ;;  %s4525_s11 = sld [smem:[#allocation2 + $0x5e]]  ;;  %s6831_s30 = smov 112  }
 0x19d   : > { %v947_v25 = vmul.f32 %v946_v36, %v773_v41  ;;  %v922_v31 = vstv %s4125_s29  ;;  %v878_v22 = vstv %s4127_s6  ;;  %v888_v21 = vstv %s4129_s18  ;;  %s4535_s12 = sld [smem:[#allocation2 + $0x67]]  ;;  %s6832_s5 = smov 111  }
 0x19e   : > { %v4065_v48 = vadd.f32 %v940_v0, %v936_v40  ;;  %v4067_v37 = vadd.f32 %v952_v34, %v948_v10  ;;  %v4069_v61 = vadd.f32 %v939_v59, %v935_v13  ;;  %6794 = sst [smem:[#allocation10_spill]] %s4147_s15  ;;  %v874_v6 = vstv %s4131_s20 }
 0x19f   : > { %791 = vrot.lane.b32.xlu1 %v784_v42, %s6787_s16  ;;  %789 = vrot.lane.b32.xlu0 %v774_v12, %s6787_s16  ;;  %v4073_v27 = vadd.f32 %v951_v43, %v947_v25  ;;  %v884_v44 = vstv %s4133_s21  ;;  %v978_v15 = vstv %s4135_s22  ;;  %s4211_s16 = sld [smem:[#allocation2 + $0x59]] }
 0x1a0   : > { %v990_v57 = vstv %s4137_s0  ;;  %v974_v52 = vstv %s4139_s1  ;;  %v986_v17 = vstv %s4141_s2  ;;  %v1018_v7 = vstv %s4143_s3  ;;  %s4545_s25 = sld [smem:[#allocation2 + $0x70]] }
 0x1a1   : > { %v1030_v58 = vstv %s4145_s4  ;;  %v1014_v30 = vstv %s4147_s15  ;;  %s4599_s29 = sld [smem:[#allocation2 + $0x63]] }
 0x1a2   : > { %s4601_s6 = sld [smem:[#allocation2 + $0x75]] }
 0x1a3   : > { %823 = vrot.lane.b32.xlu1 %v783_v1, %s6788_s7  ;;  %821 = vrot.lane.b32.xlu0 %v773_v41, %s6788_s7  ;;  %s4603_s18 = sld [smem:[#allocation2 + $0x5a]] }
 0x1a4   : > { %s4605_s20 = sld [smem:[#allocation2 + $0x6c]] }
 0x1a5   : > { %s4607_s21 = sld [smem:[#allocation2 + $0x64]] }
 0x1a6   : > { %s4615_s2 = sld [smem:[#allocation2 + $0x66]] }
 0x1a7   : > { %827 = vrot.lane.b32.xlu1 %v784_v42, %s6788_s7  ;;  %825 = vrot.lane.b32.xlu0 %v774_v12, %s6788_s7  ;;  %s4223_s7 = sld [smem:[#allocation2 + $0x3e]] }
 0x1a8   : > { %s4617_s15 = sld [smem:[#allocation2 + $0x78]] }
 0x1a9   : > { %s4625_s3 = sld [smem:[#allocation2 + $0x77]] }
 0x1aa   : > { %s4627_s4 = sld [smem:[#allocation2 + $0x5c]] }
 0x1ab   : > { %895 = vrot.lane.b32.xlu1 %v783_v1, %s6789_s8  ;;  %893 = vrot.lane.b32.xlu0 %v773_v41, %s6789_s8 }
 0x1af   : > { %899 = vrot.lane.b32.xlu1 %v784_v42, %s6789_s8  ;;  %897 = vrot.lane.b32.xlu0 %v774_v12, %s6789_s8  ;;  %s6798_s8 = sld [smem:[#allocation21_spill]] }
 0x1b3   : > { %859 = vrot.lane.b32.xlu1 %v783_v1, %s6790_s9  ;;  %857 = vrot.lane.b32.xlu0 %v773_v41, %s6790_s9 }
 0x1b5   : > { %v4190_v33 = vld [vmem:[%s6798_s8] sm:$0xff]  ;;  %v4196_v19 = vld [vmem:[%s6798_s8 + $0x8] sm:$0xff]  ;;  %v4234_v25 = vld [vmem:[%s6798_s8 + $0x10] sm:$0xff] }
 0x1b7   : > { %863 = vrot.lane.b32.xlu1 %v784_v42, %s6790_s9  ;;  %861 = vrot.lane.b32.xlu0 %v774_v12, %s6790_s9  ;;  %s4203_s9 = sld [smem:[#allocation2 + $0x47]] }
 0x1bb   : > { %959 = vrot.lane.b32.xlu1 %v783_v1, %s6757_s14  ;;  %957 = vrot.lane.b32.xlu0 %v773_v41, %s6757_s14 }
 0x1bf   : > { %963 = vrot.lane.b32.xlu1 %v784_v42, %s6757_s14  ;;  %961 = vrot.lane.b32.xlu0 %v774_v12, %s6757_s14  ;;  %s4161_s14 = sld [smem:[#allocation2 + $0x3d]] }
 0x1c3   : > { %999 = vrot.lane.b32.xlu1 %v783_v1, %s6791_s10  ;;  %997 = vrot.lane.b32.xlu0 %v773_v41, %s6791_s10 }
 0x1c7   : > { %1003 = vrot.lane.b32.xlu1 %v784_v42, %s6791_s10  ;;  %1001 = vrot.lane.b32.xlu0 %v774_v12, %s6791_s10  ;;  %s4153_s10 = sld [smem:[#allocation2 + $0x58]] }
 0x1cb   : > { %1039 = vrot.lane.b32.xlu1 %v783_v1, %s6792_s19  ;;  %1037 = vrot.lane.b32.xlu0 %v773_v41, %s6792_s19 }
 0x1cd   : > { %6797 = sst [smem:[#allocation13_spill]] %s4153_s10 }
 0x1ce   : > { %s6804_s1 = sld [smem:[#allocation13_spill]] }
 0x1cf   : > { %1043 = vrot.lane.b32.xlu1 %v784_v42, %s6792_s19  ;;  %1041 = vrot.lane.b32.xlu0 %v774_v12, %s6792_s19  ;;  %s4151_s19 = sld [smem:[#allocation2 + $0x46]] }
 0x1d0   : > { %s4619_s10 = sld [smem:[#allocation2 + $0x5d]] }
 0x1d3   : > { %1079 = vrot.lane.b32.xlu1 %v783_v1, %s6793_s13  ;;  %1077 = vrot.lane.b32.xlu0 %v773_v41, %s6793_s13 }
 0x1d5   : > { %6796 = sst [smem:[#allocation12_spill]] %s4151_s19 }
 0x1d6   : > { %s6803_s0 = sld [smem:[#allocation12_spill]] }
 0x1d7   : > { %1083 = vrot.lane.b32.xlu1 %v784_v42, %s6793_s13  ;;  %1081 = vrot.lane.b32.xlu0 %v774_v12, %s6793_s13  ;;  %s4149_s13 = sld [smem:[#allocation2 + $0x4e]] }
 0x1d8   : > { %s4621_s19 = sld [smem:[#allocation2 + $0x6f]] }
 0x1dd   : > { %6795 = sst [smem:[#allocation11_spill]] %s4149_s13 }
 0x1de   : > { %s6802_s22 = sld [smem:[#allocation11_spill]] }
 0x1df   : > { %s4631_s13 = sld [smem:[#allocation2 + $0x68]] }
 0x20d   : > { %v788_v45 = vpop.permute.xlu1 %787  ;;  %v786_v2 = vpop.permute.xlu0 %785 }
 0x211   : > { %v792_v51 = vpop.permute.xlu1 %791  ;;  %v790_v3 = vpop.permute.xlu0 %789 }
 0x212   : > { %v794_v4 = vsel %vm249_vm1, %v788_v45, %v792_v51  ;;  %v796_v62 = vsel %vm249_vm1, %v792_v51, %v788_v45  ;;  %v793_v26 = vsel %vm249_vm1, %v786_v2, %v790_v3  ;;  %v795_v14 = vsel %vm249_vm1, %v790_v3, %v786_v2  ;;  %v4240_v2 = vld [vmem:[%s6798_s8 + $0x18] sm:$0xff] }
 0x213   : > { %v799_v38 = vmul.f32 %v4190_v33, %v796_v62  ;;  %v800_v54 = vmul.f32 %v4196_v19, %v794_v4  ;;  %v797_v59 = vmul.f32 %v4190_v33, %v795_v14  ;;  %v798_v0 = vmul.f32 %v4196_v19, %v793_v26 }
 0x215   : > { %v824_v28 = vpop.permute.xlu1 %823  ;;  %v822_v29 = vpop.permute.xlu0 %821  ;;  %v807_v34 = vmul.f32 %v806_v46, %v799_v38  ;;  %v808_v13 = vmul.f32 %v806_v46, %v800_v54  ;;  %v817_v3 = vmul.f32 %v816_v47, %v799_v38  ;;  %v804_v26 = vmul.f32 %v802_v11, %v798_v0 }
 0x217   : > { %v810_v40 = vadd.f32 %v808_v13, %v804_v26 }
 0x219   : > { %v828_v20 = vpop.permute.xlu1 %827  ;;  %v826_v55 = vpop.permute.xlu0 %825 }
 0x21a   : > { %v830_v24 = vsel %vm266_vm0, %v824_v28, %v828_v20  ;;  %v832_v60 = vsel %vm266_vm0, %v828_v20, %v824_v28  ;;  %v829_v9 = vsel %vm266_vm0, %v822_v29, %v826_v55  ;;  %v831_v41 = vsel %vm266_vm0, %v826_v55, %v822_v29 }
 0x21b   : > { %v835_v45 = vmul.f32 %v4234_v25, %v832_v60  ;;  %v836_v51 = vmul.f32 %v4240_v2, %v830_v24  ;;  %v818_v28 = vmul.f32 %v816_v47, %v800_v54  ;;  %v833_v29 = vmul.f32 %v4234_v25, %v831_v41 }
 0x21c   : > { %v834_v20 = vmul.f32 %v4240_v2, %v829_v9  ;;  %v803_v54 = vmul.f32 %v802_v11, %v797_v59  ;;  %v4274_v11 = vld [vmem:[%s6798_s8 + $0x30] sm:$0xff] }
 0x21d   : > { %v896_v49 = vpop.permute.xlu1 %895  ;;  %v4159_v56 = vpop.permute.xlu0 %893  ;;  %v843_v14 = vmul.f32 %v842_v32, %v835_v45  ;;  %v844_v24 = vmul.f32 %v842_v32, %v836_v51  ;;  %v839_v41 = vmul.f32 %v838_v35, %v833_v29 }
 0x21f   : > { %v845_v10 = vadd.f32 %v843_v14, %v839_v41 }
 0x221   : > { %v900_v16 = vpop.permute.xlu1 %899  ;;  %v898_v18 = vpop.permute.xlu0 %897 }
 0x222   : > { %v902_v55 = vsel %vm300_vm2, %v896_v49, %v900_v16  ;;  %v904_v46 = vsel %vm300_vm2, %v900_v16, %v896_v49  ;;  %v901_v4 = vsel %vm300_vm2, %v4159_v56, %v898_v18  ;;  %v903_v62 = vsel %vm300_vm2, %v898_v18, %v4159_v56 }
 0x223   : > { %v813_v49 = vmul.f32 %v812_v53, %v797_v59  ;;  %v814_v16 = vmul.f32 %v812_v53, %v798_v0  ;;  %v853_v56 = vmul.f32 %v852_v23, %v835_v45  ;;  %v854_v18 = vmul.f32 %v852_v23, %v836_v51  ;;  %v4280_v53 = vld [vmem:[%s6798_s8 + $0x38] sm:$0xff] }
 0x224   : > { %v907_v60 = vmul.f32 %v4274_v11, %v904_v46  ;;  %v908_v32 = vmul.f32 %v4280_v53, %v902_v55  ;;  %v905_v9 = vmul.f32 %v4274_v11, %v903_v62  ;;  %v906_v23 = vmul.f32 %v4280_v53, %v901_v4 }
 0x225   : > { %v4217_v12 = vpop.permute.xlu1 %859  ;;  %v4219_v1 = vpop.permute.xlu0 %857  ;;  %v840_v59 = vmul.f32 %v838_v35, %v834_v20  ;;  %v849_v0 = vmul.f32 %v848_v50, %v833_v29  ;;  %v850_v45 = vmul.f32 %v848_v50, %v834_v20  ;;  %v809_v4 = vadd.f32 %v807_v34, %v803_v54 }
 0x226   : > { %v4297_v42 = vadd.f32 %v817_v3, %v813_v49  ;;  %v4299_v36 = vadd.f32 %v818_v28, %v814_v16  ;;  %v915_v35 = vmul.f32 %v914_v63, %v907_v60  ;;  %v916_v50 = vmul.f32 %v914_v63, %v908_v32 }
 0x227   : > { %v911_v29 = vmul.f32 %v910_v8, %v905_v9  ;;  %v912_v20 = vmul.f32 %v910_v8, %v906_v23  ;;  %v846_v55 = vadd.f32 %v844_v24, %v840_v59  ;;  %v855_v62 = vadd.f32 %v853_v56, %v849_v0  ;;  %v4342_v56 = vld [vmem:[%s6798_s8 + $0x28] sm:$0xff] }
 0x228   : > { %v856_v43 = vadd.f32 %v854_v18, %v850_v45  ;;  %v927_v3 = vmul.f32 %v926_v39, %v907_v60  ;;  %v928_v28 = vmul.f32 %v926_v39, %v908_v32  ;;  %v923_v8 = vmul.f32 %v922_v31, %v905_v9 }
 0x229   : > { %v864_v47 = vpop.permute.xlu1 %863  ;;  %v862_v38 = vpop.permute.xlu0 %861  ;;  %v924_v26 = vmul.f32 %v922_v31, %v906_v23  ;;  %v917_v16 = vadd.f32 %v915_v35, %v911_v29  ;;  %v918_v14 = vadd.f32 %v916_v50, %v912_v20  ;;  %v4336_v31 = vld [vmem:[%s6798_s8 + $0x20] sm:$0xff]  ;;  %v4350_v9 = vadd.f32 %v4069_v61, %v845_v10  ;;  %v4366_v61 = vld [vmem:[%s6798_s8 + $0x50] sm:$0xff]  ;;  %v4372_v10 = vld [vmem:[%s6798_s8 + $0x58] sm:$0xff] }
 0x22a   : > { %v866_v54 = vsel %vm283_vm3, %v4217_v12, %v864_v47  ;;  %v868_v63 = vsel %vm283_vm3, %v864_v47, %v4217_v12  ;;  %v865_v49 = vsel %vm283_vm3, %v4219_v1, %v862_v38  ;;  %v867_v39 = vsel %vm283_vm3, %v862_v38, %v4219_v1 }
 0x22b   : > { %v871_v47 = vmul.f32 %v4336_v31, %v868_v63  ;;  %v872_v1 = vmul.f32 %v4342_v56, %v866_v54  ;;  %v4353_v23 = vadd.f32 %v4065_v48, %v846_v55  ;;  %v869_v41 = vmul.f32 %v4336_v31, %v867_v39 }
 0x22c   : > { %v870_v59 = vmul.f32 %v4342_v56, %v865_v49  ;;  %v4358_v0 = vadd.f32 %v4073_v27, %v855_v62  ;;  %v4361_v45 = vadd.f32 %v4067_v37, %v856_v43  ;;  %v929_v37 = vadd.f32 %v927_v3, %v923_v8 }
 0x22d   : > { %v960_v51 = vpop.permute.xlu1 %959  ;;  %v958_v46 = vpop.permute.xlu0 %957  ;;  %v930_v43 = vadd.f32 %v928_v28, %v924_v26  ;;  %v4377_v55 = vadd.f32 %v917_v16, %v809_v4  ;;  %v4379_v62 = vadd.f32 %v918_v14, %v810_v40  ;;  %v879_v35 = vmul.f32 %v878_v22, %v871_v47 }
 0x22e   : > { %v880_v50 = vmul.f32 %v878_v22, %v872_v1  ;;  %v875_v3 = vmul.f32 %v874_v6, %v869_v41  ;;  %v876_v4 = vmul.f32 %v874_v6, %v870_v59  ;;  %v885_v40 = vmul.f32 %v884_v44, %v869_v41 }
 0x22f   : > { %v886_v28 = vmul.f32 %v884_v44, %v870_v59  ;;  %v4418_v14 = vadd.f32 %v929_v37, %v4297_v42 }
 0x231   : > { %v964_v34 = vpop.permute.xlu1 %963  ;;  %v962_v13 = vpop.permute.xlu0 %961 }
 0x232   : > { %v966_v24 = vsel %vm333_vm4, %v960_v51, %v964_v34  ;;  %v968_v12 = vsel %vm333_vm4, %v964_v34, %v960_v51  ;;  %v965_v38 = vsel %vm333_vm4, %v958_v46, %v962_v13  ;;  %v967_v18 = vsel %vm333_vm4, %v962_v13, %v958_v46 }
 0x233   : > { %v971_v48 = vmul.f32 %v4366_v61, %v966_v24  ;;  %v972_v27 = vmul.f32 %v4372_v10, %v968_v12  ;;  %v969_v51 = vmul.f32 %v4366_v61, %v965_v38  ;;  %v970_v46 = vmul.f32 %v4372_v10, %v967_v18 }
 0x234   : > { %v889_v34 = vmul.f32 %v888_v21, %v871_v47  ;;  %v890_v13 = vmul.f32 %v888_v21, %v872_v1  ;;  %v881_v47 = vadd.f32 %v879_v35, %v875_v3  ;;  %v4460_v3 = vld [vmem:[%s6798_s8 + $0x70] sm:$0xff] }
 0x235   : > { %v1000_v60 = vpop.permute.xlu1 %999  ;;  %v998_v32 = vpop.permute.xlu0 %997  ;;  %v979_v54 = vmul.f32 %v978_v15, %v971_v48  ;;  %v980_v22 = vmul.f32 %v978_v15, %v972_v27  ;;  %v975_v63 = vmul.f32 %v974_v52, %v969_v51  ;;  %v976_v8 = vmul.f32 %v974_v52, %v970_v46  ;;  %6805 = vst [vmem:[#allocation16_spill] sm:$0xff] %v4460_v3 }
 0x236   : > { %v991_v6 = vmul.f32 %v990_v57, %v971_v48  ;;  %v992_v49 = vmul.f32 %v990_v57, %v972_v27  ;;  %v987_v44 = vmul.f32 %v986_v17, %v969_v51  ;;  %v988_v39 = vmul.f32 %v986_v17, %v970_v46  ;;  %v4430_v17 = vld [vmem:[%s6798_s8 + $0x60] sm:$0xff] }
 0x237   : > { %v4421_v52 = vadd.f32 %v930_v43, %v4299_v36  ;;  %v882_v57 = vadd.f32 %v880_v50, %v876_v4  ;;  %6799 = vst [vmem:[#allocation14_spill] sm:$0xff] %v4430_v17  ;;  %v4436_v36 = vld [vmem:[%s6798_s8 + $0x68] sm:$0xff]  ;;  %v891_v38 = vadd.f32 %v889_v34, %v885_v40  ;;  %v892_v18 = vadd.f32 %v890_v13, %v886_v28 }
 0x238   : > { %6800 = vst [vmem:[#allocation15_spill] sm:$0xff] %v4436_v36  ;;  %v993_v41 = vadd.f32 %v991_v6, %v987_v44  ;;  %v994_v59 = vadd.f32 %v992_v49, %v988_v39  ;;  %v6809_v44 = vstv %s6803_s0  ;;  %s4611_s0 = sld [smem:[#allocation2 + $0x5b]] }
 0x239   : > { %v1004_v29 = vpop.permute.xlu1 %1003  ;;  %v1002_v20 = vpop.permute.xlu0 %1001 }
 0x23a   : > { %v1006_v26 = vsel %vm354_vm5, %v1000_v60, %v1004_v29  ;;  %v1008_v21 = vsel %vm354_vm5, %v1004_v29, %v1000_v60  ;;  %v1005_v24 = vsel %vm354_vm5, %v998_v32, %v1002_v20  ;;  %v1007_v12 = vsel %vm354_vm5, %v1002_v20, %v998_v32 }
 0x23b   : > { %v1011_v1 = vmul.f32 %v4430_v17, %v1006_v26  ;;  %v1012_v42 = vmul.f32 %v4436_v36, %v1008_v21  ;;  %v981_v60 = vadd.f32 %v979_v54, %v975_v63  ;;  %v982_v32 = vadd.f32 %v980_v22, %v976_v8 }
 0x23c   : > { %v1009_v48 = vmul.f32 %v4430_v17, %v1005_v24  ;;  %v1010_v27 = vmul.f32 %v4436_v36, %v1007_v12  ;;  %v6807_v63 = vstv %s6802_s22  ;;  %v6811_v24 = vstv %s6804_s1  ;;  %s4609_s22 = sld [smem:[#allocation2 + $0x76]] }
 0x23d   : > { %v1040_v16 = vpop.permute.xlu1 %1039  ;;  %v1038_v15 = vpop.permute.xlu0 %1037  ;;  %v1019_v29 = vmul.f32 %v1018_v7, %v1011_v1  ;;  %v1020_v20 = vmul.f32 %v1018_v7, %v1012_v42  ;;  %v1031_v34 = vmul.f32 %v1030_v58, %v1011_v1  ;;  %v1032_v13 = vmul.f32 %v1030_v58, %v1012_v42  ;;  %v4466_v7 = vld [vmem:[%s6798_s8 + $0x78] sm:$0xff]  ;;  %s4613_s1 = sld [smem:[#allocation2 + $0x6d]] }
 0x23e   : > { %6806 = vst [vmem:[#allocation17_spill] sm:$0xff] %v4466_v7  ;;  %v1015_v54 = vmul.f32 %v1014_v30, %v1009_v48  ;;  %v1016_v22 = vmul.f32 %v1014_v30, %v1010_v27  ;;  %v1027_v8 = vmul.f32 %v6807_v63, %v1009_v48  ;;  %v6808_v26 = vmov %v6807_v63 }
 0x23f   : > { %v1028_v21 = vmul.f32 %v6808_v26, %v1010_v27  ;;  %v6812_v1 = vmov %v6811_v24  ;;  %v983_v63 = vadd.f32 %v981_v60, %v881_v47  ;;  %v984_v27 = vadd.f32 %v982_v32, %v882_v57 }
 0x240   : > { %v995_v26 = vadd.f32 %v993_v41, %v891_v38  ;;  %v1021_v57 = vadd.f32 %v1019_v29, %v1015_v54  ;;  %v1022_v38 = vadd.f32 %v1020_v20, %v1016_v22  ;;  %v4514_v41 = vld [vmem:[%s6798_s8 + $0x88] sm:$0xff]  ;;  %v6817_v22 = vstv %s4203_s9  ;;  %s4551_s9 = sld [smem:[#allocation2 + $0x79]] }
 0x241   : > { %v1044_v37 = vpop.permute.xlu1 %1043  ;;  %v1042_v43 = vpop.permute.xlu0 %1041  ;;  %v1034_v60 = vadd.f32 %v1032_v13, %v1028_v21  ;;  %v6818_v21 = vmov %v6817_v22 }
 0x242   : > { %v1046_v51 = vsel %vm375_vm6, %v1040_v16, %v1044_v37  ;;  %v1048_v46 = vsel %vm375_vm6, %v1044_v37, %v1040_v16  ;;  %v1045_v35 = vsel %vm375_vm6, %v1038_v15, %v1042_v43  ;;  %v1047_v50 = vsel %vm375_vm6, %v1042_v43, %v1038_v15 }
 0x243   : > { %v1051_v4 = vmul.f32 %v4460_v3, %v1046_v51  ;;  %v1052_v40 = vmul.f32 %v4466_v7, %v1048_v46  ;;  %v1049_v58 = vmul.f32 %v4460_v3, %v1045_v35  ;;  %v1050_v28 = vmul.f32 %v4466_v7, %v1047_v50 }
 0x244   : > { %v6810_v16 = vmov %v6809_v44  ;;  %v6813_v37 = vstv %s4161_s14  ;;  %v6815_v35 = vstv %s4167_s17  ;;  %v996_v7 = vadd.f32 %v994_v59, %v892_v18  ;;  %s4503_s14 = sld [smem:[#allocation4 + $0x4]] }
 0x245   : > { %v1080_v6 = vpop.permute.xlu1 %1079  ;;  %v1078_v49 = vpop.permute.xlu0 %1077  ;;  %v1059_v39 = vmul.f32 %v6809_v44, %v1051_v4  ;;  %v1060_v15 = vmul.f32 %v6810_v16, %v1052_v40  ;;  %v1071_v12 = vmul.f32 %v6811_v24, %v1051_v4  ;;  %v1072_v42 = vmul.f32 %v6812_v1, %v1052_v40  ;;  %s4629_s17 = sld [smem:[#allocation2 + $0x6e]] }
 0x246   : > { %v1055_v43 = vmul.f32 %v6813_v37, %v1049_v58  ;;  %v6814_v51 = vmov %v6813_v37  ;;  %v1067_v30 = vmul.f32 %v6815_v35, %v1049_v58  ;;  %v6816_v50 = vmov %v6815_v35 }
 0x247   : > { %v1056_v46 = vmul.f32 %v6814_v51, %v1050_v28  ;;  %v1068_v48 = vmul.f32 %v6816_v50, %v1050_v28  ;;  %v1033_v18 = vadd.f32 %v1031_v34, %v1027_v8  ;;  %v6821_v1 = vstv %s4223_s7  ;;  %s6826_s7 = smov 16  }
 0x248   : > { %v1061_v3 = vadd.f32 %v1059_v39, %v1055_v43  ;;  %v1073_v36 = vadd.f32 %v1071_v12, %v1067_v30  ;;  %v1023_v37 = vadd.f32 %v1021_v57, %v4377_v55  ;;  %v1024_v43 = vadd.f32 %v1022_v38, %v4379_v62 }
 0x249   : > { %v1062_v44 = vadd.f32 %v1060_v15, %v1056_v46  ;;  %v1074_v16 = vadd.f32 %v1072_v42, %v1068_v48  ;;  %v1084_v17 = vpop.permute.xlu1 %1083  ;;  %v1082_v4 = vpop.permute.xlu0 %1081  ;;  %v6823_v42 = vstv %s4229_s23  ;;  %v1035_v51 = vadd.f32 %v1033_v18, %v4418_v14  ;;  %s6827_s23 = smov 1  }
 0x24a   : > { %v1086_v40 = vsel %vm396_vm7, %v1080_v6, %v1084_v17  ;;  %v1088_v24 = vsel %vm396_vm7, %v1084_v17, %v1080_v6  ;;  %v1085_v58 = vsel %vm396_vm7, %v1078_v49, %v1082_v4  ;;  %v1087_v47 = vsel %vm396_vm7, %v1082_v4, %v1078_v49  ;;  %v4508_v17 = vld [vmem:[%s6798_s8 + $0x80] sm:$0xff]  ;;  %s4643_s8 = sld [smem:[#allocation2 + $0x60]] }
 0x24b   : > { %v1091_v32 = vmul.f32 %v4508_v17, %v1086_v40  ;;  %v1092_v59 = vmul.f32 %v4514_v41, %v1088_v24  ;;  %v1089_v29 = vmul.f32 %v4508_v17, %v1085_v58  ;;  %v1090_v20 = vmul.f32 %v4514_v41, %v1087_v47 }
 0x24c   : > { %v1063_v34 = vadd.f32 %v1061_v3, %v4350_v9  ;;  %v1064_v13 = vadd.f32 %v1062_v44, %v4353_v23  ;;  %v1075_v28 = vadd.f32 %v1073_v36, %v4358_v0  ;;  %v1076_v54 = vadd.f32 %v1074_v16, %v4361_v45 }
 0x24d   : > { %v1099_v8 = vmul.f32 %v6817_v22, %v1091_v32  ;;  %v1100_v6 = vmul.f32 %v6818_v21, %v1092_v59  ;;  %v6819_v49 = vstv %s4211_s16  ;;  %v1095_v9 = vmul.f32 %v6821_v1, %v1089_v29  ;;  %s6825_s16 = smov 17  }
 0x24e   : > { %v1111_v39 = vmul.f32 %v6819_v49, %v1091_v32  ;;  %v6820_v15 = vmov %v6819_v49  ;;  %v6822_v3 = vmov %v6821_v1  ;;  %v1107_v0 = vmul.f32 %v6823_v42, %v1089_v29 }
 0x24f   : > { %v1112_v12 = vmul.f32 %v6820_v15, %v1092_v59  ;;  %v1096_v23 = vmul.f32 %v6822_v3, %v1090_v20  ;;  %v6824_v36 = vmov %v6823_v42  ;;  %v1036_v46 = vadd.f32 %v1034_v60, %v4421_v52 }
 0x250   : > { %v1108_v45 = vmul.f32 %v6824_v36, %v1090_v20  ;;  %v1101_v35 = vadd.f32 %v1099_v8, %v1095_v9  ;;  %v1113_v50 = vadd.f32 %v1111_v39, %v1107_v0  ;;  %v1117_v44 = vadd.f32 %v1063_v34, %v1023_v37 }
 0x251   : > { %v1102_v30 = vadd.f32 %v1100_v6, %v1096_v23  ;;  %v1118_v16 = vadd.f32 %v1064_v13, %v1024_v43  ;;  %v1127_v4 = vadd.f32 %v1075_v28, %v1035_v51  ;;  %v1128_v40 = vadd.f32 %v1076_v54, %v1036_v46 }
 0x252   : > { %v1114_v48 = vadd.f32 %v1112_v12, %v1108_v45  ;;  %v1103_v55 = vadd.f32 %v1101_v35, %v983_v63  ;;  %v1115_v14 = vadd.f32 %v1113_v50, %v995_v26  ;;  %v1122_v58 = vstv %s4503_s14  ;;  %s4623_s14 = sld [smem:[#allocation2 + $0x65]] }
 0x253   : > { %v1104_v62 = vadd.f32 %v1102_v30, %v984_v27  ;;  %v1132_v52 = vstv %s4517_s24  ;;  %v1286_v20 = vstv %s4525_s11  ;;  %v1290_v34 = vstv %s4535_s12  ;;  %s4633_s24 = sld [smem:[#allocation2 + $0x7a]] }
 0x254   : > { %v1116_v24 = vadd.f32 %v1114_v48, %v996_v7  ;;  %v1119_v47 = vadd.f32 %v1117_v44, %v1103_v55  ;;  %v1129_v38 = vadd.f32 %v1127_v4, %v1115_v14  ;;  %v1298_v13 = vstv %s4545_s25  ;;  %s4635_s11 = sld [smem:[#allocation2 + $0x5f]] }
 0x255   : > { %v1120_v57 = vadd.f32 %v1118_v16, %v1104_v62  ;;  %v1302_v28 = vstv %s4551_s9  ;;  %s4637_s12 = sld [smem:[#allocation2 + $0x71]]  ;;  %v1158_v46 = vstv %s4599_s29  ;;  %v1168_v35 = vstv %s4601_s6 }
 0x256   : > { %v1130_v18 = vadd.f32 %v1128_v40, %v1116_v24  ;;  %v1123_v60 = vadd.f32 %v1122_v58, %v1119_v47  ;;  %v1133_v59 = vadd.f32 %v1132_v52, %v1129_v38  ;;  %s4639_s25 = sld [smem:[#allocation2 + $0x69]]  ;;  %v1154_v30 = vstv %s4603_s18  ;;  %s6857_s18 = smov 15  }
 0x257   : > { %v1124_v32 = vadd.f32 %v1122_v58, %v1120_v57  ;;  %s4641_s9 = sld [smem:[#allocation2 + $0x7b]]  ;;  %v1164_v50 = vstv %s4605_s20  ;;  %v1194_v16 = vstv %s4607_s21  ;;  %v1204_v4 = vstv %s4609_s22  ;;  %s6858_s20 = smov 127  }
 0x258   : > { %v1134_v29 = vadd.f32 %v1132_v52, %v1130_v18  ;;  %v1125_v63 = vmax.f32 %v1123_v60, 0.0  ;;  %v1135_v27 = vmax.f32 %v1133_v59, 0.0  ;;  %v1190_v40 = vstv %s4611_s0  ;;  %s4687_s29 = sld [smem:[#allocation2 + $0x6b]]  ;;  %s6859_s21 = smov 113  }
 0x259   : > { %v1126_v54 = vmax.f32 %v1124_v32, 0.0  ;;  %v1200_v55 = vstv %s4613_s1  ;;  %v1266_v62 = vstv %s4615_s2  ;;  %v1278_v14 = vstv %s4617_s15  ;;  %s4695_s6 = sld [smem:[#allocation2 + $0x7d]]  ;;  %s6860_s22 = smov 112  }
 0x25a   : > { %v1136_v22 = vmax.f32 %v1134_v29, 0.0  ;;  %1139 = vrot.lane.b32.xlu1 %v1135_v27, %s6825_s16  ;;  %1137 = vrot.lane.b32.xlu0 %v1125_v63, %s6825_s16  ;;  %v1291_v26 = vmul.f32 %v1290_v34, %v1135_v27  ;;  %v1303_v6 = vmul.f32 %v1302_v28, %v1135_v27  ;;  %v1287_v39 = vmul.f32 %v1286_v20, %v1125_v63  ;;  %s6861_s0 = smov 111   ;;  %s5011_s1 = sld [smem:[#allocation2 + $0x87]] }
 0x25b   : > { %v1288_v7 = vmul.f32 %v1286_v20, %v1126_v54  ;;  %v1300_v21 = vmul.f32 %v1298_v13, %v1126_v54  ;;  %v1299_v12 = vmul.f32 %v1298_v13, %v1125_v63  ;;  %v1262_v24 = vstv %s4619_s10  ;;  %s5013_s2 = sld [smem:[#allocation2 + $0x99]] }
 0x25c   : > { %v1292_v8 = vmul.f32 %v1290_v34, %v1136_v22  ;;  %v1304_v49 = vmul.f32 %v1302_v28, %v1136_v22  ;;  %v4565_v9 = vadd.f32 %v1291_v26, %v1287_v39  ;;  %v1274_v58 = vstv %s4621_s19  ;;  %s5015_s15 = sld [smem:[#allocation2 + $0x7e]] }
 0x25d   : > { %v4569_v3 = vadd.f32 %v1303_v6, %v1299_v12  ;;  %v1230_v57 = vstv %s4623_s14  ;;  %v1240_v38 = vstv %s4625_s3  ;;  %v1226_v32 = vstv %s4627_s4  ;;  %s5017_s10 = sld [smem:[#allocation2 + $0x90]] }
 0x25e   : > { %v4561_v15 = vadd.f32 %v1292_v8, %v1288_v7  ;;  %v4563_v1 = vadd.f32 %v1304_v49, %v1300_v21  ;;  %1143 = vrot.lane.b32.xlu1 %v1136_v22, %s6825_s16  ;;  %1141 = vrot.lane.b32.xlu0 %v1126_v54, %s6825_s16  ;;  %v1236_v59 = vstv %s4629_s17  ;;  %v1330_v29 = vstv %s4631_s13  ;;  %s5019_s19 = sld [smem:[#allocation2 + $0x88]] }
 0x25f   : > { %v1342_v20 = vstv %s4633_s24  ;;  %v1326_v34 = vstv %s4635_s11  ;;  %v1338_v13 = vstv %s4637_s12  ;;  %v1370_v28 = vstv %s4639_s25  ;;  %s5021_s14 = sld [smem:[#allocation2 + $0x9a]] }
 0x260   : > { %v1366_v21 = vstv %s4643_s8  ;;  %s4917_s8 = sld [smem:[#allocation4 + $0x6]] }
 0x261   : > { %s5023_s3 = sld [smem:[#allocation2 + $0x7f]] }
 0x262   : > { %1175 = vrot.lane.b32.xlu1 %v1135_v27, %s6826_s7  ;;  %1173 = vrot.lane.b32.xlu0 %v1125_v63, %s6826_s7  ;;  %s5025_s4 = sld [smem:[#allocation2 + $0x91]] }
 0x263   : > { %s5027_s17 = sld [smem:[#allocation2 + $0x8a]] }
 0x264   : > { %s5029_s13 = sld [smem:[#allocation2 + $0x9c]] }
 0x265   : > { %s5031_s24 = sld [smem:[#allocation2 + $0x81]] }
 0x266   : > { %1179 = vrot.lane.b32.xlu1 %v1136_v22, %s6826_s7  ;;  %1177 = vrot.lane.b32.xlu0 %v1126_v54, %s6826_s7  ;;  %s4713_s7 = sld [smem:[#allocation2 + $0x74]] }
 0x267   : > { %s5033_s11 = sld [smem:[#allocation2 + $0x93]] }
 0x268   : > { %s5035_s12 = sld [smem:[#allocation2 + $0x89]] }
 0x269   : > { %s5037_s25 = sld [smem:[#allocation2 + $0x9b]] }
 0x26a   : > { %1247 = vrot.lane.b32.xlu1 %v1135_v27, %s6827_s23  ;;  %1245 = vrot.lane.b32.xlu0 %v1125_v63, %s6827_s23 }
 0x26e   : > { %1251 = vrot.lane.b32.xlu1 %v1136_v22, %s6827_s23  ;;  %1249 = vrot.lane.b32.xlu0 %v1126_v54, %s6827_s23  ;;  %s4707_s23 = sld [smem:[#allocation2 + $0x62]] }
 0x272   : > { %1211 = vrot.lane.b32.xlu1 %v1135_v27, %s6828_s26  ;;  %1209 = vrot.lane.b32.xlu0 %v1125_v63, %s6828_s26 }
 0x276   : > { %1215 = vrot.lane.b32.xlu1 %v1136_v22, %s6828_s26  ;;  %1213 = vrot.lane.b32.xlu0 %v1126_v54, %s6828_s26  ;;  %s4661_s26 = sld [smem:[#allocation2 + $0x73]] }
 0x27a   : > { %1311 = vrot.lane.b32.xlu1 %v1135_v27, %s6829_s27  ;;  %1309 = vrot.lane.b32.xlu0 %v1125_v63, %s6829_s27 }
 0x27e   : > { %1315 = vrot.lane.b32.xlu1 %v1136_v22, %s6829_s27  ;;  %1313 = vrot.lane.b32.xlu0 %v1126_v54, %s6829_s27  ;;  %s4655_s27 = sld [smem:[#allocation2 + $0x61]] }
 0x282   : > { %1351 = vrot.lane.b32.xlu1 %v1135_v27, %s6830_s28  ;;  %1349 = vrot.lane.b32.xlu0 %v1125_v63, %s6830_s28 }
 0x286   : > { %1355 = vrot.lane.b32.xlu1 %v1136_v22, %s6830_s28  ;;  %1353 = vrot.lane.b32.xlu0 %v1126_v54, %s6830_s28  ;;  %s4649_s28 = sld [smem:[#allocation2 + $0x7c]] }
 0x28a   : > { %1391 = vrot.lane.b32.xlu1 %v1135_v27, %s6831_s30  ;;  %1389 = vrot.lane.b32.xlu0 %v1125_v63, %s6831_s30 }
 0x28e   : > { %1395 = vrot.lane.b32.xlu1 %v1136_v22, %s6831_s30  ;;  %1393 = vrot.lane.b32.xlu0 %v1126_v54, %s6831_s30  ;;  %s4647_s30 = sld [smem:[#allocation2 + $0x6a]] }
 0x292   : > { %1431 = vrot.lane.b32.xlu1 %v1135_v27, %s6832_s5  ;;  %1429 = vrot.lane.b32.xlu0 %v1125_v63, %s6832_s5  ;;  %v1382_v63 = vstv %s4641_s9  ;;  %s5039_s9 = sld [smem:[#allocation2 + $0x80]] }
 0x296   : > { %1435 = vrot.lane.b32.xlu1 %v1136_v22, %s6832_s5  ;;  %1433 = vrot.lane.b32.xlu0 %v1126_v54, %s6832_s5  ;;  %s4645_s5 = sld [smem:[#allocation2 + $0x72]] }
 0x2cc   : > { %v1140_v23 = vpop.permute.xlu1 %1139  ;;  %v1138_v42 = vpop.permute.xlu0 %1137 }
 0x2d0   : > { %v1144_v0 = vpop.permute.xlu1 %1143  ;;  %v1142_v36 = vpop.permute.xlu0 %1141 }
 0x2d1   : > { %v1146_v52 = vsel %vm249_vm1, %v1140_v23, %v1144_v0  ;;  %v1148_v47 = vsel %vm249_vm1, %v1144_v0, %v1140_v23  ;;  %v1145_v22 = vsel %vm249_vm1, %v1138_v42, %v1142_v36  ;;  %v1147_v7 = vsel %vm249_vm1, %v1142_v36, %v1138_v42 }
 0x2d2   : > { %v1151_v54 = vmul.f32 %v4190_v33, %v1148_v47  ;;  %v1152_v27 = vmul.f32 %v4196_v19, %v1146_v52  ;;  %v1149_v36 = vmul.f32 %v4190_v33, %v1147_v7 }
 0x2d4   : > { %v1176_v45 = vpop.permute.xlu1 %1175  ;;  %v1174_v37 = vpop.permute.xlu0 %1173  ;;  %v1159_v47 = vmul.f32 %v1158_v46, %v1151_v54  ;;  %v1169_v42 = vmul.f32 %v1168_v35, %v1151_v54  ;;  %v1170_v33 = vmul.f32 %v1168_v35, %v1152_v27 }
 0x2d8   : > { %v1180_v43 = vpop.permute.xlu1 %1179  ;;  %v1178_v51 = vpop.permute.xlu0 %1177 }
 0x2d9   : > { %v1182_v26 = vsel %vm266_vm0, %v1176_v45, %v1180_v43  ;;  %v1184_v8 = vsel %vm266_vm0, %v1180_v43, %v1176_v45  ;;  %v1181_v49 = vsel %vm266_vm0, %v1174_v37, %v1178_v51  ;;  %v1183_v39 = vsel %vm266_vm0, %v1178_v51, %v1174_v37 }
 0x2da   : > { %v1150_v45 = vmul.f32 %v4196_v19, %v1145_v22  ;;  %v1160_v37 = vmul.f32 %v1158_v46, %v1152_v27  ;;  %v1187_v51 = vmul.f32 %v4234_v25, %v1184_v8  ;;  %v1188_v0 = vmul.f32 %v4240_v2, %v1182_v26 }
 0x2db   : > { %v1185_v19 = vmul.f32 %v4234_v25, %v1183_v39  ;;  %v1186_v22 = vmul.f32 %v4240_v2, %v1181_v49  ;;  %v1155_v25 = vmul.f32 %v1154_v30, %v1149_v36  ;;  %v1165_v26 = vmul.f32 %v1164_v50, %v1149_v36 }
 0x2dc   : > { %v1248_v48 = vpop.permute.xlu1 %1247  ;;  %v1246_v44 = vpop.permute.xlu0 %1245  ;;  %v1156_v2 = vmul.f32 %v1154_v30, %v1150_v45  ;;  %v1206_v49 = vmul.f32 %v1204_v4, %v1188_v0 }
 0x2e0   : > { %v1252_v18 = vpop.permute.xlu1 %1251  ;;  %v1250_v60 = vpop.permute.xlu0 %1249 }
 0x2e1   : > { %v1254_v7 = vsel %vm300_vm2, %v1248_v48, %v1252_v18  ;;  %v1256_v46 = vsel %vm300_vm2, %v1252_v18, %v1248_v48  ;;  %v1253_v8 = vsel %vm300_vm2, %v1246_v44, %v1250_v60  ;;  %v1255_v54 = vsel %vm300_vm2, %v1250_v60, %v1246_v44 }
 0x2e2   : > { %v1166_v48 = vmul.f32 %v1164_v50, %v1150_v45  ;;  %v1195_v18 = vmul.f32 %v1194_v16, %v1187_v51  ;;  %v1196_v44 = vmul.f32 %v1194_v16, %v1188_v0  ;;  %v1205_v60 = vmul.f32 %v1204_v4, %v1187_v51 }
 0x2e3   : > { %v1259_v39 = vmul.f32 %v4274_v11, %v1256_v46  ;;  %v1260_v30 = vmul.f32 %v4280_v53, %v1254_v7  ;;  %v1257_v36 = vmul.f32 %v4274_v11, %v1255_v54  ;;  %v1258_v50 = vmul.f32 %v4280_v53, %v1253_v8 }
 0x2e4   : > { %v4701_v12 = vpop.permute.xlu1 %1211  ;;  %v4703_v23 = vpop.permute.xlu0 %1209  ;;  %v1191_v45 = vmul.f32 %v1190_v40, %v1185_v19  ;;  %v1192_v16 = vmul.f32 %v1190_v40, %v1186_v22  ;;  %v1201_v51 = vmul.f32 %v1200_v55, %v1185_v19  ;;  %v1202_v4 = vmul.f32 %v1200_v55, %v1186_v22 }
 0x2e5   : > { %v1161_v53 = vadd.f32 %v1159_v47, %v1155_v25  ;;  %v1162_v8 = vadd.f32 %v1160_v37, %v1156_v2  ;;  %v4759_v54 = vadd.f32 %v1169_v42, %v1165_v26  ;;  %v4761_v6 = vadd.f32 %v1170_v33, %v1166_v48 }
 0x2e6   : > { %v1267_v40 = vmul.f32 %v1266_v62, %v1259_v39  ;;  %v1268_v55 = vmul.f32 %v1266_v62, %v1260_v30  ;;  %v1263_v19 = vmul.f32 %v1262_v24, %v1257_v36  ;;  %v1264_v22 = vmul.f32 %v1262_v24, %v1258_v50 }
 0x2e7   : > { %v1197_v43 = vadd.f32 %v1195_v18, %v1191_v45  ;;  %v1198_v7 = vadd.f32 %v1196_v44, %v1192_v16  ;;  %v1207_v11 = vadd.f32 %v1205_v60, %v1201_v51  ;;  %v1208_v52 = vadd.f32 %v1206_v49, %v1202_v4 }
 0x2e8   : > { %v1216_v35 = vpop.permute.xlu1 %1215  ;;  %v1214_v27 = vpop.permute.xlu0 %1213  ;;  %v1279_v42 = vmul.f32 %v1278_v14, %v1259_v39  ;;  %v1280_v33 = vmul.f32 %v1278_v14, %v1260_v30  ;;  %v1275_v24 = vmul.f32 %v1274_v58, %v1257_v36  ;;  %v1276_v2 = vmul.f32 %v1274_v58, %v1258_v50 }
 0x2e9   : > { %v1218_v25 = vsel %vm283_vm3, %v4701_v12, %v1216_v35  ;;  %v1220_v62 = vsel %vm283_vm3, %v1216_v35, %v4701_v12  ;;  %v1217_v26 = vsel %vm283_vm3, %v4703_v23, %v1214_v27  ;;  %v1219_v14 = vsel %vm283_vm3, %v1214_v27, %v4703_v23 }
 0x2ea   : > { %v1269_v48 = vadd.f32 %v1267_v40, %v1263_v19  ;;  %v1270_v18 = vadd.f32 %v1268_v55, %v1264_v22  ;;  %v1223_v35 = vmul.f32 %v4336_v31, %v1220_v62  ;;  %v1224_v58 = vmul.f32 %v4342_v56, %v1218_v25 }
 0x2eb   : > { %v4802_v27 = vadd.f32 %v4565_v9, %v1197_v43  ;;  %v4805_v30 = vadd.f32 %v4561_v15, %v1198_v7  ;;  %v1221_v36 = vmul.f32 %v4336_v31, %v1219_v14  ;;  %v1222_v50 = vmul.f32 %v4342_v56, %v1217_v26  ;;  %v6834_v14 = vld [vmem:[#allocation15_spill] sm:$0xff] }
 0x2ec   : > { %v1312_v0 = vpop.permute.xlu1 %1311  ;;  %v1310_v46 = vpop.permute.xlu0 %1309  ;;  %v4810_v45 = vadd.f32 %v4569_v3, %v1207_v11  ;;  %v4813_v16 = vadd.f32 %v4563_v1, %v1208_v52  ;;  %v1281_v43 = vadd.f32 %v1279_v42, %v1275_v24  ;;  %v1282_v31 = vadd.f32 %v1280_v33, %v1276_v2  ;;  %v6833_v2 = vld [vmem:[#allocation14_spill] sm:$0xff] }
 0x2ed   : > { %v4819_v51 = vadd.f32 %v1269_v48, %v1161_v53  ;;  %v4821_v1 = vadd.f32 %v1270_v18, %v1162_v8  ;;  %v1231_v52 = vmul.f32 %v1230_v57, %v1223_v35  ;;  %v1232_v4 = vmul.f32 %v1230_v57, %v1224_v58 }
 0x2ee   : > { %v1242_v7 = vmul.f32 %v1240_v38, %v1224_v58  ;;  %v1228_v11 = vmul.f32 %v1226_v32, %v1222_v50  ;;  %v1237_v53 = vmul.f32 %v1236_v59, %v1221_v36  ;;  %v1238_v8 = vmul.f32 %v1236_v59, %v1222_v50 }
 0x2ef   : > { %v4860_v33 = vadd.f32 %v1281_v43, %v4759_v54 }
 0x2f0   : > { %v1316_v47 = vpop.permute.xlu1 %1315  ;;  %v1314_v37 = vpop.permute.xlu0 %1313  ;;  %v1244_v54 = vadd.f32 %v1242_v7, %v1238_v8  ;;  %v6837_v7 = vstv %s4645_s5  ;;  %s4951_s5 = sld [smem:[#allocation2 + $0x9d]] }
 0x2f1   : > { %v1318_v44 = vsel %vm333_vm4, %v1312_v0, %v1316_v47  ;;  %v1320_v12 = vsel %vm333_vm4, %v1316_v47, %v1312_v0  ;;  %v1317_v60 = vsel %vm333_vm4, %v1310_v46, %v1314_v37  ;;  %v1319_v49 = vsel %vm333_vm4, %v1314_v37, %v1310_v46 }
 0x2f2   : > { %v1323_v9 = vmul.f32 %v4366_v61, %v1318_v44  ;;  %v1324_v15 = vmul.f32 %v4372_v10, %v1320_v12  ;;  %v1321_v56 = vmul.f32 %v4366_v61, %v1317_v60  ;;  %v1322_v3 = vmul.f32 %v4372_v10, %v1319_v49 }
 0x2f3   : > { %v1241_v61 = vmul.f32 %v1240_v38, %v1223_v35  ;;  %v1227_v10 = vmul.f32 %v1226_v32, %v1221_v36 }
 0x2f4   : > { %v1352_v39 = vpop.permute.xlu1 %1351  ;;  %v1350_v23 = vpop.permute.xlu0 %1349  ;;  %v1331_v40 = vmul.f32 %v1330_v29, %v1323_v9  ;;  %v1332_v57 = vmul.f32 %v1330_v29, %v1324_v15  ;;  %v1327_v55 = vmul.f32 %v1326_v34, %v1321_v56  ;;  %v1328_v19 = vmul.f32 %v1326_v34, %v1322_v3 }
 0x2f5   : > { %v1343_v32 = vmul.f32 %v1342_v20, %v1323_v9  ;;  %v1344_v47 = vmul.f32 %v1342_v20, %v1324_v15  ;;  %v1339_v59 = vmul.f32 %v1338_v13, %v1321_v56  ;;  %v1340_v37 = vmul.f32 %v1338_v13, %v1322_v3  ;;  %v6835_v56 = vld [vmem:[#allocation16_spill] sm:$0xff] }
 0x2f6   : > { %v4863_v34 = vadd.f32 %v1282_v31, %v4761_v6  ;;  %v1233_v24 = vadd.f32 %v1231_v52, %v1227_v10  ;;  %v1234_v20 = vadd.f32 %v1232_v4, %v1228_v11  ;;  %v1243_v48 = vadd.f32 %v1241_v61, %v1237_v53  ;;  %v6836_v52 = vld [vmem:[#allocation17_spill] sm:$0xff] }
 0x2f7   : > { %v1333_v6 = vadd.f32 %v1331_v40, %v1327_v55  ;;  %v1334_v18 = vadd.f32 %v1332_v57, %v1328_v19  ;;  %v1345_v44 = vadd.f32 %v1343_v32, %v1339_v59  ;;  %v1346_v12 = vadd.f32 %v1344_v47, %v1340_v37 }
 0x2f8   : > { %v1356_v0 = vpop.permute.xlu1 %1355  ;;  %v1354_v46 = vpop.permute.xlu0 %1353  ;;  %v6838_v11 = vmov %v6837_v7  ;;  %v6839_v40 = vstv %s4647_s30  ;;  %v6843_v59 = vstv %s4655_s27  ;;  %s4929_s27 = sld [smem:[#allocation2 + $0x82]] }
 0x2f9   : > { %v1358_v22 = vsel %vm354_vm5, %v1352_v39, %v1356_v0  ;;  %v1360_v38 = vsel %vm354_vm5, %v1356_v0, %v1352_v39  ;;  %v1357_v25 = vsel %vm354_vm5, %v1350_v23, %v1354_v46  ;;  %v1359_v62 = vsel %vm354_vm5, %v1354_v46, %v1350_v23  ;;  %s4941_s30 = sld [smem:[#allocation2 + $0x94]] }
 0x2fa   : > { %v1363_v26 = vmul.f32 %v6833_v2, %v1358_v22  ;;  %v1364_v13 = vmul.f32 %v6834_v14, %v1360_v38  ;;  %v1361_v35 = vmul.f32 %v6833_v2, %v1357_v25  ;;  %v1362_v58 = vmul.f32 %v6834_v14, %v1359_v62 }
 0x2fb   : > { %v6840_v55 = vmov %v6839_v40  ;;  %v6841_v22 = vstv %s4649_s28  ;;  %v6845_v25 = vstv %s4661_s26  ;;  %v1336_v14 = vadd.f32 %v1334_v18, %v1234_v20  ;;  %s4923_s26 = sld [smem:[#allocation4 + $0x7]] }
 0x2fc   : > { %v1392_v42 = vpop.permute.xlu1 %1391  ;;  %v1390_v29 = vpop.permute.xlu0 %1389  ;;  %v1371_v9 = vmul.f32 %v1370_v28, %v1363_v26  ;;  %v1372_v15 = vmul.f32 %v1370_v28, %v1364_v13  ;;  %v1383_v43 = vmul.f32 %v1382_v63, %v1363_v26  ;;  %v1384_v31 = vmul.f32 %v1382_v63, %v1364_v13  ;;  %s4935_s28 = sld [smem:[#allocation2 + $0x8b]] }
 0x2fd   : > { %v1367_v61 = vmul.f32 %v1366_v21, %v1361_v35  ;;  %v1368_v28 = vmul.f32 %v1366_v21, %v1362_v58  ;;  %v1379_v10 = vmul.f32 %v6837_v7, %v1361_v35  ;;  %v1380_v53 = vmul.f32 %v6838_v11, %v1362_v58 }
 0x2fe   : > { %v6842_v32 = vmov %v6841_v22  ;;  %v6846_v62 = vmov %v6845_v25  ;;  %v1335_v26 = vadd.f32 %v1333_v6, %v1233_v24  ;;  %v1347_v13 = vadd.f32 %v1345_v44, %v1243_v48 }
 0x2ff   : > { %v1348_v35 = vadd.f32 %v1346_v12, %v1244_v54  ;;  %v1373_v48 = vadd.f32 %v1371_v9, %v1367_v61  ;;  %v1374_v54 = vadd.f32 %v1372_v15, %v1368_v28  ;;  %v1385_v6 = vadd.f32 %v1383_v43, %v1379_v10 }
 0x300   : > { %v1396_v60 = vpop.permute.xlu1 %1395  ;;  %v1394_v49 = vpop.permute.xlu0 %1393  ;;  %v1386_v18 = vadd.f32 %v1384_v31, %v1380_v53  ;;  %v6851_v10 = vstv %s4707_s23  ;;  %v6853_v53 = vstv %s4713_s7  ;;  %s6855_s7 = smov 16   ;;  %s6856_s23 = smov 1  }
 0x301   : > { %v1398_v39 = vsel %vm375_vm6, %v1392_v42, %v1396_v60  ;;  %v1400_v23 = vsel %vm375_vm6, %v1396_v60, %v1392_v42  ;;  %v1397_v36 = vsel %vm375_vm6, %v1390_v29, %v1394_v49  ;;  %v1399_v50 = vsel %vm375_vm6, %v1394_v49, %v1390_v29 }
 0x302   : > { %v1403_v3 = vmul.f32 %v6835_v56, %v1398_v39  ;;  %v1404_v4 = vmul.f32 %v6836_v52, %v1400_v23  ;;  %v1401_v0 = vmul.f32 %v6835_v56, %v1397_v36  ;;  %v1402_v46 = vmul.f32 %v6836_v52, %v1399_v50 }
 0x303   : > { %v6844_v42 = vmov %v6843_v59  ;;  %v6852_v11 = vmov %v6851_v10 }
 0x304   : > { %v1432_v63 = vpop.permute.xlu1 %1431  ;;  %v1430_v8 = vpop.permute.xlu0 %1429  ;;  %v1411_v57 = vmul.f32 %v6839_v40, %v1403_v3  ;;  %v1412_v19 = vmul.f32 %v6840_v55, %v1404_v4  ;;  %v1423_v38 = vmul.f32 %v6841_v22, %v1403_v3  ;;  %v1424_v47 = vmul.f32 %v6842_v32, %v1404_v4 }
 0x305   : > { %v1407_v37 = vmul.f32 %v6843_v59, %v1401_v0  ;;  %v1408_v29 = vmul.f32 %v6844_v42, %v1402_v46  ;;  %v1419_v21 = vmul.f32 %v6845_v25, %v1401_v0  ;;  %v1420_v2 = vmul.f32 %v6846_v62, %v1402_v46 }
 0x306   : > { %v6847_v4 = vstv %s4687_s29  ;;  %v1376_v40 = vadd.f32 %v1374_v54, %v4821_v1  ;;  %v1388_v55 = vadd.f32 %v1386_v18, %v4863_v34  ;;  %s5041_s29 = sld [smem:[#allocation2 + $0x92]] }
 0x307   : > { %v1413_v58 = vadd.f32 %v1411_v57, %v1407_v37  ;;  %v1414_v60 = vadd.f32 %v1412_v19, %v1408_v29  ;;  %v1425_v49 = vadd.f32 %v1423_v38, %v1419_v21  ;;  %v1426_v39 = vadd.f32 %v1424_v47, %v1420_v2 }
 0x308   : > { %v1436_v23 = vpop.permute.xlu1 %1435  ;;  %v1434_v36 = vpop.permute.xlu0 %1433  ;;  %v6848_v46 = vmov %v6847_v4  ;;  %v1387_v57 = vadd.f32 %v1385_v6, %v4860_v33  ;;  %v1474_v21 = vstv %s4917_s8  ;;  %v1482_v33 = vstv %s4923_s26  ;;  %s5045_s8 = sld [smem:[#allocation2 + $0x9e]] }
 0x309   : > { %v1438_v50 = vsel %vm396_vm7, %v1432_v63, %v1436_v23  ;;  %v1440_v56 = vsel %vm396_vm7, %v1436_v23, %v1432_v63  ;;  %v1437_v24 = vsel %vm396_vm7, %v1430_v8, %v1434_v36  ;;  %v1439_v20 = vsel %vm396_vm7, %v1434_v36, %v1430_v8  ;;  %s5047_s26 = sld [smem:[#allocation2 + $0x83]] }
 0x30a   : > { %v1443_v44 = vmul.f32 %v4508_v17, %v1438_v50  ;;  %v1444_v12 = vmul.f32 %v4514_v41, %v1440_v56  ;;  %v1441_v3 = vmul.f32 %v4508_v17, %v1437_v24  ;;  %v1442_v9 = vmul.f32 %v4514_v41, %v1439_v20 }
 0x30b   : > { %v1415_v15 = vadd.f32 %v1413_v58, %v4802_v27  ;;  %v1416_v43 = vadd.f32 %v1414_v60, %v4805_v30  ;;  %v1427_v31 = vadd.f32 %v1425_v49, %v4810_v45  ;;  %v1428_v52 = vadd.f32 %v1426_v39, %v4813_v16 }
 0x30c   : > { %v1451_v0 = vmul.f32 %v6847_v4, %v1443_v44  ;;  %v1452_v61 = vmul.f32 %v6848_v46, %v1444_v12  ;;  %v6849_v17 = vstv %s4695_s6  ;;  %v1447_v27 = vmul.f32 %v6851_v10, %v1441_v3  ;;  %s5043_s6 = sld [smem:[#allocation2 + $0x8c]] }
 0x30d   : > { %v1463_v28 = vmul.f32 %v6849_v17, %v1443_v44  ;;  %v6850_v7 = vmov %v6849_v17  ;;  %v1448_v30 = vmul.f32 %v6852_v11, %v1442_v9  ;;  %v1459_v45 = vmul.f32 %v6853_v53, %v1441_v3 }
 0x30e   : > { %v1464_v41 = vmul.f32 %v6850_v7, %v1444_v12  ;;  %v6854_v63 = vmov %v6853_v53  ;;  %v1375_v8 = vadd.f32 %v1373_v48, %v4819_v51  ;;  %v1453_v19 = vadd.f32 %v1451_v0, %v1447_v27 }
 0x30f   : > { %v1460_v16 = vmul.f32 %v6854_v63, %v1442_v9  ;;  %v1454_v22 = vadd.f32 %v1452_v61, %v1448_v30  ;;  %v1465_v38 = vadd.f32 %v1463_v28, %v1459_v45  ;;  %v1470_v59 = vadd.f32 %v1416_v43, %v1376_v40 }
 0x310   : > { %v1469_v47 = vadd.f32 %v1415_v15, %v1375_v8  ;;  %v1477_v37 = vadd.f32 %v1427_v31, %v1387_v57  ;;  %v1478_v51 = vadd.f32 %v1428_v52, %v1388_v55  ;;  %v1455_v42 = vadd.f32 %v1453_v19, %v1335_v26 }
 0x311   : > { %v1466_v32 = vadd.f32 %v1464_v41, %v1460_v16  ;;  %v1456_v29 = vadd.f32 %v1454_v22, %v1336_v14  ;;  %v1467_v1 = vadd.f32 %v1465_v38, %v1347_v13  ;;  %v1634_v60 = vstv %s4929_s27  ;;  %s5049_s27 = sld [smem:[#allocation2 + $0x95]] }
 0x312   : > { %v1471_v62 = vadd.f32 %v1469_v47, %v1455_v42  ;;  %v1638_v49 = vstv %s4935_s28  ;;  %v1646_v39 = vstv %s4941_s30  ;;  %v1650_v23 = vstv %s4951_s5  ;;  %s5051_s28 = sld [smem:[#allocation2 + $0x8d]] }
 0x313   : > { %v1468_v25 = vadd.f32 %v1466_v32, %v1348_v35  ;;  %v1472_v34 = vadd.f32 %v1470_v59, %v1456_v29  ;;  %v1479_v2 = vadd.f32 %v1477_v37, %v1467_v1  ;;  %s5053_s30 = sld [smem:[#allocation2 + $0x9f]]  ;;  %v1506_v61 = vstv %s5011_s1 }
 0x314   : > { %v1475_v36 = vadd.f32 %v1474_v21, %v1471_v62  ;;  %s5055_s5 = sld [smem:[#allocation2 + $0x84]]  ;;  %v1516_v17 = vstv %s5013_s2  ;;  %v1502_v28 = vstv %s5015_s15  ;;  %v1512_v7 = vstv %s5017_s10 }
 0x315   : > { %v1480_v58 = vadd.f32 %v1478_v51, %v1468_v25  ;;  %v1476_v50 = vadd.f32 %v1474_v21, %v1472_v34  ;;  %v1483_v56 = vadd.f32 %v1482_v33, %v1479_v2  ;;  %v1542_v27 = vstv %s5019_s19  ;;  %s5075_s1 = sld [smem:[#allocation2 + $0x97]] }
 0x316   : > { %1485 = vrot.lane.b32.xlu0 %v1475_v36, %s6825_s16  ;;  %v1635_v54 = vmul.f32 %v1634_v60, %v1475_v36  ;;  %v1647_v18 = vmul.f32 %v1646_v39, %v1475_v36  ;;  %v1552_v11 = vstv %s5021_s14  ;;  %v1538_v30 = vstv %s5023_s3  ;;  %s5137_s2 = sld [smem:[#allocation2 + $0x98]]  ;;  %s6896_s3 = smov 15  }
 0x317   : > { %v1484_v24 = vadd.f32 %v1482_v33, %v1480_v58  ;;  %1487 = vrot.lane.b32.xlu1 %v1483_v56, %s6825_s16  ;;  %v1636_v26 = vmul.f32 %v1634_v60, %v1476_v50  ;;  %v1639_v14 = vmul.f32 %v1638_v49, %v1483_v56  ;;  %v1648_v35 = vmul.f32 %v1646_v39, %v1476_v50  ;;  %s5425_s15 = sld [smem:[#allocation4 + $0x9]] }
 0x318   : > { %v1651_v20 = vmul.f32 %v1650_v23, %v1483_v56  ;;  %v1548_v53 = vstv %s5025_s4  ;;  %v1614_v45 = vstv %s5027_s17  ;;  %v1626_v63 = vstv %s5029_s13  ;;  %s5433_s10 = sld [smem:[#allocation2 + $0xa6]]  ;;  %s6897_s4 = smov 127  }
 0x319   : > { %v1640_v13 = vmul.f32 %v1638_v49, %v1484_v24  ;;  %v1652_v48 = vmul.f32 %v1650_v23, %v1484_v24  ;;  %v4977_v12 = vadd.f32 %v1639_v14, %v1635_v54  ;;  %v1610_v16 = vstv %s5031_s24  ;;  %s5443_s19 = sld [smem:[#allocation2 + $0xaf]]  ;;  %s6898_s17 = smov 113  }
 0x31a   : > { %1489 = vrot.lane.b32.xlu0 %v1476_v50, %s6825_s16  ;;  %v4981_v3 = vadd.f32 %v1651_v20, %v1647_v18  ;;  %6862 = sst [smem:[#allocation10_spill]] %s5055_s5  ;;  %v1622_v8 = vstv %s5033_s11  ;;  %v1578_v55 = vstv %s5035_s12  ;;  %v1588_v19 = vstv %s5037_s25  ;;  %s6899_s13 = smov 112  }
 0x31b   : > { %v4973_v6 = vadd.f32 %v1640_v13, %v1636_v26  ;;  %v4975_v44 = vadd.f32 %v1652_v48, %v1648_v35  ;;  %1491 = vrot.lane.b32.xlu1 %v1484_v24, %s6825_s16  ;;  %v1574_v32 = vstv %s5039_s9  ;;  %v1584_v47 = vstv %s5041_s29  ;;  %s5119_s16 = sld [smem:[#allocation2 + $0xa1]]  ;;  %s6900_s24 = smov 111  }
 0x31c   : > { %v1678_v59 = vstv %s5043_s6  ;;  %v1690_v37 = vstv %s5045_s8  ;;  %v1674_v51 = vstv %s5047_s26  ;;  %v1686_v42 = vstv %s5049_s27  ;;  %s5453_s14 = sld [smem:[#allocation2 + $0xb8]] }
 0x31d   : > { %v1718_v29 = vstv %s5051_s28  ;;  %v1730_v1 = vstv %s5053_s30  ;;  %v1714_v49 = vstv %s5055_s5  ;;  %s5507_s11 = sld [smem:[#allocation2 + $0xab]] }
 0x31e   : > { %1521 = vrot.lane.b32.xlu0 %v1475_v36, %s6855_s7  ;;  %s5509_s12 = sld [smem:[#allocation2 + $0xbd]] }
 0x31f   : > { %1523 = vrot.lane.b32.xlu1 %v1483_v56, %s6855_s7  ;;  %s5511_s25 = sld [smem:[#allocation2 + $0xa2]] }
 0x320   : > { %s5513_s9 = sld [smem:[#allocation2 + $0xb4]] }
 0x321   : > { %s5515_s29 = sld [smem:[#allocation2 + $0xac]] }
 0x322   : > { %1525 = vrot.lane.b32.xlu0 %v1476_v50, %s6855_s7  ;;  %s5523_s27 = sld [smem:[#allocation2 + $0xae]] }
 0x323   : > { %1527 = vrot.lane.b32.xlu1 %v1484_v24, %s6855_s7  ;;  %s5131_s7 = sld [smem:[#allocation2 + $0x86]] }
 0x324   : > { %s5525_s5 = sld [smem:[#allocation2 + $0xc0]] }
 0x325   : > { %s5533_s28 = sld [smem:[#allocation2 + $0xbf]] }
 0x326   : > { %1593 = vrot.lane.b32.xlu0 %v1475_v36, %s6856_s23  ;;  %s5535_s30 = sld [smem:[#allocation2 + $0xa4]] }
 0x327   : > { %1595 = vrot.lane.b32.xlu1 %v1483_v56, %s6856_s23 }
 0x32a   : > { %1597 = vrot.lane.b32.xlu0 %v1476_v50, %s6856_s23 }
 0x32b   : > { %1599 = vrot.lane.b32.xlu1 %v1484_v24, %s6856_s23  ;;  %s6866_s23 = sld [smem:[#allocation21_spill]] }
 0x32e   : > { %1557 = vrot.lane.b32.xlu0 %v1475_v36, %s6857_s18 }
 0x32f   : > { %1559 = vrot.lane.b32.xlu1 %v1483_v56, %s6857_s18 }
 0x331   : > { %v5098_v25 = vld [vmem:[%s6866_s23] sm:$0xff]  ;;  %v5104_v33 = vld [vmem:[%s6866_s23 + $0x8] sm:$0xff]  ;;  %v5142_v18 = vld [vmem:[%s6866_s23 + $0x10] sm:$0xff] }
 0x332   : > { %1561 = vrot.lane.b32.xlu0 %v1476_v50, %s6857_s18 }
 0x333   : > { %1563 = vrot.lane.b32.xlu1 %v1484_v24, %s6857_s18  ;;  %s5111_s18 = sld [smem:[#allocation2 + $0x8f]] }
 0x336   : > { %1657 = vrot.lane.b32.xlu0 %v1475_v36, %s6858_s20 }
 0x337   : > { %1659 = vrot.lane.b32.xlu1 %v1483_v56, %s6858_s20 }
 0x33a   : > { %1661 = vrot.lane.b32.xlu0 %v1476_v50, %s6858_s20 }
 0x33b   : > { %1663 = vrot.lane.b32.xlu1 %v1484_v24, %s6858_s20  ;;  %s5069_s20 = sld [smem:[#allocation2 + $0x85]] }
 0x33e   : > { %1697 = vrot.lane.b32.xlu0 %v1475_v36, %s6859_s21 }
 0x33f   : > { %1699 = vrot.lane.b32.xlu1 %v1483_v56, %s6859_s21 }
 0x342   : > { %1701 = vrot.lane.b32.xlu0 %v1476_v50, %s6859_s21 }
 0x343   : > { %1703 = vrot.lane.b32.xlu1 %v1484_v24, %s6859_s21  ;;  %s5061_s21 = sld [smem:[#allocation2 + $0xa0]] }
 0x346   : > { %1737 = vrot.lane.b32.xlu0 %v1475_v36, %s6860_s22 }
 0x347   : > { %1739 = vrot.lane.b32.xlu1 %v1483_v56, %s6860_s22 }
 0x349   : > { %6865 = sst [smem:[#allocation13_spill]] %s5061_s21 }
 0x34a   : > { %1741 = vrot.lane.b32.xlu0 %v1476_v50, %s6860_s22  ;;  %s6872_s26 = sld [smem:[#allocation13_spill]] }
 0x34b   : > { %1743 = vrot.lane.b32.xlu1 %v1484_v24, %s6860_s22  ;;  %s5059_s22 = sld [smem:[#allocation2 + $0x8e]] }
 0x34c   : > { %s5527_s21 = sld [smem:[#allocation2 + $0xa5]] }
 0x34e   : > { %1777 = vrot.lane.b32.xlu0 %v1475_v36, %s6861_s0 }
 0x34f   : > { %1779 = vrot.lane.b32.xlu1 %v1483_v56, %s6861_s0 }
 0x351   : > { %6864 = sst [smem:[#allocation12_spill]] %s5059_s22 }
 0x352   : > { %1781 = vrot.lane.b32.xlu0 %v1476_v50, %s6861_s0  ;;  %s6871_s8 = sld [smem:[#allocation12_spill]] }
 0x353   : > { %1783 = vrot.lane.b32.xlu1 %v1484_v24, %s6861_s0  ;;  %s5057_s0 = sld [smem:[#allocation2 + $0x96]] }
 0x354   : > { %s5529_s22 = sld [smem:[#allocation2 + $0xb7]] }
 0x359   : > { %6863 = sst [smem:[#allocation11_spill]] %s5057_s0 }
 0x35a   : > { %s6870_s6 = sld [smem:[#allocation11_spill]] }
 0x35b   : > { %s5539_s0 = sld [smem:[#allocation2 + $0xb0]] }
 0x388   : > { %v1486_v15 = vpop.permute.xlu0 %1485 }
 0x389   : > { %v1488_v9 = vpop.permute.xlu1 %1487 }
 0x38c   : > { %v1490_v31 = vpop.permute.xlu0 %1489 }
 0x38d   : > { %v1492_v43 = vpop.permute.xlu1 %1491  ;;  %v1493_v34 = vsel %vm249_vm1, %v1486_v15, %v1490_v31  ;;  %v1495_v2 = vsel %vm249_vm1, %v1490_v31, %v1486_v15  ;;  %v5148_v15 = vld [vmem:[%s6866_s23 + $0x18] sm:$0xff] }
 0x38e   : > { %v1494_v40 = vsel %vm249_vm1, %v1488_v9, %v1492_v43  ;;  %v1496_v57 = vsel %vm249_vm1, %v1492_v43, %v1488_v9  ;;  %v1497_v14 = vmul.f32 %v5098_v25, %v1495_v2  ;;  %v1498_v13 = vmul.f32 %v5104_v33, %v1493_v34 }
 0x38f   : > { %v1499_v21 = vmul.f32 %v5098_v25, %v1496_v57  ;;  %v1500_v62 = vmul.f32 %v5104_v33, %v1494_v40 }
 0x390   : > { %v1522_v4 = vpop.permute.xlu0 %1521  ;;  %v1504_v34 = vmul.f32 %v1502_v28, %v1498_v13 }
 0x391   : > { %v1524_v52 = vpop.permute.xlu1 %1523  ;;  %v1507_v48 = vmul.f32 %v1506_v61, %v1499_v21  ;;  %v1508_v54 = vmul.f32 %v1506_v61, %v1500_v62  ;;  %v1517_v31 = vmul.f32 %v1516_v17, %v1499_v21 }
 0x393   : > { %v1510_v26 = vadd.f32 %v1508_v54, %v1504_v34 }
 0x394   : > { %v1526_v46 = vpop.permute.xlu0 %1525 }
 0x395   : > { %v1528_v0 = vpop.permute.xlu1 %1527  ;;  %v1529_v23 = vsel %vm266_vm0, %v1522_v4, %v1526_v46  ;;  %v1531_v36 = vsel %vm266_vm0, %v1526_v46, %v1522_v4 }
 0x396   : > { %v1530_v58 = vsel %vm266_vm0, %v1524_v52, %v1528_v0  ;;  %v1532_v60 = vsel %vm266_vm0, %v1528_v0, %v1524_v52  ;;  %v1518_v52 = vmul.f32 %v1516_v17, %v1500_v62  ;;  %v1533_v4 = vmul.f32 %v5142_v18, %v1531_v36 }
 0x397   : > { %v1535_v9 = vmul.f32 %v5142_v18, %v1532_v60  ;;  %v1536_v43 = vmul.f32 %v5148_v15, %v1530_v58  ;;  %v1534_v0 = vmul.f32 %v5148_v15, %v1529_v23  ;;  %v1503_v62 = vmul.f32 %v1502_v28, %v1497_v14  ;;  %v5182_v28 = vld [vmem:[%s6866_s23 + $0x30] sm:$0xff] }
 0x398   : > { %v5067_v10 = vpop.permute.xlu0 %1593  ;;  %v1539_v36 = vmul.f32 %v1538_v30, %v1533_v4 }
 0x399   : > { %v1596_v41 = vpop.permute.xlu1 %1595  ;;  %v1543_v2 = vmul.f32 %v1542_v27, %v1535_v9  ;;  %v1544_v58 = vmul.f32 %v1542_v27, %v1536_v43 }
 0x39b   : > { %v1545_v35 = vadd.f32 %v1543_v2, %v1539_v36 }
 0x39c   : > { %v1598_v38 = vpop.permute.xlu0 %1597 }
 0x39d   : > { %v1600_v22 = vpop.permute.xlu1 %1599  ;;  %v1601_v40 = vsel %vm300_vm2, %v5067_v10, %v1598_v38  ;;  %v1603_v57 = vsel %vm300_vm2, %v1598_v38, %v5067_v10  ;;  %v1553_v10 = vmul.f32 %v1552_v11, %v1535_v9  ;;  %v1554_v38 = vmul.f32 %v1552_v11, %v1536_v43 }
 0x39e   : > { %v1602_v46 = vsel %vm300_vm2, %v1596_v41, %v1600_v22  ;;  %v1604_v61 = vsel %vm300_vm2, %v1600_v22, %v1596_v41  ;;  %v1513_v41 = vmul.f32 %v1512_v7, %v1497_v14  ;;  %v1514_v22 = vmul.f32 %v1512_v7, %v1498_v13  ;;  %v5188_v7 = vld [vmem:[%s6866_s23 + $0x38] sm:$0xff] }
 0x39f   : > { %v1607_v60 = vmul.f32 %v5182_v28, %v1604_v61  ;;  %v1608_v27 = vmul.f32 %v5188_v7, %v1602_v46  ;;  %v1605_v23 = vmul.f32 %v5182_v28, %v1603_v57  ;;  %v1606_v11 = vmul.f32 %v5188_v7, %v1601_v40 }
 0x3a0   : > { %v5127_v56 = vpop.permute.xlu0 %1557  ;;  %v1540_v14 = vmul.f32 %v1538_v30, %v1534_v0  ;;  %v1549_v13 = vmul.f32 %v1548_v53, %v1533_v4  ;;  %v1550_v9 = vmul.f32 %v1548_v53, %v1534_v0  ;;  %v1509_v40 = vadd.f32 %v1507_v48, %v1503_v62 }
 0x3a1   : > { %v5125_v50 = vpop.permute.xlu1 %1559  ;;  %v5205_v24 = vadd.f32 %v1517_v31, %v1513_v41  ;;  %v5207_v39 = vadd.f32 %v1518_v52, %v1514_v22  ;;  %v1615_v30 = vmul.f32 %v1614_v45, %v1607_v60  ;;  %v1616_v53 = vmul.f32 %v1614_v45, %v1608_v27 }
 0x3a2   : > { %v1611_v4 = vmul.f32 %v1610_v16, %v1605_v23  ;;  %v1612_v0 = vmul.f32 %v1610_v16, %v1606_v11  ;;  %v1546_v46 = vadd.f32 %v1544_v58, %v1540_v14  ;;  %v1555_v57 = vadd.f32 %v1553_v10, %v1549_v13  ;;  %v5250_v10 = vld [vmem:[%s6866_s23 + $0x28] sm:$0xff] }
 0x3a3   : > { %v1556_v20 = vadd.f32 %v1554_v38, %v1550_v9  ;;  %v1627_v31 = vmul.f32 %v1626_v63, %v1607_v60  ;;  %v1628_v52 = vmul.f32 %v1626_v63, %v1608_v27  ;;  %v1623_v16 = vmul.f32 %v1622_v8, %v1605_v23 }
 0x3a4   : > { %v1562_v21 = vpop.permute.xlu0 %1561  ;;  %v1624_v34 = vmul.f32 %v1622_v8, %v1606_v11  ;;  %v1617_v22 = vadd.f32 %v1615_v30, %v1611_v4  ;;  %v1618_v2 = vadd.f32 %v1616_v53, %v1612_v0  ;;  %v5244_v8 = vld [vmem:[%s6866_s23 + $0x20] sm:$0xff]  ;;  %v5258_v23 = vadd.f32 %v4977_v12, %v1545_v35  ;;  %v5274_v12 = vld [vmem:[%s6866_s23 + $0x50] sm:$0xff]  ;;  %v5280_v35 = vld [vmem:[%s6866_s23 + $0x58] sm:$0xff] }
 0x3a5   : > { %v1564_v17 = vpop.permute.xlu1 %1563  ;;  %v1565_v41 = vsel %vm283_vm3, %v5127_v56, %v1562_v21  ;;  %v1567_v63 = vsel %vm283_vm3, %v1562_v21, %v5127_v56  ;;  %v5261_v11 = vadd.f32 %v4973_v6, %v1546_v46  ;;  %v5266_v13 = vadd.f32 %v4981_v3, %v1555_v57 }
 0x3a6   : > { %v1566_v62 = vsel %vm283_vm3, %v5125_v50, %v1564_v17  ;;  %v1568_v45 = vsel %vm283_vm3, %v1564_v17, %v5125_v50  ;;  %v1569_v36 = vmul.f32 %v5244_v8, %v1567_v63  ;;  %v1570_v14 = vmul.f32 %v5250_v10, %v1565_v41 }
 0x3a7   : > { %v1571_v17 = vmul.f32 %v5244_v8, %v1568_v45  ;;  %v1572_v56 = vmul.f32 %v5250_v10, %v1566_v62  ;;  %v5269_v9 = vadd.f32 %v4975_v44, %v1556_v20  ;;  %v1629_v44 = vadd.f32 %v1627_v31, %v1623_v16 }
 0x3a8   : > { %v1658_v61 = vpop.permute.xlu0 %1657  ;;  %v1630_v20 = vadd.f32 %v1628_v52, %v1624_v34  ;;  %v5285_v46 = vadd.f32 %v1617_v22, %v1509_v40  ;;  %v5287_v57 = vadd.f32 %v1618_v2, %v1510_v26  ;;  %v1575_v31 = vmul.f32 %v1574_v32, %v1569_v36 }
 0x3a9   : > { %v1660_v43 = vpop.permute.xlu1 %1659  ;;  %v1579_v30 = vmul.f32 %v1578_v55, %v1571_v17  ;;  %v1580_v53 = vmul.f32 %v1578_v55, %v1572_v56  ;;  %v1576_v40 = vmul.f32 %v1574_v32, %v1570_v14  ;;  %v1585_v26 = vmul.f32 %v1584_v47, %v1569_v36 }
 0x3aa   : > { %v1586_v52 = vmul.f32 %v1584_v47, %v1570_v14  ;;  %v5326_v2 = vadd.f32 %v1629_v44, %v5205_v24 }
 0x3ac   : > { %v1662_v54 = vpop.permute.xlu0 %1661 }
 0x3ad   : > { %v1664_v48 = vpop.permute.xlu1 %1663  ;;  %v1665_v21 = vsel %vm333_vm4, %v1658_v61, %v1662_v54  ;;  %v1667_v38 = vsel %vm333_vm4, %v1662_v54, %v1658_v61  ;;  %v1590_v54 = vmul.f32 %v1588_v19, %v1572_v56 }
 0x3ae   : > { %v1666_v58 = vsel %vm333_vm4, %v1660_v43, %v1664_v48  ;;  %v1668_v50 = vsel %vm333_vm4, %v1664_v48, %v1660_v43  ;;  %v1669_v43 = vmul.f32 %v5274_v12, %v1665_v21  ;;  %v1670_v61 = vmul.f32 %v5280_v35, %v1667_v38 }
 0x3af   : > { %v1671_v6 = vmul.f32 %v5274_v12, %v1666_v58  ;;  %v1672_v3 = vmul.f32 %v5280_v35, %v1668_v50  ;;  %v1589_v48 = vmul.f32 %v1588_v19, %v1571_v17  ;;  %v1581_v17 = vadd.f32 %v1579_v30, %v1575_v31  ;;  %v5368_v31 = vld [vmem:[%s6866_s23 + $0x70] sm:$0xff] }
 0x3b0   : > { %v1698_v27 = vpop.permute.xlu0 %1697  ;;  %v1675_v45 = vmul.f32 %v1674_v51, %v1669_v43  ;;  %v1676_v16 = vmul.f32 %v1674_v51, %v1670_v61  ;;  %v1687_v47 = vmul.f32 %v1686_v42, %v1669_v43  ;;  %v1688_v63 = vmul.f32 %v1686_v42, %v1670_v61  ;;  %v5338_v42 = vld [vmem:[%s6866_s23 + $0x60] sm:$0xff]  ;;  %6873 = vst [vmem:[#allocation16_spill] sm:$0xff] %v5368_v31 }
 0x3b1   : > { %v1700_v60 = vpop.permute.xlu1 %1699  ;;  %v1679_v62 = vmul.f32 %v1678_v59, %v1671_v6  ;;  %v1680_v55 = vmul.f32 %v1678_v59, %v1672_v3  ;;  %v1691_v32 = vmul.f32 %v1690_v37, %v1671_v6  ;;  %v1692_v41 = vmul.f32 %v1690_v37, %v1672_v3  ;;  %6867 = vst [vmem:[#allocation14_spill] sm:$0xff] %v5338_v42 }
 0x3b2   : > { %v5329_v51 = vadd.f32 %v1630_v20, %v5207_v39  ;;  %v1582_v37 = vadd.f32 %v1580_v53, %v1576_v40  ;;  %v5344_v39 = vld [vmem:[%s6866_s23 + $0x68] sm:$0xff]  ;;  %v1591_v21 = vadd.f32 %v1589_v48, %v1585_v26  ;;  %v1592_v38 = vadd.f32 %v1590_v54, %v1586_v52 }
 0x3b3   : > { %6868 = vst [vmem:[#allocation15_spill] sm:$0xff] %v5344_v39  ;;  %v1693_v36 = vadd.f32 %v1691_v32, %v1687_v47  ;;  %v1694_v14 = vadd.f32 %v1692_v41, %v1688_v63  ;;  %v6877_v47 = vstv %s6871_s8  ;;  %s5519_s8 = sld [smem:[#allocation2 + $0xa3]] }
 0x3b4   : > { %v1702_v0 = vpop.permute.xlu0 %1701 }
 0x3b5   : > { %v1704_v4 = vpop.permute.xlu1 %1703  ;;  %v1705_v58 = vsel %vm354_vm5, %v1698_v27, %v1702_v0  ;;  %v1707_v50 = vsel %vm354_vm5, %v1702_v0, %v1698_v27  ;;  %v1682_v27 = vadd.f32 %v1680_v55, %v1676_v16 }
 0x3b6   : > { %v1706_v34 = vsel %vm354_vm5, %v1700_v60, %v1704_v4  ;;  %v1708_v19 = vsel %vm354_vm5, %v1704_v4, %v1700_v60  ;;  %v1681_v60 = vadd.f32 %v1679_v62, %v1675_v45  ;;  %v1709_v6 = vmul.f32 %v5338_v42, %v1705_v58 }
 0x3b7   : > { %v1711_v56 = vmul.f32 %v5338_v42, %v1706_v34  ;;  %v1712_v24 = vmul.f32 %v5344_v39, %v1708_v19  ;;  %v1710_v3 = vmul.f32 %v5344_v39, %v1707_v50  ;;  %v6875_v45 = vstv %s6870_s6  ;;  %s5517_s6 = sld [smem:[#allocation2 + $0xbe]] }
 0x3b8   : > { %v1738_v59 = vpop.permute.xlu0 %1737  ;;  %v1715_v62 = vmul.f32 %v1714_v49, %v1709_v6  ;;  %v1727_v16 = vmul.f32 %v6875_v45, %v1709_v6  ;;  %v6876_v34 = vmov %v6875_v45  ;;  %v6879_v58 = vstv %s6872_s26  ;;  %s5521_s26 = sld [smem:[#allocation2 + $0xb5]] }
 0x3b9   : > { %v1740_v22 = vpop.permute.xlu1 %1739  ;;  %v1719_v4 = vmul.f32 %v1718_v29, %v1711_v56  ;;  %v1720_v0 = vmul.f32 %v1718_v29, %v1712_v24  ;;  %v1731_v48 = vmul.f32 %v1730_v1, %v1711_v56  ;;  %v1732_v54 = vmul.f32 %v1730_v1, %v1712_v24  ;;  %v5374_v29 = vld [vmem:[%s6866_s23 + $0x78] sm:$0xff] }
 0x3ba   : > { %6874 = vst [vmem:[#allocation17_spill] sm:$0xff] %v5374_v29  ;;  %v1716_v55 = vmul.f32 %v1714_v49, %v1710_v3  ;;  %v1728_v19 = vmul.f32 %v6876_v34, %v1710_v3  ;;  %v6880_v56 = vmov %v6879_v58  ;;  %v1683_v45 = vadd.f32 %v1681_v60, %v1581_v17 }
 0x3bb   : > { %v1684_v3 = vadd.f32 %v1682_v27, %v1582_v37  ;;  %v1695_v34 = vadd.f32 %v1693_v36, %v1591_v21  ;;  %v1721_v37 = vadd.f32 %v1719_v4, %v1715_v62  ;;  %v5422_v36 = vld [vmem:[%s6866_s23 + $0x88] sm:$0xff] }
 0x3bc   : > { %v1742_v20 = vpop.permute.xlu0 %1741  ;;  %v1722_v21 = vadd.f32 %v1720_v0, %v1716_v55  ;;  %v1734_v60 = vadd.f32 %v1732_v54, %v1728_v19  ;;  %v6885_v55 = vstv %s5111_s18  ;;  %s5459_s18 = sld [smem:[#allocation2 + $0xc1]] }
 0x3bd   : > { %v1744_v44 = vpop.permute.xlu1 %1743  ;;  %v1745_v30 = vsel %vm375_vm6, %v1738_v59, %v1742_v20  ;;  %v1747_v53 = vsel %vm375_vm6, %v1742_v20, %v1738_v59  ;;  %v6886_v19 = vmov %v6885_v55 }
 0x3be   : > { %v1746_v43 = vsel %vm375_vm6, %v1740_v22, %v1744_v44  ;;  %v1748_v61 = vsel %vm375_vm6, %v1744_v44, %v1740_v22  ;;  %v1749_v1 = vmul.f32 %v5368_v31, %v1745_v30  ;;  %v1750_v52 = vmul.f32 %v5374_v29, %v1747_v53 }
 0x3bf   : > { %v1751_v40 = vmul.f32 %v5368_v31, %v1746_v43  ;;  %v1752_v26 = vmul.f32 %v5374_v29, %v1748_v61  ;;  %v6878_v22 = vmov %v6877_v47  ;;  %v6881_v44 = vstv %s5069_s20  ;;  %s5411_s20 = sld [smem:[#allocation4 + $0x8]] }
 0x3c0   : > { %v1778_v41 = vpop.permute.xlu0 %1777  ;;  %v1755_v20 = vmul.f32 %v6881_v44, %v1749_v1  ;;  %v6882_v43 = vmov %v6881_v44  ;;  %v6883_v30 = vstv %s5075_s1  ;;  %v1696_v29 = vadd.f32 %v1694_v14, %v1592_v38  ;;  %s5537_s1 = sld [smem:[#allocation2 + $0xb6]] }
 0x3c1   : > { %v1780_v32 = vpop.permute.xlu1 %1779  ;;  %v1759_v63 = vmul.f32 %v6877_v47, %v1751_v40  ;;  %v1760_v59 = vmul.f32 %v6878_v22, %v1752_v26  ;;  %v1771_v50 = vmul.f32 %v6879_v58, %v1751_v40  ;;  %v1772_v24 = vmul.f32 %v6880_v56, %v1752_v26 }
 0x3c2   : > { %v1756_v61 = vmul.f32 %v6882_v43, %v1750_v52  ;;  %v1767_v49 = vmul.f32 %v6883_v30, %v1749_v1  ;;  %v6884_v53 = vmov %v6883_v30  ;;  %v1733_v38 = vadd.f32 %v1731_v48, %v1727_v16 }
 0x3c3   : > { %v1768_v6 = vmul.f32 %v6884_v53, %v1750_v52  ;;  %v1761_v31 = vadd.f32 %v1759_v63, %v1755_v20  ;;  %v6889_v56 = vstv %s5131_s7  ;;  %v1723_v44 = vadd.f32 %v1721_v37, %v5285_v46  ;;  %s6894_s7 = smov 16  }
 0x3c4   : > { %v1762_v47 = vadd.f32 %v1760_v59, %v1756_v61  ;;  %v1773_v39 = vadd.f32 %v1771_v50, %v1767_v49  ;;  %v1782_v40 = vpop.permute.xlu0 %1781  ;;  %v1724_v20 = vadd.f32 %v1722_v21, %v5287_v57  ;;  %v1735_v43 = vadd.f32 %v1733_v38, %v5326_v2 }
 0x3c5   : > { %v1774_v22 = vadd.f32 %v1772_v24, %v1768_v6  ;;  %v1784_v42 = vpop.permute.xlu1 %1783  ;;  %v1785_v1 = vsel %vm396_vm7, %v1778_v41, %v1782_v40  ;;  %v1787_v17 = vsel %vm396_vm7, %v1782_v40, %v1778_v41  ;;  %v1763_v48 = vadd.f32 %v1761_v31, %v5258_v23 }
 0x3c6   : > { %v1786_v26 = vsel %vm396_vm7, %v1780_v32, %v1784_v42  ;;  %v1788_v58 = vsel %vm396_vm7, %v1784_v42, %v1780_v32  ;;  %v5416_v42 = vld [vmem:[%s6866_s23 + $0x80] sm:$0xff]  ;;  %v1790_v0 = vmul.f32 %v5422_v36, %v1787_v17  ;;  %v1764_v54 = vadd.f32 %v1762_v47, %v5261_v11  ;;  %s5551_s23 = sld [smem:[#allocation2 + $0xa8]] }
 0x3c7   : > { %v1791_v27 = vmul.f32 %v5416_v42, %v1786_v26  ;;  %v1792_v14 = vmul.f32 %v5422_v36, %v1788_v58  ;;  %v1789_v4 = vmul.f32 %v5416_v42, %v1785_v1  ;;  %v1775_v52 = vadd.f32 %v1773_v39, %v5266_v13 }
 0x3c8   : > { %v1776_v62 = vadd.f32 %v1774_v22, %v5269_v9  ;;  %v6887_v41 = vstv %s5119_s16  ;;  %v6890_v31 = vmov %v6889_v56  ;;  %v6891_v24 = vstv %s5137_s2  ;;  %s6893_s16 = smov 17   ;;  %s6895_s2 = smov 1  }
 0x3c9   : > { %v1799_v16 = vmul.f32 %v6885_v55, %v1791_v27  ;;  %v1800_v32 = vmul.f32 %v6886_v19, %v1792_v14  ;;  %v1811_v63 = vmul.f32 %v6887_v41, %v1791_v27  ;;  %v6888_v59 = vmov %v6887_v41 }
 0x3ca   : > { %v1812_v50 = vmul.f32 %v6888_v59, %v1792_v14  ;;  %v1795_v23 = vmul.f32 %v6889_v56, %v1789_v4  ;;  %v1796_v11 = vmul.f32 %v6890_v31, %v1790_v0  ;;  %v1807_v13 = vmul.f32 %v6891_v24, %v1789_v4 }
 0x3cb   : > { %v6892_v39 = vmov %v6891_v24  ;;  %v1736_v61 = vadd.f32 %v1734_v60, %v5329_v51  ;;  %v1817_v47 = vadd.f32 %v1763_v48, %v1723_v44  ;;  %v1818_v22 = vadd.f32 %v1764_v54, %v1724_v20 }
 0x3cc   : > { %v1808_v9 = vmul.f32 %v6892_v39, %v1790_v0  ;;  %v1801_v30 = vadd.f32 %v1799_v16, %v1795_v23  ;;  %v1802_v49 = vadd.f32 %v1800_v32, %v1796_v11  ;;  %v1813_v53 = vadd.f32 %v1811_v63, %v1807_v13 }
 0x3cd   : > { %v1827_v40 = vadd.f32 %v1775_v52, %v1735_v43  ;;  %v1828_v26 = vadd.f32 %v1776_v62, %v1736_v61  ;;  %v1822_v1 = vstv %s5411_s20  ;;  %v1832_v51 = vstv %s5425_s15  ;;  %s5531_s20 = sld [smem:[#allocation2 + $0xad]] }
 0x3ce   : > { %v1814_v6 = vadd.f32 %v1812_v50, %v1808_v9  ;;  %v1803_v46 = vadd.f32 %v1801_v30, %v1683_v45  ;;  %v1804_v57 = vadd.f32 %v1802_v49, %v1684_v3  ;;  %v1815_v2 = vadd.f32 %v1813_v53, %v1695_v34  ;;  %s5541_s15 = sld [smem:[#allocation2 + $0xc2]] }
 0x3cf   : > { %v1986_v0 = vstv %s5433_s10  ;;  %v1990_v48 = vstv %s5443_s19  ;;  %v1998_v54 = vstv %s5453_s14  ;;  %v2002_v52 = vstv %s5459_s18  ;;  %s5543_s10 = sld [smem:[#allocation2 + $0xa7]] }
 0x3d0   : > { %v1816_v58 = vadd.f32 %v1814_v6, %v1696_v29  ;;  %v1819_v17 = vadd.f32 %v1817_v47, %v1803_v46  ;;  %v1820_v37 = vadd.f32 %v1818_v22, %v1804_v57  ;;  %v1829_v21 = vadd.f32 %v1827_v40, %v1815_v2  ;;  %s5545_s19 = sld [smem:[#allocation2 + $0xb9]] }
 0x3d1   : > { %s5547_s14 = sld [smem:[#allocation2 + $0xb1]]  ;;  %v1858_v61 = vstv %s5507_s11  ;;  %v1868_v30 = vstv %s5509_s12  ;;  %v1854_v49 = vstv %s5511_s25  ;;  %v1864_v53 = vstv %s5513_s9  ;;  %s6925_s25 = smov 15  }
 0x3d2   : > { %v1830_v38 = vadd.f32 %v1828_v26, %v1816_v58  ;;  %v1823_v60 = vadd.f32 %v1822_v1, %v1819_v17  ;;  %v1824_v27 = vadd.f32 %v1822_v1, %v1820_v37  ;;  %v1833_v14 = vadd.f32 %v1832_v51, %v1829_v21  ;;  %s5549_s18 = sld [smem:[#allocation2 + $0xc3]]  ;;  %s6926_s9 = smov 127  }
 0x3d3   : > { %v1894_v22 = vstv %s5515_s29  ;;  %v1904_v40 = vstv %s5517_s6  ;;  %v1890_v26 = vstv %s5519_s8  ;;  %v1900_v46 = vstv %s5521_s26  ;;  %s5595_s11 = sld [smem:[#allocation2 + $0xb3]]  ;;  %s6927_s29 = smov 113  }
 0x3d4   : > { %v1834_v4 = vadd.f32 %v1832_v51, %v1830_v38  ;;  %v1825_v45 = vmax.f32 %v1823_v60, 0.0  ;;  %v1826_v62 = vmax.f32 %v1824_v27, 0.0  ;;  %v1835_v3 = vmax.f32 %v1833_v14, 0.0  ;;  %s5603_s12 = sld [smem:[#allocation2 + $0xc5]]  ;;  %s6928_s6 = smov 112  }
 0x3d5   : > { %v1966_v57 = vstv %s5523_s27  ;;  %v1978_v2 = vstv %s5525_s5  ;;  %v1962_v58 = vstv %s5527_s21  ;;  %v1974_v1 = vstv %s5529_s22  ;;  %s6929_s8 = smov 111   ;;  %s5919_s26 = sld [smem:[#allocation2 + $0xcf]] }
 0x3d6   : > { %v1836_v55 = vmax.f32 %v1834_v4, 0.0  ;;  %1839 = vrot.lane.b32.xlu1 %v1835_v3, %s6893_s16  ;;  %1837 = vrot.lane.b32.xlu0 %v1825_v45, %s6893_s16  ;;  %v1988_v29 = vmul.f32 %v1986_v0, %v1826_v62  ;;  %v1991_v34 = vmul.f32 %v1990_v48, %v1835_v3  ;;  %v2000_v19 = vmul.f32 %v1998_v54, %v1826_v62  ;;  %s5921_s27 = sld [smem:[#allocation2 + $0xe1]] }
 0x3d7   : > { %v2003_v32 = vmul.f32 %v2002_v52, %v1835_v3  ;;  %v1987_v63 = vmul.f32 %v1986_v0, %v1825_v45  ;;  %v1999_v50 = vmul.f32 %v1998_v54, %v1825_v45  ;;  %v1930_v37 = vstv %s5531_s20  ;;  %s5923_s5 = sld [smem:[#allocation2 + $0xc6]] }
 0x3d8   : > { %v1992_v16 = vmul.f32 %v1990_v48, %v1836_v55  ;;  %v2004_v41 = vmul.f32 %v2002_v52, %v1836_v55  ;;  %v1940_v21 = vstv %s5533_s28  ;;  %v1926_v27 = vstv %s5535_s30  ;;  %s5925_s21 = sld [smem:[#allocation2 + $0xd8]] }
 0x3d9   : > { %v5473_v23 = vadd.f32 %v1991_v34, %v1987_v63  ;;  %v5477_v31 = vadd.f32 %v2003_v32, %v1999_v50  ;;  %v1936_v14 = vstv %s5537_s1  ;;  %v2030_v4 = vstv %s5539_s0  ;;  %s5927_s22 = sld [smem:[#allocation2 + $0xd0]] }
 0x3da   : > { %v5469_v59 = vadd.f32 %v1992_v16, %v1988_v29  ;;  %v5471_v56 = vadd.f32 %v2004_v41, %v2000_v19  ;;  %1843 = vrot.lane.b32.xlu1 %v1836_v55, %s6893_s16  ;;  %1841 = vrot.lane.b32.xlu0 %v1826_v62, %s6893_s16  ;;  %v2042_v0 = vstv %s5541_s15  ;;  %v2026_v48 = vstv %s5543_s10  ;;  %s5929_s20 = sld [smem:[#allocation2 + $0xe2]] }
 0x3db   : > { %v2038_v54 = vstv %s5545_s19  ;;  %v2070_v52 = vstv %s5547_s14  ;;  %v2066_v19 = vstv %s5551_s23  ;;  %s5833_s23 = sld [smem:[#allocation4 + $0xa]] }
 0x3dc   : > { %s5931_s28 = sld [smem:[#allocation2 + $0xc7]] }
 0x3dd   : > { %s5933_s30 = sld [smem:[#allocation2 + $0xd9]] }
 0x3de   : > { %1875 = vrot.lane.b32.xlu1 %v1835_v3, %s6894_s7  ;;  %1873 = vrot.lane.b32.xlu0 %v1825_v45, %s6894_s7  ;;  %s5935_s1 = sld [smem:[#allocation2 + $0xd2]] }
 0x3df   : > { %s5937_s0 = sld [smem:[#allocation2 + $0xe4]] }
 0x3e0   : > { %s5939_s15 = sld [smem:[#allocation2 + $0xc9]] }
 0x3e1   : > { %s5941_s10 = sld [smem:[#allocation2 + $0xdb]] }
 0x3e2   : > { %1879 = vrot.lane.b32.xlu1 %v1836_v55, %s6894_s7  ;;  %1877 = vrot.lane.b32.xlu0 %v1826_v62, %s6894_s7  ;;  %s5621_s7 = sld [smem:[#allocation2 + $0xbc]] }
 0x3e3   : > { %s5943_s19 = sld [smem:[#allocation2 + $0xd1]] }
 0x3e4   : > { %s5945_s14 = sld [smem:[#allocation2 + $0xe3]] }
 0x3e6   : > { %1947 = vrot.lane.b32.xlu1 %v1835_v3, %s6895_s2  ;;  %1945 = vrot.lane.b32.xlu0 %v1825_v45, %s6895_s2 }
 0x3ea   : > { %1951 = vrot.lane.b32.xlu1 %v1836_v55, %s6895_s2  ;;  %1949 = vrot.lane.b32.xlu0 %v1826_v62, %s6895_s2  ;;  %s5615_s2 = sld [smem:[#allocation2 + $0xaa]] }
 0x3ee   : > { %1911 = vrot.lane.b32.xlu1 %v1835_v3, %s6896_s3  ;;  %1909 = vrot.lane.b32.xlu0 %v1825_v45, %s6896_s3 }
 0x3f2   : > { %1915 = vrot.lane.b32.xlu1 %v1836_v55, %s6896_s3  ;;  %1913 = vrot.lane.b32.xlu0 %v1826_v62, %s6896_s3  ;;  %s5569_s3 = sld [smem:[#allocation2 + $0xbb]] }
 0x3f6   : > { %2011 = vrot.lane.b32.xlu1 %v1835_v3, %s6897_s4  ;;  %2009 = vrot.lane.b32.xlu0 %v1825_v45, %s6897_s4 }
 0x3fa   : > { %2015 = vrot.lane.b32.xlu1 %v1836_v55, %s6897_s4  ;;  %2013 = vrot.lane.b32.xlu0 %v1826_v62, %s6897_s4  ;;  %s5563_s4 = sld [smem:[#allocation2 + $0xa9]] }
 0x3fe   : > { %2051 = vrot.lane.b32.xlu1 %v1835_v3, %s6898_s17  ;;  %2049 = vrot.lane.b32.xlu0 %v1825_v45, %s6898_s17 }
 0x402   : > { %2055 = vrot.lane.b32.xlu1 %v1836_v55, %s6898_s17  ;;  %2053 = vrot.lane.b32.xlu0 %v1826_v62, %s6898_s17  ;;  %s5557_s17 = sld [smem:[#allocation2 + $0xc4]] }
 0x406   : > { %2091 = vrot.lane.b32.xlu1 %v1835_v3, %s6899_s13  ;;  %2089 = vrot.lane.b32.xlu0 %v1825_v45, %s6899_s13 }
 0x40a   : > { %2095 = vrot.lane.b32.xlu1 %v1836_v55, %s6899_s13  ;;  %2093 = vrot.lane.b32.xlu0 %v1826_v62, %s6899_s13  ;;  %s5555_s13 = sld [smem:[#allocation2 + $0xb2]] }
 0x40e   : > { %2131 = vrot.lane.b32.xlu1 %v1835_v3, %s6900_s24  ;;  %2129 = vrot.lane.b32.xlu0 %v1825_v45, %s6900_s24  ;;  %v2082_v45 = vstv %s5549_s18  ;;  %s5947_s18 = sld [smem:[#allocation2 + $0xc8]] }
 0x412   : > { %2135 = vrot.lane.b32.xlu1 %v1836_v55, %s6900_s24  ;;  %2133 = vrot.lane.b32.xlu0 %v1826_v62, %s6900_s24  ;;  %s5553_s24 = sld [smem:[#allocation2 + $0xba]] }
 0x448   : > { %v1840_v11 = vpop.permute.xlu1 %1839  ;;  %v1838_v24 = vpop.permute.xlu0 %1837 }
 0x44c   : > { %v1844_v13 = vpop.permute.xlu1 %1843  ;;  %v1842_v39 = vpop.permute.xlu0 %1841 }
 0x44d   : > { %v1846_v51 = vsel %vm249_vm1, %v1840_v11, %v1844_v13  ;;  %v1848_v17 = vsel %vm249_vm1, %v1844_v13, %v1840_v11  ;;  %v1845_v55 = vsel %vm249_vm1, %v1838_v24, %v1842_v39  ;;  %v1847_v29 = vsel %vm249_vm1, %v1842_v39, %v1838_v24 }
 0x44e   : > { %v1851_v62 = vmul.f32 %v5098_v25, %v1848_v17  ;;  %v1852_v3 = vmul.f32 %v5104_v33, %v1846_v51  ;;  %v1849_v39 = vmul.f32 %v5098_v25, %v1847_v29 }
 0x450   : > { %v1876_v9 = vpop.permute.xlu1 %1875  ;;  %v1874_v44 = vpop.permute.xlu0 %1873  ;;  %v1859_v17 = vmul.f32 %v1858_v61, %v1851_v62  ;;  %v1869_v24 = vmul.f32 %v1868_v30, %v1851_v62  ;;  %v1870_v25 = vmul.f32 %v1868_v30, %v1852_v3 }
 0x454   : > { %v1880_v20 = vpop.permute.xlu1 %1879  ;;  %v1878_v43 = vpop.permute.xlu0 %1877 }
 0x455   : > { %v1882_v34 = vsel %vm266_vm0, %v1876_v9, %v1880_v20  ;;  %v1884_v16 = vsel %vm266_vm0, %v1880_v20, %v1876_v9  ;;  %v1881_v41 = vsel %vm266_vm0, %v1874_v44, %v1878_v43  ;;  %v1883_v63 = vsel %vm266_vm0, %v1878_v43, %v1874_v44 }
 0x456   : > { %v1850_v9 = vmul.f32 %v5104_v33, %v1845_v55  ;;  %v1860_v44 = vmul.f32 %v1858_v61, %v1852_v3  ;;  %v1887_v43 = vmul.f32 %v5142_v18, %v1884_v16  ;;  %v1888_v13 = vmul.f32 %v5148_v15, %v1882_v34 }
 0x457   : > { %v1885_v33 = vmul.f32 %v5142_v18, %v1883_v63  ;;  %v1886_v55 = vmul.f32 %v5148_v15, %v1881_v41  ;;  %v1855_v18 = vmul.f32 %v1854_v49, %v1849_v39  ;;  %v1865_v34 = vmul.f32 %v1864_v53, %v1849_v39 }
 0x458   : > { %v1948_v6 = vpop.permute.xlu1 %1947  ;;  %v1946_v47 = vpop.permute.xlu0 %1945  ;;  %v1856_v15 = vmul.f32 %v1854_v49, %v1850_v9  ;;  %v1906_v41 = vmul.f32 %v1904_v40, %v1888_v13 }
 0x45c   : > { %v1952_v38 = vpop.permute.xlu1 %1951  ;;  %v1950_v60 = vpop.permute.xlu0 %1949 }
 0x45d   : > { %v1954_v29 = vsel %vm300_vm2, %v1948_v6, %v1952_v38  ;;  %v1956_v61 = vsel %vm300_vm2, %v1952_v38, %v1948_v6  ;;  %v1953_v16 = vsel %vm300_vm2, %v1946_v47, %v1950_v60  ;;  %v1955_v62 = vsel %vm300_vm2, %v1950_v60, %v1946_v47 }
 0x45e   : > { %v1866_v6 = vmul.f32 %v1864_v53, %v1850_v9  ;;  %v1895_v38 = vmul.f32 %v1894_v22, %v1887_v43  ;;  %v1896_v47 = vmul.f32 %v1894_v22, %v1888_v13  ;;  %v1905_v60 = vmul.f32 %v1904_v40, %v1887_v43 }
 0x45f   : > { %v1959_v63 = vmul.f32 %v5182_v28, %v1956_v61  ;;  %v1960_v49 = vmul.f32 %v5188_v7, %v1954_v29  ;;  %v1957_v39 = vmul.f32 %v5182_v28, %v1955_v62  ;;  %v1958_v53 = vmul.f32 %v5188_v7, %v1953_v16 }
 0x460   : > { %v5609_v50 = vpop.permute.xlu1 %1911  ;;  %v5611_v11 = vpop.permute.xlu0 %1909  ;;  %v1891_v9 = vmul.f32 %v1890_v26, %v1885_v33  ;;  %v1892_v22 = vmul.f32 %v1890_v26, %v1886_v55  ;;  %v1901_v43 = vmul.f32 %v1900_v46, %v1885_v33  ;;  %v1902_v40 = vmul.f32 %v1900_v46, %v1886_v55 }
 0x461   : > { %v1861_v7 = vadd.f32 %v1859_v17, %v1855_v18  ;;  %v1862_v16 = vadd.f32 %v1860_v44, %v1856_v15  ;;  %v5667_v62 = vadd.f32 %v1869_v24, %v1865_v34  ;;  %v5669_v32 = vadd.f32 %v1870_v25, %v1866_v6 }
 0x462   : > { %v1967_v26 = vmul.f32 %v1966_v57, %v1959_v63  ;;  %v1968_v46 = vmul.f32 %v1966_v57, %v1960_v49  ;;  %v1963_v33 = vmul.f32 %v1962_v58, %v1957_v39  ;;  %v1964_v55 = vmul.f32 %v1962_v58, %v1958_v53 }
 0x463   : > { %v1897_v20 = vadd.f32 %v1895_v38, %v1891_v9  ;;  %v1898_v29 = vadd.f32 %v1896_v47, %v1892_v22  ;;  %v1907_v28 = vadd.f32 %v1905_v60, %v1901_v43  ;;  %v1908_v51 = vadd.f32 %v1906_v41, %v1902_v40 }
 0x464   : > { %v1916_v30 = vpop.permute.xlu1 %1915  ;;  %v1914_v3 = vpop.permute.xlu0 %1913  ;;  %v1979_v24 = vmul.f32 %v1978_v2, %v1959_v63  ;;  %v1980_v25 = vmul.f32 %v1978_v2, %v1960_v49  ;;  %v1975_v58 = vmul.f32 %v1974_v1, %v1957_v39  ;;  %v1976_v15 = vmul.f32 %v1974_v1, %v1958_v53 }
 0x465   : > { %v1918_v18 = vsel %vm283_vm3, %v5609_v50, %v1916_v30  ;;  %v1920_v57 = vsel %vm283_vm3, %v1916_v30, %v5609_v50  ;;  %v1917_v34 = vsel %vm283_vm3, %v5611_v11, %v1914_v3  ;;  %v1919_v2 = vsel %vm283_vm3, %v1914_v3, %v5611_v11 }
 0x466   : > { %v1969_v6 = vadd.f32 %v1967_v26, %v1963_v33  ;;  %v1970_v38 = vadd.f32 %v1968_v46, %v1964_v55  ;;  %v1923_v30 = vmul.f32 %v5244_v8, %v1920_v57  ;;  %v1924_v1 = vmul.f32 %v5250_v10, %v1918_v18 }
 0x467   : > { %v5710_v3 = vadd.f32 %v5473_v23, %v1897_v20  ;;  %v5713_v49 = vadd.f32 %v5469_v59, %v1898_v29  ;;  %v1921_v39 = vmul.f32 %v5244_v8, %v1919_v2  ;;  %v1922_v53 = vmul.f32 %v5250_v10, %v1917_v34  ;;  %v6902_v2 = vld [vmem:[#allocation15_spill] sm:$0xff] }
 0x468   : > { %v2012_v13 = vpop.permute.xlu1 %2011  ;;  %v2010_v61 = vpop.permute.xlu0 %2009  ;;  %v5718_v9 = vadd.f32 %v5477_v31, %v1907_v28  ;;  %v5721_v22 = vadd.f32 %v5471_v56, %v1908_v51  ;;  %v1981_v20 = vadd.f32 %v1979_v24, %v1975_v58  ;;  %v1982_v8 = vadd.f32 %v1980_v25, %v1976_v15  ;;  %v6901_v15 = vld [vmem:[#allocation14_spill] sm:$0xff] }
 0x469   : > { %v5727_v43 = vadd.f32 %v1969_v6, %v1861_v7  ;;  %v5729_v56 = vadd.f32 %v1970_v38, %v1862_v16  ;;  %v1931_v51 = vmul.f32 %v1930_v37, %v1923_v30  ;;  %v1932_v40 = vmul.f32 %v1930_v37, %v1924_v1 }
 0x46a   : > { %v1942_v29 = vmul.f32 %v1940_v21, %v1924_v1  ;;  %v1928_v28 = vmul.f32 %v1926_v27, %v1922_v53  ;;  %v1937_v7 = vmul.f32 %v1936_v14, %v1921_v39  ;;  %v1938_v16 = vmul.f32 %v1936_v14, %v1922_v53 }
 0x46b   : > { %v5768_v25 = vadd.f32 %v1981_v20, %v5667_v62 }
 0x46c   : > { %v2016_v17 = vpop.permute.xlu1 %2015  ;;  %v2014_v44 = vpop.permute.xlu0 %2013  ;;  %v1944_v62 = vadd.f32 %v1942_v29, %v1938_v16  ;;  %v6905_v29 = vstv %s5553_s24  ;;  %s5871_s24 = sld [smem:[#allocation2 + $0xe5]] }
 0x46d   : > { %v2018_v47 = vsel %vm333_vm4, %v2012_v13, %v2016_v17  ;;  %v2020_v50 = vsel %vm333_vm4, %v2016_v17, %v2012_v13  ;;  %v2017_v60 = vsel %vm333_vm4, %v2010_v61, %v2014_v44  ;;  %v2019_v41 = vsel %vm333_vm4, %v2014_v44, %v2010_v61 }
 0x46e   : > { %v2023_v23 = vmul.f32 %v5274_v12, %v2018_v47  ;;  %v2024_v59 = vmul.f32 %v5280_v35, %v2020_v50  ;;  %v2021_v10 = vmul.f32 %v5274_v12, %v2017_v60  ;;  %v2022_v31 = vmul.f32 %v5280_v35, %v2019_v41 }
 0x46f   : > { %v1941_v12 = vmul.f32 %v1940_v21, %v1923_v30  ;;  %v1927_v35 = vmul.f32 %v1926_v27, %v1921_v39 }
 0x470   : > { %v2052_v63 = vpop.permute.xlu1 %2051  ;;  %v2050_v11 = vpop.permute.xlu0 %2049  ;;  %v2031_v26 = vmul.f32 %v2030_v4, %v2023_v23  ;;  %v2032_v37 = vmul.f32 %v2030_v4, %v2024_v59  ;;  %v2027_v46 = vmul.f32 %v2026_v48, %v2021_v10  ;;  %v2028_v33 = vmul.f32 %v2026_v48, %v2022_v31 }
 0x471   : > { %v2043_v27 = vmul.f32 %v2042_v0, %v2023_v23  ;;  %v2044_v17 = vmul.f32 %v2042_v0, %v2024_v59  ;;  %v2039_v14 = vmul.f32 %v2038_v54, %v2021_v10  ;;  %v2040_v44 = vmul.f32 %v2038_v54, %v2022_v31  ;;  %v6903_v10 = vld [vmem:[#allocation16_spill] sm:$0xff] }
 0x472   : > { %v5771_v48 = vadd.f32 %v1982_v8, %v5669_v32  ;;  %v1933_v58 = vadd.f32 %v1931_v51, %v1927_v35  ;;  %v1934_v0 = vadd.f32 %v1932_v40, %v1928_v28  ;;  %v1943_v6 = vadd.f32 %v1941_v12, %v1937_v7  ;;  %v6904_v51 = vld [vmem:[#allocation17_spill] sm:$0xff] }
 0x473   : > { %v2033_v32 = vadd.f32 %v2031_v26, %v2027_v46  ;;  %v2034_v38 = vadd.f32 %v2032_v37, %v2028_v33  ;;  %v2045_v47 = vadd.f32 %v2043_v27, %v2039_v14  ;;  %v2046_v50 = vadd.f32 %v2044_v17, %v2040_v44 }
 0x474   : > { %v2056_v13 = vpop.permute.xlu1 %2055  ;;  %v2054_v61 = vpop.permute.xlu0 %2053  ;;  %v6906_v28 = vmov %v6905_v29  ;;  %v6907_v26 = vstv %s5555_s13  ;;  %v6911_v14 = vstv %s5563_s4  ;;  %s5845_s4 = sld [smem:[#allocation2 + $0xca]] }
 0x475   : > { %v2058_v55 = vsel %vm354_vm5, %v2052_v63, %v2056_v13  ;;  %v2060_v21 = vsel %vm354_vm5, %v2056_v13, %v2052_v63  ;;  %v2057_v18 = vsel %vm354_vm5, %v2050_v11, %v2054_v61  ;;  %v2059_v57 = vsel %vm354_vm5, %v2054_v61, %v2050_v11  ;;  %s5865_s13 = sld [smem:[#allocation2 + $0xdc]] }
 0x476   : > { %v2063_v34 = vmul.f32 %v6901_v15, %v2058_v55  ;;  %v2064_v54 = vmul.f32 %v6902_v2, %v2060_v21  ;;  %v2061_v30 = vmul.f32 %v6901_v15, %v2057_v18  ;;  %v2062_v1 = vmul.f32 %v6902_v2, %v2059_v57 }
 0x477   : > { %v6908_v46 = vmov %v6907_v26  ;;  %v6909_v55 = vstv %s5557_s17  ;;  %v6913_v18 = vstv %s5569_s3  ;;  %v2036_v2 = vadd.f32 %v2034_v38, %v1934_v0  ;;  %s5837_s3 = sld [smem:[#allocation4 + $0xb]] }
 0x478   : > { %v2092_v24 = vpop.permute.xlu1 %2091  ;;  %v2090_v4 = vpop.permute.xlu0 %2089  ;;  %v2071_v23 = vmul.f32 %v2070_v52, %v2063_v34  ;;  %v2072_v59 = vmul.f32 %v2070_v52, %v2064_v54  ;;  %v2083_v20 = vmul.f32 %v2082_v45, %v2063_v34  ;;  %v2084_v8 = vmul.f32 %v2082_v45, %v2064_v54  ;;  %s5855_s17 = sld [smem:[#allocation2 + $0xd3]] }
 0x479   : > { %v2067_v12 = vmul.f32 %v2066_v19, %v2061_v30  ;;  %v2068_v52 = vmul.f32 %v2066_v19, %v2062_v1  ;;  %v2079_v35 = vmul.f32 %v6905_v29, %v2061_v30  ;;  %v2080_v7 = vmul.f32 %v6906_v28, %v2062_v1 }
 0x47a   : > { %v6910_v27 = vmov %v6909_v55  ;;  %v6914_v57 = vmov %v6913_v18  ;;  %v2035_v34 = vadd.f32 %v2033_v32, %v1933_v58  ;;  %v2047_v54 = vadd.f32 %v2045_v47, %v1943_v6 }
 0x47b   : > { %v2048_v30 = vadd.f32 %v2046_v50, %v1944_v62  ;;  %v2073_v0 = vadd.f32 %v2071_v23, %v2067_v12  ;;  %v2074_v6 = vadd.f32 %v2072_v59, %v2068_v52  ;;  %v2085_v62 = vadd.f32 %v2083_v20, %v2079_v35 }
 0x47c   : > { %v2096_v60 = vpop.permute.xlu1 %2095  ;;  %v2094_v41 = vpop.permute.xlu0 %2093  ;;  %v2086_v32 = vadd.f32 %v2084_v8, %v2080_v7  ;;  %v6917_v52 = vstv %s5603_s12  ;;  %v6921_v7 = vstv %s5621_s7  ;;  %s6923_s7 = smov 16   ;;  %s5951_s12 = sld [smem:[#allocation2 + $0xd4]] }
 0x47d   : > { %v2098_v63 = vsel %vm375_vm6, %v2092_v24, %v2096_v60  ;;  %v2100_v11 = vsel %vm375_vm6, %v2096_v60, %v2092_v24  ;;  %v2097_v39 = vsel %vm375_vm6, %v2090_v4, %v2094_v41  ;;  %v2099_v53 = vsel %vm375_vm6, %v2094_v41, %v2090_v4 }
 0x47e   : > { %v2103_v31 = vmul.f32 %v6903_v10, %v2098_v63  ;;  %v2104_v40 = vmul.f32 %v6904_v51, %v2100_v11  ;;  %v2101_v13 = vmul.f32 %v6903_v10, %v2097_v39  ;;  %v2102_v61 = vmul.f32 %v6904_v51, %v2099_v53 }
 0x47f   : > { %v6912_v24 = vmov %v6911_v14  ;;  %v6918_v35 = vmov %v6917_v52 }
 0x480   : > { %v2132_v45 = vpop.permute.xlu1 %2131  ;;  %v2130_v16 = vpop.permute.xlu0 %2129  ;;  %v2111_v37 = vmul.f32 %v6907_v26, %v2103_v31  ;;  %v2112_v33 = vmul.f32 %v6908_v46, %v2104_v40  ;;  %v2123_v21 = vmul.f32 %v6909_v55, %v2103_v31  ;;  %v2124_v17 = vmul.f32 %v6910_v27, %v2104_v40 }
 0x481   : > { %v2107_v44 = vmul.f32 %v6911_v14, %v2101_v13  ;;  %v2108_v4 = vmul.f32 %v6912_v24, %v2102_v61  ;;  %v2119_v19 = vmul.f32 %v6913_v18, %v2101_v13  ;;  %v2120_v15 = vmul.f32 %v6914_v57, %v2102_v61 }
 0x482   : > { %v6915_v40 = vstv %s5595_s11  ;;  %v2076_v26 = vadd.f32 %v2074_v6, %v5729_v56  ;;  %v2088_v46 = vadd.f32 %v2086_v32, %v5771_v48  ;;  %v2174_v18 = vstv %s5833_s23  ;;  %s5949_s11 = sld [smem:[#allocation2 + $0xda]] }
 0x483   : > { %v2113_v1 = vadd.f32 %v2111_v37, %v2107_v44  ;;  %v2114_v60 = vadd.f32 %v2112_v33, %v2108_v4  ;;  %v2125_v41 = vadd.f32 %v2123_v21, %v2119_v19  ;;  %v2126_v63 = vadd.f32 %v2124_v17, %v2120_v15  ;;  %s5953_s23 = sld [smem:[#allocation2 + $0xe6]] }
 0x484   : > { %v2136_v11 = vpop.permute.xlu1 %2135  ;;  %v2134_v39 = vpop.permute.xlu0 %2133  ;;  %v6916_v61 = vmov %v6915_v40  ;;  %v2087_v37 = vadd.f32 %v2085_v62, %v5768_v25  ;;  %v2184_v48 = vstv %s5837_s3  ;;  %s5955_s3 = sld [smem:[#allocation2 + $0xcb]] }
 0x485   : > { %v2138_v53 = vsel %vm396_vm7, %v2132_v45, %v2136_v11  ;;  %v2140_v10 = vsel %vm396_vm7, %v2136_v11, %v2132_v45  ;;  %v2137_v31 = vsel %vm396_vm7, %v2130_v16, %v2134_v39  ;;  %v2139_v58 = vsel %vm396_vm7, %v2134_v39, %v2130_v16 }
 0x486   : > { %v2143_v38 = vmul.f32 %v5416_v42, %v2138_v53  ;;  %v2144_v47 = vmul.f32 %v5422_v36, %v2140_v10  ;;  %v2141_v50 = vmul.f32 %v5416_v42, %v2137_v31  ;;  %v2142_v23 = vmul.f32 %v5422_v36, %v2139_v58 }
 0x487   : > { %v2115_v59 = vadd.f32 %v2113_v1, %v5710_v3  ;;  %v2116_v20 = vadd.f32 %v2114_v60, %v5713_v49  ;;  %v2127_v8 = vadd.f32 %v2125_v41, %v5718_v9  ;;  %v2128_v51 = vadd.f32 %v2126_v63, %v5721_v22 }
 0x488   : > { %v2151_v13 = vmul.f32 %v6915_v40, %v2143_v38  ;;  %v2152_v12 = vmul.f32 %v6916_v61, %v2144_v47  ;;  %v2163_v29 = vmul.f32 %v6917_v52, %v2143_v38  ;;  %v2164_v42 = vmul.f32 %v6918_v35, %v2144_v47 }
 0x489   : > { %v6919_v36 = vstv %s5615_s2  ;;  %v2159_v9 = vmul.f32 %v6921_v7, %v2141_v50  ;;  %v6922_v45 = vmov %v6921_v7  ;;  %v2075_v16 = vadd.f32 %v2073_v0, %v5727_v43  ;;  %s6924_s2 = smov 1  }
 0x48a   : > { %v2147_v3 = vmul.f32 %v6919_v36, %v2141_v50  ;;  %v6920_v28 = vmov %v6919_v36  ;;  %v2160_v22 = vmul.f32 %v6922_v45, %v2142_v23  ;;  %v2170_v14 = vadd.f32 %v2116_v20, %v2076_v26 }
 0x48b   : > { %v2148_v49 = vmul.f32 %v6920_v28, %v2142_v23  ;;  %v2165_v21 = vadd.f32 %v2163_v29, %v2159_v9  ;;  %v2169_v17 = vadd.f32 %v2115_v59, %v2075_v16  ;;  %v2179_v44 = vadd.f32 %v2127_v8, %v2087_v37 }
 0x48c   : > { %v2153_v33 = vadd.f32 %v2151_v13, %v2147_v3  ;;  %v2166_v27 = vadd.f32 %v2164_v42, %v2160_v22  ;;  %v2180_v24 = vadd.f32 %v2128_v51, %v2088_v46  ;;  %v2338_v39 = vstv %s5845_s4  ;;  %s5957_s4 = sld [smem:[#allocation2 + $0xdd]] }
 0x48d   : > { %v2154_v55 = vadd.f32 %v2152_v12, %v2148_v49  ;;  %v2167_v25 = vadd.f32 %v2165_v21, %v2047_v54  ;;  %v2342_v53 = vstv %s5855_s17  ;;  %v2350_v10 = vstv %s5865_s13  ;;  %s5959_s17 = sld [smem:[#allocation2 + $0xd5]] }
 0x48e   : > { %v2155_v43 = vadd.f32 %v2153_v33, %v2035_v34  ;;  %v2168_v4 = vadd.f32 %v2166_v27, %v2048_v30  ;;  %v2354_v31 = vstv %s5871_s24  ;;  %s5961_s13 = sld [smem:[#allocation2 + $0xe7]]  ;;  %v2210_v42 = vstv %s5919_s26 }
 0x48f   : > { %v2156_v56 = vadd.f32 %v2154_v55, %v2036_v2  ;;  %v2181_v15 = vadd.f32 %v2179_v44, %v2167_v25  ;;  %s5963_s24 = sld [smem:[#allocation2 + $0xcc]]  ;;  %v2220_v36 = vstv %s5921_s27  ;;  %v2206_v3 = vstv %s5923_s5 }
 0x490   : > { %v2171_v19 = vadd.f32 %v2169_v17, %v2155_v43  ;;  %v2182_v1 = vadd.f32 %v2180_v24, %v2168_v4  ;;  %v2216_v28 = vstv %s5925_s21  ;;  %v2246_v9 = vstv %s5927_s22  ;;  %s5983_s26 = sld [smem:[#allocation2 + $0xdf]]  ;;  %s6964_s21 = smov 15  }
 0x491   : > { %v2172_v57 = vadd.f32 %v2170_v14, %v2156_v56  ;;  %v2185_v63 = vadd.f32 %v2184_v48, %v2181_v15  ;;  %v2256_v45 = vstv %s5929_s20  ;;  %v2242_v22 = vstv %s5931_s28  ;;  %s6045_s27 = sld [smem:[#allocation2 + $0xe0]]  ;;  %s6965_s22 = smov 127  }
 0x492   : > { %v2175_v60 = vadd.f32 %v2174_v18, %v2171_v19  ;;  %v2186_v11 = vadd.f32 %v2184_v48, %v2182_v1  ;;  %v2252_v16 = vstv %s5933_s30  ;;  %v2318_v26 = vstv %s5935_s1  ;;  %s6333_s5 = sld [smem:[#allocation4 + $0xd]]  ;;  %s6966_s20 = smov 113  }
 0x493   : > { %v2176_v41 = vadd.f32 %v2174_v18, %v2172_v57  ;;  %v2187_v2 = vmax.f32 %v2185_v63, 0.0  ;;  %v2330_v37 = vstv %s5937_s0  ;;  %v2314_v46 = vstv %s5939_s15  ;;  %s6967_s28 = smov 112   ;;  %s6968_s30 = smov 111  }
 0x494   : > { %v2177_v34 = vmax.f32 %v2175_v60, 0.0  ;;  %v2188_v0 = vmax.f32 %v2186_v11, 0.0  ;;  %v2326_v33 = vstv %s5941_s10  ;;  %v2282_v27 = vstv %s5943_s19  ;;  %s6405_s1 = sld [smem:[#allocation2 + $0xf3]] }
 0x495   : > { %v2178_v58 = vmax.f32 %v2176_v41, 0.0  ;;  %2191 = vrot.lane.b32.xlu1 %v2187_v2, %s6893_s16  ;;  %v2343_v30 = vmul.f32 %v2342_v53, %v2187_v2  ;;  %v2355_v32 = vmul.f32 %v2354_v31, %v2187_v2  ;;  %6930 = sst [smem:[#allocation10_spill]] %s5963_s24  ;;  %v2292_v17 = vstv %s5945_s14 }
 0x496   : > { %2189 = vrot.lane.b32.xlu0 %v2177_v34, %s6893_s16  ;;  %v2344_v6 = vmul.f32 %v2342_v53, %v2188_v0  ;;  %v2356_v38 = vmul.f32 %v2354_v31, %v2188_v0  ;;  %v2339_v47 = vmul.f32 %v2338_v39, %v2177_v34  ;;  %v2351_v23 = vmul.f32 %v2350_v10, %v2177_v34  ;;  %s6407_s0 = sld [smem:[#allocation2 + $0xea]] }
 0x497   : > { %v2340_v54 = vmul.f32 %v2338_v39, %v2178_v58  ;;  %v2352_v62 = vmul.f32 %v2350_v10, %v2178_v58  ;;  %v2278_v24 = vstv %s5947_s18  ;;  %v2288_v43 = vstv %s5949_s11  ;;  %s6413_s15 = sld [smem:[#allocation2 + $0xf4]] }
 0x498   : > { %v5885_v20 = vadd.f32 %v2343_v30, %v2339_v47  ;;  %v5889_v8 = vadd.f32 %v2355_v32, %v2351_v23  ;;  %v2382_v56 = vstv %s5951_s12  ;;  %v2394_v25 = vstv %s5953_s23  ;;  %s6415_s10 = sld [smem:[#allocation2 + $0xeb]] }
 0x499   : > { %v5881_v50 = vadd.f32 %v2344_v6, %v2340_v54  ;;  %v5883_v59 = vadd.f32 %v2356_v38, %v2352_v62  ;;  %2195 = vrot.lane.b32.xlu1 %v2188_v0, %s6893_s16  ;;  %v2378_v4 = vstv %s5955_s3  ;;  %v2390_v18 = vstv %s5957_s4  ;;  %s6417_s19 = sld [smem:[#allocation2 + $0xf6]] }
 0x49a   : > { %2193 = vrot.lane.b32.xlu0 %v2178_v58, %s6893_s16  ;;  %v2422_v48 = vstv %s5959_s17  ;;  %v2434_v19 = vstv %s5961_s13  ;;  %v2418_v53 = vstv %s5963_s24  ;;  %s6027_s16 = sld [smem:[#allocation2 + $0xe9]] }
 0x49b   : > { %s6419_s14 = sld [smem:[#allocation2 + $0xed]] }
 0x49c   : > { %s6425_s18 = sld [smem:[#allocation2 + $0xf5]] }
 0x49d   : > { %2227 = vrot.lane.b32.xlu1 %v2187_v2, %s6923_s7  ;;  %s6427_s11 = sld [smem:[#allocation2 + $0xec]] }
 0x49e   : > { %2225 = vrot.lane.b32.xlu0 %v2177_v34, %s6923_s7  ;;  %s6455_s4 = sld [smem:[#allocation2 + $0xf0]] }
 0x49f   : > { %s6461_s24 = sld [smem:[#allocation2 + $0xfa]] }
 0x4a0   : > { %s3135_s17 = sld [smem:[#allocation4 + $0xe]] }
 0x4a1   : > { %2231 = vrot.lane.b32.xlu1 %v2188_v0, %s6923_s7  ;;  %s6973_s13 = sld [smem:[#allocation9_spill]] }
 0x4a2   : > { %2229 = vrot.lane.b32.xlu0 %v2178_v58, %s6923_s7  ;;  %s6039_s7 = sld [smem:[#allocation2 + $0xce]] }
 0x4a5   : > { %2299 = vrot.lane.b32.xlu1 %v2187_v2, %s6924_s2 }
 0x4a6   : > { %2297 = vrot.lane.b32.xlu0 %v2177_v34, %s6924_s2 }
 0x4a9   : > { %2303 = vrot.lane.b32.xlu1 %v2188_v0, %s6924_s2 }
 0x4aa   : > { %2301 = vrot.lane.b32.xlu0 %v2178_v58, %s6924_s2  ;;  %s6934_s2 = sld [smem:[#allocation21_spill]] }
 0x4ad   : > { %2263 = vrot.lane.b32.xlu1 %v2187_v2, %s6925_s25 }
 0x4ae   : > { %2261 = vrot.lane.b32.xlu0 %v2177_v34, %s6925_s25 }
 0x4b0   : > { %v6006_v57 = vld [vmem:[%s6934_s2] sm:$0xff]  ;;  %v6012_v1 = vld [vmem:[%s6934_s2 + $0x8] sm:$0xff]  ;;  %v6050_v23 = vld [vmem:[%s6934_s2 + $0x10] sm:$0xff] }
 0x4b1   : > { %2267 = vrot.lane.b32.xlu1 %v2188_v0, %s6925_s25 }
 0x4b2   : > { %2265 = vrot.lane.b32.xlu0 %v2178_v58, %s6925_s25  ;;  %s6019_s25 = sld [smem:[#allocation2 + $0xd7]] }
 0x4b5   : > { %2363 = vrot.lane.b32.xlu1 %v2187_v2, %s6926_s9 }
 0x4b6   : > { %2361 = vrot.lane.b32.xlu0 %v2177_v34, %s6926_s9 }
 0x4b9   : > { %2367 = vrot.lane.b32.xlu1 %v2188_v0, %s6926_s9 }
 0x4ba   : > { %2365 = vrot.lane.b32.xlu0 %v2178_v58, %s6926_s9  ;;  %s5977_s9 = sld [smem:[#allocation2 + $0xcd]] }
 0x4bd   : > { %2403 = vrot.lane.b32.xlu1 %v2187_v2, %s6927_s29 }
 0x4be   : > { %2401 = vrot.lane.b32.xlu0 %v2177_v34, %s6927_s29 }
 0x4c1   : > { %2407 = vrot.lane.b32.xlu1 %v2188_v0, %s6927_s29 }
 0x4c2   : > { %2405 = vrot.lane.b32.xlu0 %v2178_v58, %s6927_s29  ;;  %s5969_s29 = sld [smem:[#allocation2 + $0xe8]] }
 0x4c5   : > { %2443 = vrot.lane.b32.xlu1 %v2187_v2, %s6928_s6 }
 0x4c6   : > { %2441 = vrot.lane.b32.xlu0 %v2177_v34, %s6928_s6 }
 0x4c8   : > { %6933 = sst [smem:[#allocation13_spill]] %s5969_s29 }
 0x4c9   : > { %2447 = vrot.lane.b32.xlu1 %v2188_v0, %s6928_s6  ;;  %s6940_s3 = sld [smem:[#allocation13_spill]] }
 0x4ca   : > { %2445 = vrot.lane.b32.xlu0 %v2178_v58, %s6928_s6  ;;  %s5967_s6 = sld [smem:[#allocation2 + $0xd6]] }
 0x4cb   : > { %s6467_s29 = sld [smem:[#allocation2 + $0xf1]] }
 0x4cd   : > { %2483 = vrot.lane.b32.xlu1 %v2187_v2, %s6929_s8 }
 0x4ce   : > { %2481 = vrot.lane.b32.xlu0 %v2177_v34, %s6929_s8 }
 0x4d0   : > { %6932 = sst [smem:[#allocation12_spill]] %s5967_s6 }
 0x4d1   : > { %2487 = vrot.lane.b32.xlu1 %v2188_v0, %s6929_s8  ;;  %s6939_s23 = sld [smem:[#allocation12_spill]] }
 0x4d2   : > { %2485 = vrot.lane.b32.xlu0 %v2178_v58, %s6929_s8  ;;  %s5965_s8 = sld [smem:[#allocation2 + $0xde]] }
 0x4d3   : > { %s6473_s6 = sld [smem:[#allocation2 + $0xfb]] }
 0x4d8   : > { %6931 = sst [smem:[#allocation11_spill]] %s5965_s8 }
 0x4d9   : > { %s6938_s12 = sld [smem:[#allocation11_spill]] }
 0x507   : > { %v2192_v51 = vpop.permute.xlu1 %2191 }
 0x508   : > { %v2190_v40 = vpop.permute.xlu0 %2189 }
 0x50b   : > { %v2196_v13 = vpop.permute.xlu1 %2195 }
 0x50c   : > { %v2194_v61 = vpop.permute.xlu0 %2193  ;;  %v2198_v55 = vsel %vm249_vm1, %v2192_v51, %v2196_v13  ;;  %v2200_v21 = vsel %vm249_vm1, %v2196_v13, %v2192_v51 }
 0x50d   : > { %v2203_v15 = vmul.f32 %v6006_v57, %v2200_v21  ;;  %v2204_v60 = vmul.f32 %v6012_v1, %v2198_v55  ;;  %v2197_v41 = vsel %vm249_vm1, %v2190_v40, %v2194_v61  ;;  %v2199_v63 = vsel %vm249_vm1, %v2194_v61, %v2190_v40  ;;  %v6056_v40 = vld [vmem:[%s6934_s2 + $0x18] sm:$0xff] }
 0x50e   : > { %v2201_v30 = vmul.f32 %v6006_v57, %v2199_v63  ;;  %v2202_v6 = vmul.f32 %v6012_v1, %v2197_v41 }
 0x50f   : > { %v2228_v12 = vpop.permute.xlu1 %2227  ;;  %v2211_v38 = vmul.f32 %v2210_v42, %v2203_v15  ;;  %v2212_v47 = vmul.f32 %v2210_v42, %v2204_v60  ;;  %v2221_v61 = vmul.f32 %v2220_v36, %v2203_v15 }
 0x510   : > { %v2226_v52 = vpop.permute.xlu0 %2225  ;;  %v2208_v41 = vmul.f32 %v2206_v3, %v2202_v6 }
 0x512   : > { %v2214_v54 = vadd.f32 %v2212_v47, %v2208_v41 }
 0x513   : > { %v2232_v29 = vpop.permute.xlu1 %2231 }
 0x514   : > { %v2230_v35 = vpop.permute.xlu0 %2229  ;;  %v2234_v11 = vsel %vm266_vm0, %v2228_v12, %v2232_v29  ;;  %v2236_v39 = vsel %vm266_vm0, %v2232_v29, %v2228_v12  ;;  %v2222_v12 = vmul.f32 %v2220_v36, %v2204_v60  ;;  %v2207_v60 = vmul.f32 %v2206_v3, %v2201_v30  ;;  %v6090_v3 = vld [vmem:[%s6934_s2 + $0x30] sm:$0xff] }
 0x515   : > { %v2233_v31 = vsel %vm266_vm0, %v2226_v52, %v2230_v35  ;;  %v2235_v34 = vsel %vm266_vm0, %v2230_v35, %v2226_v52  ;;  %v2239_v51 = vmul.f32 %v6050_v23, %v2236_v39  ;;  %v2240_v13 = vmul.f32 %v6056_v40, %v2234_v11 }
 0x516   : > { %v2237_v52 = vmul.f32 %v6050_v23, %v2235_v34  ;;  %v2238_v29 = vmul.f32 %v6056_v40, %v2233_v31 }
 0x517   : > { %v2300_v49 = vpop.permute.xlu1 %2299  ;;  %v2247_v63 = vmul.f32 %v2246_v9, %v2239_v51  ;;  %v2248_v11 = vmul.f32 %v2246_v9, %v2240_v13 }
 0x518   : > { %v5975_v7 = vpop.permute.xlu0 %2297  ;;  %v2243_v34 = vmul.f32 %v2242_v22, %v2237_v52 }
 0x51a   : > { %v2249_v62 = vadd.f32 %v2247_v63, %v2243_v34 }
 0x51b   : > { %v2304_v14 = vpop.permute.xlu1 %2303 }
 0x51c   : > { %v2302_v44 = vpop.permute.xlu0 %2301  ;;  %v2306_v35 = vsel %vm300_vm2, %v2300_v49, %v2304_v14  ;;  %v2308_v42 = vsel %vm300_vm2, %v2304_v14, %v2300_v49  ;;  %v2217_v49 = vmul.f32 %v2216_v28, %v2201_v30  ;;  %v2218_v14 = vmul.f32 %v2216_v28, %v2202_v6  ;;  %v6096_v28 = vld [vmem:[%s6934_s2 + $0x38] sm:$0xff] }
 0x51d   : > { %v2305_v55 = vsel %vm300_vm2, %v5975_v7, %v2302_v44  ;;  %v2307_v21 = vsel %vm300_vm2, %v2302_v44, %v5975_v7  ;;  %v2257_v7 = vmul.f32 %v2256_v45, %v2239_v51  ;;  %v2258_v44 = vmul.f32 %v2256_v45, %v2240_v13 }
 0x51e   : > { %v2311_v39 = vmul.f32 %v6090_v3, %v2308_v42  ;;  %v2312_v9 = vmul.f32 %v6096_v28, %v2306_v35  ;;  %v2309_v31 = vmul.f32 %v6090_v3, %v2307_v21  ;;  %v2310_v45 = vmul.f32 %v6096_v28, %v2305_v55 }
 0x51f   : > { %v6033_v58 = vpop.permute.xlu1 %2263  ;;  %v2244_v30 = vmul.f32 %v2242_v22, %v2238_v29  ;;  %v2253_v6 = vmul.f32 %v2252_v16, %v2237_v52  ;;  %v2254_v51 = vmul.f32 %v2252_v16, %v2238_v29  ;;  %v2213_v55 = vadd.f32 %v2211_v38, %v2207_v60 }
 0x520   : > { %v6035_v2 = vpop.permute.xlu0 %2261  ;;  %v6113_v0 = vadd.f32 %v2221_v61, %v2217_v49  ;;  %v6115_v10 = vadd.f32 %v2222_v12, %v2218_v14  ;;  %v2319_v22 = vmul.f32 %v2318_v26, %v2311_v39  ;;  %v2320_v16 = vmul.f32 %v2318_v26, %v2312_v9 }
 0x521   : > { %v2315_v52 = vmul.f32 %v2314_v46, %v2309_v31  ;;  %v2316_v29 = vmul.f32 %v2314_v46, %v2310_v45  ;;  %v2250_v35 = vadd.f32 %v2248_v11, %v2244_v30  ;;  %v2259_v21 = vadd.f32 %v2257_v7, %v2253_v6  ;;  %v6158_v7 = vld [vmem:[%s6934_s2 + $0x28] sm:$0xff] }
 0x522   : > { %v2260_v32 = vadd.f32 %v2258_v44, %v2254_v51  ;;  %v2331_v61 = vmul.f32 %v2330_v37, %v2311_v39  ;;  %v2332_v12 = vmul.f32 %v2330_v37, %v2312_v9  ;;  %v2327_v46 = vmul.f32 %v2326_v33, %v2309_v31 }
 0x523   : > { %v2268_v36 = vpop.permute.xlu1 %2267  ;;  %v2328_v41 = vmul.f32 %v2326_v33, %v2310_v45  ;;  %v2321_v14 = vadd.f32 %v2319_v22, %v2315_v52  ;;  %v2322_v63 = vadd.f32 %v2320_v16, %v2316_v29  ;;  %v6152_v33 = vld [vmem:[%s6934_s2 + $0x20] sm:$0xff]  ;;  %v6166_v31 = vadd.f32 %v5885_v20, %v2249_v62  ;;  %v6182_v20 = vld [vmem:[%s6934_s2 + $0x50] sm:$0xff]  ;;  %v6188_v62 = vld [vmem:[%s6934_s2 + $0x58] sm:$0xff] }
 0x524   : > { %v2266_v15 = vpop.permute.xlu0 %2265  ;;  %v2270_v60 = vsel %vm283_vm3, %v6033_v58, %v2268_v36  ;;  %v2272_v26 = vsel %vm283_vm3, %v2268_v36, %v6033_v58  ;;  %v6169_v45 = vadd.f32 %v5881_v50, %v2250_v35  ;;  %v6174_v6 = vadd.f32 %v5889_v8, %v2259_v21 }
 0x525   : > { %v2269_v49 = vsel %vm283_vm3, %v6035_v2, %v2266_v15  ;;  %v2271_v37 = vsel %vm283_vm3, %v2266_v15, %v6035_v2  ;;  %v2275_v36 = vmul.f32 %v6152_v33, %v2272_v26  ;;  %v2276_v2 = vmul.f32 %v6158_v7, %v2270_v60 }
 0x526   : > { %v2273_v34 = vmul.f32 %v6152_v33, %v2271_v37  ;;  %v2274_v30 = vmul.f32 %v6158_v7, %v2269_v49  ;;  %v6177_v51 = vadd.f32 %v5883_v59, %v2260_v32  ;;  %v2333_v59 = vadd.f32 %v2331_v61, %v2327_v46 }
 0x527   : > { %v2364_v13 = vpop.permute.xlu1 %2363  ;;  %v2334_v32 = vadd.f32 %v2332_v12, %v2328_v41  ;;  %v6193_v35 = vadd.f32 %v2321_v14, %v2213_v55  ;;  %v6195_v21 = vadd.f32 %v2322_v63, %v2214_v54  ;;  %v2283_v22 = vmul.f32 %v2282_v27, %v2275_v36 }
 0x528   : > { %v2362_v42 = vpop.permute.xlu0 %2361  ;;  %v2284_v16 = vmul.f32 %v2282_v27, %v2276_v2  ;;  %v2279_v61 = vmul.f32 %v2278_v24, %v2273_v34  ;;  %v2280_v55 = vmul.f32 %v2278_v24, %v2274_v30  ;;  %v2289_v54 = vmul.f32 %v2288_v43, %v2273_v34 }
 0x529   : > { %v2290_v12 = vmul.f32 %v2288_v43, %v2274_v30  ;;  %v6234_v63 = vadd.f32 %v2333_v59, %v6113_v0 }
 0x52b   : > { %v2368_v38 = vpop.permute.xlu1 %2367 }
 0x52c   : > { %v2366_v47 = vpop.permute.xlu0 %2365  ;;  %v2370_v11 = vsel %vm333_vm4, %v2364_v13, %v2368_v38  ;;  %v2372_v58 = vsel %vm333_vm4, %v2368_v38, %v2364_v13  ;;  %v2293_v38 = vmul.f32 %v2292_v17, %v2275_v36  ;;  %v2285_v36 = vadd.f32 %v2283_v22, %v2279_v61  ;;  %v6276_v61 = vld [vmem:[%s6934_s2 + $0x70] sm:$0xff] }
 0x52d   : > { %v2369_v15 = vsel %vm333_vm4, %v2362_v42, %v2366_v47  ;;  %v2371_v44 = vsel %vm333_vm4, %v2366_v47, %v2362_v42  ;;  %v2375_v50 = vmul.f32 %v6182_v20, %v2370_v11  ;;  %v2376_v8 = vmul.f32 %v6188_v62, %v2372_v58  ;;  %6941 = vst [vmem:[#allocation16_spill] sm:$0xff] %v6276_v61 }
 0x52e   : > { %v2373_v13 = vmul.f32 %v6182_v20, %v2369_v15  ;;  %v2374_v42 = vmul.f32 %v6188_v62, %v2371_v44  ;;  %v2294_v47 = vmul.f32 %v2292_v17, %v2276_v2  ;;  %v2295_v15 = vadd.f32 %v2293_v38, %v2289_v54 }
 0x52f   : > { %v2404_v39 = vpop.permute.xlu1 %2403  ;;  %v2383_v60 = vmul.f32 %v2382_v56, %v2375_v50  ;;  %v2384_v27 = vmul.f32 %v2382_v56, %v2376_v8  ;;  %v2395_v24 = vmul.f32 %v2394_v25, %v2375_v50  ;;  %v2396_v49 = vmul.f32 %v2394_v25, %v2376_v8 }
 0x530   : > { %v2402_v9 = vpop.permute.xlu0 %2401  ;;  %v2379_v26 = vmul.f32 %v2378_v4, %v2373_v13  ;;  %v2380_v46 = vmul.f32 %v2378_v4, %v2374_v42  ;;  %v2391_v43 = vmul.f32 %v2390_v18, %v2373_v13  ;;  %v2392_v37 = vmul.f32 %v2390_v18, %v2374_v42  ;;  %v6246_v18 = vld [vmem:[%s6934_s2 + $0x60] sm:$0xff] }
 0x531   : > { %v6237_v4 = vadd.f32 %v2334_v32, %v6115_v10  ;;  %v2286_v25 = vadd.f32 %v2284_v16, %v2280_v55  ;;  %6935 = vst [vmem:[#allocation14_spill] sm:$0xff] %v6246_v18  ;;  %v6252_v10 = vld [vmem:[%s6934_s2 + $0x68] sm:$0xff]  ;;  %v2296_v44 = vadd.f32 %v2294_v47, %v2290_v12 }
 0x532   : > { %6936 = vst [vmem:[#allocation15_spill] sm:$0xff] %v6252_v10  ;;  %v2397_v34 = vadd.f32 %v2395_v24, %v2391_v43  ;;  %v2398_v30 = vadd.f32 %v2396_v49, %v2392_v37  ;;  %v6945_v43 = vstv %s6939_s23  ;;  %s6435_s23 = sld [smem:[#allocation2 + $0xef]] }
 0x533   : > { %v2408_v52 = vpop.permute.xlu1 %2407 }
 0x534   : > { %v2406_v29 = vpop.permute.xlu0 %2405  ;;  %v2410_v41 = vsel %vm354_vm5, %v2404_v39, %v2408_v52  ;;  %v2412_v17 = vsel %vm354_vm5, %v2408_v52, %v2404_v39  ;;  %v2385_v39 = vadd.f32 %v2383_v60, %v2379_v26  ;;  %v6943_v26 = vstv %s6938_s12  ;;  %s6429_s12 = sld [smem:[#allocation2 + $0xf8]] }
 0x535   : > { %v2409_v11 = vsel %vm354_vm5, %v2402_v9, %v2406_v29  ;;  %v2411_v58 = vsel %vm354_vm5, %v2406_v29, %v2402_v9  ;;  %v2415_v2 = vmul.f32 %v6246_v18, %v2410_v41  ;;  %v2416_v0 = vmul.f32 %v6252_v10, %v2412_v17 }
 0x536   : > { %v2386_v9 = vadd.f32 %v2384_v27, %v2380_v46  ;;  %v2413_v50 = vmul.f32 %v6246_v18, %v2409_v11  ;;  %v2414_v8 = vmul.f32 %v6252_v10, %v2411_v58  ;;  %v6944_v41 = vmov %v6943_v26 }
 0x537   : > { %v2444_v14 = vpop.permute.xlu1 %2443  ;;  %v2423_v52 = vmul.f32 %v2422_v48, %v2415_v2  ;;  %v2424_v29 = vmul.f32 %v2422_v48, %v2416_v0  ;;  %v2435_v38 = vmul.f32 %v2434_v19, %v2415_v2  ;;  %v2436_v47 = vmul.f32 %v2434_v19, %v2416_v0  ;;  %v6282_v48 = vld [vmem:[%s6934_s2 + $0x78] sm:$0xff] }
 0x538   : > { %v2442_v56 = vpop.permute.xlu0 %2441  ;;  %6942 = vst [vmem:[#allocation17_spill] sm:$0xff] %v6282_v48  ;;  %v2419_v60 = vmul.f32 %v2418_v53, %v2413_v50  ;;  %v2420_v27 = vmul.f32 %v2418_v53, %v2414_v8  ;;  %v2431_v46 = vmul.f32 %v6943_v26, %v2413_v50  ;;  %v2432_v17 = vmul.f32 %v6944_v41, %v2414_v8 }
 0x539   : > { %v6947_v11 = vstv %s6940_s3  ;;  %v2387_v26 = vadd.f32 %v2385_v39, %v2285_v36  ;;  %v2388_v8 = vadd.f32 %v2386_v9, %v2286_v25  ;;  %v2399_v41 = vadd.f32 %v2397_v34, %v2295_v15  ;;  %v6324_v9 = vld [vmem:[%s6934_s2 + $0x80] sm:$0xff]  ;;  %s6445_s3 = sld [smem:[#allocation2 + $0xf9]] }
 0x53a   : > { %v6948_v2 = vmov %v6947_v11  ;;  %v2400_v10 = vadd.f32 %v2398_v30, %v2296_v44  ;;  %v2425_v25 = vadd.f32 %v2423_v52, %v2419_v60  ;;  %v2426_v15 = vadd.f32 %v2424_v29, %v2420_v27  ;;  %v6330_v30 = vld [vmem:[%s6934_s2 + $0x88] sm:$0xff]  ;;  %s6357_s2 = sld [smem:[#allocation2 + $0xee]] }
 0x53b   : > { %v2448_v59 = vpop.permute.xlu1 %2447  ;;  %v2437_v44 = vadd.f32 %v2435_v38, %v2431_v46  ;;  %v2438_v39 = vadd.f32 %v2436_v47, %v2432_v17  ;;  %v6953_v27 = vstv %s6019_s25  ;;  %s6363_s25 = sld [smem:[#allocation2 + $0xf7]] }
 0x53c   : > { %v2446_v32 = vpop.permute.xlu0 %2445  ;;  %v2450_v13 = vsel %vm375_vm6, %v2444_v14, %v2448_v59  ;;  %v2452_v42 = vsel %vm375_vm6, %v2448_v59, %v2444_v14  ;;  %v6946_v14 = vmov %v6945_v43  ;;  %v6949_v59 = vstv %s5977_s9  ;;  %s6319_s9 = sld [smem:[#allocation4 + $0xc]] }
 0x53d   : > { %v2449_v22 = vsel %vm375_vm6, %v2442_v56, %v2446_v32  ;;  %v2451_v16 = vsel %vm375_vm6, %v2446_v32, %v2442_v56  ;;  %v2455_v55 = vmul.f32 %v6276_v61, %v2450_v13  ;;  %v2456_v54 = vmul.f32 %v6282_v48, %v2452_v42 }
 0x53e   : > { %v2453_v19 = vmul.f32 %v6276_v61, %v2449_v22  ;;  %v2454_v12 = vmul.f32 %v6282_v48, %v2451_v16  ;;  %v6950_v13 = vmov %v6949_v59  ;;  %v6951_v22 = vstv %s5983_s26  ;;  %s6974_s26 = sshll.u32 %s6973_s13, 4 }
 0x53f   : > { %v2484_v24 = vpop.permute.xlu1 %2483  ;;  %v2463_v37 = vmul.f32 %v6945_v43, %v2455_v55  ;;  %v2464_v56 = vmul.f32 %v6946_v14, %v2456_v54  ;;  %v2475_v58 = vmul.f32 %v6947_v11, %v2455_v55  ;;  %v2476_v0 = vmul.f32 %v6948_v2, %v2456_v54 }
 0x540   : > { %v2482_v49 = vpop.permute.xlu0 %2481  ;;  %v2459_v32 = vmul.f32 %v6949_v59, %v2453_v19  ;;  %v2460_v42 = vmul.f32 %v6950_v13, %v2454_v12  ;;  %v2471_v53 = vmul.f32 %v6951_v22, %v2453_v19  ;;  %v6952_v16 = vmov %v6951_v22 }
 0x541   : > { %v2472_v50 = vmul.f32 %v6952_v16, %v2454_v12  ;;  %v6954_v17 = vmov %v6953_v27  ;;  %v6957_v2 = vstv %s6039_s7  ;;  %v6959_v13 = vstv %s6045_s27  ;;  %s6962_s7 = smov 16   ;;  %s6963_s27 = smov 1  }
 0x542   : > { %v2465_v18 = vadd.f32 %v2463_v37, %v2459_v32  ;;  %v2466_v43 = vadd.f32 %v2464_v56, %v2460_v42  ;;  %v2477_v48 = vadd.f32 %v2475_v58, %v2471_v53  ;;  %v6958_v59 = vmov %v6957_v2 }
 0x543   : > { %v2478_v14 = vadd.f32 %v2476_v0, %v2472_v50  ;;  %v2488_v61 = vpop.permute.xlu1 %2487  ;;  %v2440_v42 = vadd.f32 %v2438_v39, %v6237_v4 }
 0x544   : > { %v2486_v55 = vpop.permute.xlu0 %2485  ;;  %v2490_v54 = vsel %vm396_vm7, %v2484_v24, %v2488_v61  ;;  %v2492_v11 = vsel %vm396_vm7, %v2488_v61, %v2484_v24  ;;  %v2467_v47 = vadd.f32 %v2465_v18, %v6166_v31  ;;  %v2468_v61 = vadd.f32 %v2466_v43, %v6169_v45 }
 0x545   : > { %v2489_v19 = vsel %vm396_vm7, %v2482_v49, %v2486_v55  ;;  %v2491_v36 = vsel %vm396_vm7, %v2486_v55, %v2482_v49  ;;  %v2495_v34 = vmul.f32 %v6324_v9, %v2490_v54  ;;  %v2496_v52 = vmul.f32 %v6330_v30, %v2492_v11 }
 0x546   : > { %v2493_v29 = vmul.f32 %v6324_v9, %v2489_v19  ;;  %v2494_v38 = vmul.f32 %v6330_v30, %v2491_v36  ;;  %v2479_v12 = vadd.f32 %v2477_v48, %v6174_v6  ;;  %v2480_v60 = vadd.f32 %v2478_v14, %v6177_v51 }
 0x547   : > { %v2503_v46 = vmul.f32 %v6953_v27, %v2495_v34  ;;  %v2504_v24 = vmul.f32 %v6954_v17, %v2496_v52  ;;  %v6955_v49 = vstv %s6027_s16  ;;  %v6960_v18 = vmov %v6959_v13  ;;  %s6961_s16 = smov 17  }
 0x548   : > { %v2515_v37 = vmul.f32 %v6955_v49, %v2495_v34  ;;  %v6956_v56 = vmov %v6955_v49  ;;  %v2499_v0 = vmul.f32 %v6957_v2, %v2493_v29  ;;  %v2500_v32 = vmul.f32 %v6958_v59, %v2494_v38 }
 0x549   : > { %v2516_v58 = vmul.f32 %v6956_v56, %v2496_v52  ;;  %v2511_v31 = vmul.f32 %v6959_v13, %v2493_v29  ;;  %v2512_v45 = vmul.f32 %v6960_v18, %v2494_v38  ;;  %v2427_v6 = vadd.f32 %v2425_v25, %v6193_v35 }
 0x54a   : > { %v2428_v51 = vadd.f32 %v2426_v15, %v6195_v21  ;;  %v2439_v48 = vadd.f32 %v2437_v44, %v6234_v63  ;;  %v2505_v22 = vadd.f32 %v2503_v46, %v2499_v0  ;;  %v2506_v53 = vadd.f32 %v2504_v24, %v2500_v32 }
 0x54b   : > { %v2517_v16 = vadd.f32 %v2515_v37, %v2511_v31  ;;  %v2518_v50 = vadd.f32 %v2516_v58, %v2512_v45  ;;  %v2521_v43 = vadd.f32 %v2467_v47, %v2427_v6  ;;  %v2532_v54 = vadd.f32 %v2480_v60, %v2440_v42 }
 0x54c   : > { %v2522_v14 = vadd.f32 %v2468_v61, %v2428_v51  ;;  %v2531_v55 = vadd.f32 %v2479_v12, %v2439_v48  ;;  %v2507_v35 = vadd.f32 %v2505_v22, %v2387_v26  ;;  %v2508_v21 = vadd.f32 %v2506_v53, %v2388_v8 }
 0x54d   : > { %v2519_v11 = vadd.f32 %v2517_v16, %v2399_v41  ;;  %v2520_v19 = vadd.f32 %v2518_v50, %v2400_v10  ;;  %v2526_v63 = vstv %s6319_s9  ;;  %v2536_v36 = vstv %s6333_s5  ;;  %s6483_s9 = sld [smem:[#allocation2 + $0xf2]] }
 0x54e   : > { %v2523_v25 = vadd.f32 %v2521_v43, %v2507_v35  ;;  %v2524_v4 = vadd.f32 %v2522_v14, %v2508_v21  ;;  %v2648_v38 = vstv %s6357_s2  ;;  %v2652_v47 = vstv %s6363_s25  ;;  %s6975_s2 = sld [smem:[#allocation22_spill]] }
 0x54f   : > { %v2533_v15 = vadd.f32 %v2531_v55, %v2519_v11  ;;  %v2534_v44 = vadd.f32 %v2532_v54, %v2520_v19  ;;  %v2562_v21 = vstv %s6405_s1  ;;  %v2558_v11 = vstv %s6407_s0 }
 0x550   : > { %v2527_v39 = vadd.f32 %v2526_v63, %v2523_v25  ;;  %v2528_v34 = vadd.f32 %v2526_v63, %v2524_v4  ;;  %v2588_v19 = vstv %s6413_s15  ;;  %v2584_v63 = vstv %s6415_s10 }
 0x551   : > { %v2537_v52 = vadd.f32 %v2536_v36, %v2533_v15  ;;  %v2538_v29 = vadd.f32 %v2536_v36, %v2534_v44 }
 0x552   : > { %v2529_v61 = vmax.f32 %v2527_v39, 0.0  ;;  %v2530_v12 = vmax.f32 %v2528_v34, 0.0 }
 0x553   : > { %v2539_v60 = vmax.f32 %v2537_v52, 0.0  ;;  %v2540_v27 = vmax.f32 %v2538_v29, 0.0 }
 0x554   : > { %2541 = vrot.lane.b32.xlu0 %v2529_v61, %s6961_s16  ;;  %v2650_v10 = vmul.f32 %v2648_v38, %v2530_v12  ;;  %v2649_v41 = vmul.f32 %v2648_v38, %v2529_v61  ;;  %s224_s25 = scalar_lea.vmem %s6975_s2, %s6974_s26 }
 0x555   : > { %2543 = vrot.lane.b32.xlu1 %v2539_v60, %s6961_s16  ;;  %v2653_v26 = vmul.f32 %v2652_v47, %v2539_v60  ;;  %v2654_v8 = vmul.f32 %v2652_v47, %v2540_v27 }
 0x557   : > { %v6371_v46 = vadd.f32 %v2654_v8, %v2650_v10  ;;  %v6373_v17 = vadd.f32 %v2653_v26, %v2649_v41 }
 0x558   : > { %2545 = vrot.lane.b32.xlu0 %v2530_v12, %s6961_s16 }
 0x559   : > { %2547 = vrot.lane.b32.xlu1 %v2540_v27, %s6961_s16 }
 0x55c   : > { %2567 = vrot.lane.b32.xlu0 %v2529_v61, %s6962_s7 }
 0x55d   : > { %2569 = vrot.lane.b32.xlu1 %v2539_v60, %s6962_s7 }
 0x560   : > { %2571 = vrot.lane.b32.xlu0 %v2530_v12, %s6962_s7 }
 0x561   : > { %2573 = vrot.lane.b32.xlu1 %v2540_v27, %s6962_s7 }
 0x564   : > { %2619 = vrot.lane.b32.xlu0 %v2529_v61, %s6963_s27 }
 0x565   : > { %2621 = vrot.lane.b32.xlu1 %v2539_v60, %s6963_s27 }
 0x568   : > { %2623 = vrot.lane.b32.xlu0 %v2530_v12, %s6963_s27 }
 0x569   : > { %2625 = vrot.lane.b32.xlu1 %v2540_v27, %s6963_s27 }
 0x56c   : > { %2593 = vrot.lane.b32.xlu0 %v2529_v61, %s6964_s21 }
 0x56d   : > { %2595 = vrot.lane.b32.xlu1 %v2539_v60, %s6964_s21 }
 0x570   : > { %2597 = vrot.lane.b32.xlu0 %v2530_v12, %s6964_s21 }
 0x571   : > { %2599 = vrot.lane.b32.xlu1 %v2540_v27, %s6964_s21 }
 0x574   : > { %2659 = vrot.lane.b32.xlu0 %v2529_v61, %s6965_s22 }
 0x575   : > { %2661 = vrot.lane.b32.xlu1 %v2539_v60, %s6965_s22 }
 0x578   : > { %2663 = vrot.lane.b32.xlu0 %v2530_v12, %s6965_s22 }
 0x579   : > { %2665 = vrot.lane.b32.xlu1 %v2540_v27, %s6965_s22 }
 0x57c   : > { %2687 = vrot.lane.b32.xlu0 %v2529_v61, %s6966_s20 }
 0x57d   : > { %2689 = vrot.lane.b32.xlu1 %v2539_v60, %s6966_s20 }
 0x580   : > { %2691 = vrot.lane.b32.xlu0 %v2530_v12, %s6966_s20 }
 0x581   : > { %2693 = vrot.lane.b32.xlu1 %v2540_v27, %s6966_s20 }
 0x584   : > { %2715 = vrot.lane.b32.xlu0 %v2529_v61, %s6967_s28 }
 0x585   : > { %2717 = vrot.lane.b32.xlu1 %v2539_v60, %s6967_s28 }
 0x588   : > { %2719 = vrot.lane.b32.xlu0 %v2530_v12, %s6967_s28 }
 0x589   : > { %2721 = vrot.lane.b32.xlu1 %v2540_v27, %s6967_s28 }
 0x58c   : > { %2743 = vrot.lane.b32.xlu0 %v2529_v61, %s6968_s30 }
 0x58d   : > { %2745 = vrot.lane.b32.xlu1 %v2539_v60, %s6968_s30  ;;  %v2614_v60 = vstv %s6425_s18 }
 0x590   : > { %2747 = vrot.lane.b32.xlu0 %v2530_v12, %s6968_s30  ;;  %v2640_v12 = vstv %s6417_s19 }
 0x591   : > { %2749 = vrot.lane.b32.xlu1 %v2540_v27, %s6968_s30 }
 0x5c6   : > { %v2542_v49 = vpop.permute.xlu0 %2541 }
 0x5c7   : > { %v2544_v24 = vpop.permute.xlu1 %2543 }
 0x5ca   : > { %v2546_v56 = vpop.permute.xlu0 %2545 }
 0x5cb   : > { %v2548_v37 = vpop.permute.xlu1 %2547  ;;  %v2549_v54 = vsel %vm249_vm1, %v2542_v49, %v2546_v56  ;;  %v2551_v35 = vsel %vm249_vm1, %v2546_v56, %v2542_v49 }
 0x5cc   : > { %v2550_v14 = vsel %vm249_vm1, %v2544_v24, %v2548_v37  ;;  %v2552_v55 = vsel %vm249_vm1, %v2548_v37, %v2544_v24  ;;  %v2553_v29 = vmul.f32 %v6006_v57, %v2551_v35  ;;  %v2554_v38 = vmul.f32 %v6012_v1, %v2549_v54 }
 0x5cd   : > { %v2555_v34 = vmul.f32 %v6006_v57, %v2552_v55  ;;  %v2556_v52 = vmul.f32 %v6012_v1, %v2550_v14  ;;  %v2636_v57 = vstv %s6419_s14  ;;  %v2610_v1 = vstv %s6427_s11 }
 0x5ce   : > { %v2568_v2 = vpop.permute.xlu0 %2567  ;;  %v2736_v55 = vstv %s6461_s24  ;;  %v2732_v54 = vstv %s6467_s29 }
 0x5cf   : > { %v2570_v58 = vpop.permute.xlu1 %2569 }
 0x5d2   : > { %v2572_v59 = vpop.permute.xlu0 %2571 }
 0x5d3   : > { %v2574_v0 = vpop.permute.xlu1 %2573  ;;  %v2575_v50 = vsel %vm266_vm0, %v2568_v2, %v2572_v59  ;;  %v2577_v43 = vsel %vm266_vm0, %v2572_v59, %v2568_v2  ;;  %v2563_v2 = vmul.f32 %v2562_v21, %v2555_v34  ;;  %v2559_v59 = vmul.f32 %v2558_v11, %v2553_v29 }
 0x5d4   : > { %v2576_v53 = vsel %vm266_vm0, %v2570_v58, %v2574_v0  ;;  %v2578_v16 = vsel %vm266_vm0, %v2574_v0, %v2570_v58  ;;  %v2579_v4 = vmul.f32 %v6050_v23, %v2577_v43  ;;  %v2580_v15 = vmul.f32 %v6056_v40, %v2575_v50 }
 0x5d5   : > { %v2581_v36 = vmul.f32 %v6050_v23, %v2578_v16  ;;  %v2582_v25 = vmul.f32 %v6056_v40, %v2576_v53  ;;  %v2564_v0 = vmul.f32 %v2562_v21, %v2556_v52  ;;  %v2704_v53 = vstv %s6455_s4 }
 0x5d6   : > { %v2620_v13 = vpop.permute.xlu0 %2619  ;;  %v2585_v26 = vmul.f32 %v2584_v63, %v2579_v4  ;;  %v2586_v8 = vmul.f32 %v2584_v63, %v2580_v15  ;;  %v2565_v63 = vadd.f32 %v2563_v2, %v2559_v59 }
 0x5d7   : > { %v2622_v32 = vpop.permute.xlu1 %2621  ;;  %v2589_v27 = vmul.f32 %v2588_v19, %v2581_v36  ;;  %v2590_v10 = vmul.f32 %v2588_v19, %v2582_v25  ;;  %v2764_v36 = vstv %s6473_s6 }
 0x5d9   : > { %v2591_v16 = vadd.f32 %v2589_v27, %v2585_v26  ;;  %v2592_v50 = vadd.f32 %v2590_v10, %v2586_v8 }
 0x5da   : > { %v2624_v18 = vpop.permute.xlu0 %2623 }
 0x5db   : > { %v2626_v31 = vpop.permute.xlu1 %2625  ;;  %v2627_v47 = vsel %vm300_vm2, %v2620_v13, %v2624_v18  ;;  %v2629_v61 = vsel %vm300_vm2, %v2624_v18, %v2620_v13  ;;  %v2680_v13 = vstv %s6429_s12  ;;  %v2708_v18 = vstv %s6445_s3 }
 0x5dc   : > { %v2628_v23 = vsel %vm300_vm2, %v2622_v32, %v2626_v31  ;;  %v2630_v40 = vsel %vm300_vm2, %v2626_v31, %v2622_v32  ;;  %v2631_v56 = vmul.f32 %v6090_v3, %v2629_v61  ;;  %v2632_v58 = vmul.f32 %v6096_v28, %v2627_v47 }
 0x5dd   : > { %v2633_v49 = vmul.f32 %v6090_v3, %v2630_v40  ;;  %v2634_v37 = vmul.f32 %v6096_v28, %v2628_v23  ;;  %v2560_v32 = vmul.f32 %v2558_v11, %v2554_v38  ;;  %v2676_v31 = vstv %s6435_s23 }
 0x5de   : > { %v6411_v6 = vpop.permute.xlu0 %2593  ;;  %v2637_v19 = vmul.f32 %v2636_v57, %v2631_v56  ;;  %v2638_v28 = vmul.f32 %v2636_v57, %v2632_v58  ;;  %v2760_v11 = vstv %s6483_s9  ;;  %v6970_v56 = vld [vmem:[#allocation17_spill] sm:$0xff] }
 0x5df   : > { %v6409_v45 = vpop.permute.xlu1 %2595  ;;  %v2641_v35 = vmul.f32 %v2640_v12, %v2633_v49  ;;  %v2642_v3 = vmul.f32 %v2640_v12, %v2634_v37  ;;  %v2566_v21 = vadd.f32 %v2564_v0, %v2560_v32  ;;  %v6969_v49 = vld [vmem:[#allocation16_spill] sm:$0xff]  ;;  %v6971_v0 = vld [vmem:[#allocation14_spill] sm:$0xff]  ;;  %v6972_v32 = vld [vmem:[#allocation15_spill] sm:$0xff] }
 0x5e1   : > { %v2643_v40 = vadd.f32 %v2641_v35, %v2637_v19  ;;  %v2644_v47 = vadd.f32 %v2642_v3, %v2638_v28 }
 0x5e2   : > { %v6423_v48 = vpop.permute.xlu0 %2597 }
 0x5e3   : > { %v6421_v51 = vpop.permute.xlu1 %2599  ;;  %v2601_v15 = vsel %vm283_vm3, %v6411_v6, %v6423_v48  ;;  %v2603_v34 = vsel %vm283_vm3, %v6423_v48, %v6411_v6  ;;  %v6530_v6 = vadd.f32 %v6373_v17, %v2591_v16  ;;  %v6533_v48 = vadd.f32 %v6371_v46, %v2592_v50 }
 0x5e4   : > { %v2602_v25 = vsel %vm283_vm3, %v6409_v45, %v6421_v51  ;;  %v2604_v4 = vsel %vm283_vm3, %v6421_v51, %v6409_v45  ;;  %v2605_v61 = vmul.f32 %v6152_v33, %v2603_v34  ;;  %v2606_v12 = vmul.f32 %v6158_v7, %v2601_v15 }
 0x5e5   : > { %v2646_v15 = vadd.f32 %v2644_v47, %v2566_v21 }
 0x5e6   : > { %v6433_v22 = vpop.permute.xlu0 %2659  ;;  %v2611_v21 = vmul.f32 %v2610_v1, %v2605_v61 }
 0x5e7   : > { %v6431_v42 = vpop.permute.xlu1 %2661 }
 0x5ea   : > { %v2664_v39 = vpop.permute.xlu0 %2663 }
 0x5eb   : > { %v2666_v44 = vpop.permute.xlu1 %2665  ;;  %v2667_v45 = vsel %vm333_vm4, %v6433_v22, %v2664_v39  ;;  %v2669_v51 = vsel %vm333_vm4, %v2664_v39, %v6433_v22 }
 0x5ec   : > { %v2668_v52 = vsel %vm333_vm4, %v6431_v42, %v2666_v44  ;;  %v2670_v29 = vsel %vm333_vm4, %v2666_v44, %v6431_v42  ;;  %v2607_v42 = vmul.f32 %v6152_v33, %v2604_v4  ;;  %v2608_v44 = vmul.f32 %v6158_v7, %v2602_v25 }
 0x5ed   : > { %v2673_v22 = vmul.f32 %v6182_v20, %v2668_v52  ;;  %v2674_v39 = vmul.f32 %v6188_v62, %v2670_v29  ;;  %v2671_v17 = vmul.f32 %v6182_v20, %v2667_v45  ;;  %v2672_v57 = vmul.f32 %v6188_v62, %v2669_v51 }
 0x5ee   : > { %v2688_v24 = vpop.permute.xlu0 %2687  ;;  %v2645_v4 = vadd.f32 %v2643_v40, %v2565_v63  ;;  %v2615_v34 = vmul.f32 %v2614_v60, %v2607_v42  ;;  %v2616_v52 = vmul.f32 %v2614_v60, %v2608_v44  ;;  %v2612_v60 = vmul.f32 %v2610_v1, %v2606_v12 }
 0x5ef   : > { %v2690_v41 = vpop.permute.xlu1 %2689  ;;  %v2681_v29 = vmul.f32 %v2680_v13, %v2673_v22  ;;  %v2682_v45 = vmul.f32 %v2680_v13, %v2674_v39  ;;  %v2677_v51 = vmul.f32 %v2676_v31, %v2671_v17 }
 0x5f1   : > { %v2683_v1 = vadd.f32 %v2681_v29, %v2677_v51 }
 0x5f2   : > { %v2692_v14 = vpop.permute.xlu0 %2691 }
 0x5f3   : > { %v2694_v43 = vpop.permute.xlu1 %2693  ;;  %v2695_v10 = vsel %vm354_vm5, %v2688_v24, %v2692_v14  ;;  %v2697_v33 = vsel %vm354_vm5, %v2692_v14, %v2688_v24 }
 0x5f4   : > { %v2696_v46 = vsel %vm354_vm5, %v2690_v41, %v2694_v43  ;;  %v2698_v27 = vsel %vm354_vm5, %v2694_v43, %v2690_v41  ;;  %v2699_v50 = vmul.f32 %v6971_v0, %v2695_v10  ;;  %v2700_v43 = vmul.f32 %v6972_v32, %v2697_v33 }
 0x5f5   : > { %v2701_v59 = vmul.f32 %v6971_v0, %v2696_v46  ;;  %v2702_v16 = vmul.f32 %v6972_v32, %v2698_v27  ;;  %v2617_v27 = vadd.f32 %v2615_v34, %v2611_v21  ;;  %v2618_v10 = vadd.f32 %v2616_v52, %v2612_v60 }
 0x5f6   : > { %v2716_v23 = vpop.permute.xlu0 %2715  ;;  %v2706_v63 = vmul.f32 %v2704_v53, %v2700_v43 }
 0x5f7   : > { %v2718_v38 = vpop.permute.xlu1 %2717 }
 0x5fa   : > { %v2720_v26 = vpop.permute.xlu0 %2719 }
 0x5fb   : > { %v2722_v7 = vpop.permute.xlu1 %2721  ;;  %v2723_v62 = vsel %vm375_vm6, %v2716_v23, %v2720_v26  ;;  %v2725_v41 = vsel %vm375_vm6, %v2720_v26, %v2716_v23  ;;  %v2705_v23 = vmul.f32 %v2704_v53, %v2699_v50 }
 0x5fc   : > { %v2724_v8 = vsel %vm375_vm6, %v2718_v38, %v2722_v7  ;;  %v2726_v20 = vsel %vm375_vm6, %v2722_v7, %v2718_v38  ;;  %v2727_v24 = vmul.f32 %v6969_v49, %v2723_v62  ;;  %v2728_v2 = vmul.f32 %v6970_v56, %v2725_v41 }
 0x5fd   : > { %v2729_v37 = vmul.f32 %v6969_v49, %v2724_v8  ;;  %v2730_v58 = vmul.f32 %v6970_v56, %v2726_v20  ;;  %v2709_v38 = vmul.f32 %v2708_v18, %v2701_v59  ;;  %v2685_v62 = vadd.f32 %v2683_v1, %v2617_v27 }
 0x5fe   : > { %v2733_v3 = vmul.f32 %v2732_v54, %v2727_v24  ;;  %v2734_v19 = vmul.f32 %v2732_v54, %v2728_v2  ;;  %v2744_v25 = vpop.permute.xlu0 %2743  ;;  %v2710_v54 = vmul.f32 %v2708_v18, %v2702_v16 }
 0x5ff   : > { %v2737_v14 = vmul.f32 %v2736_v55, %v2729_v37  ;;  %v2738_v35 = vmul.f32 %v2736_v55, %v2730_v58  ;;  %v2746_v28 = vpop.permute.xlu1 %2745  ;;  %v2678_v55 = vmul.f32 %v2676_v31, %v2672_v57  ;;  %v2711_v39 = vadd.f32 %v2709_v38, %v2705_v23 }
 0x600   : > { %v2712_v17 = vadd.f32 %v2710_v54, %v2706_v63 }
 0x601   : > { %v2739_v40 = vadd.f32 %v2737_v14, %v2733_v3  ;;  %v2740_v47 = vadd.f32 %v2738_v35, %v2734_v19  ;;  %v2684_v61 = vadd.f32 %v2682_v45, %v2678_v55 }
 0x602   : > { %v2748_v13 = vpop.permute.xlu0 %2747  ;;  %v2714_v49 = vadd.f32 %v2712_v17, %v2646_v15 }
 0x603   : > { %v2750_v42 = vpop.permute.xlu1 %2749  ;;  %v2751_v44 = vsel %vm396_vm7, %v2744_v25, %v2748_v13  ;;  %v2753_v53 = vsel %vm396_vm7, %v2748_v13, %v2744_v25  ;;  %v2741_v7 = vadd.f32 %v2739_v40, %v6530_v6  ;;  %v2742_v26 = vadd.f32 %v2740_v47, %v6533_v48 }
 0x604   : > { %v2752_v31 = vsel %vm396_vm7, %v2746_v28, %v2750_v42  ;;  %v2754_v18 = vsel %vm396_vm7, %v2750_v42, %v2746_v28  ;;  %v2755_v57 = vmul.f32 %v6324_v9, %v2751_v44  ;;  %v2756_v46 = vmul.f32 %v6330_v30, %v2753_v53 }
 0x605   : > { %v2757_v12 = vmul.f32 %v6324_v9, %v2752_v31  ;;  %v2758_v22 = vmul.f32 %v6330_v30, %v2754_v18  ;;  %v2686_v41 = vadd.f32 %v2684_v61, %v2618_v10  ;;  %v2713_v9 = vadd.f32 %v2711_v39, %v2645_v4 }
 0x606   : > { %v2761_v8 = vmul.f32 %v2760_v11, %v2755_v57  ;;  %v2762_v20 = vmul.f32 %v2760_v11, %v2756_v46  ;;  %v2772_v58 = vadd.f32 %v2742_v26, %v2714_v49 }
 0x607   : > { %v2765_v5 = vmul.f32 %v2764_v36, %v2757_v12  ;;  %v2766_v33 = vmul.f32 %v2764_v36, %v2758_v22  ;;  %v2771_v56 = vadd.f32 %v2741_v7, %v2713_v9  ;;  %v2776_v36 = vstv %s3135_s17 }
 0x609   : > { %v2767_v30 = vadd.f32 %v2765_v5, %v2761_v8  ;;  %v2768_v37 = vadd.f32 %v2766_v33, %v2762_v20 }
 0x60b   : > { %v2769_v24 = vadd.f32 %v2767_v30, %v2685_v62  ;;  %v2770_v2 = vadd.f32 %v2768_v37, %v2686_v41 }
 0x60d   : > { %v2773_v0 = vadd.f32 %v2771_v56, %v2769_v24  ;;  %v2774_v6 = vadd.f32 %v2772_v58, %v2770_v2 }
 0x60f   : > { %v2777_v48 = vadd.f32 %v2776_v36, %v2773_v0  ;;  %v2778_v11 = vadd.f32 %v2776_v36, %v2774_v6 }
 0x611   : > { %2779 = vst [vmem:[%s224_s25] sm:$0xff] %v2777_v48  ;;  %2780 = vst [vmem:[%s224_s25 + $0x8] sm:$0xff] %v2778_v11 }
 0x612 PF: > { %s6976_s16 = sld [smem:[#allocation8_spill]] }
 0x618   : > { %s16_s15 = sadd.s32 1, %s6976_s16  }
 0x619   : > { %p13_p5 = scmp.ge.s32.totalorder %s16_s15, 4  }
 0x61b   :  { %15 = sbr.rel (!%p13_p5) target bundleno = 8 (0x8), region = 75 }
 0x620   :  { %2802 = vsyncpa [#allocation3], 1 }
 0x621   :  { %2804 = vsyncpa [#allocation3 + $0x1], 1 }
 0x622   :  { %2805 = vsyncpa [#allocation5], 1 }

</bundles_post_ra>
